<compile_context>
chip_gen: v7x
topology: tpu7x:2x2x1
jax: 0.10.0
libtpu: 0.0.40
codegen_flags: <defaults>
</compile_context>

<pallas_src>
import functools

import numpy as np
import jax
import jax.numpy as jnp
from jax import lax
from jax.experimental import pallas as pl
from jax.experimental.pallas import tpu as pltpu


# ---------------------------------------------------------------------------
# Autoregressive masks + weight normalization (parameter-setup glue, mirrors
# the ARConv2d construction in the reference implementation).
# ---------------------------------------------------------------------------
def channel_mask(c_in, g_in, c_out, zero_diag):
    assert c_in % c_out == 0 or c_out % c_in == 0
    assert g_in == 1 or g_in == c_in
    if g_in == 1:
        mask = np.ones([c_out, c_in], dtype=np.float32)
        if c_out >= c_in:
            ratio = c_out // c_in
            for i in range(c_in):
                mask[i * ratio:(i + 1) * ratio, i + 1:] = 0
                if zero_diag:
                    mask[i * ratio:(i + 1) * ratio, i:i + 1] = 0
        else:
            ratio = c_in // c_out
            for i in range(c_out):
                mask[i:i + 1, (i + 1) * ratio:] = 0
                if zero_diag:
                    mask[i:i + 1, i * ratio:(i + 1) * ratio] = 0
    else:  # depthwise
        mask = np.ones([c_out, c_in // g_in], dtype=np.float32)
        if zero_diag:
            mask = 0.0 * mask
    return mask


def create_conv_mask(kernel_size, c_in, g_in, c_out, zero_diag, mirror):
    m = (kernel_size - 1) // 2
    mask = np.ones([c_out, c_in // g_in, kernel_size, kernel_size], dtype=np.float32)
    mask[:, :, m:, :] = 0
    mask[:, :, m, :m] = 1
    mask[:, :, m, m] = channel_mask(c_in, g_in, c_out, zero_diag)
    if mirror:
        mask = np.copy(mask[:, :, ::-1, ::-1])
    return mask


def normalize_ar_weight(w_raw, mask, weight_init_coeff=1.0):
    """Masked weight + weight-norm, with log_weight_norm at its init value."""
    wm = w_raw * mask
    wn = jnp.sqrt(jnp.sum(wm * wm, axis=(1, 2, 3)))
    log_wn = jnp.log(wn + 1e-2) + jnp.log(weight_init_coeff)
    return (jnp.exp(log_wn) / (wn + 1e-5)).reshape(-1, 1, 1, 1) * wm


def make_cell_params(key, num_z, hidden, mirror):
    k1, k2, k3, k4 = jax.random.split(key, 4)
    w1_raw = 0.1 * jax.random.normal(k1, (hidden, num_z, 3, 3), jnp.float32)
    w2_raw = 0.1 * jax.random.normal(k2, (hidden, 1, 5, 5), jnp.float32)
    w3_raw = 0.1 * jax.random.normal(k3, (num_z, hidden, 1, 1), jnp.float32)
    b3 = 0.01 * jax.random.normal(k4, (num_z,), jnp.float32)

    m1 = jnp.asarray(create_conv_mask(3, num_z, 1, hidden, True, mirror))
    m2 = jnp.asarray(create_conv_mask(5, hidden, hidden, hidden, False, mirror))
    m3 = jnp.asarray(create_conv_mask(1, hidden, 1, num_z, False, mirror))

    w1 = normalize_ar_weight(w1_raw, m1)                         # (CH, CZ, 3, 3)
    w2 = normalize_ar_weight(w2_raw, m2)                         # (CH, 1, 5, 5)
    w3 = normalize_ar_weight(w3_raw, m3, weight_init_coeff=0.1)  # (CZ, CH, 1, 1)

    # 8-aligned im2col weight: tap t = kh*3+kw occupies columns [t*SLOT, t*SLOT+CZ),
    # i.e. w1pad[co, t*SLOT + ci] = w1[co, ci, kh, kw]; padding columns are zero.
    slot = ((num_z + 7) // 8) * 8
    w1r = jnp.transpose(w1, (0, 2, 3, 1)).reshape(hidden, 9, num_z)   # (CH, 9, CZ)
    w1pad = jnp.pad(w1r, ((0, 0), (0, 0), (0, slot - num_z)))
    w1pad = w1pad.reshape(hidden, 9 * slot)

    return {
        # OIHW effective weights (used by the pure-JAX reference check)
        "w1": w1, "w2": w2, "w3": w3, "b3": b3,
        # kernel-friendly layouts (matmul weights in bf16 -> native MXU path)
        "w1k": w1pad.astype(jnp.bfloat16),        # (CH, 9*SLOT) bf16
        "w2k": w2[:, 0].reshape(hidden, 25),      # (CH, 25)     f32 (fused later)
        "w3k": w3[:, :, 0, 0].astype(jnp.bfloat16),   # (CZ, CH) bf16
        "b3k": b3.reshape(num_z, 1),              # (CZ, 1)      f32
    }


def _elu(x):
    return jnp.where(x > 0, x, jnp.exp(jnp.minimum(x, 0.0)) - 1.0)


# ---------------------------------------------------------------------------
# Host-precomputed border masks (zero-padding semantics) for a chunk of `bc`
# images concatenated along the lane axis. mask depends only on p % HW, so the
# lane-rolled cross-image bleed is always zeroed.
# ---------------------------------------------------------------------------
def _border_mask_fn(H, W, bc):
    HW = H * W
    p = np.arange(HW)
    row = p // W
    col = p % W

    def mask(dh, dw):
        ok = ((row + dh >= 0) & (row + dh < H) &
              (col + dw >= 0) & (col + dw < W))
        return np.tile(ok.astype(np.float32), bc)   # (bc*HW,)

    return mask


# ---------------------------------------------------------------------------
# Fused PairedCellAR Pallas kernel.
# ---------------------------------------------------------------------------
def _roll(x, dh, dw, W, L):
    """x (C, L) -> value at position p + dh*W + dw (wrapped; caller masks)."""
    d = dh * W + dw
    return pltpu.roll(x, (-d) % L, axis=1)   # rolled[:, p] == x[:, (p+d) % L]


def _one_cell(z, m3_ref, w1_ref, c5_ref, w3_ref, b3_ref, im_ref,
              *, W, CZ, SLOT, L):
    """CellAR forward: z (CZ, L) f32 -> new_z (CZ, L) f32."""
    # masked 3x3 conv (z -> hidden): im2col into 8-aligned VMEM slots, then one
    # bf16 MXU matmul against the host-padded weight.
    for kh in range(3):
        for kw in range(3):
            t = kh * 3 + kw
            dh, dw = kh - 1, kw - 1
            if dh == 0 and dw == 0:
                tap = z                                   # centre: no roll, no mask
            else:
                tap = _roll(z, dh, dw, W, L) * m3_ref[t]
            im_ref[t * SLOT:t * SLOT + CZ, :] = tap
    h1 = _elu(jnp.dot(w1_ref[...], im_ref[...].astype(jnp.bfloat16),
                      preferred_element_type=jnp.float32))          # (CH, L)

    # masked depthwise 5x5: 25 lane-rolled taps, fused (mask * weight) planes.
    acc = h1 * c5_ref[12]                       # centre tap initializes acc
    for t in range(25):
        if t == 12:
            continue
        dh, dw = t // 5 - 2, t % 5 - 2
        acc = acc + _roll(h1, dh, dw, W, L) * c5_ref[t]

    s = _elu(acc)                 # end of ARInvertedResidual
    x = _elu(s)                   # ARELUConv applies ELU again before the 1x1 conv
    mu = jnp.dot(w3_ref[...], x.astype(jnp.bfloat16),
                 preferred_element_type=jnp.float32) + b3_ref[...]  # (CZ, L)
    return z - mu


def _paired_cell_ar_kernel(z_ref, m3_ref,
                           w1a_ref, c5a_ref, w3a_ref, b3a_ref,
                           w1b_ref, c5b_ref, w3b_ref, b3b_ref,
                           out_ref, im_ref, *, W, CZ, SLOT):
    L = z_ref.shape[-1]
    # Zero the padding rows of the im2col scratch (data rows are overwritten
    # every cell). Done unconditionally so every core's scratch is valid.
    pad = SLOT - CZ
    if pad:
        for t in range(9):
            im_ref[t * SLOT + CZ:(t + 1) * SLOT, :] = jnp.zeros((pad, L), jnp.float32)

    z = z_ref[...].astype(jnp.float32)                              # (CZ, L)
    z1 = _one_cell(z, m3_ref, w1a_ref, c5a_ref, w3a_ref, b3a_ref, im_ref,
                   W=W, CZ=CZ, SLOT=SLOT, L=L)
    z2 = _one_cell(z1, m3_ref, w1b_ref, c5b_ref, w3b_ref, b3b_ref, im_ref,
                   W=W, CZ=CZ, SLOT=SLOT, L=L)
    out_ref[...] = z2.astype(out_ref.dtype)


def paired_cell_ar_pallas(z_nchw, ftr_nchw, p1, p2, *, batch_chunk=None):
    # ftr is accepted but unused, matching ARInvertedResidual.forward of the
    # reference model (only z goes through convz).
    del ftr_nchw
    B, CZ, H, W = z_nchw.shape
    HW = H * W
    CH = p1["w2k"].shape[0]
    SLOT = ((CZ + 7) // 8) * 8

    if batch_chunk is None:
        # Fold batch into the lane axis until the lane slab is >= 512 wide
        # (amortizes per-grid-step overhead; output stays lane-dense).
        bc = 1
        while bc < B and bc * HW < 512 and B % (bc * 2) == 0:
            bc *= 2
        # TODO(synk): on v7x keep >= 2 grid steps (both TensorCores) when B allows.
    else:
        bc = batch_chunk
    assert B % bc == 0
    G = B // bc
    L = bc * HW

    # Host-precomputed border masks: no in-kernel mask construction.
    mk = _border_mask_fn(H, W, bc)
    m3_np = np.stack([np.broadcast_to(mk(kh - 1, kw - 1), (CZ, L))
                      for kh in range(3) for kw in range(3)])        # (9, CZ, L)
    m5_np = np.stack([mk(t // 5 - 2, t % 5 - 2) for t in range(25)])  # (25, L)
    m3 = jnp.asarray(m3_np)
    m5 = jnp.asarray(m5_np)

    # Fused (border mask x depthwise weight) coefficient planes, per cell.
    def coeff_planes(w2k):                     # (CH, 25) -> (25, CH, L)
        return w2k.T[:, :, None] * m5[:, None, :]

    c5a = coeff_planes(p1["w2k"])
    c5b = coeff_planes(p2["w2k"])

    # NCHW -> (G, CZ, bc*HW): the bc images of a chunk are concatenated on lanes.
    z_flat = jnp.transpose(z_nchw.reshape(G, bc, CZ, HW), (0, 2, 1, 3))
    z_flat = z_flat.reshape(G, CZ, L)

    def full(arr):
        nd = arr.ndim
        return pl.BlockSpec(arr.shape, lambda g, _nd=nd: (0,) * _nd)

    out = pl.pallas_call(
        functools.partial(_paired_cell_ar_kernel, W=W, CZ=CZ, SLOT=SLOT),
        out_shape=jax.ShapeDtypeStruct((G, CZ, L), z_nchw.dtype),
        grid=(G,),
        in_specs=[
            pl.BlockSpec((None, CZ, L), lambda g: (g, 0, 0)),
            full(m3),
            full(p1["w1k"]), full(c5a), full(p1["w3k"]), full(p1["b3k"]),
            full(p2["w1k"]), full(c5b), full(p2["w3k"]), full(p2["b3k"]),
        ],
        out_specs=pl.BlockSpec((None, CZ, L), lambda g: (g, 0, 0)),
        scratch_shapes=[pltpu.VMEM((9 * SLOT, L), jnp.float32)],   # aligned im2col
        compiler_params=pltpu.CompilerParams(
            dimension_semantics=("parallel",)),   # chunks are independent
    )(z_flat, m3,
      p1["w1k"], c5a, p1["w3k"], p1["b3k"],
      p2["w1k"], c5b, p2["w3k"], p2["b3k"])

    new_z = jnp.transpose(out.reshape(G, CZ, bc, HW), (0, 2, 1, 3))
    new_z = new_z.reshape(B, CZ, H, W)
    log_det = jnp.zeros_like(new_z)          # both cells emit zeros; sum is zeros
    return new_z, log_det


# ---------------------------------------------------------------------------
# Pure-JAX reference (NCHW, lax.conv) for a correctness sanity check.
# ---------------------------------------------------------------------------
def cell_ar_reference(z_nchw, p):
    dn = ("NCHW", "OIHW", "NCHW")
    ch = p["w2"].shape[0]
    h = lax.conv_general_dilated(z_nchw, p["w1"], (1, 1), [(1, 1), (1, 1)],
                                 dimension_numbers=dn)
    h = _elu(h)
    h = lax.conv_general_dilated(h, p["w2"], (1, 1), [(2, 2), (2, 2)],
                                 dimension_numbers=dn, feature_group_count=ch)
    s = _elu(h)
    mu = lax.conv_general_dilated(_elu(s), p["w3"], (1, 1), [(0, 0), (0, 0)],
                                  dimension_numbers=dn)
    mu = mu + p["b3"].reshape(1, -1, 1, 1)
    return z_nchw - mu


if __name__ == "__main__":
    num_z, num_ftr, num_c = 4, 8, 8          # num_c % num_z == 0
    B, H, W = 2, 16, 16
    hidden = 6 * num_z                       # ex = 6 in CellAR

    key = jax.random.PRNGKey(0)
    kz, kf, kp1, kp2 = jax.random.split(key, 4)
    z = jax.random.normal(kz, (B, num_z, H, W), jnp.float32)
    ftr = jax.random.normal(kf, (B, num_ftr, H, W), jnp.float32)

    p1 = make_cell_params(kp1, num_z, hidden, mirror=False)
    p2 = make_cell_params(kp2, num_z, hidden, mirror=True)

    new_z, log_det = jax.jit(paired_cell_ar_pallas)(z, ftr, p1, p2)
    new_z = jax.block_until_ready(new_z)
    log_det = jax.block_until_ready(log_det)

    # sanity check vs. pure-JAX f32 reference (kernel matmuls are bf16 -> looser tol)
    ref = cell_ar_reference(cell_ar_reference(z, p1), p2)
    assert new_z.shape == (B, num_z, H, W) and log_det.shape == (B, num_z, H, W)
    assert jnp.allclose(new_z, ref, atol=1e-2, rtol=1e-2)
    assert float(jnp.max(jnp.abs(log_det))) == 0.0

    print("KERNEL_OK")
</pallas_src>

<mosaic_0001>
module attributes {stable_mosaic.version = 11 : i64} {
  func.func @_paired_cell_ar_kernel(%arg0: i32, %arg1: memref<1x4x512xf32, #tpu.memory_space<vmem>>, %arg2: memref<9x4x512xf32, #tpu.memory_space<vmem>>, %arg3: memref<24x72xbf16, #tpu.memory_space<vmem>>, %arg4: memref<25x24x512xf32, #tpu.memory_space<vmem>>, %arg5: memref<4x24xbf16, #tpu.memory_space<vmem>>, %arg6: memref<4x1xf32, #tpu.memory_space<vmem>>, %arg7: memref<24x72xbf16, #tpu.memory_space<vmem>>, %arg8: memref<25x24x512xf32, #tpu.memory_space<vmem>>, %arg9: memref<4x24xbf16, #tpu.memory_space<vmem>>, %arg10: memref<4x1xf32, #tpu.memory_space<vmem>>, %arg11: memref<1x4x512xf32, #tpu.memory_space<vmem>>, %arg12: memref<72x512xf32, #tpu.memory_space<vmem>>) attributes {dimension_semantics = [#tpu.dimension_semantics<parallel>], iteration_bounds = array<i64: 1>, scalar_prefetch = 0 : i64, scratch_operands = 1 : i64, tpu.core_type = #tpu.core_type<tc>, window_params = [{transform_indices = @transform_0, window_bounds = array<i64: 1, 4, 512>}, {pipeline_mode = #tpu.pipeline_mode<synchronous>, transform_indices = @transform_1, window_bounds = array<i64: 9, 4, 512>}, {pipeline_mode = #tpu.pipeline_mode<synchronous>, transform_indices = @transform_2, window_bounds = array<i64: 24, 72>}, {pipeline_mode = #tpu.pipeline_mode<synchronous>, transform_indices = @transform_3, window_bounds = array<i64: 25, 24, 512>}, {pipeline_mode = #tpu.pipeline_mode<synchronous>, transform_indices = @transform_4, window_bounds = array<i64: 4, 24>}, {pipeline_mode = #tpu.pipeline_mode<synchronous>, transform_indices = @transform_5, window_bounds = array<i64: 4, 1>}, {pipeline_mode = #tpu.pipeline_mode<synchronous>, transform_indices = @transform_6, window_bounds = array<i64: 24, 72>}, {pipeline_mode = #tpu.pipeline_mode<synchronous>, transform_indices = @transform_7, window_bounds = array<i64: 25, 24, 512>}, {pipeline_mode = #tpu.pipeline_mode<synchronous>, transform_indices = @transform_8, window_bounds = array<i64: 4, 24>}, {pipeline_mode = #tpu.pipeline_mode<synchronous>, transform_indices = @transform_9, window_bounds = array<i64: 4, 1>}, {transform_indices = @transform_10, window_bounds = array<i64: 1, 4, 512>}]} {
    %cst = arith.constant 0.000000e+00 : f32
    %0 = vector.broadcast %cst : f32 to vector<4x512xf32>
    %c4 = arith.constant 4 : index
    %c0 = arith.constant 0 : index
    %1 = vector.load %arg12[%c4, %c0] : memref<72x512xf32, #tpu.memory_space<vmem>>, vector<4x512xf32>
    tpu.vector_store %arg12[%c4, %c0], %0 {strides = array<i32>} : memref<72x512xf32, #tpu.memory_space<vmem>>, vector<4x512xf32>,
    %cst_0 = arith.constant 0.000000e+00 : f32
    %2 = vector.broadcast %cst_0 : f32 to vector<4x512xf32>
    %c12 = arith.constant 12 : index
    %c0_1 = arith.constant 0 : index
    %3 = vector.load %arg12[%c12, %c0_1] : memref<72x512xf32, #tpu.memory_space<vmem>>, vector<4x512xf32>
    tpu.vector_store %arg12[%c12, %c0_1], %2 {strides = array<i32>} : memref<72x512xf32, #tpu.memory_space<vmem>>, vector<4x512xf32>,
    %cst_2 = arith.constant 0.000000e+00 : f32
    %4 = vector.broadcast %cst_2 : f32 to vector<4x512xf32>
    %c20 = arith.constant 20 : index
    %c0_3 = arith.constant 0 : index
    %5 = vector.load %arg12[%c20, %c0_3] : memref<72x512xf32, #tpu.memory_space<vmem>>, vector<4x512xf32>
    tpu.vector_store %arg12[%c20, %c0_3], %4 {strides = array<i32>} : memref<72x512xf32, #tpu.memory_space<vmem>>, vector<4x512xf32>,
    %cst_4 = arith.constant 0.000000e+00 : f32
    %6 = vector.broadcast %cst_4 : f32 to vector<4x512xf32>
    %c28 = arith.constant 28 : index
    %c0_5 = arith.constant 0 : index
    %7 = vector.load %arg12[%c28, %c0_5] : memref<72x512xf32, #tpu.memory_space<vmem>>, vector<4x512xf32>
    tpu.vector_store %arg12[%c28, %c0_5], %6 {strides = array<i32>} : memref<72x512xf32, #tpu.memory_space<vmem>>, vector<4x512xf32>,
    %cst_6 = arith.constant 0.000000e+00 : f32
    %8 = vector.broadcast %cst_6 : f32 to vector<4x512xf32>
    %c36 = arith.constant 36 : index
    %c0_7 = arith.constant 0 : index
    %9 = vector.load %arg12[%c36, %c0_7] : memref<72x512xf32, #tpu.memory_space<vmem>>, vector<4x512xf32>
    tpu.vector_store %arg12[%c36, %c0_7], %8 {strides = array<i32>} : memref<72x512xf32, #tpu.memory_space<vmem>>, vector<4x512xf32>,
    %cst_8 = arith.constant 0.000000e+00 : f32
    %10 = vector.broadcast %cst_8 : f32 to vector<4x512xf32>
    %c44 = arith.constant 44 : index
    %c0_9 = arith.constant 0 : index
    %11 = vector.load %arg12[%c44, %c0_9] : memref<72x512xf32, #tpu.memory_space<vmem>>, vector<4x512xf32>
    tpu.vector_store %arg12[%c44, %c0_9], %10 {strides = array<i32>} : memref<72x512xf32, #tpu.memory_space<vmem>>, vector<4x512xf32>,
    %cst_10 = arith.constant 0.000000e+00 : f32
    %12 = vector.broadcast %cst_10 : f32 to vector<4x512xf32>
    %c52 = arith.constant 52 : index
    %c0_11 = arith.constant 0 : index
    %13 = vector.load %arg12[%c52, %c0_11] : memref<72x512xf32, #tpu.memory_space<vmem>>, vector<4x512xf32>
    tpu.vector_store %arg12[%c52, %c0_11], %12 {strides = array<i32>} : memref<72x512xf32, #tpu.memory_space<vmem>>, vector<4x512xf32>,
    %cst_12 = arith.constant 0.000000e+00 : f32
    %14 = vector.broadcast %cst_12 : f32 to vector<4x512xf32>
    %c60 = arith.constant 60 : index
    %c0_13 = arith.constant 0 : index
    %15 = vector.load %arg12[%c60, %c0_13] : memref<72x512xf32, #tpu.memory_space<vmem>>, vector<4x512xf32>
    tpu.vector_store %arg12[%c60, %c0_13], %14 {strides = array<i32>} : memref<72x512xf32, #tpu.memory_space<vmem>>, vector<4x512xf32>,
    %cst_14 = arith.constant 0.000000e+00 : f32
    %16 = vector.broadcast %cst_14 : f32 to vector<4x512xf32>
    %c68 = arith.constant 68 : index
    %c0_15 = arith.constant 0 : index
    %17 = vector.load %arg12[%c68, %c0_15] : memref<72x512xf32, #tpu.memory_space<vmem>>, vector<4x512xf32>
    tpu.vector_store %arg12[%c68, %c0_15], %16 {strides = array<i32>} : memref<72x512xf32, #tpu.memory_space<vmem>>, vector<4x512xf32>,
    %c0_16 = arith.constant 0 : index
    %c0_17 = arith.constant 0 : index
    %c0_18 = arith.constant 0 : index
    %18 = vector.load %arg1[%c0_16, %c0_17, %c0_18] : memref<1x4x512xf32, #tpu.memory_space<vmem>>, vector<1x4x512xf32>
    %19 = vector.shape_cast %18 : vector<1x4x512xf32> to vector<4x512xf32>
    %c17_i32 = arith.constant 17 : i32
    %20 = tpu.dynamic_rotate %19 by %c17_i32 dim 1 : vector<4x512xf32>, i32 -> vector<4x512xf32>
    %c0_19 = arith.constant 0 : index
    %c0_20 = arith.constant 0 : index
    %c0_21 = arith.constant 0 : index
    %21 = vector.load %arg2[%c0_19, %c0_20, %c0_21] : memref<9x4x512xf32, #tpu.memory_space<vmem>>, vector<1x4x512xf32>
    %22 = vector.shape_cast %21 : vector<1x4x512xf32> to vector<4x512xf32>
    %23 = arith.mulf %20, %22 : vector<4x512xf32>
    %c0_22 = arith.constant 0 : index
    %c0_23 = arith.constant 0 : index
    %24 = vector.load %arg12[%c0_22, %c0_23] : memref<72x512xf32, #tpu.memory_space<vmem>>, vector<4x512xf32>
    tpu.vector_store %arg12[%c0_22, %c0_23], %23 {strides = array<i32>} : memref<72x512xf32, #tpu.memory_space<vmem>>, vector<4x512xf32>,
    %c16_i32 = arith.constant 16 : i32
    %25 = tpu.dynamic_rotate %19 by %c16_i32 dim 1 : vector<4x512xf32>, i32 -> vector<4x512xf32>
    %c1 = arith.constant 1 : index
    %c0_24 = arith.constant 0 : index
    %c0_25 = arith.constant 0 : index
    %26 = vector.load %arg2[%c1, %c0_24, %c0_25] : memref<9x4x512xf32, #tpu.memory_space<vmem>>, vector<1x4x512xf32>
    %27 = vector.shape_cast %26 : vector<1x4x512xf32> to vector<4x512xf32>
    %28 = arith.mulf %25, %27 : vector<4x512xf32>
    %c8 = arith.constant 8 : index
    %c0_26 = arith.constant 0 : index
    %29 = vector.load %arg12[%c8, %c0_26] : memref<72x512xf32, #tpu.memory_space<vmem>>, vector<4x512xf32>
    tpu.vector_store %arg12[%c8, %c0_26], %28 {strides = array<i32>} : memref<72x512xf32, #tpu.memory_space<vmem>>, vector<4x512xf32>,
    %c15_i32 = arith.constant 15 : i32
    %30 = tpu.dynamic_rotate %19 by %c15_i32 dim 1 : vector<4x512xf32>, i32 -> vector<4x512xf32>
    %c2 = arith.constant 2 : index
    %c0_27 = arith.constant 0 : index
    %c0_28 = arith.constant 0 : index
    %31 = vector.load %arg2[%c2, %c0_27, %c0_28] : memref<9x4x512xf32, #tpu.memory_space<vmem>>, vector<1x4x512xf32>
    %32 = vector.shape_cast %31 : vector<1x4x512xf32> to vector<4x512xf32>
    %33 = arith.mulf %30, %32 : vector<4x512xf32>
    %c16 = arith.constant 16 : index
    %c0_29 = arith.constant 0 : index
    %34 = vector.load %arg12[%c16, %c0_29] : memref<72x512xf32, #tpu.memory_space<vmem>>, vector<4x512xf32>
    tpu.vector_store %arg12[%c16, %c0_29], %33 {strides = array<i32>} : memref<72x512xf32, #tpu.memory_space<vmem>>, vector<4x512xf32>,
    %c1_i32 = arith.constant 1 : i32
    %35 = tpu.dynamic_rotate %19 by %c1_i32 dim 1 : vector<4x512xf32>, i32 -> vector<4x512xf32>
    %c3 = arith.constant 3 : index
    %c0_30 = arith.constant 0 : index
    %c0_31 = arith.constant 0 : index
    %36 = vector.load %arg2[%c3, %c0_30, %c0_31] : memref<9x4x512xf32, #tpu.memory_space<vmem>>, vector<1x4x512xf32>
    %37 = vector.shape_cast %36 : vector<1x4x512xf32> to vector<4x512xf32>
    %38 = arith.mulf %35, %37 : vector<4x512xf32>
    %c24 = arith.constant 24 : index
    %c0_32 = arith.constant 0 : index
    %39 = vector.load %arg12[%c24, %c0_32] : memref<72x512xf32, #tpu.memory_space<vmem>>, vector<4x512xf32>
    tpu.vector_store %arg12[%c24, %c0_32], %38 {strides = array<i32>} : memref<72x512xf32, #tpu.memory_space<vmem>>, vector<4x512xf32>,
    %c32 = arith.constant 32 : index
    %c0_33 = arith.constant 0 : index
    %40 = vector.load %arg12[%c32, %c0_33] : memref<72x512xf32, #tpu.memory_space<vmem>>, vector<4x512xf32>
    tpu.vector_store %arg12[%c32, %c0_33], %19 {strides = array<i32>} : memref<72x512xf32, #tpu.memory_space<vmem>>, vector<4x512xf32>,
    %c511_i32 = arith.constant 511 : i32
    %41 = tpu.dynamic_rotate %19 by %c511_i32 dim 1 : vector<4x512xf32>, i32 -> vector<4x512xf32>
    %c5 = arith.constant 5 : index
    %c0_34 = arith.constant 0 : index
    %c0_35 = arith.constant 0 : index
    %42 = vector.load %arg2[%c5, %c0_34, %c0_35] : memref<9x4x512xf32, #tpu.memory_space<vmem>>, vector<1x4x512xf32>
    %43 = vector.shape_cast %42 : vector<1x4x512xf32> to vector<4x512xf32>
    %44 = arith.mulf %41, %43 : vector<4x512xf32>
    %c40 = arith.constant 40 : index
    %c0_36 = arith.constant 0 : index
    %45 = vector.load %arg12[%c40, %c0_36] : memref<72x512xf32, #tpu.memory_space<vmem>>, vector<4x512xf32>
    tpu.vector_store %arg12[%c40, %c0_36], %44 {strides = array<i32>} : memref<72x512xf32, #tpu.memory_space<vmem>>, vector<4x512xf32>,
    %c497_i32 = arith.constant 497 : i32
    %46 = tpu.dynamic_rotate %19 by %c497_i32 dim 1 : vector<4x512xf32>, i32 -> vector<4x512xf32>
    %c6 = arith.constant 6 : index
    %c0_37 = arith.constant 0 : index
    %c0_38 = arith.constant 0 : index
    %47 = vector.load %arg2[%c6, %c0_37, %c0_38] : memref<9x4x512xf32, #tpu.memory_space<vmem>>, vector<1x4x512xf32>
    %48 = vector.shape_cast %47 : vector<1x4x512xf32> to vector<4x512xf32>
    %49 = arith.mulf %46, %48 : vector<4x512xf32>
    %c48 = arith.constant 48 : index
    %c0_39 = arith.constant 0 : index
    %50 = vector.load %arg12[%c48, %c0_39] : memref<72x512xf32, #tpu.memory_space<vmem>>, vector<4x512xf32>
    tpu.vector_store %arg12[%c48, %c0_39], %49 {strides = array<i32>} : memref<72x512xf32, #tpu.memory_space<vmem>>, vector<4x512xf32>,
    %c496_i32 = arith.constant 496 : i32
    %51 = tpu.dynamic_rotate %19 by %c496_i32 dim 1 : vector<4x512xf32>, i32 -> vector<4x512xf32>
    %c7 = arith.constant 7 : index
    %c0_40 = arith.constant 0 : index
    %c0_41 = arith.constant 0 : index
    %52 = vector.load %arg2[%c7, %c0_40, %c0_41] : memref<9x4x512xf32, #tpu.memory_space<vmem>>, vector<1x4x512xf32>
    %53 = vector.shape_cast %52 : vector<1x4x512xf32> to vector<4x512xf32>
    %54 = arith.mulf %51, %53 : vector<4x512xf32>
    %c56 = arith.constant 56 : index
    %c0_42 = arith.constant 0 : index
    %55 = vector.load %arg12[%c56, %c0_42] : memref<72x512xf32, #tpu.memory_space<vmem>>, vector<4x512xf32>
    tpu.vector_store %arg12[%c56, %c0_42], %54 {strides = array<i32>} : memref<72x512xf32, #tpu.memory_space<vmem>>, vector<4x512xf32>,
    %c495_i32 = arith.constant 495 : i32
    %56 = tpu.dynamic_rotate %19 by %c495_i32 dim 1 : vector<4x512xf32>, i32 -> vector<4x512xf32>
    %c8_43 = arith.constant 8 : index
    %c0_44 = arith.constant 0 : index
    %c0_45 = arith.constant 0 : index
    %57 = vector.load %arg2[%c8_43, %c0_44, %c0_45] : memref<9x4x512xf32, #tpu.memory_space<vmem>>, vector<1x4x512xf32>
    %58 = vector.shape_cast %57 : vector<1x4x512xf32> to vector<4x512xf32>
    %59 = arith.mulf %56, %58 : vector<4x512xf32>
    %c64 = arith.constant 64 : index
    %c0_46 = arith.constant 0 : index
    %60 = vector.load %arg12[%c64, %c0_46] : memref<72x512xf32, #tpu.memory_space<vmem>>, vector<4x512xf32>
    tpu.vector_store %arg12[%c64, %c0_46], %59 {strides = array<i32>} : memref<72x512xf32, #tpu.memory_space<vmem>>, vector<4x512xf32>,
    %c0_47 = arith.constant 0 : index
    %c0_48 = arith.constant 0 : index
    %61 = vector.load %arg3[%c0_47, %c0_48] : memref<24x72xbf16, #tpu.memory_space<vmem>>, vector<24x72xbf16>
    %c0_49 = arith.constant 0 : index
    %c0_50 = arith.constant 0 : index
    %62 = vector.load %arg12[%c0_49, %c0_50] : memref<72x512xf32, #tpu.memory_space<vmem>>, vector<72x512xf32>
    %63 = arith.truncf %62 : vector<72x512xf32> to vector<72x512xbf16>
    %cst_51 = arith.constant dense<0.000000e+00> : vector<24x512xf32>
    %64 = tpu.matmul %61, %63, %cst_51 {dimension_numbers = #tpu.dot_dimension_numbers<[1], [0], [0], [1], [0, 0, 1, 1], [], []>} : vector<24x72xbf16>, vector<72x512xbf16>, vector<24x512xf32> -> vector<24x512xf32>
    %cst_52 = arith.constant 0.000000e+00 : f32
    %65 = vector.broadcast %cst_52 : f32 to vector<24x512xf32>
    %66 = arith.cmpf ogt, %64, %65 : vector<24x512xf32>
    %cst_53 = arith.constant 0.000000e+00 : f32
    %67 = vector.broadcast %cst_53 : f32 to vector<24x512xf32>
    %68 = arith.minimumf %64, %67 : vector<24x512xf32>
    %69 = math.exp %68 : vector<24x512xf32>
    %cst_54 = arith.constant 1.000000e+00 : f32
    %70 = vector.broadcast %cst_54 : f32 to vector<24x512xf32>
    %71 = arith.subf %69, %70 : vector<24x512xf32>
    %72 = arith.select %66, %64, %71 : vector<24x512xi1>, vector<24x512xf32>
    %c12_55 = arith.constant 12 : index
    %c0_56 = arith.constant 0 : index
    %c0_57 = arith.constant 0 : index
    %73 = vector.load %arg4[%c12_55, %c0_56, %c0_57] : memref<25x24x512xf32, #tpu.memory_space<vmem>>, vector<1x24x512xf32>
    %74 = vector.shape_cast %73 : vector<1x24x512xf32> to vector<24x512xf32>
    %75 = arith.mulf %72, %74 : vector<24x512xf32>
    %c34_i32 = arith.constant 34 : i32
    %76 = tpu.dynamic_rotate %72 by %c34_i32 dim 1 : vector<24x512xf32>, i32 -> vector<24x512xf32>
    %c0_58 = arith.constant 0 : index
    %c0_59 = arith.constant 0 : index
    %c0_60 = arith.constant 0 : index
    %77 = vector.load %arg4[%c0_58, %c0_59, %c0_60] : memref<25x24x512xf32, #tpu.memory_space<vmem>>, vector<1x24x512xf32>
    %78 = vector.shape_cast %77 : vector<1x24x512xf32> to vector<24x512xf32>
    %79 = arith.mulf %76, %78 : vector<24x512xf32>
    %80 = arith.addf %75, %79 : vector<24x512xf32>
    %c33_i32 = arith.constant 33 : i32
    %81 = tpu.dynamic_rotate %72 by %c33_i32 dim 1 : vector<24x512xf32>, i32 -> vector<24x512xf32>
    %c1_61 = arith.constant 1 : index
    %c0_62 = arith.constant 0 : index
    %c0_63 = arith.constant 0 : index
    %82 = vector.load %arg4[%c1_61, %c0_62, %c0_63] : memref<25x24x512xf32, #tpu.memory_space<vmem>>, vector<1x24x512xf32>
    %83 = vector.shape_cast %82 : vector<1x24x512xf32> to vector<24x512xf32>
    %84 = arith.mulf %81, %83 : vector<24x512xf32>
    %85 = arith.addf %80, %84 : vector<24x512xf32>
    %c32_i32 = arith.constant 32 : i32
    %86 = tpu.dynamic_rotate %72 by %c32_i32 dim 1 : vector<24x512xf32>, i32 -> vector<24x512xf32>
    %c2_64 = arith.constant 2 : index
    %c0_65 = arith.constant 0 : index
    %c0_66 = arith.constant 0 : index
    %87 = vector.load %arg4[%c2_64, %c0_65, %c0_66] : memref<25x24x512xf32, #tpu.memory_space<vmem>>, vector<1x24x512xf32>
    %88 = vector.shape_cast %87 : vector<1x24x512xf32> to vector<24x512xf32>
    %89 = arith.mulf %86, %88 : vector<24x512xf32>
    %90 = arith.addf %85, %89 : vector<24x512xf32>
    %c31_i32 = arith.constant 31 : i32
    %91 = tpu.dynamic_rotate %72 by %c31_i32 dim 1 : vector<24x512xf32>, i32 -> vector<24x512xf32>
    %c3_67 = arith.constant 3 : index
    %c0_68 = arith.constant 0 : index
    %c0_69 = arith.constant 0 : index
    %92 = vector.load %arg4[%c3_67, %c0_68, %c0_69] : memref<25x24x512xf32, #tpu.memory_space<vmem>>, vector<1x24x512xf32>
    %93 = vector.shape_cast %92 : vector<1x24x512xf32> to vector<24x512xf32>
    %94 = arith.mulf %91, %93 : vector<24x512xf32>
    %95 = arith.addf %90, %94 : vector<24x512xf32>
    %c30_i32 = arith.constant 30 : i32
    %96 = tpu.dynamic_rotate %72 by %c30_i32 dim 1 : vector<24x512xf32>, i32 -> vector<24x512xf32>
    %c4_70 = arith.constant 4 : index
    %c0_71 = arith.constant 0 : index
    %c0_72 = arith.constant 0 : index
    %97 = vector.load %arg4[%c4_70, %c0_71, %c0_72] : memref<25x24x512xf32, #tpu.memory_space<vmem>>, vector<1x24x512xf32>
    %98 = vector.shape_cast %97 : vector<1x24x512xf32> to vector<24x512xf32>
    %99 = arith.mulf %96, %98 : vector<24x512xf32>
    %100 = arith.addf %95, %99 : vector<24x512xf32>
    %c18_i32 = arith.constant 18 : i32
    %101 = tpu.dynamic_rotate %72 by %c18_i32 dim 1 : vector<24x512xf32>, i32 -> vector<24x512xf32>
    %c5_73 = arith.constant 5 : index
    %c0_74 = arith.constant 0 : index
    %c0_75 = arith.constant 0 : index
    %102 = vector.load %arg4[%c5_73, %c0_74, %c0_75] : memref<25x24x512xf32, #tpu.memory_space<vmem>>, vector<1x24x512xf32>
    %103 = vector.shape_cast %102 : vector<1x24x512xf32> to vector<24x512xf32>
    %104 = arith.mulf %101, %103 : vector<24x512xf32>
    %105 = arith.addf %100, %104 : vector<24x512xf32>
    %c17_i32_76 = arith.constant 17 : i32
    %106 = tpu.dynamic_rotate %72 by %c17_i32_76 dim 1 : vector<24x512xf32>, i32 -> vector<24x512xf32>
    %c6_77 = arith.constant 6 : index
    %c0_78 = arith.constant 0 : index
    %c0_79 = arith.constant 0 : index
    %107 = vector.load %arg4[%c6_77, %c0_78, %c0_79] : memref<25x24x512xf32, #tpu.memory_space<vmem>>, vector<1x24x512xf32>
    %108 = vector.shape_cast %107 : vector<1x24x512xf32> to vector<24x512xf32>
    %109 = arith.mulf %106, %108 : vector<24x512xf32>
    %110 = arith.addf %105, %109 : vector<24x512xf32>
    %c16_i32_80 = arith.constant 16 : i32
    %111 = tpu.dynamic_rotate %72 by %c16_i32_80 dim 1 : vector<24x512xf32>, i32 -> vector<24x512xf32>
    %c7_81 = arith.constant 7 : index
    %c0_82 = arith.constant 0 : index
    %c0_83 = arith.constant 0 : index
    %112 = vector.load %arg4[%c7_81, %c0_82, %c0_83] : memref<25x24x512xf32, #tpu.memory_space<vmem>>, vector<1x24x512xf32>
    %113 = vector.shape_cast %112 : vector<1x24x512xf32> to vector<24x512xf32>
    %114 = arith.mulf %111, %113 : vector<24x512xf32>
    %115 = arith.addf %110, %114 : vector<24x512xf32>
    %c15_i32_84 = arith.constant 15 : i32
    %116 = tpu.dynamic_rotate %72 by %c15_i32_84 dim 1 : vector<24x512xf32>, i32 -> vector<24x512xf32>
    %c8_85 = arith.constant 8 : index
    %c0_86 = arith.constant 0 : index
    %c0_87 = arith.constant 0 : index
    %117 = vector.load %arg4[%c8_85, %c0_86, %c0_87] : memref<25x24x512xf32, #tpu.memory_space<vmem>>, vector<1x24x512xf32>
    %118 = vector.shape_cast %117 : vector<1x24x512xf32> to vector<24x512xf32>
    %119 = arith.mulf %116, %118 : vector<24x512xf32>
    %120 = arith.addf %115, %119 : vector<24x512xf32>
    %c14_i32 = arith.constant 14 : i32
    %121 = tpu.dynamic_rotate %72 by %c14_i32 dim 1 : vector<24x512xf32>, i32 -> vector<24x512xf32>
    %c9 = arith.constant 9 : index
    %c0_88 = arith.constant 0 : index
    %c0_89 = arith.constant 0 : index
    %122 = vector.load %arg4[%c9, %c0_88, %c0_89] : memref<25x24x512xf32, #tpu.memory_space<vmem>>, vector<1x24x512xf32>
    %123 = vector.shape_cast %122 : vector<1x24x512xf32> to vector<24x512xf32>
    %124 = arith.mulf %121, %123 : vector<24x512xf32>
    %125 = arith.addf %120, %124 : vector<24x512xf32>
    %c2_i32 = arith.constant 2 : i32
    %126 = tpu.dynamic_rotate %72 by %c2_i32 dim 1 : vector<24x512xf32>, i32 -> vector<24x512xf32>
    %c10 = arith.constant 10 : index
    %c0_90 = arith.constant 0 : index
    %c0_91 = arith.constant 0 : index
    %127 = vector.load %arg4[%c10, %c0_90, %c0_91] : memref<25x24x512xf32, #tpu.memory_space<vmem>>, vector<1x24x512xf32>
    %128 = vector.shape_cast %127 : vector<1x24x512xf32> to vector<24x512xf32>
    %129 = arith.mulf %126, %128 : vector<24x512xf32>
    %130 = arith.addf %125, %129 : vector<24x512xf32>
    %c1_i32_92 = arith.constant 1 : i32
    %131 = tpu.dynamic_rotate %72 by %c1_i32_92 dim 1 : vector<24x512xf32>, i32 -> vector<24x512xf32>
    %c11 = arith.constant 11 : index
    %c0_93 = arith.constant 0 : index
    %c0_94 = arith.constant 0 : index
    %132 = vector.load %arg4[%c11, %c0_93, %c0_94] : memref<25x24x512xf32, #tpu.memory_space<vmem>>, vector<1x24x512xf32>
    %133 = vector.shape_cast %132 : vector<1x24x512xf32> to vector<24x512xf32>
    %134 = arith.mulf %131, %133 : vector<24x512xf32>
    %135 = arith.addf %130, %134 : vector<24x512xf32>
    %c511_i32_95 = arith.constant 511 : i32
    %136 = tpu.dynamic_rotate %72 by %c511_i32_95 dim 1 : vector<24x512xf32>, i32 -> vector<24x512xf32>
    %c13 = arith.constant 13 : index
    %c0_96 = arith.constant 0 : index
    %c0_97 = arith.constant 0 : index
    %137 = vector.load %arg4[%c13, %c0_96, %c0_97] : memref<25x24x512xf32, #tpu.memory_space<vmem>>, vector<1x24x512xf32>
    %138 = vector.shape_cast %137 : vector<1x24x512xf32> to vector<24x512xf32>
    %139 = arith.mulf %136, %138 : vector<24x512xf32>
    %140 = arith.addf %135, %139 : vector<24x512xf32>
    %c510_i32 = arith.constant 510 : i32
    %141 = tpu.dynamic_rotate %72 by %c510_i32 dim 1 : vector<24x512xf32>, i32 -> vector<24x512xf32>
    %c14 = arith.constant 14 : index
    %c0_98 = arith.constant 0 : index
    %c0_99 = arith.constant 0 : index
    %142 = vector.load %arg4[%c14, %c0_98, %c0_99] : memref<25x24x512xf32, #tpu.memory_space<vmem>>, vector<1x24x512xf32>
    %143 = vector.shape_cast %142 : vector<1x24x512xf32> to vector<24x512xf32>
    %144 = arith.mulf %141, %143 : vector<24x512xf32>
    %145 = arith.addf %140, %144 : vector<24x512xf32>
    %c498_i32 = arith.constant 498 : i32
    %146 = tpu.dynamic_rotate %72 by %c498_i32 dim 1 : vector<24x512xf32>, i32 -> vector<24x512xf32>
    %c15 = arith.constant 15 : index
    %c0_100 = arith.constant 0 : index
    %c0_101 = arith.constant 0 : index
    %147 = vector.load %arg4[%c15, %c0_100, %c0_101] : memref<25x24x512xf32, #tpu.memory_space<vmem>>, vector<1x24x512xf32>
    %148 = vector.shape_cast %147 : vector<1x24x512xf32> to vector<24x512xf32>
    %149 = arith.mulf %146, %148 : vector<24x512xf32>
    %150 = arith.addf %145, %149 : vector<24x512xf32>
    %c497_i32_102 = arith.constant 497 : i32
    %151 = tpu.dynamic_rotate %72 by %c497_i32_102 dim 1 : vector<24x512xf32>, i32 -> vector<24x512xf32>
    %c16_103 = arith.constant 16 : index
    %c0_104 = arith.constant 0 : index
    %c0_105 = arith.constant 0 : index
    %152 = vector.load %arg4[%c16_103, %c0_104, %c0_105] : memref<25x24x512xf32, #tpu.memory_space<vmem>>, vector<1x24x512xf32>
    %153 = vector.shape_cast %152 : vector<1x24x512xf32> to vector<24x512xf32>
    %154 = arith.mulf %151, %153 : vector<24x512xf32>
    %155 = arith.addf %150, %154 : vector<24x512xf32>
    %c496_i32_106 = arith.constant 496 : i32
    %156 = tpu.dynamic_rotate %72 by %c496_i32_106 dim 1 : vector<24x512xf32>, i32 -> vector<24x512xf32>
    %c17 = arith.constant 17 : index
    %c0_107 = arith.constant 0 : index
    %c0_108 = arith.constant 0 : index
    %157 = vector.load %arg4[%c17, %c0_107, %c0_108] : memref<25x24x512xf32, #tpu.memory_space<vmem>>, vector<1x24x512xf32>
    %158 = vector.shape_cast %157 : vector<1x24x512xf32> to vector<24x512xf32>
    %159 = arith.mulf %156, %158 : vector<24x512xf32>
    %160 = arith.addf %155, %159 : vector<24x512xf32>
    %c495_i32_109 = arith.constant 495 : i32
    %161 = tpu.dynamic_rotate %72 by %c495_i32_109 dim 1 : vector<24x512xf32>, i32 -> vector<24x512xf32>
    %c18 = arith.constant 18 : index
    %c0_110 = arith.constant 0 : index
    %c0_111 = arith.constant 0 : index
    %162 = vector.load %arg4[%c18, %c0_110, %c0_111] : memref<25x24x512xf32, #tpu.memory_space<vmem>>, vector<1x24x512xf32>
    %163 = vector.shape_cast %162 : vector<1x24x512xf32> to vector<24x512xf32>
    %164 = arith.mulf %161, %163 : vector<24x512xf32>
    %165 = arith.addf %160, %164 : vector<24x512xf32>
    %c494_i32 = arith.constant 494 : i32
    %166 = tpu.dynamic_rotate %72 by %c494_i32 dim 1 : vector<24x512xf32>, i32 -> vector<24x512xf32>
    %c19 = arith.constant 19 : index
    %c0_112 = arith.constant 0 : index
    %c0_113 = arith.constant 0 : index
    %167 = vector.load %arg4[%c19, %c0_112, %c0_113] : memref<25x24x512xf32, #tpu.memory_space<vmem>>, vector<1x24x512xf32>
    %168 = vector.shape_cast %167 : vector<1x24x512xf32> to vector<24x512xf32>
    %169 = arith.mulf %166, %168 : vector<24x512xf32>
    %170 = arith.addf %165, %169 : vector<24x512xf32>
    %c482_i32 = arith.constant 482 : i32
    %171 = tpu.dynamic_rotate %72 by %c482_i32 dim 1 : vector<24x512xf32>, i32 -> vector<24x512xf32>
    %c20_114 = arith.constant 20 : index
    %c0_115 = arith.constant 0 : index
    %c0_116 = arith.constant 0 : index
    %172 = vector.load %arg4[%c20_114, %c0_115, %c0_116] : memref<25x24x512xf32, #tpu.memory_space<vmem>>, vector<1x24x512xf32>
    %173 = vector.shape_cast %172 : vector<1x24x512xf32> to vector<24x512xf32>
    %174 = arith.mulf %171, %173 : vector<24x512xf32>
    %175 = arith.addf %170, %174 : vector<24x512xf32>
    %c481_i32 = arith.constant 481 : i32
    %176 = tpu.dynamic_rotate %72 by %c481_i32 dim 1 : vector<24x512xf32>, i32 -> vector<24x512xf32>
    %c21 = arith.constant 21 : index
    %c0_117 = arith.constant 0 : index
    %c0_118 = arith.constant 0 : index
    %177 = vector.load %arg4[%c21, %c0_117, %c0_118] : memref<25x24x512xf32, #tpu.memory_space<vmem>>, vector<1x24x512xf32>
    %178 = vector.shape_cast %177 : vector<1x24x512xf32> to vector<24x512xf32>
    %179 = arith.mulf %176, %178 : vector<24x512xf32>
    %180 = arith.addf %175, %179 : vector<24x512xf32>
    %c480_i32 = arith.constant 480 : i32
    %181 = tpu.dynamic_rotate %72 by %c480_i32 dim 1 : vector<24x512xf32>, i32 -> vector<24x512xf32>
    %c22 = arith.constant 22 : index
    %c0_119 = arith.constant 0 : index
    %c0_120 = arith.constant 0 : index
    %182 = vector.load %arg4[%c22, %c0_119, %c0_120] : memref<25x24x512xf32, #tpu.memory_space<vmem>>, vector<1x24x512xf32>
    %183 = vector.shape_cast %182 : vector<1x24x512xf32> to vector<24x512xf32>
    %184 = arith.mulf %181, %183 : vector<24x512xf32>
    %185 = arith.addf %180, %184 : vector<24x512xf32>
    %c479_i32 = arith.constant 479 : i32
    %186 = tpu.dynamic_rotate %72 by %c479_i32 dim 1 : vector<24x512xf32>, i32 -> vector<24x512xf32>
    %c23 = arith.constant 23 : index
    %c0_121 = arith.constant 0 : index
    %c0_122 = arith.constant 0 : index
    %187 = vector.load %arg4[%c23, %c0_121, %c0_122] : memref<25x24x512xf32, #tpu.memory_space<vmem>>, vector<1x24x512xf32>
    %188 = vector.shape_cast %187 : vector<1x24x512xf32> to vector<24x512xf32>
    %189 = arith.mulf %186, %188 : vector<24x512xf32>
    %190 = arith.addf %185, %189 : vector<24x512xf32>
    %c478_i32 = arith.constant 478 : i32
    %191 = tpu.dynamic_rotate %72 by %c478_i32 dim 1 : vector<24x512xf32>, i32 -> vector<24x512xf32>
    %c24_123 = arith.constant 24 : index
    %c0_124 = arith.constant 0 : index
    %c0_125 = arith.constant 0 : index
    %192 = vector.load %arg4[%c24_123, %c0_124, %c0_125] : memref<25x24x512xf32, #tpu.memory_space<vmem>>, vector<1x24x512xf32>
    %193 = vector.shape_cast %192 : vector<1x24x512xf32> to vector<24x512xf32>
    %194 = arith.mulf %191, %193 : vector<24x512xf32>
    %195 = arith.addf %190, %194 : vector<24x512xf32>
    %cst_126 = arith.constant 0.000000e+00 : f32
    %196 = vector.broadcast %cst_126 : f32 to vector<24x512xf32>
    %197 = arith.cmpf ogt, %195, %196 : vector<24x512xf32>
    %cst_127 = arith.constant 0.000000e+00 : f32
    %198 = vector.broadcast %cst_127 : f32 to vector<24x512xf32>
    %199 = arith.minimumf %195, %198 : vector<24x512xf32>
    %200 = math.exp %199 : vector<24x512xf32>
    %cst_128 = arith.constant 1.000000e+00 : f32
    %201 = vector.broadcast %cst_128 : f32 to vector<24x512xf32>
    %202 = arith.subf %200, %201 : vector<24x512xf32>
    %203 = arith.select %197, %195, %202 : vector<24x512xi1>, vector<24x512xf32>
    %cst_129 = arith.constant 0.000000e+00 : f32
    %204 = vector.broadcast %cst_129 : f32 to vector<24x512xf32>
    %205 = arith.cmpf ogt, %203, %204 : vector<24x512xf32>
    %cst_130 = arith.constant 0.000000e+00 : f32
    %206 = vector.broadcast %cst_130 : f32 to vector<24x512xf32>
    %207 = arith.minimumf %203, %206 : vector<24x512xf32>
    %208 = math.exp %207 : vector<24x512xf32>
    %cst_131 = arith.constant 1.000000e+00 : f32
    %209 = vector.broadcast %cst_131 : f32 to vector<24x512xf32>
    %210 = arith.subf %208, %209 : vector<24x512xf32>
    %211 = arith.select %205, %203, %210 : vector<24x512xi1>, vector<24x512xf32>
    %c0_132 = arith.constant 0 : index
    %c0_133 = arith.constant 0 : index
    %212 = vector.load %arg5[%c0_132, %c0_133] : memref<4x24xbf16, #tpu.memory_space<vmem>>, vector<4x24xbf16>
    %213 = arith.truncf %211 : vector<24x512xf32> to vector<24x512xbf16>
    %cst_134 = arith.constant dense<0.000000e+00> : vector<4x512xf32>
    %214 = tpu.matmul %212, %213, %cst_134 {dimension_numbers = #tpu.dot_dimension_numbers<[1], [0], [0], [1], [0, 0, 1, 1], [], []>} : vector<4x24xbf16>, vector<24x512xbf16>, vector<4x512xf32> -> vector<4x512xf32>
    %c0_135 = arith.constant 0 : index
    %c0_136 = arith.constant 0 : index
    %215 = vector.load %arg6[%c0_135, %c0_136] : memref<4x1xf32, #tpu.memory_space<vmem>>, vector<4x1xf32>
    %216 = vector.broadcast %215 : vector<4x1xf32> to vector<4x512xf32>
    %217 = arith.addf %214, %216 : vector<4x512xf32>
    %218 = arith.subf %19, %217 : vector<4x512xf32>
    %c17_i32_137 = arith.constant 17 : i32
    %219 = tpu.dynamic_rotate %218 by %c17_i32_137 dim 1 : vector<4x512xf32>, i32 -> vector<4x512xf32>
    %c0_138 = arith.constant 0 : index
    %c0_139 = arith.constant 0 : index
    %c0_140 = arith.constant 0 : index
    %220 = vector.load %arg2[%c0_138, %c0_139, %c0_140] : memref<9x4x512xf32, #tpu.memory_space<vmem>>, vector<1x4x512xf32>
    %221 = vector.shape_cast %220 : vector<1x4x512xf32> to vector<4x512xf32>
    %222 = arith.mulf %219, %221 : vector<4x512xf32>
    %c0_141 = arith.constant 0 : index
    %c0_142 = arith.constant 0 : index
    %223 = vector.load %arg12[%c0_141, %c0_142] : memref<72x512xf32, #tpu.memory_space<vmem>>, vector<4x512xf32>
    tpu.vector_store %arg12[%c0_141, %c0_142], %222 {strides = array<i32>} : memref<72x512xf32, #tpu.memory_space<vmem>>, vector<4x512xf32>,
    %c16_i32_143 = arith.constant 16 : i32
    %224 = tpu.dynamic_rotate %218 by %c16_i32_143 dim 1 : vector<4x512xf32>, i32 -> vector<4x512xf32>
    %c1_144 = arith.constant 1 : index
    %c0_145 = arith.constant 0 : index
    %c0_146 = arith.constant 0 : index
    %225 = vector.load %arg2[%c1_144, %c0_145, %c0_146] : memref<9x4x512xf32, #tpu.memory_space<vmem>>, vector<1x4x512xf32>
    %226 = vector.shape_cast %225 : vector<1x4x512xf32> to vector<4x512xf32>
    %227 = arith.mulf %224, %226 : vector<4x512xf32>
    %c8_147 = arith.constant 8 : index
    %c0_148 = arith.constant 0 : index
    %228 = vector.load %arg12[%c8_147, %c0_148] : memref<72x512xf32, #tpu.memory_space<vmem>>, vector<4x512xf32>
    tpu.vector_store %arg12[%c8_147, %c0_148], %227 {strides = array<i32>} : memref<72x512xf32, #tpu.memory_space<vmem>>, vector<4x512xf32>,
    %c15_i32_149 = arith.constant 15 : i32
    %229 = tpu.dynamic_rotate %218 by %c15_i32_149 dim 1 : vector<4x512xf32>, i32 -> vector<4x512xf32>
    %c2_150 = arith.constant 2 : index
    %c0_151 = arith.constant 0 : index
    %c0_152 = arith.constant 0 : index
    %230 = vector.load %arg2[%c2_150, %c0_151, %c0_152] : memref<9x4x512xf32, #tpu.memory_space<vmem>>, vector<1x4x512xf32>
    %231 = vector.shape_cast %230 : vector<1x4x512xf32> to vector<4x512xf32>
    %232 = arith.mulf %229, %231 : vector<4x512xf32>
    %c16_153 = arith.constant 16 : index
    %c0_154 = arith.constant 0 : index
    %233 = vector.load %arg12[%c16_153, %c0_154] : memref<72x512xf32, #tpu.memory_space<vmem>>, vector<4x512xf32>
    tpu.vector_store %arg12[%c16_153, %c0_154], %232 {strides = array<i32>} : memref<72x512xf32, #tpu.memory_space<vmem>>, vector<4x512xf32>,
    %c1_i32_155 = arith.constant 1 : i32
    %234 = tpu.dynamic_rotate %218 by %c1_i32_155 dim 1 : vector<4x512xf32>, i32 -> vector<4x512xf32>
    %c3_156 = arith.constant 3 : index
    %c0_157 = arith.constant 0 : index
    %c0_158 = arith.constant 0 : index
    %235 = vector.load %arg2[%c3_156, %c0_157, %c0_158] : memref<9x4x512xf32, #tpu.memory_space<vmem>>, vector<1x4x512xf32>
    %236 = vector.shape_cast %235 : vector<1x4x512xf32> to vector<4x512xf32>
    %237 = arith.mulf %234, %236 : vector<4x512xf32>
    %c24_159 = arith.constant 24 : index
    %c0_160 = arith.constant 0 : index
    %238 = vector.load %arg12[%c24_159, %c0_160] : memref<72x512xf32, #tpu.memory_space<vmem>>, vector<4x512xf32>
    tpu.vector_store %arg12[%c24_159, %c0_160], %237 {strides = array<i32>} : memref<72x512xf32, #tpu.memory_space<vmem>>, vector<4x512xf32>,
    %c32_161 = arith.constant 32 : index
    %c0_162 = arith.constant 0 : index
    %239 = vector.load %arg12[%c32_161, %c0_162] : memref<72x512xf32, #tpu.memory_space<vmem>>, vector<4x512xf32>
    tpu.vector_store %arg12[%c32_161, %c0_162], %218 {strides = array<i32>} : memref<72x512xf32, #tpu.memory_space<vmem>>, vector<4x512xf32>,
    %c511_i32_163 = arith.constant 511 : i32
    %240 = tpu.dynamic_rotate %218 by %c511_i32_163 dim 1 : vector<4x512xf32>, i32 -> vector<4x512xf32>
    %c5_164 = arith.constant 5 : index
    %c0_165 = arith.constant 0 : index
    %c0_166 = arith.constant 0 : index
    %241 = vector.load %arg2[%c5_164, %c0_165, %c0_166] : memref<9x4x512xf32, #tpu.memory_space<vmem>>, vector<1x4x512xf32>
    %242 = vector.shape_cast %241 : vector<1x4x512xf32> to vector<4x512xf32>
    %243 = arith.mulf %240, %242 : vector<4x512xf32>
    %c40_167 = arith.constant 40 : index
    %c0_168 = arith.constant 0 : index
    %244 = vector.load %arg12[%c40_167, %c0_168] : memref<72x512xf32, #tpu.memory_space<vmem>>, vector<4x512xf32>
    tpu.vector_store %arg12[%c40_167, %c0_168], %243 {strides = array<i32>} : memref<72x512xf32, #tpu.memory_space<vmem>>, vector<4x512xf32>,
    %c497_i32_169 = arith.constant 497 : i32
    %245 = tpu.dynamic_rotate %218 by %c497_i32_169 dim 1 : vector<4x512xf32>, i32 -> vector<4x512xf32>
    %c6_170 = arith.constant 6 : index
    %c0_171 = arith.constant 0 : index
    %c0_172 = arith.constant 0 : index
    %246 = vector.load %arg2[%c6_170, %c0_171, %c0_172] : memref<9x4x512xf32, #tpu.memory_space<vmem>>, vector<1x4x512xf32>
    %247 = vector.shape_cast %246 : vector<1x4x512xf32> to vector<4x512xf32>
    %248 = arith.mulf %245, %247 : vector<4x512xf32>
    %c48_173 = arith.constant 48 : index
    %c0_174 = arith.constant 0 : index
    %249 = vector.load %arg12[%c48_173, %c0_174] : memref<72x512xf32, #tpu.memory_space<vmem>>, vector<4x512xf32>
    tpu.vector_store %arg12[%c48_173, %c0_174], %248 {strides = array<i32>} : memref<72x512xf32, #tpu.memory_space<vmem>>, vector<4x512xf32>,
    %c496_i32_175 = arith.constant 496 : i32
    %250 = tpu.dynamic_rotate %218 by %c496_i32_175 dim 1 : vector<4x512xf32>, i32 -> vector<4x512xf32>
    %c7_176 = arith.constant 7 : index
    %c0_177 = arith.constant 0 : index
    %c0_178 = arith.constant 0 : index
    %251 = vector.load %arg2[%c7_176, %c0_177, %c0_178] : memref<9x4x512xf32, #tpu.memory_space<vmem>>, vector<1x4x512xf32>
    %252 = vector.shape_cast %251 : vector<1x4x512xf32> to vector<4x512xf32>
    %253 = arith.mulf %250, %252 : vector<4x512xf32>
    %c56_179 = arith.constant 56 : index
    %c0_180 = arith.constant 0 : index
    %254 = vector.load %arg12[%c56_179, %c0_180] : memref<72x512xf32, #tpu.memory_space<vmem>>, vector<4x512xf32>
    tpu.vector_store %arg12[%c56_179, %c0_180], %253 {strides = array<i32>} : memref<72x512xf32, #tpu.memory_space<vmem>>, vector<4x512xf32>,
    %c495_i32_181 = arith.constant 495 : i32
    %255 = tpu.dynamic_rotate %218 by %c495_i32_181 dim 1 : vector<4x512xf32>, i32 -> vector<4x512xf32>
    %c8_182 = arith.constant 8 : index
    %c0_183 = arith.constant 0 : index
    %c0_184 = arith.constant 0 : index
    %256 = vector.load %arg2[%c8_182, %c0_183, %c0_184] : memref<9x4x512xf32, #tpu.memory_space<vmem>>, vector<1x4x512xf32>
    %257 = vector.shape_cast %256 : vector<1x4x512xf32> to vector<4x512xf32>
    %258 = arith.mulf %255, %257 : vector<4x512xf32>
    %c64_185 = arith.constant 64 : index
    %c0_186 = arith.constant 0 : index
    %259 = vector.load %arg12[%c64_185, %c0_186] : memref<72x512xf32, #tpu.memory_space<vmem>>, vector<4x512xf32>
    tpu.vector_store %arg12[%c64_185, %c0_186], %258 {strides = array<i32>} : memref<72x512xf32, #tpu.memory_space<vmem>>, vector<4x512xf32>,
    %c0_187 = arith.constant 0 : index
    %c0_188 = arith.constant 0 : index
    %260 = vector.load %arg7[%c0_187, %c0_188] : memref<24x72xbf16, #tpu.memory_space<vmem>>, vector<24x72xbf16>
    %c0_189 = arith.constant 0 : index
    %c0_190 = arith.constant 0 : index
    %261 = vector.load %arg12[%c0_189, %c0_190] : memref<72x512xf32, #tpu.memory_space<vmem>>, vector<72x512xf32>
    %262 = arith.truncf %261 : vector<72x512xf32> to vector<72x512xbf16>
    %cst_191 = arith.constant dense<0.000000e+00> : vector<24x512xf32>
    %263 = tpu.matmul %260, %262, %cst_191 {dimension_numbers = #tpu.dot_dimension_numbers<[1], [0], [0], [1], [0, 0, 1, 1], [], []>} : vector<24x72xbf16>, vector<72x512xbf16>, vector<24x512xf32> -> vector<24x512xf32>
    %cst_192 = arith.constant 0.000000e+00 : f32
    %264 = vector.broadcast %cst_192 : f32 to vector<24x512xf32>
    %265 = arith.cmpf ogt, %263, %264 : vector<24x512xf32>
    %cst_193 = arith.constant 0.000000e+00 : f32
    %266 = vector.broadcast %cst_193 : f32 to vector<24x512xf32>
    %267 = arith.minimumf %263, %266 : vector<24x512xf32>
    %268 = math.exp %267 : vector<24x512xf32>
    %cst_194 = arith.constant 1.000000e+00 : f32
    %269 = vector.broadcast %cst_194 : f32 to vector<24x512xf32>
    %270 = arith.subf %268, %269 : vector<24x512xf32>
    %271 = arith.select %265, %263, %270 : vector<24x512xi1>, vector<24x512xf32>
    %c12_195 = arith.constant 12 : index
    %c0_196 = arith.constant 0 : index
    %c0_197 = arith.constant 0 : index
    %272 = vector.load %arg8[%c12_195, %c0_196, %c0_197] : memref<25x24x512xf32, #tpu.memory_space<vmem>>, vector<1x24x512xf32>
    %273 = vector.shape_cast %272 : vector<1x24x512xf32> to vector<24x512xf32>
    %274 = arith.mulf %271, %273 : vector<24x512xf32>
    %c34_i32_198 = arith.constant 34 : i32
    %275 = tpu.dynamic_rotate %271 by %c34_i32_198 dim 1 : vector<24x512xf32>, i32 -> vector<24x512xf32>
    %c0_199 = arith.constant 0 : index
    %c0_200 = arith.constant 0 : index
    %c0_201 = arith.constant 0 : index
    %276 = vector.load %arg8[%c0_199, %c0_200, %c0_201] : memref<25x24x512xf32, #tpu.memory_space<vmem>>, vector<1x24x512xf32>
    %277 = vector.shape_cast %276 : vector<1x24x512xf32> to vector<24x512xf32>
    %278 = arith.mulf %275, %277 : vector<24x512xf32>
    %279 = arith.addf %274, %278 : vector<24x512xf32>
    %c33_i32_202 = arith.constant 33 : i32
    %280 = tpu.dynamic_rotate %271 by %c33_i32_202 dim 1 : vector<24x512xf32>, i32 -> vector<24x512xf32>
    %c1_203 = arith.constant 1 : index
    %c0_204 = arith.constant 0 : index
    %c0_205 = arith.constant 0 : index
    %281 = vector.load %arg8[%c1_203, %c0_204, %c0_205] : memref<25x24x512xf32, #tpu.memory_space<vmem>>, vector<1x24x512xf32>
    %282 = vector.shape_cast %281 : vector<1x24x512xf32> to vector<24x512xf32>
    %283 = arith.mulf %280, %282 : vector<24x512xf32>
    %284 = arith.addf %279, %283 : vector<24x512xf32>
    %c32_i32_206 = arith.constant 32 : i32
    %285 = tpu.dynamic_rotate %271 by %c32_i32_206 dim 1 : vector<24x512xf32>, i32 -> vector<24x512xf32>
    %c2_207 = arith.constant 2 : index
    %c0_208 = arith.constant 0 : index
    %c0_209 = arith.constant 0 : index
    %286 = vector.load %arg8[%c2_207, %c0_208, %c0_209] : memref<25x24x512xf32, #tpu.memory_space<vmem>>, vector<1x24x512xf32>
    %287 = vector.shape_cast %286 : vector<1x24x512xf32> to vector<24x512xf32>
    %288 = arith.mulf %285, %287 : vector<24x512xf32>
    %289 = arith.addf %284, %288 : vector<24x512xf32>
    %c31_i32_210 = arith.constant 31 : i32
    %290 = tpu.dynamic_rotate %271 by %c31_i32_210 dim 1 : vector<24x512xf32>, i32 -> vector<24x512xf32>
    %c3_211 = arith.constant 3 : index
    %c0_212 = arith.constant 0 : index
    %c0_213 = arith.constant 0 : index
    %291 = vector.load %arg8[%c3_211, %c0_212, %c0_213] : memref<25x24x512xf32, #tpu.memory_space<vmem>>, vector<1x24x512xf32>
    %292 = vector.shape_cast %291 : vector<1x24x512xf32> to vector<24x512xf32>
    %293 = arith.mulf %290, %292 : vector<24x512xf32>
    %294 = arith.addf %289, %293 : vector<24x512xf32>
    %c30_i32_214 = arith.constant 30 : i32
    %295 = tpu.dynamic_rotate %271 by %c30_i32_214 dim 1 : vector<24x512xf32>, i32 -> vector<24x512xf32>
    %c4_215 = arith.constant 4 : index
    %c0_216 = arith.constant 0 : index
    %c0_217 = arith.constant 0 : index
    %296 = vector.load %arg8[%c4_215, %c0_216, %c0_217] : memref<25x24x512xf32, #tpu.memory_space<vmem>>, vector<1x24x512xf32>
    %297 = vector.shape_cast %296 : vector<1x24x512xf32> to vector<24x512xf32>
    %298 = arith.mulf %295, %297 : vector<24x512xf32>
    %299 = arith.addf %294, %298 : vector<24x512xf32>
    %c18_i32_218 = arith.constant 18 : i32
    %300 = tpu.dynamic_rotate %271 by %c18_i32_218 dim 1 : vector<24x512xf32>, i32 -> vector<24x512xf32>
    %c5_219 = arith.constant 5 : index
    %c0_220 = arith.constant 0 : index
    %c0_221 = arith.constant 0 : index
    %301 = vector.load %arg8[%c5_219, %c0_220, %c0_221] : memref<25x24x512xf32, #tpu.memory_space<vmem>>, vector<1x24x512xf32>
    %302 = vector.shape_cast %301 : vector<1x24x512xf32> to vector<24x512xf32>
    %303 = arith.mulf %300, %302 : vector<24x512xf32>
    %304 = arith.addf %299, %303 : vector<24x512xf32>
    %c17_i32_222 = arith.constant 17 : i32
    %305 = tpu.dynamic_rotate %271 by %c17_i32_222 dim 1 : vector<24x512xf32>, i32 -> vector<24x512xf32>
    %c6_223 = arith.constant 6 : index
    %c0_224 = arith.constant 0 : index
    %c0_225 = arith.constant 0 : index
    %306 = vector.load %arg8[%c6_223, %c0_224, %c0_225] : memref<25x24x512xf32, #tpu.memory_space<vmem>>, vector<1x24x512xf32>
    %307 = vector.shape_cast %306 : vector<1x24x512xf32> to vector<24x512xf32>
    %308 = arith.mulf %305, %307 : vector<24x512xf32>
    %309 = arith.addf %304, %308 : vector<24x512xf32>
    %c16_i32_226 = arith.constant 16 : i32
    %310 = tpu.dynamic_rotate %271 by %c16_i32_226 dim 1 : vector<24x512xf32>, i32 -> vector<24x512xf32>
    %c7_227 = arith.constant 7 : index
    %c0_228 = arith.constant 0 : index
    %c0_229 = arith.constant 0 : index
    %311 = vector.load %arg8[%c7_227, %c0_228, %c0_229] : memref<25x24x512xf32, #tpu.memory_space<vmem>>, vector<1x24x512xf32>
    %312 = vector.shape_cast %311 : vector<1x24x512xf32> to vector<24x512xf32>
    %313 = arith.mulf %310, %312 : vector<24x512xf32>
    %314 = arith.addf %309, %313 : vector<24x512xf32>
    %c15_i32_230 = arith.constant 15 : i32
    %315 = tpu.dynamic_rotate %271 by %c15_i32_230 dim 1 : vector<24x512xf32>, i32 -> vector<24x512xf32>
    %c8_231 = arith.constant 8 : index
    %c0_232 = arith.constant 0 : index
    %c0_233 = arith.constant 0 : index
    %316 = vector.load %arg8[%c8_231, %c0_232, %c0_233] : memref<25x24x512xf32, #tpu.memory_space<vmem>>, vector<1x24x512xf32>
    %317 = vector.shape_cast %316 : vector<1x24x512xf32> to vector<24x512xf32>
    %318 = arith.mulf %315, %317 : vector<24x512xf32>
    %319 = arith.addf %314, %318 : vector<24x512xf32>
    %c14_i32_234 = arith.constant 14 : i32
    %320 = tpu.dynamic_rotate %271 by %c14_i32_234 dim 1 : vector<24x512xf32>, i32 -> vector<24x512xf32>
    %c9_235 = arith.constant 9 : index
    %c0_236 = arith.constant 0 : index
    %c0_237 = arith.constant 0 : index
    %321 = vector.load %arg8[%c9_235, %c0_236, %c0_237] : memref<25x24x512xf32, #tpu.memory_space<vmem>>, vector<1x24x512xf32>
    %322 = vector.shape_cast %321 : vector<1x24x512xf32> to vector<24x512xf32>
    %323 = arith.mulf %320, %322 : vector<24x512xf32>
    %324 = arith.addf %319, %323 : vector<24x512xf32>
    %c2_i32_238 = arith.constant 2 : i32
    %325 = tpu.dynamic_rotate %271 by %c2_i32_238 dim 1 : vector<24x512xf32>, i32 -> vector<24x512xf32>
    %c10_239 = arith.constant 10 : index
    %c0_240 = arith.constant 0 : index
    %c0_241 = arith.constant 0 : index
    %326 = vector.load %arg8[%c10_239, %c0_240, %c0_241] : memref<25x24x512xf32, #tpu.memory_space<vmem>>, vector<1x24x512xf32>
    %327 = vector.shape_cast %326 : vector<1x24x512xf32> to vector<24x512xf32>
    %328 = arith.mulf %325, %327 : vector<24x512xf32>
    %329 = arith.addf %324, %328 : vector<24x512xf32>
    %c1_i32_242 = arith.constant 1 : i32
    %330 = tpu.dynamic_rotate %271 by %c1_i32_242 dim 1 : vector<24x512xf32>, i32 -> vector<24x512xf32>
    %c11_243 = arith.constant 11 : index
    %c0_244 = arith.constant 0 : index
    %c0_245 = arith.constant 0 : index
    %331 = vector.load %arg8[%c11_243, %c0_244, %c0_245] : memref<25x24x512xf32, #tpu.memory_space<vmem>>, vector<1x24x512xf32>
    %332 = vector.shape_cast %331 : vector<1x24x512xf32> to vector<24x512xf32>
    %333 = arith.mulf %330, %332 : vector<24x512xf32>
    %334 = arith.addf %329, %333 : vector<24x512xf32>
    %c511_i32_246 = arith.constant 511 : i32
    %335 = tpu.dynamic_rotate %271 by %c511_i32_246 dim 1 : vector<24x512xf32>, i32 -> vector<24x512xf32>
    %c13_247 = arith.constant 13 : index
    %c0_248 = arith.constant 0 : index
    %c0_249 = arith.constant 0 : index
    %336 = vector.load %arg8[%c13_247, %c0_248, %c0_249] : memref<25x24x512xf32, #tpu.memory_space<vmem>>, vector<1x24x512xf32>
    %337 = vector.shape_cast %336 : vector<1x24x512xf32> to vector<24x512xf32>
    %338 = arith.mulf %335, %337 : vector<24x512xf32>
    %339 = arith.addf %334, %338 : vector<24x512xf32>
    %c510_i32_250 = arith.constant 510 : i32
    %340 = tpu.dynamic_rotate %271 by %c510_i32_250 dim 1 : vector<24x512xf32>, i32 -> vector<24x512xf32>
    %c14_251 = arith.constant 14 : index
    %c0_252 = arith.constant 0 : index
    %c0_253 = arith.constant 0 : index
    %341 = vector.load %arg8[%c14_251, %c0_252, %c0_253] : memref<25x24x512xf32, #tpu.memory_space<vmem>>, vector<1x24x512xf32>
    %342 = vector.shape_cast %341 : vector<1x24x512xf32> to vector<24x512xf32>
    %343 = arith.mulf %340, %342 : vector<24x512xf32>
    %344 = arith.addf %339, %343 : vector<24x512xf32>
    %c498_i32_254 = arith.constant 498 : i32
    %345 = tpu.dynamic_rotate %271 by %c498_i32_254 dim 1 : vector<24x512xf32>, i32 -> vector<24x512xf32>
    %c15_255 = arith.constant 15 : index
    %c0_256 = arith.constant 0 : index
    %c0_257 = arith.constant 0 : index
    %346 = vector.load %arg8[%c15_255, %c0_256, %c0_257] : memref<25x24x512xf32, #tpu.memory_space<vmem>>, vector<1x24x512xf32>
    %347 = vector.shape_cast %346 : vector<1x24x512xf32> to vector<24x512xf32>
    %348 = arith.mulf %345, %347 : vector<24x512xf32>
    %349 = arith.addf %344, %348 : vector<24x512xf32>
    %c497_i32_258 = arith.constant 497 : i32
    %350 = tpu.dynamic_rotate %271 by %c497_i32_258 dim 1 : vector<24x512xf32>, i32 -> vector<24x512xf32>
    %c16_259 = arith.constant 16 : index
    %c0_260 = arith.constant 0 : index
    %c0_261 = arith.constant 0 : index
    %351 = vector.load %arg8[%c16_259, %c0_260, %c0_261] : memref<25x24x512xf32, #tpu.memory_space<vmem>>, vector<1x24x512xf32>
    %352 = vector.shape_cast %351 : vector<1x24x512xf32> to vector<24x512xf32>
    %353 = arith.mulf %350, %352 : vector<24x512xf32>
    %354 = arith.addf %349, %353 : vector<24x512xf32>
    %c496_i32_262 = arith.constant 496 : i32
    %355 = tpu.dynamic_rotate %271 by %c496_i32_262 dim 1 : vector<24x512xf32>, i32 -> vector<24x512xf32>
    %c17_263 = arith.constant 17 : index
    %c0_264 = arith.constant 0 : index
    %c0_265 = arith.constant 0 : index
    %356 = vector.load %arg8[%c17_263, %c0_264, %c0_265] : memref<25x24x512xf32, #tpu.memory_space<vmem>>, vector<1x24x512xf32>
    %357 = vector.shape_cast %356 : vector<1x24x512xf32> to vector<24x512xf32>
    %358 = arith.mulf %355, %357 : vector<24x512xf32>
    %359 = arith.addf %354, %358 : vector<24x512xf32>
    %c495_i32_266 = arith.constant 495 : i32
    %360 = tpu.dynamic_rotate %271 by %c495_i32_266 dim 1 : vector<24x512xf32>, i32 -> vector<24x512xf32>
    %c18_267 = arith.constant 18 : index
    %c0_268 = arith.constant 0 : index
    %c0_269 = arith.constant 0 : index
    %361 = vector.load %arg8[%c18_267, %c0_268, %c0_269] : memref<25x24x512xf32, #tpu.memory_space<vmem>>, vector<1x24x512xf32>
    %362 = vector.shape_cast %361 : vector<1x24x512xf32> to vector<24x512xf32>
    %363 = arith.mulf %360, %362 : vector<24x512xf32>
    %364 = arith.addf %359, %363 : vector<24x512xf32>
    %c494_i32_270 = arith.constant 494 : i32
    %365 = tpu.dynamic_rotate %271 by %c494_i32_270 dim 1 : vector<24x512xf32>, i32 -> vector<24x512xf32>
    %c19_271 = arith.constant 19 : index
    %c0_272 = arith.constant 0 : index
    %c0_273 = arith.constant 0 : index
    %366 = vector.load %arg8[%c19_271, %c0_272, %c0_273] : memref<25x24x512xf32, #tpu.memory_space<vmem>>, vector<1x24x512xf32>
    %367 = vector.shape_cast %366 : vector<1x24x512xf32> to vector<24x512xf32>
    %368 = arith.mulf %365, %367 : vector<24x512xf32>
    %369 = arith.addf %364, %368 : vector<24x512xf32>
    %c482_i32_274 = arith.constant 482 : i32
    %370 = tpu.dynamic_rotate %271 by %c482_i32_274 dim 1 : vector<24x512xf32>, i32 -> vector<24x512xf32>
    %c20_275 = arith.constant 20 : index
    %c0_276 = arith.constant 0 : index
    %c0_277 = arith.constant 0 : index
    %371 = vector.load %arg8[%c20_275, %c0_276, %c0_277] : memref<25x24x512xf32, #tpu.memory_space<vmem>>, vector<1x24x512xf32>
    %372 = vector.shape_cast %371 : vector<1x24x512xf32> to vector<24x512xf32>
    %373 = arith.mulf %370, %372 : vector<24x512xf32>
    %374 = arith.addf %369, %373 : vector<24x512xf32>
    %c481_i32_278 = arith.constant 481 : i32
    %375 = tpu.dynamic_rotate %271 by %c481_i32_278 dim 1 : vector<24x512xf32>, i32 -> vector<24x512xf32>
    %c21_279 = arith.constant 21 : index
    %c0_280 = arith.constant 0 : index
    %c0_281 = arith.constant 0 : index
    %376 = vector.load %arg8[%c21_279, %c0_280, %c0_281] : memref<25x24x512xf32, #tpu.memory_space<vmem>>, vector<1x24x512xf32>
    %377 = vector.shape_cast %376 : vector<1x24x512xf32> to vector<24x512xf32>
    %378 = arith.mulf %375, %377 : vector<24x512xf32>
    %379 = arith.addf %374, %378 : vector<24x512xf32>
    %c480_i32_282 = arith.constant 480 : i32
    %380 = tpu.dynamic_rotate %271 by %c480_i32_282 dim 1 : vector<24x512xf32>, i32 -> vector<24x512xf32>
    %c22_283 = arith.constant 22 : index
    %c0_284 = arith.constant 0 : index
    %c0_285 = arith.constant 0 : index
    %381 = vector.load %arg8[%c22_283, %c0_284, %c0_285] : memref<25x24x512xf32, #tpu.memory_space<vmem>>, vector<1x24x512xf32>
    %382 = vector.shape_cast %381 : vector<1x24x512xf32> to vector<24x512xf32>
    %383 = arith.mulf %380, %382 : vector<24x512xf32>
    %384 = arith.addf %379, %383 : vector<24x512xf32>
    %c479_i32_286 = arith.constant 479 : i32
    %385 = tpu.dynamic_rotate %271 by %c479_i32_286 dim 1 : vector<24x512xf32>, i32 -> vector<24x512xf32>
    %c23_287 = arith.constant 23 : index
    %c0_288 = arith.constant 0 : index
    %c0_289 = arith.constant 0 : index
    %386 = vector.load %arg8[%c23_287, %c0_288, %c0_289] : memref<25x24x512xf32, #tpu.memory_space<vmem>>, vector<1x24x512xf32>
    %387 = vector.shape_cast %386 : vector<1x24x512xf32> to vector<24x512xf32>
    %388 = arith.mulf %385, %387 : vector<24x512xf32>
    %389 = arith.addf %384, %388 : vector<24x512xf32>
    %c478_i32_290 = arith.constant 478 : i32
    %390 = tpu.dynamic_rotate %271 by %c478_i32_290 dim 1 : vector<24x512xf32>, i32 -> vector<24x512xf32>
    %c24_291 = arith.constant 24 : index
    %c0_292 = arith.constant 0 : index
    %c0_293 = arith.constant 0 : index
    %391 = vector.load %arg8[%c24_291, %c0_292, %c0_293] : memref<25x24x512xf32, #tpu.memory_space<vmem>>, vector<1x24x512xf32>
    %392 = vector.shape_cast %391 : vector<1x24x512xf32> to vector<24x512xf32>
    %393 = arith.mulf %390, %392 : vector<24x512xf32>
    %394 = arith.addf %389, %393 : vector<24x512xf32>
    %cst_294 = arith.constant 0.000000e+00 : f32
    %395 = vector.broadcast %cst_294 : f32 to vector<24x512xf32>
    %396 = arith.cmpf ogt, %394, %395 : vector<24x512xf32>
    %cst_295 = arith.constant 0.000000e+00 : f32
    %397 = vector.broadcast %cst_295 : f32 to vector<24x512xf32>
    %398 = arith.minimumf %394, %397 : vector<24x512xf32>
    %399 = math.exp %398 : vector<24x512xf32>
    %cst_296 = arith.constant 1.000000e+00 : f32
    %400 = vector.broadcast %cst_296 : f32 to vector<24x512xf32>
    %401 = arith.subf %399, %400 : vector<24x512xf32>
    %402 = arith.select %396, %394, %401 : vector<24x512xi1>, vector<24x512xf32>
    %cst_297 = arith.constant 0.000000e+00 : f32
    %403 = vector.broadcast %cst_297 : f32 to vector<24x512xf32>
    %404 = arith.cmpf ogt, %402, %403 : vector<24x512xf32>
    %cst_298 = arith.constant 0.000000e+00 : f32
    %405 = vector.broadcast %cst_298 : f32 to vector<24x512xf32>
    %406 = arith.minimumf %402, %405 : vector<24x512xf32>
    %407 = math.exp %406 : vector<24x512xf32>
    %cst_299 = arith.constant 1.000000e+00 : f32
    %408 = vector.broadcast %cst_299 : f32 to vector<24x512xf32>
    %409 = arith.subf %407, %408 : vector<24x512xf32>
    %410 = arith.select %404, %402, %409 : vector<24x512xi1>, vector<24x512xf32>
    %c0_300 = arith.constant 0 : index
    %c0_301 = arith.constant 0 : index
    %411 = vector.load %arg9[%c0_300, %c0_301] : memref<4x24xbf16, #tpu.memory_space<vmem>>, vector<4x24xbf16>
    %412 = arith.truncf %410 : vector<24x512xf32> to vector<24x512xbf16>
    %cst_302 = arith.constant dense<0.000000e+00> : vector<4x512xf32>
    %413 = tpu.matmul %411, %412, %cst_302 {dimension_numbers = #tpu.dot_dimension_numbers<[1], [0], [0], [1], [0, 0, 1, 1], [], []>} : vector<4x24xbf16>, vector<24x512xbf16>, vector<4x512xf32> -> vector<4x512xf32>
    %c0_303 = arith.constant 0 : index
    %c0_304 = arith.constant 0 : index
    %414 = vector.load %arg10[%c0_303, %c0_304] : memref<4x1xf32, #tpu.memory_space<vmem>>, vector<4x1xf32>
    %415 = vector.broadcast %414 : vector<4x1xf32> to vector<4x512xf32>
    %416 = arith.addf %413, %415 : vector<4x512xf32>
    %417 = arith.subf %218, %416 : vector<4x512xf32>
    %c0_305 = arith.constant 0 : index
    %c0_306 = arith.constant 0 : index
    %c0_307 = arith.constant 0 : index
    %418 = vector.load %arg11[%c0_305, %c0_306, %c0_307] : memref<1x4x512xf32, #tpu.memory_space<vmem>>, vector<1x4x512xf32>
    %419 = vector.shape_cast %418 : vector<1x4x512xf32> to vector<4x512xf32>
    %420 = vector.shape_cast %417 : vector<4x512xf32> to vector<1x4x512xf32>
    tpu.vector_store %arg11[%c0_305, %c0_306, %c0_307], %420 {strides = array<i32>} : memref<1x4x512xf32, #tpu.memory_space<vmem>>, vector<1x4x512xf32>,
    return
  }
  func.func @transform_0(%arg0: i32) -> (i32, i32, i32) {
    %c0_i32 = arith.constant 0 : i32
    %c0_i32_0 = arith.constant 0 : i32
    %c0_i32_1 = arith.constant 0 : i32
    return %arg0, %c0_i32, %c0_i32_0 : i32, i32, i32
  }
  func.func @transform_1(%arg0: i32) -> (i32, i32, i32) {
    %c0_i32 = arith.constant 0 : i32
    %c0_i32_0 = arith.constant 0 : i32
    %c0_i32_1 = arith.constant 0 : i32
    %c0_i32_2 = arith.constant 0 : i32
    return %c0_i32, %c0_i32_0, %c0_i32_1 : i32, i32, i32
  }
  func.func @transform_2(%arg0: i32) -> (i32, i32) {
    %c0_i32 = arith.constant 0 : i32
    %c0_i32_0 = arith.constant 0 : i32
    %c0_i32_1 = arith.constant 0 : i32
    return %c0_i32, %c0_i32_0 : i32, i32
  }
  func.func @transform_3(%arg0: i32) -> (i32, i32, i32) {
    %c0_i32 = arith.constant 0 : i32
    %c0_i32_0 = arith.constant 0 : i32
    %c0_i32_1 = arith.constant 0 : i32
    %c0_i32_2 = arith.constant 0 : i32
    return %c0_i32, %c0_i32_0, %c0_i32_1 : i32, i32, i32
  }
  func.func @transform_4(%arg0: i32) -> (i32, i32) {
    %c0_i32 = arith.constant 0 : i32
    %c0_i32_0 = arith.constant 0 : i32
    %c0_i32_1 = arith.constant 0 : i32
    return %c0_i32, %c0_i32_0 : i32, i32
  }
  func.func @transform_5(%arg0: i32) -> (i32, i32) {
    %c0_i32 = arith.constant 0 : i32
    %c0_i32_0 = arith.constant 0 : i32
    %c0_i32_1 = arith.constant 0 : i32
    return %c0_i32, %c0_i32_0 : i32, i32
  }
  func.func @transform_6(%arg0: i32) -> (i32, i32) {
    %c0_i32 = arith.constant 0 : i32
    %c0_i32_0 = arith.constant 0 : i32
    %c0_i32_1 = arith.constant 0 : i32
    return %c0_i32, %c0_i32_0 : i32, i32
  }
  func.func @transform_7(%arg0: i32) -> (i32, i32, i32) {
    %c0_i32 = arith.constant 0 : i32
    %c0_i32_0 = arith.constant 0 : i32
    %c0_i32_1 = arith.constant 0 : i32
    %c0_i32_2 = arith.constant 0 : i32
    return %c0_i32, %c0_i32_0, %c0_i32_1 : i32, i32, i32
  }
  func.func @transform_8(%arg0: i32) -> (i32, i32) {
    %c0_i32 = arith.constant 0 : i32
    %c0_i32_0 = arith.constant 0 : i32
    %c0_i32_1 = arith.constant 0 : i32
    return %c0_i32, %c0_i32_0 : i32, i32
  }
  func.func @transform_9(%arg0: i32) -> (i32, i32) {
    %c0_i32 = arith.constant 0 : i32
    %c0_i32_0 = arith.constant 0 : i32
    %c0_i32_1 = arith.constant 0 : i32
    return %c0_i32, %c0_i32_0 : i32, i32
  }
  func.func @transform_10(%arg0: i32) -> (i32, i32, i32) {
    %c0_i32 = arith.constant 0 : i32
    %c0_i32_0 = arith.constant 0 : i32
    %c0_i32_1 = arith.constant 0 : i32
    return %arg0, %c0_i32, %c0_i32_0 : i32, i32, i32
  }
}

</mosaic_0001>

<bundles_post_ra>
// kernel: paired_cell_ar_pallas.1
= control target key start
LH: loop header
LB: loop body
LE: loop exit
PB: predicated region body
PF: predicated region fallthrough
CT: control target
= control target key end

     0   :  { %v6095_v2 = vmov 0.0   ;;  %s6097_s17 = smov 16   ;;  %s6098_s18 = smov 15   ;;  %v13412_v5 = vmov 0   ;;  %v88_v6 = vlaneseq  ;;  %vm13578_vm8 = vcmask 1043456   ;;  %s13401_s0 = inlined_call_operand.vmem [shape: f32[1,4,512], index: 0, kind: input, shape index: {}]   ;;  %s13402_s2 = inlined_call_operand.vmem [shape: bf16[24,72], index: 2, kind: input, shape index: {}]   ;;  %s13403_s1 = inlined_call_operand.vmem [shape: f32[9,4,512], index: 1, kind: input, shape index: {}]   ;;  %s13404_s3 = inlined_call_operand.vmem [shape: f32[25,24,512], index: 3, kind: input, shape index: {}]   ;;  %s13405_s5 = inlined_call_operand.vmem [shape: f32[4,1], index: 5, kind: input, shape index: {}]   ;;  %s13406_s4 = inlined_call_operand.vmem [shape: bf16[4,24], index: 4, kind: input, shape index: {}]   ;;  %s13407_s6 = inlined_call_operand.vmem [shape: bf16[24,72], index: 6, kind: input, shape index: {}]   ;;  %s13408_s7 = inlined_call_operand.vmem [shape: f32[25,24,512], index: 7, kind: input, shape index: {}]   ;;  %s13409_s9 = inlined_call_operand.vmem [shape: f32[4,1], index: 9, kind: input, shape index: {}]   ;;  %s13410_s8 = inlined_call_operand.vmem [shape: bf16[4,24], index: 8, kind: input, shape index: {}]   ;;  %s13411_s10 = inlined_call_operand.vmem [shape: f32[1,4,512], index: 10, kind: output, shape index: {}]  }
   0x1   :  { %v6179_v0 = vld [vmem:[%s13401_s0 + $0x8] sm:$0xff]  ;;  %v6184_v1 = vld [vmem:[%s13401_s0] sm:$0xff]  ;;  %37 = vst [vmem:[#allocation2 + $0x8] sm:$0xf0] %v6095_v2  ;;  %41 = vst [vmem:[#allocation2 + $0x28] sm:$0xf0] %v6095_v2  ;;  %444 = vmatprep.mubr.bf16.mxu0 %v13412_v5  ;;  %495 = vmatprep.mubr.bf16.mxu1 %v13412_v5 }
   0x2   :  { %13811 = vst [vmem:[#allocation3_spill] sm:$0xff] %v6179_v0  ;;  %13812 = vst [vmem:[#allocation4_spill] sm:$0xff] %v6184_v1  ;;  %s6096_s0 = smov 17   ;;  %v77_v3 = vcombine.high %v6179_v0, %v6179_v0  ;;  %v76_v4 = vcombine.high %v6184_v1, %v6184_v1  ;;  %s6099_s19 = smov 1   ;;  %5912 = vset.pattern.permute.xlu0 %v13412_v5  ;;  %v6243_v7 = vand.u32 127, %v88_v6  ;;  %v95_v8 = vld [vmem:[%s13403_s1] sm:$0xff] }
   0x3   :  { %36 = vst [vmem:[#allocation2] sm:$0xf0] %v6095_v2  ;;  %38 = vst [vmem:[#allocation2 + $0x10] sm:$0xf0] %v6095_v2  ;;  %84 = vrot.lane.b32.xlu1 %v6179_v0, %s6096_s0  ;;  %80 = vrot.lane.b32.xlu0 %v6184_v1, %s6096_s0  ;;  %s6100_s20 = smov 127   ;;  %s6101_s21 = smov 113   ;;  %v99_v14 = vcombine.high %v95_v8, %v95_v8 }
   0x4   :  { %39 = vst [vmem:[#allocation2 + $0x18] sm:$0xf0] %v6095_v2  ;;  %40 = vst [vmem:[#allocation2 + $0x20] sm:$0xf0] %v6095_v2  ;;  %s6102_s22 = smov 112   ;;  %s6103_s23 = smov 111  }
   0x5   :  { %42 = vst [vmem:[#allocation2 + $0x30] sm:$0xf0] %v6095_v2  ;;  %43 = vst [vmem:[#allocation2 + $0x38] sm:$0xf0] %v6095_v2  ;;  %v96_v9 = vld [vmem:[%s13403_s1 + $0x8] sm:$0xff]  ;;  %v5186_v12 = vld [vmem:[%s13403_s1 + $0x10] sm:$0xff] }
   0x6   :  { %44 = vst [vmem:[#allocation2 + $0x40] sm:$0xf0] %v6095_v2  ;;  %45 = vst [vmem:[#allocation2 + $0x48] sm:$0xf0] %v6095_v2  ;;  %vm90_vm0 = vcmp.lt.s32.totalorder %v6243_v7, 17  ;;  %v100_v13 = vcombine.high %v96_v9, %v96_v9  ;;  %vm119_vm1 = vcmp.lt.s32.totalorder %v6243_v7, 16  ;;  %v129_v17 = vcombine.high %v5186_v12, %v5186_v12 }
   0x7   :  { %46 = vst [vmem:[#allocation2 + $0x50] sm:$0xf0] %v6095_v2  ;;  %47 = vst [vmem:[#allocation2 + $0x58] sm:$0xf0] %v6095_v2  ;;  %86 = vrot.lane.b32.xlu1 %v77_v3, %s6096_s0  ;;  %82 = vrot.lane.b32.xlu0 %v76_v4, %s6096_s0  ;;  %v5187_v26 = vld [vmem:[%s13403_s1 + $0x18] sm:$0xff]  ;;  %v5188_v32 = vld [vmem:[%s13403_s1 + $0x20] sm:$0xff] }
   0x8   :  { %48 = vst [vmem:[#allocation2 + $0x60] sm:$0xf0] %v6095_v2  ;;  %49 = vst [vmem:[#allocation2 + $0x68] sm:$0xf0] %v6095_v2  ;;  %v130_v31 = vcombine.high %v5187_v26, %v5187_v26  ;;  %vm149_vm2 = vcmp.lt.s32.totalorder %v6243_v7, 15  ;;  %v159_v41 = vcombine.high %v5188_v32, %v5188_v32  ;;  %v5189_v42 = vld [vmem:[%s13403_s1 + $0x28] sm:$0xff] }
   0x9   :  { %50 = vst [vmem:[#allocation2 + $0x70] sm:$0xf0] %v6095_v2  ;;  %51 = vst [vmem:[#allocation2 + $0x78] sm:$0xf0] %v6095_v2  ;;  %v160_v47 = vcombine.high %v5189_v42, %v5189_v42  ;;  %v5190_v50 = vld [vmem:[%s13403_s1 + $0x30] sm:$0xff]  ;;  %vm179_vm3 = vcmp.lt.s32.totalorder %v6243_v7, 1 }
   0xa   :  { %52 = vst [vmem:[#allocation2 + $0x80] sm:$0xf0] %v6095_v2  ;;  %53 = vst [vmem:[#allocation2 + $0x88] sm:$0xf0] %v6095_v2  ;;  %v5191_v57 = vld [vmem:[%s13403_s1 + $0x38] sm:$0xff]  ;;  %v189_v61 = vcombine.high %v5190_v50, %v5190_v50  ;;  %vm213_vm4 = vcmp.lt.s32.totalorder %v6243_v7, 127 }
   0xb   :  { %54 = vst [vmem:[#allocation2 + $0x90] sm:$0xf0] %v6095_v2  ;;  %55 = vst [vmem:[#allocation2 + $0x98] sm:$0xf0] %v6095_v2  ;;  %113 = vrot.lane.b32.xlu1 %v76_v4, %s6097_s17  ;;  %111 = vrot.lane.b32.xlu0 %v6184_v1, %s6097_s17  ;;  %vm243_vm5 = vcmp.lt.s32.totalorder %v6243_v7, 113  ;;  %vm273_vm6 = vcmp.lt.s32.totalorder %v6243_v7, 112 }
   0xc   :  { %56 = vst [vmem:[#allocation2 + $0xa0] sm:$0xf0] %v6095_v2  ;;  %57 = vst [vmem:[#allocation2 + $0xa8] sm:$0xf0] %v6095_v2  ;;  %vm13579_vm7 = vcmp.lt.s32.totalorder %v6243_v7, 111  ;;  %vm13577_vm9 = vcmask 588800  }
   0xd   :  { %58 = vst [vmem:[#allocation2 + $0xb0] sm:$0xf0] %v6095_v2  ;;  %59 = vst [vmem:[#allocation2 + $0xb8] sm:$0xf0] %v6095_v2  ;;  %s13555_s14 = smov 33   ;;  %s13551_s15 = smov 32  }
   0xe   :  { %60 = vst [vmem:[#allocation2 + $0xc0] sm:$0xf0] %v6095_v2  ;;  %61 = vst [vmem:[#allocation2 + $0xc8] sm:$0xf0] %v6095_v2  ;;  %s13549_s16 = smov 31   ;;  %s13546_s24 = smov 30  }
   0xf   :  { %62 = vst [vmem:[#allocation2 + $0xd0] sm:$0xf0] %v6095_v2  ;;  %63 = vst [vmem:[#allocation2 + $0xd8] sm:$0xf0] %v6095_v2  ;;  %117 = vrot.lane.b32.xlu1 %v77_v3, %s6097_s17  ;;  %115 = vrot.lane.b32.xlu0 %v6179_v0, %s6097_s17  ;;  %s13544_s25 = smov 18   ;;  %s6111_s26 = smov 14  }
  0x10   :  { %64 = vst [vmem:[#allocation2 + $0xe0] sm:$0xf0] %v6095_v2  ;;  %65 = vst [vmem:[#allocation2 + $0xe8] sm:$0xf0] %v6095_v2  ;;  %s6112_s27 = smov 2   ;;  %s13541_s28 = smov 126  }
  0x11   :  { %66 = vst [vmem:[#allocation2 + $0xf0] sm:$0xf0] %v6095_v2  ;;  %67 = vst [vmem:[#allocation2 + $0xf8] sm:$0xf0] %v6095_v2  ;;  %s13539_s29 = smov 114   ;;  %s6115_s30 = smov 110  }
  0x12   :  { %68 = vst [vmem:[#allocation2 + $0x100] sm:$0xf0] %v6095_v2  ;;  %69 = vst [vmem:[#allocation2 + $0x108] sm:$0xf0] %v6095_v2  ;;  %s6116_s11 = smov 98   ;;  %s6117_s13 = smov 97  }
  0x13   :  { %70 = vst [vmem:[#allocation2 + $0x110] sm:$0xf0] %v6095_v2  ;;  %71 = vst [vmem:[#allocation2 + $0x118] sm:$0xf0] %v6095_v2  ;;  %143 = vrot.lane.b32.xlu1 %v76_v4, %s6098_s18  ;;  %141 = vrot.lane.b32.xlu0 %v6184_v1, %s6098_s18 }
  0x14   :  { %203 = vst [vmem:[#allocation2 + $0x90] sm:$0xf] %v6179_v0  ;;  %201 = vst [vmem:[#allocation2 + $0x80] sm:$0xf] %v6184_v1 }
  0x15   :  { %204 = vst [vmem:[#allocation2 + $0x98] sm:$0xf] %v77_v3  ;;  %202 = vst [vmem:[#allocation2 + $0x88] sm:$0xf] %v76_v4 }
  0x17   :  { %147 = vrot.lane.b32.xlu1 %v77_v3, %s6098_s18  ;;  %145 = vrot.lane.b32.xlu0 %v6179_v0, %s6098_s18 }
  0x1b   :  { %173 = vrot.lane.b32.xlu1 %v76_v4, %s6099_s19  ;;  %171 = vrot.lane.b32.xlu0 %v6184_v1, %s6099_s19 }
  0x1f   :  { %177 = vrot.lane.b32.xlu1 %v77_v3, %s6099_s19  ;;  %175 = vrot.lane.b32.xlu0 %v6179_v0, %s6099_s19 }
  0x23   :  { %207 = vrot.lane.b32.xlu1 %v76_v4, %s6100_s20  ;;  %205 = vrot.lane.b32.xlu0 %v6184_v1, %s6100_s20 }
  0x27   :  { %211 = vrot.lane.b32.xlu1 %v77_v3, %s6100_s20  ;;  %209 = vrot.lane.b32.xlu0 %v6179_v0, %s6100_s20 }
  0x2b   :  { %237 = vrot.lane.b32.xlu1 %v76_v4, %s6101_s21  ;;  %235 = vrot.lane.b32.xlu0 %v6184_v1, %s6101_s21 }
  0x2f   :  { %241 = vrot.lane.b32.xlu1 %v77_v3, %s6101_s21  ;;  %239 = vrot.lane.b32.xlu0 %v6179_v0, %s6101_s21 }
  0x33   :  { %267 = vrot.lane.b32.xlu1 %v76_v4, %s6102_s22  ;;  %265 = vrot.lane.b32.xlu0 %v6184_v1, %s6102_s22 }
  0x37   :  { %271 = vrot.lane.b32.xlu1 %v77_v3, %s6102_s22  ;;  %269 = vrot.lane.b32.xlu0 %v6179_v0, %s6102_s22 }
  0x3b   :  { %297 = vrot.lane.b32.xlu1 %v76_v4, %s6103_s23  ;;  %295 = vrot.lane.b32.xlu0 %v6184_v1, %s6103_s23 }
  0x3f   :  { %301 = vrot.lane.b32.xlu1 %v77_v3, %s6103_s23  ;;  %299 = vrot.lane.b32.xlu0 %v6179_v0, %s6103_s23 }
  0x75   :  { %v85_v10 = vpop.permute.xlu1 %84  ;;  %v81_v11 = vpop.permute.xlu0 %80 }
  0x79   :  { %v87_v15 = vpop.permute.xlu1 %86  ;;  %v83_v16 = vpop.permute.xlu0 %82 }
  0x7a   :  { %v91_v18 = vsel %vm90_vm0, %v85_v10, %v87_v15  ;;  %v94_v19 = vsel %vm90_vm0, %v87_v15, %v81_v11  ;;  %v92_v20 = vsel %vm90_vm0, %v83_v16, %v85_v10  ;;  %v93_v21 = vsel %vm90_vm0, %v81_v11, %v83_v16 }
  0x7b   :  { %v103_v22 = vmul.f32 %v95_v8, %v94_v19  ;;  %v106_v23 = vmul.f32 %v100_v13, %v91_v18  ;;  %v104_v24 = vmul.f32 %v99_v14, %v93_v21  ;;  %v105_v25 = vmul.f32 %v96_v9, %v92_v20 }
  0x7c   :  { %v190_v15 = vcombine.high %v5191_v57, %v5191_v57 }
  0x7d   :  { %107 = vst [vmem:[#allocation2] sm:$0xf] %v103_v22  ;;  %110 = vst [vmem:[#allocation2 + $0x18] sm:$0xf] %v106_v23  ;;  %v114_v27 = vpop.permute.xlu1 %113  ;;  %v112_v28 = vpop.permute.xlu0 %111 }
  0x7e   :  { %108 = vst [vmem:[#allocation2 + $0x8] sm:$0xf] %v104_v24  ;;  %109 = vst [vmem:[#allocation2 + $0x10] sm:$0xf] %v105_v25  ;;  %v122_v29 = vsel %vm119_vm1, %v112_v28, %v114_v27  ;;  %v5192_v24 = vld [vmem:[%s13403_s1 + $0x50] sm:$0xff]  ;;  %v5193_v25 = vld [vmem:[%s13403_s1 + $0x58] sm:$0xff] }
  0x7f   :  { %v134_v30 = vmul.f32 %v129_v17, %v122_v29 }
  0x81   :  { %138 = vst [vmem:[#allocation2 + $0x28] sm:$0xf] %v134_v30  ;;  %v118_v33 = vpop.permute.xlu1 %117  ;;  %v116_v34 = vpop.permute.xlu0 %115  ;;  %v224_v30 = vcombine.high %v5193_v25, %v5193_v25 }
  0x82   :  { %v123_v35 = vsel %vm119_vm1, %v118_v33, %v112_v28  ;;  %v120_v36 = vsel %vm119_vm1, %v116_v34, %v118_v33  ;;  %v121_v37 = vsel %vm119_vm1, %v114_v27, %v116_v34 }
  0x83   :  { %v133_v38 = vmul.f32 %v5186_v12, %v123_v35  ;;  %v135_v39 = vmul.f32 %v5187_v26, %v121_v37  ;;  %v136_v40 = vmul.f32 %v130_v31, %v120_v36  ;;  %v223_v31 = vcombine.high %v5192_v24, %v5192_v24 }
  0x84   :  { %v328_v62 = vld [vmem:[#allocation2] sm:$0xff]  ;;  %v331_v63 = vld [vmem:[#allocation2 + $0x18] sm:$0xff] }
  0x85   :  { %137 = vst [vmem:[#allocation2 + $0x20] sm:$0xf] %v133_v38  ;;  %139 = vst [vmem:[#allocation2 + $0x30] sm:$0xf] %v135_v39  ;;  %v144_v43 = vpop.permute.xlu1 %143  ;;  %v142_v44 = vpop.permute.xlu0 %141  ;;  %v329_v48 = vld [vmem:[#allocation2 + $0x8] sm:$0xff]  ;;  %v330_v2 = vld [vmem:[#allocation2 + $0x10] sm:$0xff] }
  0x86   :  { %140 = vst [vmem:[#allocation2 + $0x38] sm:$0xf] %v136_v40  ;;  %v152_v45 = vsel %vm149_vm2, %v142_v44, %v144_v43  ;;  %v5194_v40 = vld [vmem:[%s13403_s1 + $0x60] sm:$0xff] }
  0x87   :  { %v164_v46 = vmul.f32 %v159_v41, %v152_v45  ;;  %v5195_v41 = vld [vmem:[%s13403_s1 + $0x68] sm:$0xff] }
  0x88   :  { %v333_v49 = vld [vmem:[#allocation2 + $0x28] sm:$0xff] }
  0x89   :  { %168 = vst [vmem:[#allocation2 + $0x48] sm:$0xf] %v164_v46  ;;  %v148_v51 = vpop.permute.xlu1 %147  ;;  %v146_v52 = vpop.permute.xlu0 %145  ;;  %v365_v53 = vpack.c.bf16 %v333_v49, %v329_v48 }
  0x8a   :  { %v153_v54 = vsel %vm149_vm2, %v148_v51, %v142_v44  ;;  %v150_v55 = vsel %vm149_vm2, %v146_v52, %v148_v51  ;;  %v151_v56 = vsel %vm149_vm2, %v144_v43, %v146_v52 }
  0x8b   :  { %v163_v58 = vmul.f32 %v5188_v32, %v153_v54  ;;  %v165_v59 = vmul.f32 %v5189_v42, %v151_v56  ;;  %v166_v60 = vmul.f32 %v160_v47, %v150_v55  ;;  %412 = vmatprep.subr.bf16.mxu0 %v365_v53 }
  0x8c   :  { %v332_v3 = vld [vmem:[#allocation2 + $0x20] sm:$0xff]  ;;  %v334_v6 = vld [vmem:[#allocation2 + $0x30] sm:$0xff] }
  0x8d   :  { %v335_v4 = vld [vmem:[#allocation2 + $0x38] sm:$0xff]  ;;  %167 = vst [vmem:[#allocation2 + $0x40] sm:$0xf] %v163_v58  ;;  %169 = vst [vmem:[#allocation2 + $0x50] sm:$0xf] %v165_v59  ;;  %v174_v8 = vpop.permute.xlu1 %173  ;;  %v172_v9 = vpop.permute.xlu0 %171  ;;  %v364_v10 = vpack.c.bf16 %v332_v3, %v328_v62  ;;  %v366_v12 = vpack.c.bf16 %v334_v6, %v330_v2  ;;  %v254_v58 = vcombine.high %v5195_v41, %v5195_v41  ;;  %v344_v62 = vld [vmem:[#allocation2 + $0x80] sm:$0xff] }
  0x8e   :  { %170 = vst [vmem:[#allocation2 + $0x58] sm:$0xf] %v166_v60  ;;  %v367_v11 = vpack.c.bf16 %v335_v4, %v331_v63  ;;  %v182_v13 = vsel %vm179_vm3, %v172_v9, %v174_v8  ;;  %v253_v59 = vcombine.high %v5194_v40, %v5194_v40  ;;  %v345_v4 = vld [vmem:[#allocation2 + $0x88] sm:$0xff]  ;;  %v347_v6 = vld [vmem:[#allocation2 + $0x98] sm:$0xff] }
  0x8f   :  { %v194_v14 = vmul.f32 %v189_v61, %v182_v13  ;;  %413 = vmatpush1.bf16.msra.mxu0 %v364_v10 }
  0x90   :  { %463 = vmatprep.subr.bf16.mxu1 %v367_v11  ;;  %v337_v32 = vld [vmem:[#allocation2 + $0x48] sm:$0xff] }
  0x91   :  { %464 = vmatpush1.bf16.msra.mxu1 %v366_v12  ;;  %198 = vst [vmem:[#allocation2 + $0x68] sm:$0xf] %v194_v14  ;;  %v178_v16 = vpop.permute.xlu1 %177  ;;  %v176_v17 = vpop.permute.xlu0 %175  ;;  %v5196_v12 = vld [vmem:[%s13403_s1 + $0x70] sm:$0xff]  ;;  %v5197_v14 = vld [vmem:[%s13403_s1 + $0x78] sm:$0xff] }
  0x92   :  { %v183_v18 = vsel %vm179_vm3, %v178_v16, %v172_v9  ;;  %v180_v19 = vsel %vm179_vm3, %v176_v17, %v178_v16  ;;  %v181_v20 = vsel %vm179_vm3, %v174_v8, %v176_v17  ;;  %v346_v8 = vld [vmem:[#allocation2 + $0x90] sm:$0xff] }
  0x93   :  { %v193_v21 = vmul.f32 %v5190_v50, %v183_v18  ;;  %v195_v22 = vmul.f32 %v5191_v57, %v181_v20  ;;  %v196_v23 = vmul.f32 %v190_v15, %v180_v19 }
  0x94   :  { %v336_v45 = vld [vmem:[#allocation2 + $0x40] sm:$0xff]  ;;  %v338_v47 = vld [vmem:[#allocation2 + $0x50] sm:$0xff] }
  0x95   :  { %197 = vst [vmem:[#allocation2 + $0x60] sm:$0xf] %v193_v21  ;;  %199 = vst [vmem:[#allocation2 + $0x70] sm:$0xf] %v195_v22  ;;  %v208_v26 = vpop.permute.xlu1 %207  ;;  %v206_v27 = vpop.permute.xlu0 %205  ;;  %v339_v46 = vld [vmem:[#allocation2 + $0x58] sm:$0xff] }
  0x96   :  { %200 = vst [vmem:[#allocation2 + $0x78] sm:$0xf] %v196_v23  ;;  %v216_v28 = vsel %vm213_vm4, %v206_v27, %v208_v26 }
  0x97   :  { %v227_v29 = vmul.f32 %v5192_v24, %v216_v28 }
  0x98   :  { %v341_v33 = vld [vmem:[#allocation2 + $0x68] sm:$0xff] }
  0x99   :  { %231 = vst [vmem:[#allocation2 + $0xa0] sm:$0xf] %v227_v29  ;;  %v212_v34 = vpop.permute.xlu1 %211  ;;  %v210_v35 = vpop.permute.xlu0 %209  ;;  %v369_v36 = vpack.c.bf16 %v341_v33, %v337_v32 }
  0x9a   :  { %v217_v37 = vsel %vm213_vm4, %v212_v34, %v206_v27  ;;  %v214_v38 = vsel %vm213_vm4, %v210_v35, %v212_v34  ;;  %v215_v39 = vsel %vm213_vm4, %v208_v26, %v210_v35  ;;  %v284_v26 = vcombine.high %v5197_v14, %v5197_v14 }
  0x9b   :  { %v230_v42 = vmul.f32 %v224_v30, %v217_v37  ;;  %v228_v43 = vmul.f32 %v223_v31, %v215_v39  ;;  %v229_v44 = vmul.f32 %v5193_v25, %v214_v38  ;;  %414 = vmatprep.subr.bf16.mxu0 %v369_v36  ;;  %v283_v27 = vcombine.high %v5196_v12, %v5196_v12  ;;  %v5198_v36 = vld [vmem:[%s13403_s1 + $0x80] sm:$0xff]  ;;  %v5199_v37 = vld [vmem:[%s13403_s1 + $0x88] sm:$0xff] }
  0x9c   :  { %v340_v48 = vld [vmem:[#allocation2 + $0x60] sm:$0xff]  ;;  %v342_v50 = vld [vmem:[#allocation2 + $0x70] sm:$0xff] }
  0x9d   :  { %v343_v49 = vld [vmem:[#allocation2 + $0x78] sm:$0xff]  ;;  %234 = vst [vmem:[#allocation2 + $0xb8] sm:$0xf] %v230_v42  ;;  %232 = vst [vmem:[#allocation2 + $0xa8] sm:$0xf] %v228_v43  ;;  %v238_v51 = vpop.permute.xlu1 %237  ;;  %v236_v52 = vpop.permute.xlu0 %235  ;;  %v368_v53 = vpack.c.bf16 %v340_v48, %v336_v45  ;;  %v370_v55 = vpack.c.bf16 %v342_v50, %v338_v47  ;;  %v314_v42 = vcombine.high %v5199_v37, %v5199_v37 }
  0x9e   :  { %233 = vst [vmem:[#allocation2 + $0xb0] sm:$0xf] %v229_v44  ;;  %v371_v54 = vpack.c.bf16 %v343_v49, %v339_v46  ;;  %v246_v56 = vsel %vm243_vm5, %v236_v52, %v238_v51  ;;  %v313_v43 = vcombine.high %v5198_v36, %v5198_v36 }
  0x9f   :  { %v257_v57 = vmul.f32 %v5194_v40, %v246_v56  ;;  %415 = vmatpush1.bf16.msra.mxu0 %v368_v53 }
  0xa0   :  { %465 = vmatprep.subr.bf16.mxu1 %v371_v54  ;;  %v348_v13 = vld [vmem:[#allocation2 + $0xa0] sm:$0xff] }
  0xa1   :  { %466 = vmatpush1.bf16.msra.mxu1 %v370_v55  ;;  %261 = vst [vmem:[#allocation2 + $0xc0] sm:$0xf] %v257_v57  ;;  %v242_v60 = vpop.permute.xlu1 %241  ;;  %v240_v61 = vpop.permute.xlu0 %239  ;;  %v372_v24 = vpack.c.bf16 %v348_v13, %v344_v62 }
  0xa2   :  { %v247_v63 = vsel %vm243_vm5, %v242_v60, %v236_v52  ;;  %v244_v2 = vsel %vm243_vm5, %v240_v61, %v242_v60  ;;  %v245_v3 = vsel %vm243_vm5, %v238_v51, %v240_v61 }
  0xa3   :  { %v260_v9 = vmul.f32 %v254_v58, %v247_v63  ;;  %v258_v10 = vmul.f32 %v253_v59, %v245_v3  ;;  %v259_v11 = vmul.f32 %v5195_v41, %v244_v2 }
  0xa4   :  { %v349_v15 = vld [vmem:[#allocation2 + $0xa8] sm:$0xff]  ;;  %v351_v16 = vld [vmem:[#allocation2 + $0xb8] sm:$0xff] }
  0xa5   :  { %v350_v17 = vld [vmem:[#allocation2 + $0xb0] sm:$0xff]  ;;  %264 = vst [vmem:[#allocation2 + $0xd8] sm:$0xf] %v260_v9  ;;  %262 = vst [vmem:[#allocation2 + $0xc8] sm:$0xf] %v258_v10  ;;  %v268_v18 = vpop.permute.xlu1 %267  ;;  %v266_v19 = vpop.permute.xlu0 %265  ;;  %v373_v20 = vpack.c.bf16 %v349_v15, %v345_v4  ;;  %v375_v21 = vpack.c.bf16 %v351_v16, %v347_v6 }
  0xa6   :  { %263 = vst [vmem:[#allocation2 + $0xd0] sm:$0xf] %v259_v11  ;;  %v374_v22 = vpack.c.bf16 %v350_v17, %v346_v8  ;;  %v276_v23 = vsel %vm273_vm6, %v266_v19, %v268_v18  ;;  %v5932_v15 = vld [vmem:[%s13402_s2 + $0x8] ss:$0 sps:$4 sm:$0xff]  }
  0xa7   :  { %v287_v25 = vmul.f32 %v5196_v12, %v276_v23  ;;  %416 = vmatprep.subr.bf16.mxu0 %v373_v20  ;;  %467 = vmatprep.subr.bf16.mxu1 %v375_v21 }
  0xa8   :  { %417 = vmatpush1.bf16.msra.mxu0 %v372_v24  ;;  %468 = vmatpush1.bf16.msra.mxu1 %v374_v22  ;;  %v352_v61 = vld [vmem:[#allocation2 + $0xc0] sm:$0xff] }
  0xa9   :  { %291 = vst [vmem:[#allocation2 + $0xe0] sm:$0xf] %v287_v25  ;;  %v272_v28 = vpop.permute.xlu1 %271  ;;  %v270_v29 = vpop.permute.xlu0 %269 }
  0xaa   :  { %v277_v30 = vsel %vm273_vm6, %v272_v28, %v266_v19  ;;  %v274_v31 = vsel %vm273_vm6, %v270_v29, %v272_v28  ;;  %v275_v32 = vsel %vm273_vm6, %v268_v18, %v270_v29 }
  0xab   :  { %v290_v33 = vmul.f32 %v284_v26, %v277_v30  ;;  %v288_v34 = vmul.f32 %v283_v27, %v275_v32  ;;  %v289_v35 = vmul.f32 %v5197_v14, %v274_v31  ;;  %v5931_v14 = vld [vmem:[%s13402_s2] sm:$0xff]   ;;  %s6105_s2 = smov 34  }
  0xac   :  { %v353_v49 = vld [vmem:[#allocation2 + $0xc8] sm:$0xff]  ;;  %v355_v53 = vld [vmem:[#allocation2 + $0xd8] sm:$0xff] }
  0xad   :  { %294 = vst [vmem:[#allocation2 + $0xf8] sm:$0xf] %v290_v33  ;;  %292 = vst [vmem:[#allocation2 + $0xe8] sm:$0xf] %v288_v34  ;;  %v298_v38 = vpop.permute.xlu1 %297  ;;  %v296_v39 = vpop.permute.xlu0 %295  ;;  %v354_v55 = vld [vmem:[#allocation2 + $0xd0] sm:$0xff] }
  0xae   :  { %293 = vst [vmem:[#allocation2 + $0xf0] sm:$0xf] %v289_v35  ;;  %v306_v40 = vsel %vm13579_vm7, %v296_v39, %v298_v38 }
  0xaf   :  { %v317_v41 = vmul.f32 %v5198_v36, %v306_v40 }
  0xb0   :  { %v356_v54 = vld [vmem:[#allocation2 + $0xe0] sm:$0xff] }
  0xb1   :  { %321 = vst [vmem:[#allocation2 + $0x100] sm:$0xf] %v317_v41  ;;  %v302_v44 = vpop.permute.xlu1 %301  ;;  %v300_v45 = vpop.permute.xlu0 %299  ;;  %v376_v63 = vpack.c.bf16 %v356_v54, %v352_v61 }
  0xb2   :  { %v307_v46 = vsel %vm13579_vm7, %v302_v44, %v296_v39  ;;  %v304_v47 = vsel %vm13579_vm7, %v300_v45, %v302_v44  ;;  %v305_v48 = vsel %vm13579_vm7, %v298_v38, %v300_v45  ;;  %vm13637_vm7 = vcmp.lt.s32.totalorder %v6243_v7, 126 }
  0xb3   :  { %v320_v50 = vmul.f32 %v314_v42, %v307_v46  ;;  %v318_v51 = vmul.f32 %v313_v43, %v305_v48  ;;  %v319_v52 = vmul.f32 %v5199_v37, %v304_v47 }
  0xb4   :  { %v357_v56 = vld [vmem:[#allocation2 + $0xe8] sm:$0xff]  ;;  %v359_v57 = vld [vmem:[#allocation2 + $0xf8] sm:$0xff] }
  0xb5   :  { %v358_v58 = vld [vmem:[#allocation2 + $0xf0] sm:$0xff]  ;;  %324 = vst [vmem:[#allocation2 + $0x118] sm:$0xf] %v320_v50  ;;  %322 = vst [vmem:[#allocation2 + $0x108] sm:$0xf] %v318_v51  ;;  %v377_v59 = vpack.c.bf16 %v357_v56, %v353_v49  ;;  %v379_v60 = vpack.c.bf16 %v359_v57, %v355_v53 }
  0xb6   :  { %323 = vst [vmem:[#allocation2 + $0x110] sm:$0xf] %v319_v52  ;;  %v378_v62 = vpack.c.bf16 %v358_v58, %v354_v55 }
  0xb7   :  { %418 = vmatprep.subr.bf16.mxu0 %v377_v59  ;;  %469 = vmatprep.subr.bf16.mxu1 %v379_v60 }
  0xb8   :  { %419 = vmatpush1.bf16.msra.mxu0 %v376_v63  ;;  %470 = vmatpush1.bf16.msra.mxu1 %v378_v62  ;;  %v360_v2 = vld [vmem:[#allocation2 + $0x100] sm:$0xff] }
  0xb9   :  { %v380_v3 = vpack.c.bf16 %v360_v2, %v360_v2 }
  0xbb   :  { %v401_v12 = vsel %vm13578_vm8, %v380_v3, 0 }
  0xbc   :  { %v361_v4 = vld [vmem:[#allocation2 + $0x108] sm:$0xff]  ;;  %v363_v6 = vld [vmem:[#allocation2 + $0x118] sm:$0xff] }
  0xbd   :  { %v362_v8 = vld [vmem:[#allocation2 + $0x110] sm:$0xff]  ;;  %v381_v9 = vpack.c.bf16 %v361_v4, %v361_v4  ;;  %v383_v10 = vpack.c.bf16 %v363_v6, %v363_v6 }
  0xbe   :  { %v382_v11 = vpack.c.bf16 %v362_v8, %v362_v8 }
  0xbf   :  { %5202 = vmatprep.subr.msk.bf16.mxu0 %vm13578_vm8, %v381_v9  ;;  %5205 = vmatprep.subr.msk.bf16.mxu1 %vm13578_vm8, %v383_v10 }
  0xc0   :  { %v407_v13 = vsel %vm13578_vm8, %v382_v11, 0  ;;  %421 = vmatpush1.bf16.msra.mxu0 %v401_v12  ;;  %vm13638_vm8 = vcmp.lt.s32.totalorder %v6243_v7, 2 }
  0xc1   :  { %472 = vmatpush1.bf16.msra.mxu1 %v407_v13 }
  0xc3   :  { %5203 = vmatmul.mubr.msk.bf16.vlgmr.msra.gmra.mrb[0].mxu0 %vm13577_vm9, %v5931_v14 }
  0xc4   :  { %5206 = vmatmul.mubr.msk.bf16.vlgmr.msra.gmra.mrb[0].mxu1 %vm13577_vm9, %v5931_v14  ;;  %454 = vmatprep.mubr.bf16.mxu0 %v13412_v5 }
  0xc5   :  { %505 = vmatprep.mubr.bf16.mxu1 %v13412_v5 }
  0xcb   :  { %5204 = vmatmul.mubr.msk.bf16.gmra.mrb[4].mxu0 %vm13577_vm9, %v5932_v15 }
  0xcc   :  { %5207 = vmatmul.mubr.msk.bf16.gmra.mrb[4].mxu1 %vm13577_vm9, %v5932_v15  ;;  %2585 = vmatprep.mubr.bf16.mxu0 %v13412_v5  ;;  %vm13639_vm9 = vcmp.lt.s32.totalorder %v6243_v7, 14 }
  0xcd   :  { %2626 = vmatprep.mubr.bf16.mxu1 %v13412_v5 }
 0x196   :  { %v446_v16 = vpop.f32.mrb[0].mxu0 }
 0x197   :  { %v497_v17 = vpop.f32.mrb[0].mxu1  ;;  %v526_v18 = vmin.f32 %v446_v16, 0.0  ;;  %v448_v20 = vpop.f32.mrb[1].mxu0  ;;  %vm514_vm10 = vcmp.gt.f32.partialorder %v446_v16, 0.0 }
 0x198   :  { %v528_v19 = vmin.f32 %v497_v17, 0.0  ;;  %v499_v21 = vpop.f32.mrb[1].mxu1  ;;  %v527_v22 = vmin.f32 %v448_v20, 0.0  ;;  %v6383_v24 = vpop.f32.mrb[2].mxu0  ;;  %vm515_vm11 = vcmp.gt.f32.partialorder %v448_v20, 0.0  ;;  %vm516_vm12 = vcmp.gt.f32.partialorder %v497_v17, 0.0 }
 0x199   :  { %v529_v23 = vmin.f32 %v499_v21, 0.0  ;;  %v6385_v25 = vpop.f32.mrb[2].mxu1  ;;  %v538_v26 = vmul.f32 1.442695, %v526_v18  ;;  %v6387_v30 = vpop.f32.mrb[3].mxu0  ;;  %vm517_vm13 = vcmp.gt.f32.partialorder %v499_v21, 0.0 }
 0x19a   :  { %v542_v27 = vmul.f32 1.442695, %v528_v19  ;;  %v540_v28 = vmul.f32 1.442695, %v527_v22  ;;  %v6389_v31 = vpop.f32.mrb[3].mxu1  ;;  %v530_v44 = vmin.f32 %v6383_v24, 0.0 }
 0x19b   :  { %v544_v29 = vmul.f32 1.442695, %v529_v23  ;;  %5951 = vpow2.f32 %v538_v26  ;;  %v532_v46 = vmin.f32 %v6385_v25, 0.0  ;;  %vm518_vm14 = vcmp.gt.f32.partialorder %v6383_v24, 0.0 }
 0x19c   :  { %5953 = vpow2.f32 %v542_v27  ;;  %v546_v45 = vmul.f32 1.442695, %v530_v44  ;;  %vm520_vm15 = vcmp.gt.f32.partialorder %v6385_v25, 0.0  ;;  %v533_v15 = vmin.f32 %v6389_v31, 0.0 }
 0x19d   :  { %5955 = vpow2.f32 %v540_v28  ;;  %v550_v47 = vmul.f32 1.442695, %v532_v46  ;;  %v531_v18 = vmin.f32 %v6387_v30, 0.0 }
 0x19e   :  { %5957 = vpow2.f32 %v544_v29  ;;  %v6471_v54 = vpop.f32.mrb[4].mxu0  ;;  %v552_v19 = vmul.f32 1.442695, %v533_v15 }
 0x19f   :  { %5959 = vpow2.f32 %v546_v45  ;;  %v6473_v55 = vpop.f32.mrb[5].mxu0  ;;  %v6477_v56 = vpop.f32.mrb[4].mxu1  ;;  %v548_v22 = vmul.f32 1.442695, %v531_v18 }
 0x1a0   :  { %5961 = vpow2.f32 %v550_v47  ;;  %v460_v57 = vpop.f32.mrb[6].mxu0  ;;  %v6481_v59 = vpop.f32.mrb[5].mxu1 }
 0x1a1   :  { %v461_v58 = vpop.f32.mrb[7].mxu0  ;;  %v511_v60 = vpop.f32.mrb[6].mxu1  ;;  %5963 = vpow2.f32 %v552_v19  ;;  %v534_v19 = vmin.f32 %v6471_v54, 0.0  ;;  %v537_v1 = vmin.f32 %v6481_v59, 0.0 }
 0x1a2   :  { %v512_v61 = vpop.f32.mrb[7].mxu1  ;;  %5965 = vpow2.f32 %v548_v22 }
 0x1a5   :  { %v5952_v32 = vpop.eup %5951 }
 0x1a6   :  { %v5954_v33 = vpop.eup %5953  ;;  %v5208_v34 = vadd.f32 -1.0, %v5952_v32 }
 0x1a7   :  { %v5956_v35 = vpop.eup %5955  ;;  %v5210_v38 = vadd.f32 -1.0, %v5954_v33 }
 0x1a8   :  { %v5958_v36 = vpop.eup %5957  ;;  %v6391_v37 = vsel %vm514_vm10, %v446_v16, %v5208_v34  ;;  %v5209_v39 = vadd.f32 -1.0, %v5956_v35  ;;  %vm521_vm10 = vcmp.gt.f32.partialorder %v6389_v31, 0.0 }
 0x1a9   :  { %611 = vrot.lane.b32.xlu0 %v6391_v37, %s6105_s2  ;;  %v5211_v41 = vadd.f32 -1.0, %v5958_v36  ;;  %v6399_v42 = vsel %vm516_vm12, %v497_v17, %v5210_v38  ;;  %v5960_v48 = vpop.eup %5959  ;;  %vm522_vm12 = vcmp.gt.f32.partialorder %v6471_v54, 0.0 }
 0x1aa   :  { %v6395_v40 = vsel %vm515_vm11, %v448_v20, %v5209_v39  ;;  %v5212_v49 = vadd.f32 -1.0, %v5960_v48  ;;  %v5962_v50 = vpop.eup %5961  ;;  %vm519_vm11 = vcmp.gt.f32.partialorder %v6387_v30, 0.0 }
 0x1ab   :  { %617 = vrot.lane.b32.xlu1 %v6395_v40, %s6105_s2  ;;  %v6403_v43 = vsel %vm517_vm13, %v499_v21, %v5211_v41  ;;  %v5214_v52 = vadd.f32 -1.0, %v5962_v50  ;;  %v5964_v28 = vpop.eup %5963  ;;  %vm523_vm13 = vcmp.gt.f32.partialorder %v6473_v55, 0.0 }
 0x1ac   :  { %v6457_v51 = vsel %vm518_vm14, %v6383_v24, %v5212_v49  ;;  %v5215_v33 = vadd.f32 -1.0, %v5964_v28  ;;  %v5966_v34 = vpop.eup %5965  ;;  %v535_v28 = vmin.f32 %v6473_v55, 0.0  ;;  %vm524_vm14 = vcmp.gt.f32.partialorder %v6477_v56, 0.0 }
 0x1ad   :  { %623 = vrot.lane.b32.xlu0 %v6399_v42, %s6105_s2  ;;  %v6465_v53 = vsel %vm520_vm15, %v6385_v25, %v5214_v52  ;;  %v5213_v38 = vadd.f32 -1.0, %v5966_v34  ;;  %v554_v34 = vmul.f32 1.442695, %v534_v19  ;;  %vm525_vm15 = vcmp.gt.f32.partialorder %v6481_v59, 0.0 }
 0x1ae   :  { %v6639_v39 = vsel %vm521_vm10, %v6389_v31, %v5215_v33  ;;  %v556_v0 = vmul.f32 1.442695, %v535_v28  ;;  %vm635_vm10 = vcmp.lt.s32.totalorder %v6243_v7, 34 }
 0x1af   :  { %629 = vrot.lane.b32.xlu1 %v6403_v43, %s6105_s2  ;;  %13813 = vst [vmem:[#allocation5_spill] sm:$0xff] %v6639_v39  ;;  %v6651_v45 = vsel %vm519_vm11, %v6387_v30, %v5213_v38  ;;  %v536_v38 = vmin.f32 %v6477_v56, 0.0  ;;  %5967 = vpow2.f32 %v554_v34  ;;  %vm708_vm11 = vcmp.lt.s32.totalorder %v6243_v7, 33 }
 0x1b0   :  { %5969 = vpow2.f32 %v556_v0 }
 0x1b1   :  { %684 = vrot.lane.b32.xlu0 %v6391_v37, %s13555_s14 }
 0x1b3   :  { %690 = vrot.lane.b32.xlu1 %v6395_v40, %s13555_s14 }
 0x1b5   :  { %696 = vrot.lane.b32.xlu0 %v6399_v42, %s13555_s14 }
 0x1b7   :  { %702 = vrot.lane.b32.xlu1 %v6403_v43, %s13555_s14 }
 0x1b9   :  { %758 = vrot.lane.b32.xlu0 %v6391_v37, %s13551_s15 }
 0x1bb   :  { %764 = vrot.lane.b32.xlu1 %v6395_v40, %s13551_s15 }
 0x1bd   :  { %770 = vrot.lane.b32.xlu0 %v6399_v42, %s13551_s15 }
 0x1bf   :  { %776 = vrot.lane.b32.xlu1 %v6403_v43, %s13551_s15 }
 0x1c1   :  { %832 = vrot.lane.b32.xlu0 %v6391_v37, %s13549_s16 }
 0x1c3   :  { %838 = vrot.lane.b32.xlu1 %v6395_v40, %s13549_s16 }
 0x1c5   :  { %844 = vrot.lane.b32.xlu0 %v6399_v42, %s13549_s16 }
 0x1c7   :  { %850 = vrot.lane.b32.xlu1 %v6403_v43, %s13549_s16 }
 0x1c9   :  { %906 = vrot.lane.b32.xlu0 %v6391_v37, %s13546_s24 }
 0x1cb   :  { %912 = vrot.lane.b32.xlu1 %v6395_v40, %s13546_s24 }
 0x1cd   :  { %918 = vrot.lane.b32.xlu0 %v6399_v42, %s13546_s24 }
 0x1cf   :  { %924 = vrot.lane.b32.xlu1 %v6403_v43, %s13546_s24 }
 0x1d1   :  { %980 = vrot.lane.b32.xlu0 %v6391_v37, %s13544_s25 }
 0x1d3   :  { %986 = vrot.lane.b32.xlu1 %v6395_v40, %s13544_s25 }
 0x1d5   :  { %992 = vrot.lane.b32.xlu0 %v6399_v42, %s13544_s25 }
 0x1d7   :  { %998 = vrot.lane.b32.xlu1 %v6403_v43, %s13544_s25 }
 0x1d9   :  { %1054 = vrot.lane.b32.xlu0 %v6391_v37, %s6096_s0 }
 0x1db   :  { %1060 = vrot.lane.b32.xlu1 %v6395_v40, %s6096_s0 }
 0x1dd   :  { %1066 = vrot.lane.b32.xlu0 %v6399_v42, %s6096_s0 }
 0x1df   :  { %613 = vrot.lane.b32.xlu1 %v6457_v51, %s6105_s2 }
 0x1e1   :  { %1127 = vrot.lane.b32.xlu0 %v6391_v37, %s6097_s17 }
 0x1e3   :  { %625 = vrot.lane.b32.xlu1 %v6465_v53, %s6105_s2 }
 0x1e5   :  { %1139 = vrot.lane.b32.xlu0 %v6399_v42, %s6097_s17 }
 0x1e7   :  { %686 = vrot.lane.b32.xlu1 %v6457_v51, %s13555_s14 }
 0x1e9   :  { %1200 = vrot.lane.b32.xlu0 %v6391_v37, %s6098_s18 }
 0x1eb   :  { %698 = vrot.lane.b32.xlu1 %v6465_v53, %s13555_s14 }
 0x1ed   :  { %1212 = vrot.lane.b32.xlu0 %v6399_v42, %s6098_s18 }
 0x1ef   :  { %760 = vrot.lane.b32.xlu1 %v6457_v51, %s13551_s15 }
 0x1f1   :  { %1273 = vrot.lane.b32.xlu0 %v6391_v37, %s6111_s26 }
 0x1f3   :  { %772 = vrot.lane.b32.xlu1 %v6465_v53, %s13551_s15 }
 0x1f5   :  { %1285 = vrot.lane.b32.xlu0 %v6399_v42, %s6111_s26 }
 0x1f7   :  { %834 = vrot.lane.b32.xlu1 %v6457_v51, %s13549_s16 }
 0x1f9   :  { %1347 = vrot.lane.b32.xlu0 %v6391_v37, %s6112_s27 }
 0x1fb   :  { %846 = vrot.lane.b32.xlu1 %v6465_v53, %s13549_s16 }
 0x1fd   :  { %1359 = vrot.lane.b32.xlu0 %v6399_v42, %s6112_s27 }
 0x1ff   :  { %908 = vrot.lane.b32.xlu1 %v6457_v51, %s13546_s24 }
 0x201   :  { %1421 = vrot.lane.b32.xlu0 %v6391_v37, %s6099_s19 }
 0x203   :  { %920 = vrot.lane.b32.xlu1 %v6465_v53, %s13546_s24 }
 0x205   :  { %1433 = vrot.lane.b32.xlu0 %v6399_v42, %s6099_s19 }
 0x207   :  { %982 = vrot.lane.b32.xlu1 %v6457_v51, %s13544_s25 }
 0x209   :  { %1494 = vrot.lane.b32.xlu0 %v6391_v37, %s6100_s20 }
 0x20b   :  { %994 = vrot.lane.b32.xlu1 %v6465_v53, %s13544_s25 }
 0x20d   :  { %1506 = vrot.lane.b32.xlu0 %v6399_v42, %s6100_s20 }
 0x20f   :  { %1056 = vrot.lane.b32.xlu1 %v6457_v51, %s6096_s0 }
 0x211   :  { %1567 = vrot.lane.b32.xlu0 %v6391_v37, %s13541_s28 }
 0x213   :  { %1068 = vrot.lane.b32.xlu1 %v6465_v53, %s6096_s0 }
 0x215   :  { %1579 = vrot.lane.b32.xlu0 %v6399_v42, %s13541_s28 }
 0x217   :  { %1129 = vrot.lane.b32.xlu1 %v6457_v51, %s6097_s17 }
 0x219   :  { %1072 = vrot.lane.b32.xlu0 %v6403_v43, %s6096_s0 }
 0x21b   :  { %1141 = vrot.lane.b32.xlu1 %v6465_v53, %s6097_s17  ;;  %v6533_v62 = vpop.permute.xlu0 %611 }
 0x21d   :  { %v6535_v63 = vpop.permute.xlu1 %617  ;;  %1133 = vrot.lane.b32.xlu0 %v6395_v40, %s6097_s17 }
 0x21f   :  { %1202 = vrot.lane.b32.xlu1 %v6457_v51, %s6098_s18  ;;  %v6541_v2 = vpop.permute.xlu0 %623 }
 0x221   :  { %v6543_v3 = vpop.permute.xlu1 %629  ;;  %1145 = vrot.lane.b32.xlu0 %v6403_v43, %s6097_s17 }
 0x223   :  { %1214 = vrot.lane.b32.xlu1 %v6465_v53, %s6098_s18  ;;  %v6549_v4 = vpop.permute.xlu0 %684 }
 0x225   :  { %v6551_v6 = vpop.permute.xlu1 %690  ;;  %1206 = vrot.lane.b32.xlu0 %v6395_v40, %s6098_s18 }
 0x227   :  { %1275 = vrot.lane.b32.xlu1 %v6457_v51, %s6111_s26  ;;  %v6557_v8 = vpop.permute.xlu0 %696 }
 0x229   :  { %v6559_v9 = vpop.permute.xlu1 %702  ;;  %1218 = vrot.lane.b32.xlu0 %v6403_v43, %s6098_s18 }
 0x22b   :  { %1287 = vrot.lane.b32.xlu1 %v6465_v53, %s6111_s26  ;;  %v6565_v10 = vpop.permute.xlu0 %758 }
 0x22d   :  { %v6567_v11 = vpop.permute.xlu1 %764  ;;  %1279 = vrot.lane.b32.xlu0 %v6395_v40, %s6111_s26 }
 0x22f   :  { %1349 = vrot.lane.b32.xlu1 %v6457_v51, %s6112_s27  ;;  %v6573_v12 = vpop.permute.xlu0 %770 }
 0x231   :  { %v6575_v13 = vpop.permute.xlu1 %776  ;;  %1291 = vrot.lane.b32.xlu0 %v6403_v43, %s6111_s26 }
 0x233   :  { %1361 = vrot.lane.b32.xlu1 %v6465_v53, %s6112_s27  ;;  %v6581_v14 = vpop.permute.xlu0 %832 }
 0x235   :  { %v6584_v16 = vpop.permute.xlu1 %838  ;;  %1353 = vrot.lane.b32.xlu0 %v6395_v40, %s6112_s27 }
 0x237   :  { %1423 = vrot.lane.b32.xlu1 %v6457_v51, %s6099_s19  ;;  %v6590_v17 = vpop.permute.xlu0 %844 }
 0x239   :  { %v6593_v20 = vpop.permute.xlu1 %850  ;;  %1365 = vrot.lane.b32.xlu0 %v6403_v43, %s6112_s27 }
 0x23b   :  { %1435 = vrot.lane.b32.xlu1 %v6465_v53, %s6099_s19  ;;  %v6599_v21 = vpop.permute.xlu0 %906 }
 0x23d   :  { %v6601_v23 = vpop.permute.xlu1 %912  ;;  %1427 = vrot.lane.b32.xlu0 %v6395_v40, %s6099_s19 }
 0x23f   :  { %1496 = vrot.lane.b32.xlu1 %v6457_v51, %s6100_s20  ;;  %v6607_v24 = vpop.permute.xlu0 %918 }
 0x241   :  { %v6609_v25 = vpop.permute.xlu1 %924  ;;  %1439 = vrot.lane.b32.xlu0 %v6403_v43, %s6099_s19 }
 0x243   :  { %1508 = vrot.lane.b32.xlu1 %v6465_v53, %s6100_s20  ;;  %v6615_v26 = vpop.permute.xlu0 %980 }
 0x245   :  { %v6617_v27 = vpop.permute.xlu1 %986  ;;  %1500 = vrot.lane.b32.xlu0 %v6395_v40, %s6100_s20 }
 0x247   :  { %1569 = vrot.lane.b32.xlu1 %v6457_v51, %s13541_s28  ;;  %v6623_v29 = vpop.permute.xlu0 %992 }
 0x249   :  { %v6625_v32 = vpop.permute.xlu1 %998  ;;  %1512 = vrot.lane.b32.xlu0 %v6403_v43, %s6100_s20 }
 0x24b   :  { %1581 = vrot.lane.b32.xlu1 %v6465_v53, %s13541_s28  ;;  %v6631_v35 = vpop.permute.xlu0 %1054 }
 0x24d   :  { %v6634_v36 = vpop.permute.xlu1 %1060  ;;  %1573 = vrot.lane.b32.xlu0 %v6395_v40, %s13541_s28 }
 0x24f   :  { %1074 = vrot.lane.b32.xlu1 %v6639_v39, %s6096_s0  ;;  %v6643_v41 = vpop.permute.xlu0 %1066 }
 0x251   :  { %v6646_v44 = vpop.permute.xlu1 %613  ;;  %1585 = vrot.lane.b32.xlu0 %v6403_v43, %s13541_s28 }
 0x252   :  { %13814 = vst [vmem:[#allocation6_spill] sm:$0xff] %v6646_v44 }
 0x253   :  { %1135 = vrot.lane.b32.xlu1 %v6651_v45, %s6097_s17  ;;  %v6655_v31 = vpop.permute.xlu0 %1127 }
 0x255   :  { %v6657_v46 = vpop.permute.xlu1 %625  ;;  %619 = vrot.lane.b32.xlu0 %v6651_v45, %s6105_s2 }
 0x256   :  { %13815 = vst [vmem:[#allocation7_spill] sm:$0xff] %v6657_v46 }
 0x257   :  { %1147 = vrot.lane.b32.xlu1 %v6639_v39, %s6097_s17  ;;  %v6663_v47 = vpop.permute.xlu0 %1139 }
 0x259   :  { %v6665_v48 = vpop.permute.xlu1 %686  ;;  %631 = vrot.lane.b32.xlu0 %v6639_v39, %s6105_s2 }
 0x25a   :  { %13816 = vst [vmem:[#allocation8_spill] sm:$0xff] %v6665_v48 }
 0x25b   :  { %1208 = vrot.lane.b32.xlu1 %v6651_v45, %s6098_s18  ;;  %v6671_v30 = vpop.permute.xlu0 %1200 }
 0x25c   :  { %13817 = vst [vmem:[#allocation9_spill] sm:$0xff] %v6671_v30  ;;  %v651_v30 = vld [vmem:[%s13404_s3 + $0x18] sm:$0xff] }
 0x25d   :  { %v6673_v49 = vpop.permute.xlu1 %698  ;;  %692 = vrot.lane.b32.xlu0 %v6651_v45, %s13555_s14 }
 0x25e   :  { %13818 = vst [vmem:[#allocation10_spill] sm:$0xff] %v6673_v49 }
 0x25f   :  { %1220 = vrot.lane.b32.xlu1 %v6639_v39, %s6098_s18  ;;  %v6679_v50 = vpop.permute.xlu0 %1212 }
 0x260   :  { %13819 = vst [vmem:[#allocation11_spill] sm:$0xff] %v6679_v50 }
 0x261   :  { %v6681_v52 = vpop.permute.xlu1 %760  ;;  %704 = vrot.lane.b32.xlu0 %v6639_v39, %s13555_s14 }
 0x262   :  { %13820 = vst [vmem:[#allocation12_spill] sm:$0xff] %v6681_v52 }
 0x263   :  { %1281 = vrot.lane.b32.xlu1 %v6651_v45, %s6111_s26  ;;  %v6687_v57 = vpop.permute.xlu0 %1273 }
 0x264   :  { %13821 = vst [vmem:[#allocation13_spill] sm:$0xff] %v6687_v57  ;;  %v639_v57 = vsel %vm635_vm10, %v6535_v63, %v6541_v2 }
 0x265   :  { %v6689_v58 = vpop.permute.xlu1 %772  ;;  %766 = vrot.lane.b32.xlu0 %v6651_v45, %s13551_s15 }
 0x266   :  { %13822 = vst [vmem:[#allocation14_spill] sm:$0xff] %v6689_v58 }
 0x267   :  { %1293 = vrot.lane.b32.xlu1 %v6639_v39, %s6111_s26  ;;  %v6695_v60 = vpop.permute.xlu0 %1285 }
 0x268   :  { %13823 = vst [vmem:[#allocation15_spill] sm:$0xff] %v6695_v60 }
 0x269   :  { %v6697_v61 = vpop.permute.xlu1 %834  ;;  %778 = vrot.lane.b32.xlu0 %v6639_v39, %s13551_s15 }
 0x26a   :  { %13824 = vst [vmem:[#allocation16_spill] sm:$0xff] %v6697_v61  ;;  %v560_v61 = vmul.f32 1.442695, %v537_v1  ;;  %v5968_v1 = vpop.eup %5967 }
 0x26b   :  { %1355 = vrot.lane.b32.xlu1 %v6651_v45, %s6112_s27  ;;  %v6703_v15 = vpop.permute.xlu0 %1347 }
 0x26c   :  { %13825 = vst [vmem:[#allocation17_spill] sm:$0xff] %v6703_v15  ;;  %v5225_v15 = vld [vmem:[%s13404_s3 + $0x4a8] sm:$0xff] }
 0x26d   :  { %v6705_v18 = vpop.permute.xlu1 %846  ;;  %840 = vrot.lane.b32.xlu0 %v6651_v45, %s13549_s16 }
 0x26e   :  { %13826 = vst [vmem:[#allocation18_spill] sm:$0xff] %v6705_v18 }
 0x26f   :  { %1367 = vrot.lane.b32.xlu1 %v6639_v39, %s6112_s27  ;;  %v6712_v22 = vpop.permute.xlu0 %1359 }
 0x270   :  { %13827 = vst [vmem:[#allocation19_spill] sm:$0xff] %v6712_v22  ;;  %v649_v22 = vld [vmem:[%s13404_s3 + $0x8] sm:$0xff] }
 0x271   :  { %v6715_v33 = vpop.permute.xlu1 %908  ;;  %852 = vrot.lane.b32.xlu0 %v6639_v39, %s13549_s16 }
 0x272   :  { %13828 = vst [vmem:[#allocation20_spill] sm:$0xff] %v6715_v33  ;;  %v558_v33 = vmul.f32 1.442695, %v536_v38 }
 0x273   :  { %1429 = vrot.lane.b32.xlu1 %v6651_v45, %s6099_s19  ;;  %v6722_v5 = vpop.permute.xlu0 %1421 }
 0x274   :  { %13829 = vst [vmem:[#allocation21_spill] sm:$0xff] %v6722_v5  ;;  %5971 = vpow2.f32 %v558_v33  ;;  %v5970_v33 = vpop.eup %5969 }
 0x275   :  { %v6725_v18 = vpop.permute.xlu1 %920  ;;  %914 = vrot.lane.b32.xlu0 %v6651_v45, %s13546_s24  ;;  %5973 = vpow2.f32 %v560_v61  ;;  %v5217_v52 = vadd.f32 -1.0, %v5970_v33 }
 0x276   :  { %13830 = vst [vmem:[#allocation22_spill] sm:$0xff] %v6725_v18 }
 0x277   :  { %1441 = vrot.lane.b32.xlu1 %v6639_v39, %s6099_s19  ;;  %v6731_v19 = vpop.permute.xlu0 %1433  ;;  %v6776_v33 = vsel %vm523_vm13, %v6473_v55, %v5217_v52  ;;  %vm13654_vm13 = vcmp.lt.s32.totalorder %v6243_v7, 31 }
 0x278   :  { %13831 = vst [vmem:[#allocation23_spill] sm:$0xff] %v6731_v19 }
 0x279   :  { %v6733_v58 = vpop.permute.xlu1 %982  ;;  %926 = vrot.lane.b32.xlu0 %v6639_v39, %s13546_s24 }
 0x27a   :  { %13832 = vst [vmem:[#allocation24_spill] sm:$0xff] %v6733_v58 }
 0x27b   :  { %1502 = vrot.lane.b32.xlu1 %v6651_v45, %s6100_s20  ;;  %v6739_v28 = vpop.permute.xlu0 %1494 }
 0x27c   :  { %13833 = vst [vmem:[#allocation25_spill] sm:$0xff] %v6739_v28 }
 0x27d   :  { %v6741_v34 = vpop.permute.xlu1 %994  ;;  %988 = vrot.lane.b32.xlu0 %v6651_v45, %s13544_s25 }
 0x27e   :  { %13834 = vst [vmem:[#allocation26_spill] sm:$0xff] %v6741_v34  ;;  %v5216_v34 = vadd.f32 -1.0, %v5968_v1  ;;  %v5972_v58 = vpop.eup %5971 }
 0x27f   :  { %1514 = vrot.lane.b32.xlu1 %v6639_v39, %s6100_s20  ;;  %v6747_v0 = vpop.permute.xlu0 %1506  ;;  %v5974_v49 = vpop.eup %5973  ;;  %v5218_v1 = vadd.f32 -1.0, %v5972_v58 }
 0x280   :  { %13835 = vst [vmem:[#allocation27_spill] sm:$0xff] %v6747_v0  ;;  %v6768_v46 = vsel %vm522_vm12, %v6471_v54, %v5216_v34  ;;  %vm782_vm12 = vcmp.lt.s32.totalorder %v6243_v7, 32 }
 0x281   :  { %v6749_v38 = vpop.permute.xlu1 %1056  ;;  %1000 = vrot.lane.b32.xlu0 %v6639_v39, %s13544_s25  ;;  %v6784_v54 = vsel %vm524_vm14, %v6477_v56, %v5218_v1  ;;  %vm13640_vm14 = vcmp.lt.s32.totalorder %v6243_v7, 30 }
 0x282   :  { %13836 = vst [vmem:[#allocation28_spill] sm:$0xff] %v6749_v38 }
 0x283   :  { %1575 = vrot.lane.b32.xlu1 %v6651_v45, %s13541_s28  ;;  %v6755_v61 = vpop.permute.xlu0 %1567 }
 0x284   :  { %13837 = vst [vmem:[#allocation29_spill] sm:$0xff] %v6755_v61 }
 0x285   :  { %v6758_v18 = vpop.permute.xlu1 %1068  ;;  %1062 = vrot.lane.b32.xlu0 %v6651_v45, %s6096_s0 }
 0x286   :  { %13838 = vst [vmem:[#allocation30_spill] sm:$0xff] %v6758_v18  ;;  %v5219_v18 = vadd.f32 -1.0, %v5974_v49 }
 0x287   :  { %1587 = vrot.lane.b32.xlu1 %v6639_v39, %s13541_s28  ;;  %v6765_v48 = vpop.permute.xlu0 %1579 }
 0x288   :  { %13839 = vst [vmem:[#allocation31_spill] sm:$0xff] %v6765_v48  ;;  %v6791_v34 = vsel %vm525_vm15, %v6481_v59, %v5219_v18  ;;  %vm13620_vm15 = vcmp.lt.s32.totalorder %v6243_v7, 18 }
 0x289   :  { %v6771_v38 = vpop.permute.xlu1 %1129  ;;  %615 = vrot.lane.b32.xlu0 %v6768_v46, %s6105_s2 }
 0x28a   :  { %13840 = vst [vmem:[#allocation32_spill] sm:$0xff] %v6771_v38 }
 0x28b   :  { %621 = vrot.lane.b32.xlu1 %v6776_v33, %s6105_s2  ;;  %v6781_v44 = vpop.permute.xlu0 %1072 }
 0x28d   :  { %v6786_v58 = vpop.permute.xlu1 %1141  ;;  %627 = vrot.lane.b32.xlu0 %v6784_v54, %s6105_s2 }
 0x28e   :  { %13841 = vst [vmem:[#allocation33_spill] sm:$0xff] %v6786_v58 }
 0x28f   :  { %633 = vrot.lane.b32.xlu1 %v6791_v34, %s6105_s2  ;;  %v6795_v55 = vpop.permute.xlu0 %1133 }
 0x291   :  { %v6797_v49 = vpop.permute.xlu1 %1202  ;;  %688 = vrot.lane.b32.xlu0 %v6768_v46, %s13555_s14 }
 0x292   :  { %13842 = vst [vmem:[#allocation34_spill] sm:$0xff] %v6797_v49 }
 0x293   :  { %694 = vrot.lane.b32.xlu1 %v6776_v33, %s13555_s14  ;;  %v6803_v56 = vpop.permute.xlu0 %1145 }
 0x295   :  { %v6805_v52 = vpop.permute.xlu1 %1214  ;;  %700 = vrot.lane.b32.xlu0 %v6784_v54, %s13555_s14 }
 0x296   :  { %13843 = vst [vmem:[#allocation35_spill] sm:$0xff] %v6805_v52 }
 0x297   :  { %706 = vrot.lane.b32.xlu1 %v6791_v34, %s13555_s14  ;;  %v6811_v59 = vpop.permute.xlu0 %1206  ;;  %s14277_s14 = smov 126  }
 0x298   :  { %13844 = vst [vmem:[#allocation36_spill] sm:$0xff] %v6811_v59 }
 0x299   :  { %v6813_v18 = vpop.permute.xlu1 %1275  ;;  %762 = vrot.lane.b32.xlu0 %v6768_v46, %s13551_s15 }
 0x29a   :  { %13845 = vst [vmem:[#allocation37_spill] sm:$0xff] %v6813_v18 }
 0x29b   :  { %768 = vrot.lane.b32.xlu1 %v6776_v33, %s13551_s15  ;;  %v6819_v1 = vpop.permute.xlu0 %1218 }
 0x29c   :  { %13846 = vst [vmem:[#allocation38_spill] sm:$0xff] %v6819_v1  ;;  %v5227_v1 = vld [vmem:[%s13404_s3 + $0x4b8] sm:$0xff] }
 0x29d   :  { %v6821_v49 = vpop.permute.xlu1 %1287  ;;  %774 = vrot.lane.b32.xlu0 %v6784_v54, %s13551_s15 }
 0x29e   :  { %13847 = vst [vmem:[#allocation39_spill] sm:$0xff] %v6821_v49 }
 0x29f   :  { %780 = vrot.lane.b32.xlu1 %v6791_v34, %s13551_s15  ;;  %v6827_v52 = vpop.permute.xlu0 %1279  ;;  %s14283_s15 = smov 96  }
 0x2a0   :  { %13848 = vst [vmem:[#allocation40_spill] sm:$0xff] %v6827_v52 }
 0x2a1   :  { %v6829_v38 = vpop.permute.xlu1 %1349  ;;  %836 = vrot.lane.b32.xlu0 %v6768_v46, %s13549_s16 }
 0x2a2   :  { %13849 = vst [vmem:[#allocation41_spill] sm:$0xff] %v6829_v38 }
 0x2a3   :  { %842 = vrot.lane.b32.xlu1 %v6776_v33, %s13549_s16  ;;  %v6835_v18 = vpop.permute.xlu0 %1291 }
 0x2a4   :  { %13850 = vst [vmem:[#allocation42_spill] sm:$0xff] %v6835_v18 }
 0x2a5   :  { %v6837_v58 = vpop.permute.xlu1 %1361  ;;  %848 = vrot.lane.b32.xlu0 %v6784_v54, %s13549_s16 }
 0x2a6   :  { %13851 = vst [vmem:[#allocation43_spill] sm:$0xff] %v6837_v58 }
 0x2a7   :  { %854 = vrot.lane.b32.xlu1 %v6791_v34, %s13549_s16  ;;  %v6843_v49 = vpop.permute.xlu0 %1353 }
 0x2a8   :  { %13852 = vst [vmem:[#allocation44_spill] sm:$0xff] %v6843_v49 }
 0x2a9   :  { %v6845_v48 = vpop.permute.xlu1 %1423  ;;  %910 = vrot.lane.b32.xlu0 %v6768_v46, %s13546_s24 }
 0x2aa   :  { %13853 = vst [vmem:[#allocation45_spill] sm:$0xff] %v6845_v48 }
 0x2ab   :  { %916 = vrot.lane.b32.xlu1 %v6776_v33, %s13546_s24  ;;  %v6851_v38 = vpop.permute.xlu0 %1365 }
 0x2ac   :  { %13854 = vst [vmem:[#allocation46_spill] sm:$0xff] %v6851_v38 }
 0x2ad   :  { %v6853_v61 = vpop.permute.xlu1 %1435  ;;  %922 = vrot.lane.b32.xlu0 %v6784_v54, %s13546_s24 }
 0x2ae   :  { %13855 = vst [vmem:[#allocation47_spill] sm:$0xff] %v6853_v61 }
 0x2af   :  { %928 = vrot.lane.b32.xlu1 %v6791_v34, %s13546_s24  ;;  %v6859_v58 = vpop.permute.xlu0 %1427  ;;  %s13648_s24 = smov 94  }
 0x2b0   :  { %13856 = vst [vmem:[#allocation48_spill] sm:$0xff] %v6859_v58  ;;  %v5224_v58 = vld [vmem:[%s13404_s3 + $0x4a0] sm:$0xff] }
 0x2b1   :  { %v6861_v28 = vpop.permute.xlu1 %1496  ;;  %984 = vrot.lane.b32.xlu0 %v6768_v46, %s13544_s25 }
 0x2b2   :  { %13857 = vst [vmem:[#allocation49_spill] sm:$0xff] %v6861_v28 }
 0x2b3   :  { %990 = vrot.lane.b32.xlu1 %v6776_v33, %s13544_s25  ;;  %v6867_v48 = vpop.permute.xlu0 %1439 }
 0x2b4   :  { %13858 = vst [vmem:[#allocation50_spill] sm:$0xff] %v6867_v48 }
 0x2b5   :  { %v6869_v0 = vpop.permute.xlu1 %1508  ;;  %996 = vrot.lane.b32.xlu0 %v6784_v54, %s13544_s25 }
 0x2b6   :  { %13859 = vst [vmem:[#allocation51_spill] sm:$0xff] %v6869_v0 }
 0x2b7   :  { %1002 = vrot.lane.b32.xlu1 %v6791_v34, %s13544_s25  ;;  %v6875_v61 = vpop.permute.xlu0 %1500  ;;  %s6119_s25 = smov 95  }
 0x2b8   :  { %13860 = vst [vmem:[#allocation52_spill] sm:$0xff] %v6875_v61 }
 0x2b9   :  { %v6877_v19 = vpop.permute.xlu1 %1569  ;;  %1058 = vrot.lane.b32.xlu0 %v6768_v46, %s6096_s0 }
 0x2ba   :  { %13861 = vst [vmem:[#allocation53_spill] sm:$0xff] %v6877_v19 }
 0x2bb   :  { %1064 = vrot.lane.b32.xlu1 %v6776_v33, %s6096_s0  ;;  %v6883_v28 = vpop.permute.xlu0 %1512 }
 0x2bc   :  { %13862 = vst [vmem:[#allocation54_spill] sm:$0xff] %v6883_v28 }
 0x2bd   :  { %v6885_v48 = vpop.permute.xlu1 %1581  ;;  %1070 = vrot.lane.b32.xlu0 %v6784_v54, %s6096_s0 }
 0x2be   :  { %13863 = vst [vmem:[#allocation55_spill] sm:$0xff] %v6885_v48 }
 0x2bf   :  { %1076 = vrot.lane.b32.xlu1 %v6791_v34, %s6096_s0  ;;  %v6891_v0 = vpop.permute.xlu0 %1573 }
 0x2c0   :  { %13864 = vst [vmem:[#allocation56_spill] sm:$0xff] %v6891_v0 }
 0x2c1   :  { %v6893_v61 = vpop.permute.xlu1 %1074  ;;  %1131 = vrot.lane.b32.xlu0 %v6768_v46, %s6097_s17 }
 0x2c2   :  { %13865 = vst [vmem:[#allocation57_spill] sm:$0xff] %v6893_v61 }
 0x2c3   :  { %1137 = vrot.lane.b32.xlu1 %v6776_v33, %s6097_s17  ;;  %v6899_v19 = vpop.permute.xlu0 %1585 }
 0x2c4   :  { %13866 = vst [vmem:[#allocation58_spill] sm:$0xff] %v6899_v19 }
 0x2c5   :  { %v6901_v28 = vpop.permute.xlu1 %1135  ;;  %1143 = vrot.lane.b32.xlu0 %v6784_v54, %s6097_s17 }
 0x2c6   :  { %13867 = vst [vmem:[#allocation59_spill] sm:$0xff] %v6901_v28 }
 0x2c7   :  { %1149 = vrot.lane.b32.xlu1 %v6791_v34, %s6097_s17  ;;  %v6907_v48 = vpop.permute.xlu0 %619 }
 0x2c8   :  { %13868 = vst [vmem:[#allocation60_spill] sm:$0xff] %v6907_v48 }
 0x2c9   :  { %v6909_v0 = vpop.permute.xlu1 %1147  ;;  %1204 = vrot.lane.b32.xlu0 %v6768_v46, %s6098_s18 }
 0x2ca   :  { %13869 = vst [vmem:[#allocation61_spill] sm:$0xff] %v6909_v0 }
 0x2cb   :  { %1210 = vrot.lane.b32.xlu1 %v6776_v33, %s6098_s18  ;;  %v6915_v61 = vpop.permute.xlu0 %631 }
 0x2cc   :  { %13870 = vst [vmem:[#allocation62_spill] sm:$0xff] %v6915_v61 }
 0x2cd   :  { %v6917_v19 = vpop.permute.xlu1 %1208  ;;  %1216 = vrot.lane.b32.xlu0 %v6784_v54, %s6098_s18 }
 0x2ce   :  { %13871 = vst [vmem:[#allocation63_spill] sm:$0xff] %v6917_v19 }
 0x2cf   :  { %1222 = vrot.lane.b32.xlu1 %v6791_v34, %s6098_s18  ;;  %v6923_v28 = vpop.permute.xlu0 %692 }
 0x2d0   :  { %13872 = vst [vmem:[#allocation64_spill] sm:$0xff] %v6923_v28 }
 0x2d1   :  { %v6925_v48 = vpop.permute.xlu1 %1220  ;;  %1277 = vrot.lane.b32.xlu0 %v6768_v46, %s6111_s26 }
 0x2d2   :  { %13873 = vst [vmem:[#allocation65_spill] sm:$0xff] %v6925_v48 }
 0x2d3   :  { %1283 = vrot.lane.b32.xlu1 %v6776_v33, %s6111_s26  ;;  %v6931_v0 = vpop.permute.xlu0 %704 }
 0x2d4   :  { %13874 = vst [vmem:[#allocation66_spill] sm:$0xff] %v6931_v0 }
 0x2d5   :  { %v6933_v61 = vpop.permute.xlu1 %1281  ;;  %1289 = vrot.lane.b32.xlu0 %v6784_v54, %s6111_s26 }
 0x2d6   :  { %13875 = vst [vmem:[#allocation67_spill] sm:$0xff] %v6933_v61 }
 0x2d7   :  { %1295 = vrot.lane.b32.xlu1 %v6791_v34, %s6111_s26  ;;  %v6939_v19 = vpop.permute.xlu0 %766 }
 0x2d8   :  { %13876 = vst [vmem:[#allocation68_spill] sm:$0xff] %v6939_v19 }
 0x2d9   :  { %v6941_v28 = vpop.permute.xlu1 %1293  ;;  %1351 = vrot.lane.b32.xlu0 %v6768_v46, %s6112_s27 }
 0x2da   :  { %13877 = vst [vmem:[#allocation69_spill] sm:$0xff] %v6941_v28 }
 0x2db   :  { %1357 = vrot.lane.b32.xlu1 %v6776_v33, %s6112_s27  ;;  %v6947_v48 = vpop.permute.xlu0 %778 }
 0x2dc   :  { %13878 = vst [vmem:[#allocation70_spill] sm:$0xff] %v6947_v48 }
 0x2dd   :  { %v6949_v0 = vpop.permute.xlu1 %1355  ;;  %1363 = vrot.lane.b32.xlu0 %v6784_v54, %s6112_s27 }
 0x2de   :  { %13879 = vst [vmem:[#allocation71_spill] sm:$0xff] %v6949_v0 }
 0x2df   :  { %1369 = vrot.lane.b32.xlu1 %v6791_v34, %s6112_s27  ;;  %v6955_v61 = vpop.permute.xlu0 %840 }
 0x2e0   :  { %13880 = vst [vmem:[#allocation72_spill] sm:$0xff] %v6955_v61 }
 0x2e1   :  { %v6957_v19 = vpop.permute.xlu1 %1367  ;;  %1425 = vrot.lane.b32.xlu0 %v6768_v46, %s6099_s19 }
 0x2e2   :  { %13881 = vst [vmem:[#allocation73_spill] sm:$0xff] %v6957_v19 }
 0x2e3   :  { %1431 = vrot.lane.b32.xlu1 %v6776_v33, %s6099_s19  ;;  %v6963_v28 = vpop.permute.xlu0 %852 }
 0x2e4   :  { %13882 = vst [vmem:[#allocation74_spill] sm:$0xff] %v6963_v28 }
 0x2e5   :  { %v6965_v48 = vpop.permute.xlu1 %1429  ;;  %1437 = vrot.lane.b32.xlu0 %v6784_v54, %s6099_s19 }
 0x2e6   :  { %13883 = vst [vmem:[#allocation75_spill] sm:$0xff] %v6965_v48 }
 0x2e7   :  { %1443 = vrot.lane.b32.xlu1 %v6791_v34, %s6099_s19  ;;  %v6971_v0 = vpop.permute.xlu0 %914 }
 0x2e8   :  { %13884 = vst [vmem:[#allocation76_spill] sm:$0xff] %v6971_v0 }
 0x2e9   :  { %v6973_v61 = vpop.permute.xlu1 %1441  ;;  %1498 = vrot.lane.b32.xlu0 %v6768_v46, %s6100_s20 }
 0x2ea   :  { %13885 = vst [vmem:[#allocation77_spill] sm:$0xff] %v6973_v61 }
 0x2eb   :  { %1504 = vrot.lane.b32.xlu1 %v6776_v33, %s6100_s20  ;;  %v6979_v19 = vpop.permute.xlu0 %926 }
 0x2ec   :  { %13886 = vst [vmem:[#allocation78_spill] sm:$0xff] %v6979_v19 }
 0x2ed   :  { %v6981_v28 = vpop.permute.xlu1 %1502  ;;  %1510 = vrot.lane.b32.xlu0 %v6784_v54, %s6100_s20 }
 0x2ee   :  { %13887 = vst [vmem:[#allocation79_spill] sm:$0xff] %v6981_v28 }
 0x2ef   :  { %1516 = vrot.lane.b32.xlu1 %v6791_v34, %s6100_s20  ;;  %v6987_v48 = vpop.permute.xlu0 %988 }
 0x2f0   :  { %13888 = vst [vmem:[#allocation80_spill] sm:$0xff] %v6987_v48 }
 0x2f1   :  { %v6989_v0 = vpop.permute.xlu1 %1514  ;;  %1641 = vrot.lane.b32.xlu0 %v6391_v37, %s13539_s29 }
 0x2f2   :  { %13889 = vst [vmem:[#allocation81_spill] sm:$0xff] %v6989_v0 }
 0x2f3   :  { %1643 = vrot.lane.b32.xlu1 %v6457_v51, %s13539_s29  ;;  %v6995_v61 = vpop.permute.xlu0 %1000 }
 0x2f4   :  { %13890 = vst [vmem:[#allocation82_spill] sm:$0xff] %v6995_v61 }
 0x2f5   :  { %v6997_v28 = vpop.permute.xlu1 %1575  ;;  %1647 = vrot.lane.b32.xlu0 %v6395_v40, %s13539_s29 }
 0x2f6   :  { %13891 = vst [vmem:[#allocation83_spill] sm:$0xff] %v6997_v28 }
 0x2f7   :  { %1649 = vrot.lane.b32.xlu1 %v6651_v45, %s13539_s29  ;;  %v7003_v48 = vpop.permute.xlu0 %1062 }
 0x2f8   :  { %13892 = vst [vmem:[#allocation84_spill] sm:$0xff] %v7003_v48 }
 0x2f9   :  { %v7005_v0 = vpop.permute.xlu1 %1587  ;;  %1653 = vrot.lane.b32.xlu0 %v6399_v42, %s13539_s29 }
 0x2fa   :  { %13893 = vst [vmem:[#allocation85_spill] sm:$0xff] %v7005_v0 }
 0x2fb   :  { %1655 = vrot.lane.b32.xlu1 %v6465_v53, %s13539_s29  ;;  %v7011_v19 = vpop.permute.xlu0 %615 }
 0x2fc   :  { %13894 = vst [vmem:[#allocation86_spill] sm:$0xff] %v7011_v19 }
 0x2fd   :  { %v7013_v61 = vpop.permute.xlu1 %621  ;;  %1659 = vrot.lane.b32.xlu0 %v6403_v43, %s13539_s29 }
 0x2fe   :  { %13895 = vst [vmem:[#allocation87_spill] sm:$0xff] %v7013_v61 }
 0x2ff   :  { %1661 = vrot.lane.b32.xlu1 %v6639_v39, %s13539_s29  ;;  %v7019_v28 = vpop.permute.xlu0 %627 }
 0x300   :  { %13896 = vst [vmem:[#allocation88_spill] sm:$0xff] %v7019_v28 }
 0x301   :  { %v7021_v48 = vpop.permute.xlu1 %633  ;;  %1571 = vrot.lane.b32.xlu0 %v6768_v46, %s13541_s28 }
 0x302   :  { %13897 = vst [vmem:[#allocation89_spill] sm:$0xff] %v7021_v48 }
 0x303   :  { %1577 = vrot.lane.b32.xlu1 %v6776_v33, %s13541_s28  ;;  %v7027_v0 = vpop.permute.xlu0 %688 }
 0x304   :  { %13898 = vst [vmem:[#allocation90_spill] sm:$0xff] %v7027_v0 }
 0x305   :  { %v7029_v19 = vpop.permute.xlu1 %694  ;;  %1583 = vrot.lane.b32.xlu0 %v6784_v54, %s13541_s28 }
 0x306   :  { %13899 = vst [vmem:[#allocation91_spill] sm:$0xff] %v7029_v19 }
 0x307   :  { %1589 = vrot.lane.b32.xlu1 %v6791_v34, %s13541_s28  ;;  %v7035_v61 = vpop.permute.xlu0 %700  ;;  %s13606_s28 = smov 96  }
 0x308   :  { %13900 = vst [vmem:[#allocation92_spill] sm:$0xff] %v7035_v61 }
 0x309   :  { %v7037_v28 = vpop.permute.xlu1 %706  ;;  %1715 = vrot.lane.b32.xlu0 %v6391_v37, %s6101_s21 }
 0x30a   :  { %13901 = vst [vmem:[#allocation93_spill] sm:$0xff] %v7037_v28 }
 0x30b   :  { %1717 = vrot.lane.b32.xlu1 %v6457_v51, %s6101_s21  ;;  %v7043_v48 = vpop.permute.xlu0 %762 }
 0x30c   :  { %13902 = vst [vmem:[#allocation94_spill] sm:$0xff] %v7043_v48 }
 0x30d   :  { %v7045_v0 = vpop.permute.xlu1 %768  ;;  %1721 = vrot.lane.b32.xlu0 %v6395_v40, %s6101_s21 }
 0x30e   :  { %13903 = vst [vmem:[#allocation95_spill] sm:$0xff] %v7045_v0 }
 0x30f   :  { %1723 = vrot.lane.b32.xlu1 %v6651_v45, %s6101_s21  ;;  %v7051_v19 = vpop.permute.xlu0 %774 }
 0x310   :  { %13904 = vst [vmem:[#allocation96_spill] sm:$0xff] %v7051_v19 }
 0x311   :  { %v7053_v61 = vpop.permute.xlu1 %780  ;;  %1727 = vrot.lane.b32.xlu0 %v6399_v42, %s6101_s21 }
 0x312   :  { %13905 = vst [vmem:[#allocation97_spill] sm:$0xff] %v7053_v61 }
 0x313   :  { %1729 = vrot.lane.b32.xlu1 %v6465_v53, %s6101_s21  ;;  %v7059_v28 = vpop.permute.xlu0 %836 }
 0x314   :  { %13906 = vst [vmem:[#allocation98_spill] sm:$0xff] %v7059_v28 }
 0x315   :  { %v7061_v48 = vpop.permute.xlu1 %842  ;;  %1733 = vrot.lane.b32.xlu0 %v6403_v43, %s6101_s21 }
 0x316   :  { %13907 = vst [vmem:[#allocation99_spill] sm:$0xff] %v7061_v48 }
 0x317   :  { %1735 = vrot.lane.b32.xlu1 %v6639_v39, %s6101_s21  ;;  %v7067_v0 = vpop.permute.xlu0 %848 }
 0x318   :  { %13908 = vst [vmem:[#allocation100_spill] sm:$0xff] %v7067_v0 }
 0x319   :  { %v7069_v19 = vpop.permute.xlu1 %854  ;;  %1645 = vrot.lane.b32.xlu0 %v6768_v46, %s13539_s29 }
 0x31a   :  { %13909 = vst [vmem:[#allocation101_spill] sm:$0xff] %v7069_v19 }
 0x31b   :  { %1651 = vrot.lane.b32.xlu1 %v6776_v33, %s13539_s29  ;;  %v7075_v61 = vpop.permute.xlu0 %910 }
 0x31c   :  { %13910 = vst [vmem:[#allocation102_spill] sm:$0xff] %v7075_v61 }
 0x31d   :  { %v7077_v28 = vpop.permute.xlu1 %916  ;;  %1657 = vrot.lane.b32.xlu0 %v6784_v54, %s13539_s29 }
 0x31e   :  { %13911 = vst [vmem:[#allocation103_spill] sm:$0xff] %v7077_v28 }
 0x31f   :  { %1663 = vrot.lane.b32.xlu1 %v6791_v34, %s13539_s29  ;;  %v7083_v48 = vpop.permute.xlu0 %922  ;;  %s14272_s29 = smov 32  }
 0x320   :  { %13912 = vst [vmem:[#allocation104_spill] sm:$0xff] %v7083_v48 }
 0x321   :  { %v7085_v0 = vpop.permute.xlu1 %928  ;;  %1788 = vrot.lane.b32.xlu0 %v6391_v37, %s6102_s22 }
 0x322   :  { %13913 = vst [vmem:[#allocation105_spill] sm:$0xff] %v7085_v0 }
 0x323   :  { %1790 = vrot.lane.b32.xlu1 %v6457_v51, %s6102_s22  ;;  %v7091_v19 = vpop.permute.xlu0 %984 }
 0x324   :  { %13914 = vst [vmem:[#allocation106_spill] sm:$0xff] %v7091_v19 }
 0x325   :  { %v7093_v61 = vpop.permute.xlu1 %990  ;;  %1794 = vrot.lane.b32.xlu0 %v6395_v40, %s6102_s22 }
 0x326   :  { %13915 = vst [vmem:[#allocation107_spill] sm:$0xff] %v7093_v61 }
 0x327   :  { %1796 = vrot.lane.b32.xlu1 %v6651_v45, %s6102_s22  ;;  %v7099_v28 = vpop.permute.xlu0 %996 }
 0x328   :  { %13916 = vst [vmem:[#allocation108_spill] sm:$0xff] %v7099_v28 }
 0x329   :  { %v7101_v48 = vpop.permute.xlu1 %1002  ;;  %1800 = vrot.lane.b32.xlu0 %v6399_v42, %s6102_s22 }
 0x32a   :  { %13917 = vst [vmem:[#allocation109_spill] sm:$0xff] %v7101_v48 }
 0x32b   :  { %1802 = vrot.lane.b32.xlu1 %v6465_v53, %s6102_s22  ;;  %v7107_v0 = vpop.permute.xlu0 %1058 }
 0x32c   :  { %13918 = vst [vmem:[#allocation110_spill] sm:$0xff] %v7107_v0 }
 0x32d   :  { %v7109_v19 = vpop.permute.xlu1 %1064  ;;  %1806 = vrot.lane.b32.xlu0 %v6403_v43, %s6102_s22 }
 0x32e   :  { %13919 = vst [vmem:[#allocation111_spill] sm:$0xff] %v7109_v19 }
 0x32f   :  { %1808 = vrot.lane.b32.xlu1 %v6639_v39, %s6102_s22  ;;  %v7115_v61 = vpop.permute.xlu0 %1070 }
 0x330   :  { %13920 = vst [vmem:[#allocation112_spill] sm:$0xff] %v7115_v61 }
 0x331   :  { %v7117_v28 = vpop.permute.xlu1 %1076  ;;  %1719 = vrot.lane.b32.xlu0 %v6768_v46, %s6101_s21 }
 0x332   :  { %13921 = vst [vmem:[#allocation113_spill] sm:$0xff] %v7117_v28 }
 0x333   :  { %1725 = vrot.lane.b32.xlu1 %v6776_v33, %s6101_s21  ;;  %v7123_v48 = vpop.permute.xlu0 %1131 }
 0x334   :  { %13922 = vst [vmem:[#allocation114_spill] sm:$0xff] %v7123_v48 }
 0x335   :  { %v7125_v0 = vpop.permute.xlu1 %1137  ;;  %1731 = vrot.lane.b32.xlu0 %v6784_v54, %s6101_s21 }
 0x336   :  { %13923 = vst [vmem:[#allocation115_spill] sm:$0xff] %v7125_v0 }
 0x337   :  { %1737 = vrot.lane.b32.xlu1 %v6791_v34, %s6101_s21  ;;  %v7131_v19 = vpop.permute.xlu0 %1143 }
 0x338   :  { %13924 = vst [vmem:[#allocation116_spill] sm:$0xff] %v7131_v19 }
 0x339   :  { %v7133_v61 = vpop.permute.xlu1 %1149  ;;  %1861 = vrot.lane.b32.xlu0 %v6391_v37, %s6103_s23 }
 0x33a   :  { %13925 = vst [vmem:[#allocation117_spill] sm:$0xff] %v7133_v61 }
 0x33b   :  { %1863 = vrot.lane.b32.xlu1 %v6457_v51, %s6103_s23  ;;  %v7139_v28 = vpop.permute.xlu0 %1204 }
 0x33c   :  { %13926 = vst [vmem:[#allocation118_spill] sm:$0xff] %v7139_v28 }
 0x33d   :  { %v7141_v48 = vpop.permute.xlu1 %1210  ;;  %1867 = vrot.lane.b32.xlu0 %v6395_v40, %s6103_s23 }
 0x33e   :  { %13927 = vst [vmem:[#allocation119_spill] sm:$0xff] %v7141_v48 }
 0x33f   :  { %1869 = vrot.lane.b32.xlu1 %v6651_v45, %s6103_s23  ;;  %v7147_v0 = vpop.permute.xlu0 %1216 }
 0x340   :  { %13928 = vst [vmem:[#allocation120_spill] sm:$0xff] %v7147_v0 }
 0x341   :  { %v7149_v19 = vpop.permute.xlu1 %1222  ;;  %1873 = vrot.lane.b32.xlu0 %v6399_v42, %s6103_s23 }
 0x342   :  { %13929 = vst [vmem:[#allocation121_spill] sm:$0xff] %v7149_v19 }
 0x343   :  { %1875 = vrot.lane.b32.xlu1 %v6465_v53, %s6103_s23  ;;  %v7155_v61 = vpop.permute.xlu0 %1277 }
 0x344   :  { %13930 = vst [vmem:[#allocation122_spill] sm:$0xff] %v7155_v61 }
 0x345   :  { %v7157_v28 = vpop.permute.xlu1 %1283  ;;  %1879 = vrot.lane.b32.xlu0 %v6403_v43, %s6103_s23 }
 0x346   :  { %13931 = vst [vmem:[#allocation123_spill] sm:$0xff] %v7157_v28 }
 0x347   :  { %1881 = vrot.lane.b32.xlu1 %v6639_v39, %s6103_s23  ;;  %v7163_v48 = vpop.permute.xlu0 %1289 }
 0x348   :  { %13932 = vst [vmem:[#allocation124_spill] sm:$0xff] %v7163_v48 }
 0x349   :  { %v7165_v0 = vpop.permute.xlu1 %1295  ;;  %1792 = vrot.lane.b32.xlu0 %v6768_v46, %s6102_s22 }
 0x34a   :  { %13933 = vst [vmem:[#allocation125_spill] sm:$0xff] %v7165_v0 }
 0x34b   :  { %1798 = vrot.lane.b32.xlu1 %v6776_v33, %s6102_s22  ;;  %v7171_v19 = vpop.permute.xlu0 %1351 }
 0x34c   :  { %13934 = vst [vmem:[#allocation126_spill] sm:$0xff] %v7171_v19 }
 0x34d   :  { %v7173_v61 = vpop.permute.xlu1 %1357  ;;  %1804 = vrot.lane.b32.xlu0 %v6784_v54, %s6102_s22 }
 0x34e   :  { %13935 = vst [vmem:[#allocation127_spill] sm:$0xff] %v7173_v61 }
 0x34f   :  { %1810 = vrot.lane.b32.xlu1 %v6791_v34, %s6102_s22  ;;  %v7179_v28 = vpop.permute.xlu0 %1363 }
 0x350   :  { %13936 = vst [vmem:[#allocation128_spill] sm:$0xff] %v7179_v28 }
 0x351   :  { %v7181_v48 = vpop.permute.xlu1 %1369  ;;  %1934 = vrot.lane.b32.xlu0 %v6391_v37, %s6115_s30 }
 0x352   :  { %13937 = vst [vmem:[#allocation129_spill] sm:$0xff] %v7181_v48 }
 0x353   :  { %1936 = vrot.lane.b32.xlu1 %v6457_v51, %s6115_s30  ;;  %v7187_v19 = vpop.permute.xlu0 %1425 }
 0x354   :  { %13938 = vst [vmem:[#allocation130_spill] sm:$0xff] %v7187_v19 }
 0x355   :  { %v7189_v61 = vpop.permute.xlu1 %1431  ;;  %1940 = vrot.lane.b32.xlu0 %v6395_v40, %s6115_s30 }
 0x356   :  { %13939 = vst [vmem:[#allocation131_spill] sm:$0xff] %v7189_v61 }
 0x357   :  { %1942 = vrot.lane.b32.xlu1 %v6651_v45, %s6115_s30  ;;  %v7195_v28 = vpop.permute.xlu0 %1437 }
 0x358   :  { %13940 = vst [vmem:[#allocation132_spill] sm:$0xff] %v7195_v28 }
 0x359   :  { %v7197_v48 = vpop.permute.xlu1 %1443  ;;  %1946 = vrot.lane.b32.xlu0 %v6399_v42, %s6115_s30 }
 0x35a   :  { %13941 = vst [vmem:[#allocation133_spill] sm:$0xff] %v7197_v48 }
 0x35b   :  { %1948 = vrot.lane.b32.xlu1 %v6465_v53, %s6115_s30  ;;  %v7203_v0 = vpop.permute.xlu0 %1498 }
 0x35c   :  { %13942 = vst [vmem:[#allocation134_spill] sm:$0xff] %v7203_v0 }
 0x35d   :  { %v7205_v19 = vpop.permute.xlu1 %1504  ;;  %1952 = vrot.lane.b32.xlu0 %v6403_v43, %s6115_s30 }
 0x35e   :  { %13943 = vst [vmem:[#allocation135_spill] sm:$0xff] %v7205_v19 }
 0x35f   :  { %1954 = vrot.lane.b32.xlu1 %v6639_v39, %s6115_s30  ;;  %v7211_v61 = vpop.permute.xlu0 %1510 }
 0x360   :  { %13944 = vst [vmem:[#allocation136_spill] sm:$0xff] %v7211_v61 }
 0x361   :  { %v7213_v28 = vpop.permute.xlu1 %1516  ;;  %1865 = vrot.lane.b32.xlu0 %v6768_v46, %s6103_s23 }
 0x362   :  { %13945 = vst [vmem:[#allocation137_spill] sm:$0xff] %v7213_v28 }
 0x363   :  { %1871 = vrot.lane.b32.xlu1 %v6776_v33, %s6103_s23  ;;  %v7219_v48 = vpop.permute.xlu0 %1641 }
 0x364   :  { %13946 = vst [vmem:[#allocation138_spill] sm:$0xff] %v7219_v48 }
 0x365   :  { %v7221_v0 = vpop.permute.xlu1 %1643  ;;  %1877 = vrot.lane.b32.xlu0 %v6784_v54, %s6103_s23 }
 0x366   :  { %13947 = vst [vmem:[#allocation139_spill] sm:$0xff] %v7221_v0 }
 0x367   :  { %1883 = vrot.lane.b32.xlu1 %v6791_v34, %s6103_s23  ;;  %v7227_v19 = vpop.permute.xlu0 %1647 }
 0x368   :  { %13948 = vst [vmem:[#allocation140_spill] sm:$0xff] %v7227_v19 }
 0x369   :  { %v7229_v61 = vpop.permute.xlu1 %1649  ;;  %2008 = vrot.lane.b32.xlu0 %v6391_v37, %s6116_s11 }
 0x36a   :  { %13949 = vst [vmem:[#allocation141_spill] sm:$0xff] %v7229_v61 }
 0x36b   :  { %2010 = vrot.lane.b32.xlu1 %v6457_v51, %s6116_s11  ;;  %v7235_v48 = vpop.permute.xlu0 %1653 }
 0x36c   :  { %13950 = vst [vmem:[#allocation142_spill] sm:$0xff] %v7235_v48  ;;  %v5223_v48 = vld [vmem:[%s13404_s3 + $0x498] sm:$0xff] }
 0x36d   :  { %v7237_v0 = vpop.permute.xlu1 %1655  ;;  %2014 = vrot.lane.b32.xlu0 %v6395_v40, %s6116_s11  ;;  %v602_v52 = vmul.f32 %v5223_v48, %v6403_v43 }
 0x36e   :  { %13951 = vst [vmem:[#allocation143_spill] sm:$0xff] %v7237_v0  ;;  %v5220_v0 = vld [vmem:[%s13404_s3 + $0x480] sm:$0xff] }
 0x36f   :  { %2016 = vrot.lane.b32.xlu1 %v6651_v45, %s6116_s11  ;;  %v7243_v19 = vpop.permute.xlu0 %1659  ;;  %v7284_v38 = vmul.f32 %v5220_v0, %v6391_v37  ;;  %v650_v0 = vld [vmem:[%s13404_s3 + $0x10] sm:$0xff] }
 0x370   :  { %13952 = vst [vmem:[#allocation144_spill] sm:$0xff] %v7243_v19  ;;  %v5221_v19 = vld [vmem:[%s13404_s3 + $0x488] sm:$0xff] }
 0x371   :  { %v7245_v61 = vpop.permute.xlu1 %1661  ;;  %2020 = vrot.lane.b32.xlu0 %v6399_v42, %s6116_s11  ;;  %v600_v18 = vmul.f32 %v5221_v19, %v6395_v40  ;;  %v648_v19 = vld [vmem:[%s13404_s3] sm:$0xff] }
 0x372   :  { %13953 = vst [vmem:[#allocation145_spill] sm:$0xff] %v7245_v61  ;;  %v5222_v61 = vld [vmem:[%s13404_s3 + $0x490] sm:$0xff] }
 0x373   :  { %2022 = vrot.lane.b32.xlu1 %v6465_v53, %s6116_s11  ;;  %v7251_v28 = vpop.permute.xlu0 %1571  ;;  %v601_v60 = vmul.f32 %v5222_v61, %v6399_v42  ;;  %v645_v61 = vsel %vm635_vm10, %v6543_v3, %v6533_v62 }
 0x374   :  { %13954 = vst [vmem:[#allocation146_spill] sm:$0xff] %v7251_v28  ;;  %v5226_v28 = vld [vmem:[%s13404_s3 + $0x4b0] sm:$0xff] }
 0x375   :  { %v7266_v5 = vpop.permute.xlu1 %1577  ;;  %2026 = vrot.lane.b32.xlu0 %v6403_v43, %s6116_s11 }
 0x376   :  { %13955 = vst [vmem:[#allocation147_spill] sm:$0xff] %v7266_v5  ;;  %v642_v5 = vsel %vm635_vm10, %v6533_v62, %v6535_v63  ;;  %v7319_v63 = vmul.f32 %v5224_v58, %v6457_v51  ;;  %v636_v62 = vsel %vm635_vm10, %v6541_v2, %v6543_v3  ;;  %v715_v58 = vsel %vm708_vm11, %v6549_v4, %v6551_v6 }
 0x377   :  { %2028 = vrot.lane.b32.xlu1 %v6639_v39, %s6116_s11  ;;  %v7292_v49 = vpop.permute.xlu0 %1583  ;;  %v661_v50 = vmul.f32 %v649_v22, %v642_v5  ;;  %v7340_v5 = vmul.f32 %v5225_v15, %v6651_v45  ;;  %v662_v22 = vmul.f32 %v650_v0, %v639_v57  ;;  %v712_v2 = vsel %vm708_vm11, %v6551_v6, %v6557_v8  ;;  %v5229_v15 = vld [vmem:[%s13404_s3 + $0x4c8] sm:$0xff]  ;;  %v5235_v6 = vld [vmem:[%s13404_s3 + $0x78] sm:$0xff] }
 0x378   :  { %13956 = vst [vmem:[#allocation148_spill] sm:$0xff] %v7292_v49  ;;  %v7316_v49 = vmul.f32 %v5226_v28, %v6465_v53  ;;  %13958 = vst [vmem:[#allocation150_spill] sm:$0xff] %v7319_v63  ;;  %v5233_v28 = vld [vmem:[%s13404_s3 + $0x68] sm:$0xff]  ;;  %v7351_v3 = vmul.f32 %v5227_v1, %v6639_v39  ;;  %v660_v0 = vmul.f32 %v648_v19, %v645_v61 }
 0x379   :  { %v7321_v48 = vpop.permute.xlu1 %1589  ;;  %1938 = vrot.lane.b32.xlu0 %v6768_v46, %s6115_s30  ;;  %13960 = vst [vmem:[#allocation152_spill] sm:$0xff] %v7340_v5  ;;  %v5232_v5 = vld [vmem:[%s13404_s3 + $0x60] sm:$0xff]  ;;  %v709_v1 = vsel %vm708_vm11, %v6557_v8, %v6559_v9  ;;  %v663_v19 = vmul.f32 %v651_v30, %v636_v62  ;;  %v735_v61 = vmul.f32 %v5233_v28, %v715_v58  ;;  %v5246_v8 = vld [vmem:[%s13404_s3 + $0xd0] sm:$0xff] }
 0x37a   :  { %13957 = vst [vmem:[#allocation149_spill] sm:$0xff] %v7316_v49  ;;  %13959 = vst [vmem:[#allocation151_spill] sm:$0xff] %v7321_v48  ;;  %v5234_v48 = vld [vmem:[%s13404_s3 + $0x70] sm:$0xff]  ;;  %v718_v49 = vsel %vm708_vm11, %v6559_v9, %v6549_v4  ;;  %v786_v4 = vsel %vm782_vm12, %v6567_v11, %v6573_v12  ;;  %v673_v30 = vadd.f32 %v661_v50, %v600_v18  ;;  %v5228_v58 = vld [vmem:[%s13404_s3 + $0x4c0] sm:$0xff] }
 0x37b   :  { %13961 = vst [vmem:[#allocation153_spill] sm:$0xff] %v7351_v3  ;;  %1944 = vrot.lane.b32.xlu1 %v6776_v33, %s6115_s30  ;;  %v7358_v57 = vpop.permute.xlu0 %1715  ;;  %v789_v3 = vsel %vm782_vm12, %v6565_v10, %v6567_v11  ;;  %v736_v62 = vmul.f32 %v5234_v48, %v712_v2  ;;  %v7395_v28 = vmul.f32 %v5229_v15, %v6776_v33  ;;  %v5244_v11 = vld [vmem:[%s13404_s3 + $0xc0] sm:$0xff] }
 0x37c   :  { %13962 = vst [vmem:[#allocation154_spill] sm:$0xff] %v7358_v57  ;;  %v5245_v57 = vld [vmem:[%s13404_s3 + $0xc8] sm:$0xff]  ;;  %v674_v63 = vadd.f32 %v662_v22, %v601_v60  ;;  %v734_v59 = vmul.f32 %v5232_v5, %v718_v49  ;;  %v737_v39 = vmul.f32 %v5235_v6, %v709_v1  ;;  %v792_v50 = vsel %vm782_vm12, %v6575_v13, %v6565_v10  ;;  %v5247_v60 = vld [vmem:[%s13404_s3 + $0xd8] sm:$0xff]  ;;  %v5258_v1 = vld [vmem:[%s13404_s3 + $0x130] sm:$0xff] }
 0x37d   :  { %v7389_v9 = vpop.permute.xlu1 %1717  ;;  %1950 = vrot.lane.b32.xlu0 %v6784_v54, %s6115_s30  ;;  %v809_v48 = vmul.f32 %v5245_v57, %v789_v3  ;;  %v810_v2 = vmul.f32 %v5246_v8, %v786_v4  ;;  %v783_v49 = vsel %vm782_vm12, %v6573_v12, %v6575_v13  ;;  %v5257_v10 = vld [vmem:[%s13404_s3 + $0x128] sm:$0xff]  ;;  %v863_v5 = vsel %vm13654_vm13, %v6581_v14, %v6584_v16 }
 0x37e   :  { %13963 = vst [vmem:[#allocation155_spill] sm:$0xff] %v7389_v9  ;;  %v672_v22 = vadd.f32 %v660_v0, %v7284_v38  ;;  %v675_v3 = vadd.f32 %v663_v19, %v602_v52  ;;  %v747_v15 = vadd.f32 %v735_v61, %v673_v30  ;;  %v7427_v57 = vmul.f32 %v5228_v58, %v6768_v46  ;;  %v5256_v52 = vld [vmem:[%s13404_s3 + $0x120] sm:$0xff]  ;;  %v5259_v61 = vld [vmem:[%s13404_s3 + $0x138] sm:$0xff]  ;;  %v5269_v8 = vld [vmem:[%s13404_s3 + $0x188] sm:$0xff] }
 0x37f   :  { %1956 = vrot.lane.b32.xlu1 %v6791_v34, %s6115_s30  ;;  %v7409_v18 = vpop.permute.xlu0 %1721  ;;  %v748_v12 = vadd.f32 %v736_v62, %v674_v63  ;;  %v808_v13 = vmul.f32 %v5244_v11, %v792_v50  ;;  %v860_v38 = vsel %vm13654_vm13, %v6584_v16, %v6590_v17  ;;  %v866_v0 = vsel %vm13654_vm13, %v6593_v20, %v6581_v14 }
 0x380   :  { %13964 = vst [vmem:[#allocation156_spill] sm:$0xff] %v7409_v18  ;;  %v811_v63 = vmul.f32 %v5247_v60, %v783_v49  ;;  %v883_v19 = vmul.f32 %v5257_v10, %v863_v5  ;;  %v857_v16 = vsel %vm13654_vm13, %v6590_v17, %v6593_v20  ;;  %v937_v14 = vsel %vm13640_vm14, %v6599_v21, %v6601_v23  ;;  %v5270_v20 = vld [vmem:[%s13404_s3 + $0x190] sm:$0xff]  ;;  %v5268_v49 = vld [vmem:[%s13404_s3 + $0x180] sm:$0xff]  ;;  %v5287_v18 = vld [vmem:[%s13404_s3 + $0x218] sm:$0xff] }
 0x381   :  { %v7429_v6 = vpop.permute.xlu1 %1723  ;;  %2082 = vrot.lane.b32.xlu0 %v6391_v37, %s6117_s13  ;;  %v746_v30 = vadd.f32 %v734_v59, %v672_v22  ;;  %v749_v62 = vadd.f32 %v737_v39, %v675_v3  ;;  %v821_v58 = vadd.f32 %v809_v48, %v747_v15  ;;  %v822_v11 = vadd.f32 %v810_v2, %v748_v12  ;;  %v5282_v12 = vld [vmem:[%s13404_s3 + $0x1f0] sm:$0xff] }
 0x382   :  { %13965 = vst [vmem:[#allocation157_spill] sm:$0xff] %v7429_v6  ;;  %v884_v50 = vmul.f32 %v5258_v1, %v860_v38  ;;  %v882_v17 = vmul.f32 %v5256_v52, %v866_v0  ;;  %v934_v60 = vsel %vm13640_vm14, %v6601_v23, %v6607_v24  ;;  %v940_v39 = vsel %vm13640_vm14, %v6609_v25, %v6599_v21  ;;  %v5271_v23 = vld [vmem:[%s13404_s3 + $0x198] sm:$0xff]  ;;  %v5281_v21 = vld [vmem:[%s13404_s3 + $0x1e8] sm:$0xff]  ;;  %v5280_v38 = vld [vmem:[%s13404_s3 + $0x1e0] sm:$0xff] }
 0x383   :  { %2084 = vrot.lane.b32.xlu1 %v6457_v51, %s6117_s13  ;;  %v7463_v4 = vpop.permute.xlu0 %1727  ;;  %v885_v48 = vmul.f32 %v5259_v61, %v857_v16  ;;  %v957_v2 = vmul.f32 %v5269_v8, %v937_v14  ;;  %v931_v10 = vsel %vm13640_vm14, %v6607_v24, %v6609_v25  ;;  %v1011_v5 = vsel %vm13620_vm15, %v6615_v26, %v6617_v27  ;;  %v5283_v52 = vld [vmem:[%s13404_s3 + $0x1f8] sm:$0xff]  ;;  %v5293_v16 = vld [vmem:[%s13404_s3 + $0x248] sm:$0xff] }
 0x384   :  { %13966 = vst [vmem:[#allocation158_spill] sm:$0xff] %v7463_v4  ;;  %v820_v22 = vadd.f32 %v808_v13, %v746_v30  ;;  %v823_v3 = vadd.f32 %v811_v63, %v749_v62  ;;  %v895_v15 = vadd.f32 %v883_v19, %v821_v58  ;;  %v1008_v24 = vsel %vm13620_vm15, %v6617_v27, %v6623_v29 }
 0x385   :  { %v7479_v59 = vpop.permute.xlu1 %1729  ;;  %2088 = vrot.lane.b32.xlu0 %v6395_v40, %s6117_s13  ;;  %v958_v1 = vmul.f32 %v5270_v20, %v934_v60  ;;  %v956_v13 = vmul.f32 %v5268_v49, %v940_v39  ;;  %v1005_v27 = vsel %vm13620_vm15, %v6623_v29, %v6625_v32  ;;  %v1014_v0 = vsel %vm13620_vm15, %v6625_v32, %v6615_v26  ;;  %v5292_v20 = vld [vmem:[%s13404_s3 + $0x240] sm:$0xff] }
 0x386   :  { %13967 = vst [vmem:[#allocation159_spill] sm:$0xff] %v7479_v59  ;;  %v896_v63 = vadd.f32 %v884_v50, %v822_v11  ;;  %v959_v19 = vmul.f32 %v5271_v23, %v931_v10  ;;  %v1031_v61 = vmul.f32 %v5281_v21, %v1011_v5  ;;  %v1084_v8 = vsel %vm90_vm0, %v6631_v35, %v6634_v36  ;;  %v5294_v11 = vld [vmem:[%s13404_s3 + $0x250] sm:$0xff]  ;;  %v5305_v10 = vld [vmem:[%s13404_s3 + $0x2a8] sm:$0xff]  ;;  %v5275_v59 = vld [vmem:[%s13404_s3 + $0x1b8] sm:$0xff] }
 0x387   :  { %2090 = vrot.lane.b32.xlu1 %v6651_v45, %s6117_s13  ;;  %v7507_v25 = vpop.permute.xlu0 %1733  ;;  %v894_v29 = vadd.f32 %v882_v17, %v820_v22  ;;  %v897_v30 = vadd.f32 %v885_v48, %v823_v3  ;;  %v969_v26 = vadd.f32 %v957_v2, %v895_v15  ;;  %v1032_v32 = vmul.f32 %v5282_v12, %v1008_v24  ;;  %v5306_v21 = vld [vmem:[%s13404_s3 + $0x2b0] sm:$0xff]  ;;  %v5304_v12 = vld [vmem:[%s13404_s3 + $0x2a0] sm:$0xff] }
 0x388   :  { %13968 = vst [vmem:[#allocation160_spill] sm:$0xff] %v7507_v25  ;;  %v1030_v62 = vmul.f32 %v5280_v38, %v1014_v0  ;;  %v1033_v58 = vmul.f32 %v5283_v52, %v1005_v27  ;;  %v1081_v50 = vsel %vm90_vm0, %v6634_v36, %v6643_v41  ;;  %v1087_v17 = vsel %vm90_vm0, %v6781_v44, %v6631_v35  ;;  %v5295_v36 = vld [vmem:[%s13404_s3 + $0x258] sm:$0xff]  ;;  %v13972_v27 = vld [vmem:[#allocation5_spill] sm:$0xff] }
 0x389   :  { %v7530_v14 = vpop.permute.xlu1 %1735  ;;  %2094 = vrot.lane.b32.xlu0 %v6399_v42, %s6117_s13  ;;  %v970_v49 = vadd.f32 %v958_v1, %v896_v63  ;;  %v968_v39 = vadd.f32 %v956_v13, %v894_v29  ;;  %v1104_v48 = vmul.f32 %v5293_v16, %v1084_v8  ;;  %v1078_v2 = vsel %vm90_vm0, %v6643_v41, %v6781_v44  ;;  %v5307_v38 = vld [vmem:[%s13404_s3 + $0x2b8] sm:$0xff]  ;;  %v13974_v16 = vld [vmem:[#allocation36_spill] sm:$0xff]  ;;  %v13975_v8 = vld [vmem:[#allocation9_spill] sm:$0xff] }
 0x38a   :  { %13969 = vst [vmem:[#allocation161_spill] sm:$0xff] %v7530_v14  ;;  %v971_v35 = vadd.f32 %v959_v19, %v897_v30  ;;  %v1043_v23 = vadd.f32 %v1031_v61, %v969_v26  ;;  %v1154_v5 = vsel %vm119_vm1, %v6795_v55, %v6663_v47  ;;  %v1157_v41 = vsel %vm119_vm1, %v6655_v31, %v6795_v55  ;;  %v5317_v61 = vld [vmem:[%s13404_s3 + $0x308] sm:$0xff]  ;;  %v14035_v14 = vld [vmem:[#allocation153_spill] sm:$0xff]  ;;  %v14036_v25 = vld [vmem:[#allocation18_spill] sm:$0xff] }
 0x38b   :  { %2096 = vrot.lane.b32.xlu1 %v6465_v53, %s6117_s13  ;;  %v7551_v60 = vpop.permute.xlu0 %1645  ;;  %v1044_v22 = vadd.f32 %v1032_v32, %v970_v49  ;;  %v1105_v3 = vmul.f32 %v5294_v11, %v1081_v50  ;;  %v1103_v15 = vmul.f32 %v5292_v20, %v1087_v17  ;;  %v1160_v24 = vsel %vm119_vm1, %v6803_v56, %v6655_v31  ;;  %v5316_v32 = vld [vmem:[%s13404_s3 + $0x300] sm:$0xff] }
 0x38c   :  { %13970 = vst [vmem:[#allocation162_spill] sm:$0xff] %v7551_v60  ;;  %v1042_v1 = vadd.f32 %v1030_v62, %v968_v39  ;;  %v1045_v13 = vadd.f32 %v1033_v58, %v971_v35  ;;  %v1106_v55 = vmul.f32 %v5295_v36, %v1078_v2  ;;  %v1151_v52 = vsel %vm119_vm1, %v6663_v47, %v6803_v56  ;;  %v5318_v47 = vld [vmem:[%s13404_s3 + $0x310] sm:$0xff]  ;;  %v13976_v56 = vld [vmem:[#allocation11_spill] sm:$0xff]  ;;  %v5319_v62 = vld [vmem:[%s13404_s3 + $0x318] sm:$0xff] }
 0x38d   :  { %v7574_v44 = vpop.permute.xlu1 %1651  ;;  %2100 = vrot.lane.b32.xlu0 %v6403_v43, %s6117_s13  ;;  %v1116_v63 = vadd.f32 %v1104_v48, %v1043_v23  ;;  %v1177_v19 = vmul.f32 %v5305_v10, %v1157_v41  ;;  %v1178_v31 = vmul.f32 %v5306_v21, %v1154_v5  ;;  %v1230_v29 = vsel %vm149_vm2, %v13975_v8, %v13974_v16  ;;  %v13977_v58 = vld [vmem:[#allocation38_spill] sm:$0xff]  ;;  %v5329_v48 = vld [vmem:[%s13404_s3 + $0x368] sm:$0xff]  ;;  %v13980_v2 = vld [vmem:[#allocation13_spill] sm:$0xff] }
 0x38e   :  { %13971 = vst [vmem:[#allocation163_spill] sm:$0xff] %v7574_v44  ;;  %v1176_v30 = vmul.f32 %v5304_v12, %v1160_v24  ;;  %v1227_v26 = vsel %vm149_vm2, %v13974_v16, %v13976_v56  ;;  %v1224_v11 = vsel %vm149_vm2, %v13976_v56, %v13977_v58  ;;  %v1233_v50 = vsel %vm149_vm2, %v13977_v58, %v13975_v8  ;;  %v13979_v36 = vld [vmem:[#allocation40_spill] sm:$0xff]  ;;  %v5330_v21 = vld [vmem:[%s13404_s3 + $0x370] sm:$0xff]  ;;  %v13981_v5 = vld [vmem:[#allocation15_spill] sm:$0xff] }
 0x38f   :  { %2102 = vrot.lane.b32.xlu1 %v13972_v27, %s6117_s13  ;;  %v7594_v0 = vpop.permute.xlu0 %1657  ;;  %v1117_v17 = vadd.f32 %v1105_v3, %v1044_v22  ;;  %v1115_v49 = vadd.f32 %v1103_v15, %v1042_v1  ;;  %v1179_v39 = vmul.f32 %v5307_v38, %v1151_v52  ;;  %v1304_v35 = vsel %vm13639_vm9, %v13980_v2, %v13979_v36  ;;  %v5328_v22 = vld [vmem:[%s13404_s3 + $0x360] sm:$0xff]  ;;  %v13982_v3 = vld [vmem:[#allocation42_spill] sm:$0xff]  ;;  %v5230_v52 = vld [vmem:[%s13404_s3 + $0x4d0] sm:$0xff] }
 0x390   :  { %13973 = vst [vmem:[#allocation5_spill] sm:$0xff] %v7594_v0  ;;  %v1118_v23 = vadd.f32 %v1106_v55, %v1045_v13  ;;  %v1250_v10 = vmul.f32 %v5317_v61, %v1230_v29  ;;  %v1301_v41 = vsel %vm13639_vm9, %v13979_v36, %v13981_v5  ;;  %v1307_v15 = vsel %vm13639_vm9, %v13982_v3, %v13980_v2  ;;  %v5331_v55 = vld [vmem:[%s13404_s3 + $0x378] sm:$0xff]  ;;  %v13985_v58 = vld [vmem:[#allocation44_spill] sm:$0xff]  ;;  %v5260_v0 = vld [vmem:[%s13404_s3 + $0x140] sm:$0xff] }
 0x391   :  { %v7624_v20 = vpop.permute.xlu1 %1663  ;;  %2012 = vrot.lane.b32.xlu0 %v6768_v46, %s6116_s11  ;;  %v1251_v24 = vmul.f32 %v5318_v47, %v1227_v26  ;;  %v1249_v1 = vmul.f32 %v5316_v32, %v1233_v50  ;;  %v1252_v13 = vmul.f32 %v5319_v62, %v1224_v11  ;;  %v1298_v38 = vsel %vm13639_vm9, %v13981_v5, %v13982_v3  ;;  %v5341_v62 = vld [vmem:[%s13404_s3 + $0x3c8] sm:$0xff]  ;;  %v13986_v11 = vld [vmem:[#allocation17_spill] sm:$0xff]  ;;  %v13988_v36 = vld [vmem:[#allocation46_spill] sm:$0xff] }
 0x392   :  { %13978 = vst [vmem:[#allocation36_spill] sm:$0xff] %v7624_v20  ;;  %v1189_v61 = vadd.f32 %v1177_v19, %v1116_v63  ;;  %v1190_v16 = vadd.f32 %v1178_v31, %v1117_v17  ;;  %v1188_v8 = vadd.f32 %v1176_v30, %v1115_v49  ;;  %v1324_v29 = vmul.f32 %v5329_v48, %v1304_v35  ;;  %v5340_v48 = vld [vmem:[%s13404_s3 + $0x3c0] sm:$0xff]  ;;  %v14030_v60 = vld [vmem:[#allocation16_spill] sm:$0xff]  ;;  %v14031_v44 = vld [vmem:[#allocation74_spill] sm:$0xff] }
 0x393   :  { %2018 = vrot.lane.b32.xlu1 %v6776_v33, %s6116_s11  ;;  %v7651_v12 = vpop.permute.xlu0 %1788  ;;  %v1191_v56 = vadd.f32 %v1179_v39, %v1118_v23  ;;  %v1325_v26 = vmul.f32 %v5330_v21, %v1301_v41  ;;  %v1323_v32 = vmul.f32 %v5328_v22, %v1307_v15  ;;  %v1378_v63 = vsel %vm13638_vm8, %v13986_v11, %v13985_v58  ;;  %v5342_v23 = vld [vmem:[%s13404_s3 + $0x3d0] sm:$0xff]  ;;  %v5343_v41 = vld [vmem:[%s13404_s3 + $0x3d8] sm:$0xff] }
 0x394   :  { %13983 = vst [vmem:[#allocation9_spill] sm:$0xff] %v7651_v12  ;;  %v1262_v19 = vadd.f32 %v1250_v10, %v1189_v61  ;;  %v1326_v31 = vmul.f32 %v5331_v55, %v1298_v38  ;;  %v7676_v30 = vmul.f32 %v5230_v52, %v6784_v54  ;;  %v1263_v17 = vadd.f32 %v1251_v24, %v1190_v16  ;;  %v13989_v10 = vld [vmem:[#allocation19_spill] sm:$0xff]  ;;  %v13992_v55 = vld [vmem:[#allocation21_spill] sm:$0xff]  ;;  %v13993_v61 = vld [vmem:[#allocation50_spill] sm:$0xff] }
 0x395   :  { %v7663_v47 = vpop.permute.xlu1 %1790  ;;  %2024 = vrot.lane.b32.xlu0 %v6784_v54, %s6116_s11  ;;  %v1261_v49 = vadd.f32 %v1249_v1, %v1188_v8  ;;  %v1264_v39 = vadd.f32 %v1252_v13, %v1191_v56  ;;  %v1381_v2 = vsel %vm13638_vm8, %v13988_v36, %v13986_v11  ;;  %v1375_v21 = vsel %vm13638_vm8, %v13985_v58, %v13989_v10  ;;  %v5353_v1 = vld [vmem:[%s13404_s3 + $0x428] sm:$0xff]  ;;  %v5352_v52 = vld [vmem:[%s13404_s3 + $0x420] sm:$0xff]  ;;  %v5354_v56 = vld [vmem:[%s13404_s3 + $0x430] sm:$0xff] }
 0x396   :  { %13984 = vst [vmem:[#allocation11_spill] sm:$0xff] %v7663_v47  ;;  %v1336_v35 = vadd.f32 %v1324_v29, %v1262_v19  ;;  %v1398_v5 = vmul.f32 %v5341_v62, %v1378_v63  ;;  %v1372_v22 = vsel %vm13638_vm8, %v13989_v10, %v13988_v36  ;;  %v1337_v15 = vadd.f32 %v1325_v26, %v1263_v17  ;;  %v13991_v13 = vld [vmem:[#allocation48_spill] sm:$0xff]  ;;  %v13994_v26 = vld [vmem:[#allocation23_spill] sm:$0xff]  ;;  %v5355_v62 = vld [vmem:[%s13404_s3 + $0x438] sm:$0xff] }
 0x397   :  { %2030 = vrot.lane.b32.xlu1 %v6791_v34, %s6116_s11  ;;  %v7680_v50 = vpop.permute.xlu0 %1794  ;;  %v1335_v24 = vadd.f32 %v1323_v32, %v1261_v49  ;;  %v1451_v38 = vsel %vm179_vm3, %v13992_v55, %v13991_v13  ;;  %v1454_v16 = vsel %vm179_vm3, %v13993_v61, %v13992_v55  ;;  %v1338_v8 = vadd.f32 %v1326_v31, %v1264_v39  ;;  %v5364_v31 = vld [vmem:[%s13404_s3 + $0x4e0] sm:$0xff]  ;;  %v5365_v17 = vld [vmem:[%s13404_s3 + $0x4e8] sm:$0xff]  ;;  %v13998_v36 = vld [vmem:[#allocation25_spill] sm:$0xff] }
 0x398   :  { %13987 = vst [vmem:[#allocation38_spill] sm:$0xff] %v7680_v50  ;;  %v1397_v29 = vmul.f32 %v5340_v48, %v1381_v2  ;;  %v1448_v32 = vsel %vm179_vm3, %v13991_v13, %v13994_v26  ;;  %v1445_v58 = vsel %vm179_vm3, %v13994_v26, %v13993_v61  ;;  %v1399_v63 = vmul.f32 %v5342_v23, %v1375_v21  ;;  %v13996_v49 = vld [vmem:[#allocation27_spill] sm:$0xff]  ;;  %v13997_v39 = vld [vmem:[#allocation52_spill] sm:$0xff]  ;;  %v5231_v55 = vld [vmem:[%s13404_s3 + $0x4d8] sm:$0xff] }
 0x399   :  { %v7703_v3 = vpop.permute.xlu1 %1796  ;;  %2156 = vrot.lane.b32.xlu0 %v6391_v37, %s13606_s28  ;;  %v1400_v19 = vmul.f32 %v5343_v41, %v1372_v22  ;;  %v1521_v48 = vsel %vm213_vm4, %v13997_v39, %v13996_v49  ;;  %v1524_v2 = vsel %vm213_vm4, %v13998_v36, %v13997_v39  ;;  %v1410_v23 = vadd.f32 %v1398_v5, %v1336_v35  ;;  %v5366_v41 = vld [vmem:[%s13404_s3 + $0x4f0] sm:$0xff]  ;;  %v13999_v22 = vld [vmem:[#allocation54_spill] sm:$0xff]  ;;  %v14003_v39 = vld [vmem:[#allocation31_spill] sm:$0xff] }
 0x39a   :  { %13990 = vst [vmem:[#allocation40_spill] sm:$0xff] %v7703_v3  ;;  %v1471_v10 = vmul.f32 %v5353_v1, %v1451_v38  ;;  %v1470_v21 = vmul.f32 %v5352_v52, %v1454_v16  ;;  %v1518_v13 = vsel %vm213_vm4, %v13996_v49, %v13999_v22  ;;  %v1472_v35 = vmul.f32 %v5354_v56, %v1448_v32  ;;  %v5367_v1 = vld [vmem:[%s13404_s3 + $0x4f8] sm:$0xff]  ;;  %v5376_v52 = vld [vmem:[%s13404_s3 + $0x540] sm:$0xff]  ;;  %v14001_v16 = vld [vmem:[#allocation56_spill] sm:$0xff] }
 0x39b   :  { %2158 = vrot.lane.b32.xlu1 %v6457_v51, %s13606_s28  ;;  %v7737_v11 = vpop.permute.xlu0 %1800  ;;  %v1473_v5 = vmul.f32 %v5355_v62, %v1445_v58  ;;  %v1527_v38 = vsel %vm213_vm4, %v13999_v22, %v13998_v36  ;;  %v14002_v26 = vld [vmem:[#allocation29_spill] sm:$0xff]  ;;  %v1409_v56 = vadd.f32 %v1397_v29, %v1335_v24  ;;  %v1543_v32 = vmul.f32 %v5364_v31, %v1524_v2  ;;  %v5377_v58 = vld [vmem:[%s13404_s3 + $0x548] sm:$0xff]  ;;  %v5251_v50 = vld [vmem:[%s13404_s3 + $0xf8] sm:$0xff] }
 0x39c   :  { %13995 = vst [vmem:[#allocation13_spill] sm:$0xff] %v7737_v11  ;;  %v1598_v49 = vsel %vm13637_vm7, %v14002_v26, %v14001_v16  ;;  %v1544_v62 = vmul.f32 %v5365_v17, %v1521_v48  ;;  %v1595_v36 = vsel %vm13637_vm7, %v14001_v16, %v14003_v39  ;;  %v1412_v11 = vadd.f32 %v1400_v19, %v1338_v8  ;;  %v14007_v8 = vld [vmem:[#allocation58_spill] sm:$0xff] }
 0x39d   :  { %v7763_v61 = vpop.permute.xlu1 %1802  ;;  %2162 = vrot.lane.b32.xlu0 %v6395_v40, %s13606_s28  ;;  %v1545_v47 = vmul.f32 %v5366_v41, %v1518_v13  ;;  %v7793_v24 = vmul.f32 %v5231_v55, %v6791_v34  ;;  %v1483_v29 = vadd.f32 %v1471_v10, %v1410_v23  ;;  %v1482_v31 = vadd.f32 %v1470_v21, %v1409_v56  ;;  %v5379_v10 = vld [vmem:[%s13404_s3 + $0x558] sm:$0xff]  ;;  %v652_v21 = vld [vmem:[%s13404_s3 + $0x20] sm:$0xff] }
 0x39e   :  { %14000 = vst [vmem:[#allocation15_spill] sm:$0xff] %v7763_v61  ;;  %v1411_v61 = vadd.f32 %v1399_v63, %v1337_v15  ;;  %v1546_v17 = vmul.f32 %v5367_v1, %v1527_v38  ;;  %v1617_v48 = vmul.f32 %v5376_v52, %v1598_v49  ;;  %v1485_v3 = vadd.f32 %v1473_v5, %v1412_v11  ;;  %v5378_v15 = vld [vmem:[%s13404_s3 + $0x550] sm:$0xff]  ;;  %v14008_v41 = vld [vmem:[#allocation6_spill] sm:$0xff]  ;;  %v5296_v5 = vld [vmem:[%s13404_s3 + $0x260] sm:$0xff] }
 0x39f   :  { %2164 = vrot.lane.b32.xlu1 %v6651_v45, %s13606_s28  ;;  %v7790_v22 = vpop.permute.xlu0 %1806  ;;  %14005 = vst [vmem:[#allocation44_spill] sm:$0xff] %v7793_v24  ;;  %v1618_v12 = vmul.f32 %v5377_v58, %v1595_v36  ;;  %v1592_v63 = vsel %vm13637_vm7, %v14003_v39, %v14007_v8  ;;  %v1555_v19 = vadd.f32 %v1543_v32, %v1482_v31  ;;  %v14009_v13 = vld [vmem:[#allocation62_spill] sm:$0xff]  ;;  %v14011_v38 = vld [vmem:[#allocation57_spill] sm:$0xff]  ;;  %v14013_v49 = vld [vmem:[#allocation28_spill] sm:$0xff] }
 0x3a0   :  { %14004 = vst [vmem:[#allocation42_spill] sm:$0xff] %v7790_v22  ;;  %v1484_v16 = vadd.f32 %v1472_v35, %v1411_v61  ;;  %v1556_v23 = vadd.f32 %v1544_v62, %v1483_v29  ;;  %v1601_v11 = vsel %vm13637_vm7, %v14007_v8, %v14002_v26  ;;  %v646_v55 = vsel %vm635_vm10, %v14009_v13, %v14008_v41  ;;  %v5299_v1 = vld [vmem:[%s13404_s3 + $0x278] sm:$0xff]  ;;  %v14014_v32 = vld [vmem:[#allocation7_spill] sm:$0xff]  ;;  %v14016_v31 = vld [vmem:[#allocation8_spill] sm:$0xff] }
 0x3a1   :  { %v7795_v2 = vpop.permute.xlu1 %1808  ;;  %2168 = vrot.lane.b32.xlu0 %v6399_v42, %s13606_s28  ;;  %v14012_v52 = vld [vmem:[#allocation30_spill] sm:$0xff]  ;;  %v1088_v56 = vsel %vm90_vm0, %v14011_v38, %v14013_v49  ;;  %v637_v62 = vsel %vm635_vm10, %v14014_v32, %v14009_v13  ;;  %v1558_v58 = vadd.f32 %v1546_v17, %v1485_v3  ;;  %v7845_v39 = vadd.f32 %v1617_v48, %v1555_v19  ;;  %v5236_v29 = vld [vmem:[%s13404_s3 + $0x80] sm:$0xff] }
 0x3a2   :  { %14006 = vst [vmem:[#allocation17_spill] sm:$0xff] %v7795_v2  ;;  %v1557_v35 = vadd.f32 %v1545_v47, %v1484_v16  ;;  %v1079_v26 = vsel %vm90_vm0, %v14012_v52, %v14011_v38  ;;  %v655_v47 = vld [vmem:[%s13404_s3 + $0x38] sm:$0xff]  ;;  %v1619_v36 = vmul.f32 %v5378_v15, %v1592_v63  ;;  %v1620_v3 = vmul.f32 %v5379_v10, %v1601_v11 }
 0x3a3   :  { %2170 = vrot.lane.b32.xlu1 %v6465_v53, %s13606_s28  ;;  %v7822_v61 = vpop.permute.xlu0 %1719  ;;  %14015 = vst [vmem:[#allocation19_spill] sm:$0xff] %v7845_v39  ;;  %v14017_v16 = vld [vmem:[#allocation66_spill] sm:$0xff]  ;;  %v664_v17 = vmul.f32 %v652_v21, %v646_v55  ;;  %v7867_v19 = vmul.f32 %v5296_v5, %v1088_v56  ;;  %v7869_v13 = vmul.f32 %v5299_v1, %v1079_v26  ;;  %v14024_v55 = vld [vmem:[#allocation33_spill] sm:$0xff]  ;;  %v14025_v5 = vld [vmem:[#allocation59_spill] sm:$0xff] }
 0x3a4   :  { %14010 = vst [vmem:[#allocation46_spill] sm:$0xff] %v7822_v61  ;;  %v719_v8 = vsel %vm708_vm11, %v14017_v16, %v14016_v31  ;;  %v7858_v61 = vadd.f32 %v1618_v12, %v1556_v23  ;;  %v5239_v48 = vld [vmem:[%s13404_s3 + $0x98] sm:$0xff]  ;;  %v5248_v12 = vld [vmem:[%s13404_s3 + $0xe0] sm:$0xff]  ;;  %v14021_v23 = vld [vmem:[#allocation12_spill] sm:$0xff]  ;;  %v7886_v1 = vsel %vm119_vm1, %v14025_v5, %v14024_v55  ;;  %v7901_v2 = vadd.f32 %v1619_v36, %v1557_v35 }
 0x3a5   :  { %v7854_v38 = vpop.permute.xlu1 %1725  ;;  %2174 = vrot.lane.b32.xlu0 %v6403_v43, %s13606_s28  ;;  %v14020_v15 = vld [vmem:[#allocation10_spill] sm:$0xff]  ;;  %v14026_v26 = vld [vmem:[#allocation32_spill] sm:$0xff]  ;;  %v867_v35 = vsel %vm13654_vm13, %v14031_v44, %v14030_v60  ;;  %v7921_v36 = vadd.f32 %v1620_v3, %v1558_v58  ;;  %v858_v58 = vsel %vm13654_vm13, %v14036_v25, %v14031_v44  ;;  %v5272_v3 = vld [vmem:[%s13404_s3 + $0x1a0] sm:$0xff] }
 0x3a6   :  { %14018 = vst [vmem:[#allocation48_spill] sm:$0xff] %v7854_v38  ;;  %14019 = vst [vmem:[#allocation21_spill] sm:$0xff] %v7858_v61  ;;  %v710_v63 = vsel %vm708_vm11, %v14020_v15, %v14017_v16  ;;  %v667_v38 = vmul.f32 %v655_v47, %v637_v62  ;;  %v14022_v10 = vld [vmem:[#allocation70_spill] sm:$0xff]  ;;  %v7892_v56 = vsel %vm119_vm1, %v14026_v26, %v14025_v5  ;;  %v654_v47 = vld [vmem:[%s13404_s3 + $0x30] sm:$0xff] }
 0x3a7   :  { %v793_v11 = vsel %vm782_vm12, %v14022_v10, %v14021_v23  ;;  %2176 = vrot.lane.b32.xlu1 %v13972_v27, %s13606_s28  ;;  %v7880_v21 = vpop.permute.xlu0 %1731  ;;  %v14027_v62 = vld [vmem:[#allocation60_spill] sm:$0xff]  ;;  %14028 = vst [vmem:[#allocation23_spill] sm:$0xff] %v7901_v2  ;;  %v741_v22 = vmul.f32 %v5239_v48, %v710_v63  ;;  %v14029_v5 = vld [vmem:[#allocation14_spill] sm:$0xff]  ;;  %14033 = vst [vmem:[#allocation52_spill] sm:$0xff] %v7921_v36 }
 0x3a8   :  { %14023 = vst [vmem:[#allocation50_spill] sm:$0xff] %v7880_v21  ;;  %v640_v16 = vsel %vm635_vm10, %v14027_v62, %v14014_v32  ;;  %v738_v21 = vmul.f32 %v5236_v29, %v719_v8  ;;  %v784_v20 = vsel %vm782_vm12, %v14029_v5, %v14022_v10  ;;  %v643_v29 = vsel %vm635_vm10, %v14008_v41, %v14027_v62  ;;  %v14034_v8 = vld [vmem:[#allocation150_spill] sm:$0xff]  ;;  %v14037_v41 = vld [vmem:[#allocation20_spill] sm:$0xff]  ;;  %v5238_v44 = vld [vmem:[%s13404_s3 + $0x90] sm:$0xff] }
 0x3a9   :  { %v7917_v32 = vpop.permute.xlu1 %1737  ;;  %2086 = vrot.lane.b32.xlu0 %v6768_v46, %s6117_s13  ;;  %v676_v48 = vadd.f32 %v664_v17, %v14034_v8  ;;  %v812_v63 = vmul.f32 %v5248_v12, %v793_v11  ;;  %v666_v10 = vmul.f32 %v654_v47, %v640_v16  ;;  %v679_v2 = vadd.f32 %v667_v38, %v14035_v14  ;;  %v14038_v62 = vld [vmem:[#allocation78_spill] sm:$0xff]  ;;  %v653_v38 = vld [vmem:[%s13404_s3 + $0x28] sm:$0xff] }
 0x3aa   :  { %14032 = vst [vmem:[#allocation27_spill] sm:$0xff] %v7917_v32  ;;  %v5263_v32 = vld [vmem:[%s13404_s3 + $0x158] sm:$0xff]  ;;  %v941_v17 = vsel %vm13640_vm14, %v14038_v62, %v14037_v41  ;;  %v14040_v12 = vld [vmem:[#allocation64_spill] sm:$0xff]  ;;  %v815_v16 = vmul.f32 %v5251_v50, %v784_v20  ;;  %v886_v8 = vmul.f32 %v5260_v0, %v867_v35  ;;  %v5284_v20 = vld [vmem:[%s13404_s3 + $0x200] sm:$0xff] }
 0x3ab   :  { %2092 = vrot.lane.b32.xlu1 %v6776_v33, %s6117_s13  ;;  %v7945_v14 = vpop.permute.xlu0 %1861  ;;  %v713_v11 = vsel %vm708_vm11, %v14040_v12, %v14020_v15  ;;  %v750_v47 = vadd.f32 %v738_v21, %v676_v48  ;;  %v753_v36 = vadd.f32 %v741_v22, %v679_v2  ;;  %v14041_v61 = vld [vmem:[#allocation22_spill] sm:$0xff]  ;;  %v14042_v0 = vld [vmem:[#allocation24_spill] sm:$0xff]  ;;  %v5250_v2 = vld [vmem:[%s13404_s3 + $0xf0] sm:$0xff] }
 0x3ac   :  { %14039 = vst [vmem:[#allocation25_spill] sm:$0xff] %v7945_v14  ;;  %v716_v14 = vsel %vm708_vm11, %v14016_v31, %v14040_v12  ;;  %v932_v4 = vsel %vm13640_vm14, %v14041_v61, %v14038_v62  ;;  %v14043_v50 = vld [vmem:[#allocation82_spill] sm:$0xff]  ;;  %v5237_v22 = vld [vmem:[%s13404_s3 + $0x88] sm:$0xff]  ;;  %v889_v62 = vmul.f32 %v5263_v32, %v858_v58  ;;  %v960_v12 = vmul.f32 %v5272_v3, %v941_v17  ;;  %v14047_v3 = vld [vmem:[#allocation149_spill] sm:$0xff] }
 0x3ad   :  { %v1015_v15 = vsel %vm13620_vm15, %v14043_v50, %v14042_v0  ;;  %v7975_v31 = vpop.permute.xlu1 %1863  ;;  %2098 = vrot.lane.b32.xlu0 %v6784_v54, %s6117_s13  ;;  %v14045_v21 = vld [vmem:[#allocation68_spill] sm:$0xff]  ;;  %v824_v48 = vadd.f32 %v812_v63, %v750_v47  ;;  %v740_v9 = vmul.f32 %v5238_v44, %v713_v11  ;;  %v14046_v39 = vld [vmem:[#allocation26_spill] sm:$0xff]  ;;  %v963_v63 = vmul.f32 %v5275_v59, %v932_v4  ;;  %v5262_v11 = vld [vmem:[%s13404_s3 + $0x150] sm:$0xff] }
 0x3ae   :  { %14044 = vst [vmem:[#allocation54_spill] sm:$0xff] %v7975_v31  ;;  %v787_v35 = vsel %vm782_vm12, %v14045_v21, %v14029_v5  ;;  %v665_v31 = vmul.f32 %v653_v38, %v643_v29  ;;  %v790_v6 = vsel %vm782_vm12, %v14021_v23, %v14045_v21  ;;  %v1006_v24 = vsel %vm13620_vm15, %v14046_v39, %v14043_v50  ;;  %v5249_v32 = vld [vmem:[%s13404_s3 + $0xe8] sm:$0xff] }
 0x3af   :  { %2104 = vrot.lane.b32.xlu1 %v6791_v34, %s6117_s13  ;;  %v8002_v5 = vpop.permute.xlu0 %1867  ;;  %v827_v29 = vadd.f32 %v815_v16, %v753_v36  ;;  %v898_v23 = vadd.f32 %v886_v8, %v824_v48  ;;  %v1034_v58 = vmul.f32 %v5284_v20, %v1015_v15  ;;  %v678_v17 = vadd.f32 %v666_v10, %v14047_v3  ;;  %v14048_v47 = vld [vmem:[#allocation72_spill] sm:$0xff]  ;;  %v14050_v8 = vld [vmem:[#allocation61_spill] sm:$0xff] }
 0x3b0   :  { %v739_v38 = vmul.f32 %v5237_v22, %v716_v14  ;;  %v814_v44 = vmul.f32 %v5250_v2, %v787_v35  ;;  %v861_v50 = vsel %vm13654_vm13, %v14048_v47, %v14036_v25  ;;  %v5261_v4 = vld [vmem:[%s13404_s3 + $0x148] sm:$0xff]  ;;  %v864_v59 = vsel %vm13654_vm13, %v14030_v60, %v14048_v47  ;;  %v5274_v22 = vld [vmem:[%s13404_s3 + $0x1b0] sm:$0xff] }
 0x3b1   :  { %v8015_v21 = vpop.permute.xlu1 %1869  ;;  %2230 = vrot.lane.b32.xlu0 %v6391_v37, %s6119_s25  ;;  %v901_v36 = vadd.f32 %v889_v62, %v827_v29  ;;  %v972_v10 = vadd.f32 %v960_v12, %v898_v23  ;;  %v1037_v14 = vmul.f32 %v5287_v18, %v1006_v24  ;;  %v14049_v16 = vld [vmem:[#allocation152_spill] sm:$0xff]  ;;  %v1161_v20 = vsel %vm119_vm1, %v14050_v8, %v14026_v26  ;;  %v5308_v24 = vld [vmem:[%s13404_s3 + $0x2c0] sm:$0xff]  ;;  %v5298_v47 = vld [vmem:[%s13404_s3 + $0x270] sm:$0xff] }
 0x3b2   :  { %v677_v25 = vadd.f32 %v665_v31, %v14049_v16  ;;  %v813_v15 = vmul.f32 %v5249_v32, %v790_v6  ;;  %v14051_v2 = vld [vmem:[#allocation76_spill] sm:$0xff]  ;;  %v752_v26 = vadd.f32 %v740_v9, %v678_v17  ;;  %v888_v6 = vmul.f32 %v5262_v11, %v861_v50  ;;  %v5286_v32 = vld [vmem:[%s13404_s3 + $0x210] sm:$0xff]  ;;  %v14054_v16 = vld [vmem:[#allocation63_spill] sm:$0xff] }
 0x3b3   :  { %v935_v60 = vsel %vm13640_vm14, %v14051_v2, %v14041_v61  ;;  %2232 = vrot.lane.b32.xlu1 %v6457_v51, %s6119_s25  ;;  %v8040_v18 = vpop.permute.xlu0 %1873  ;;  %v975_v31 = vadd.f32 %v963_v63, %v901_v36  ;;  %v1046_v35 = vadd.f32 %v1034_v58, %v972_v10  ;;  %v887_v62 = vmul.f32 %v5261_v4, %v864_v59  ;;  %v5273_v12 = vld [vmem:[%s13404_s3 + $0x1a8] sm:$0xff] }
 0x3b4   :  { %v751_v48 = vadd.f32 %v739_v38, %v677_v25  ;;  %v938_v61 = vsel %vm13640_vm14, %v14037_v41, %v14051_v2  ;;  %v14052_v9 = vld [vmem:[#allocation80_spill] sm:$0xff]  ;;  %v1152_v63 = vsel %vm119_vm1, %v14024_v55, %v14050_v8  ;;  %v826_v41 = vadd.f32 %v814_v44, %v752_v26  ;;  %v14056_v8 = vld [vmem:[#allocation65_spill] sm:$0xff]  ;;  %v5320_v26 = vld [vmem:[%s13404_s3 + $0x320] sm:$0xff] }
 0x3b5   :  { %v1009_v29 = vsel %vm13620_vm15, %v14052_v9, %v14046_v39  ;;  %v8059_v23 = vpop.permute.xlu1 %1875  ;;  %2236 = vrot.lane.b32.xlu0 %v6395_v40, %s6119_s25  ;;  %v962_v58 = vmul.f32 %v5274_v22, %v935_v60  ;;  %v1049_v3 = vadd.f32 %v1037_v14, %v975_v31  ;;  %v1180_v17 = vmul.f32 %v5308_v24, %v1161_v20  ;;  %v5285_v11 = vld [vmem:[%s13404_s3 + $0x208] sm:$0xff]  ;;  %v5310_v60 = vld [vmem:[%s13404_s3 + $0x2d0] sm:$0xff] }
 0x3b6   :  { %v825_v38 = vadd.f32 %v813_v15, %v751_v48  ;;  %v1012_v39 = vsel %vm13620_vm15, %v14042_v0, %v14052_v9  ;;  %v14053_v55 = vld [vmem:[#allocation84_spill] sm:$0xff]  ;;  %v5311_v0 = vld [vmem:[%s13404_s3 + $0x2d8] sm:$0xff]  ;;  %v900_v59 = vadd.f32 %v888_v6, %v826_v41  ;;  %v961_v36 = vmul.f32 %v5273_v12, %v938_v61  ;;  %v14057_v12 = vld [vmem:[#allocation35_spill] sm:$0xff] }
 0x3b7   :  { %v1082_v44 = vsel %vm90_vm0, %v14053_v55, %v14012_v52  ;;  %2238 = vrot.lane.b32.xlu1 %v6651_v45, %s6119_s25  ;;  %v8083_v50 = vpop.permute.xlu0 %1879  ;;  %v5309_v4 = vld [vmem:[%s13404_s3 + $0x2c8] sm:$0xff]  ;;  %v1036_v10 = vmul.f32 %v5286_v32, %v1009_v29  ;;  %v1119_v14 = vadd.f32 %v7867_v19, %v1046_v35  ;;  %v14055_v52 = vld [vmem:[#allocation34_spill] sm:$0xff]  ;;  %v1085_v19 = vsel %vm90_vm0, %v14013_v49, %v14053_v55 }
 0x3b8   :  { %v1231_v25 = vsel %vm149_vm2, %v14055_v52, %v14054_v16  ;;  %v1234_v20 = vsel %vm149_vm2, %v14056_v8, %v14055_v52  ;;  %v899_v15 = vadd.f32 %v887_v62, %v825_v38  ;;  %v5297_v22 = vld [vmem:[%s13404_s3 + $0x268] sm:$0xff]  ;;  %v974_v6 = vadd.f32 %v962_v58, %v900_v59  ;;  %v5334_v52 = vld [vmem:[%s13404_s3 + $0x390] sm:$0xff] }
 0x3b9   :  { %v8107_v2 = vpop.permute.xlu1 %1881  ;;  %2242 = vrot.lane.b32.xlu0 %v6399_v42, %s6119_s25  ;;  %v5321_v24 = vld [vmem:[%s13404_s3 + $0x328] sm:$0xff]  ;;  %v1035_v31 = vmul.f32 %v5285_v11, %v1012_v39  ;;  %v1122_v49 = vadd.f32 %v7869_v13, %v1049_v3  ;;  %v1109_v35 = vmul.f32 %v5298_v47, %v1082_v44  ;;  %v8122_v48 = vmul.f32 %v5309_v4, %v7892_v56  ;;  %v5322_v13 = vld [vmem:[%s13404_s3 + $0x330] sm:$0xff]  ;;  %v5323_v56 = vld [vmem:[%s13404_s3 + $0x338] sm:$0xff] }
 0x3ba   :  { %v1183_v62 = vmul.f32 %v5311_v0, %v1152_v63  ;;  %v1228_v61 = vsel %vm149_vm2, %v14054_v16, %v14057_v12  ;;  %v1225_v32 = vsel %vm149_vm2, %v14057_v12, %v14056_v8  ;;  %v973_v29 = vadd.f32 %v961_v36, %v899_v15  ;;  %v14058_v39 = vld [vmem:[#allocation67_spill] sm:$0xff]  ;;  %v14059_v47 = vld [vmem:[#allocation37_spill] sm:$0xff] }
 0x3bb   :  { %2244 = vrot.lane.b32.xlu1 %v6465_v53, %s6119_s25  ;;  %v8134_v9 = vpop.permute.xlu0 %1792  ;;  %v1048_v63 = vadd.f32 %v1036_v10, %v974_v6  ;;  %v1192_v41 = vadd.f32 %v1180_v17, %v1119_v14  ;;  %v1108_v58 = vmul.f32 %v5297_v22, %v1085_v19  ;;  %v1182_v3 = vmul.f32 %v5310_v60, %v7886_v1  ;;  %v5333_v17 = vld [vmem:[%s13404_s3 + $0x388] sm:$0xff]  ;;  %v5332_v1 = vld [vmem:[%s13404_s3 + $0x380] sm:$0xff]  ;;  %v14060_v4 = vld [vmem:[#allocation69_spill] sm:$0xff] }
 0x3bc   :  { %v8143_v38 = vmul.f32 %v5321_v24, %v1231_v25  ;;  %v1253_v11 = vmul.f32 %v5320_v26, %v1234_v20  ;;  %v1305_v55 = vsel %vm13639_vm9, %v14059_v47, %v14058_v39  ;;  %v1308_v0 = vsel %vm13639_vm9, %v14060_v4, %v14059_v47  ;;  %v14061_v25 = vld [vmem:[#allocation39_spill] sm:$0xff]  ;;  %v5335_v22 = vld [vmem:[%s13404_s3 + $0x398] sm:$0xff]  ;;  %v5345_v19 = vld [vmem:[%s13404_s3 + $0x3e8] sm:$0xff] }
 0x3bd   :  { %v8149_v44 = vpop.permute.xlu1 %1798  ;;  %2248 = vrot.lane.b32.xlu0 %v6403_v43, %s6119_s25  ;;  %v1047_v59 = vadd.f32 %v1035_v31, %v973_v29  ;;  %v1195_v36 = vadd.f32 %v1183_v62, %v1122_v49  ;;  %v1121_v10 = vadd.f32 %v1109_v35, %v1048_v63  ;;  %v1255_v14 = vmul.f32 %v5322_v13, %v1228_v61  ;;  %v5346_v60 = vld [vmem:[%s13404_s3 + $0x3f0] sm:$0xff]  ;;  %v14062_v24 = vld [vmem:[#allocation43_spill] sm:$0xff] }
 0x3be   :  { %v1256_v16 = vmul.f32 %v5323_v56, %v1225_v32  ;;  %v1302_v8 = vsel %vm13639_vm9, %v14058_v39, %v14061_v25  ;;  %v1299_v20 = vsel %vm13639_vm9, %v14061_v25, %v14060_v4  ;;  %v14063_v26 = vld [vmem:[#allocation71_spill] sm:$0xff]  ;;  %v14064_v31 = vld [vmem:[#allocation41_spill] sm:$0xff]  ;;  %v1265_v35 = vadd.f32 %v1253_v11, %v1192_v41  ;;  %v5347_v41 = vld [vmem:[%s13404_s3 + $0x3f8] sm:$0xff] }
 0x3bf   :  { %2250 = vrot.lane.b32.xlu1 %v13972_v27, %s6119_s25  ;;  %v8176_v15 = vpop.permute.xlu0 %1804  ;;  %v1376_v6 = vsel %vm13638_vm8, %v14063_v26, %v14062_v24  ;;  %v1379_v49 = vsel %vm13638_vm8, %v14064_v31, %v14063_v26  ;;  %v1120_v62 = vadd.f32 %v1108_v58, %v1047_v59  ;;  %v8195_v12 = vmul.f32 %v5333_v17, %v1305_v55  ;;  %v5344_v32 = vld [vmem:[%s13404_s3 + $0x3e0] sm:$0xff]  ;;  %v14065_v13 = vld [vmem:[#allocation73_spill] sm:$0xff]  ;;  %v5357_v58 = vld [vmem:[%s13404_s3 + $0x448] sm:$0xff] }
 0x3c0   :  { %v1327_v61 = vmul.f32 %v5332_v1, %v1308_v0  ;;  %v1373_v56 = vsel %vm13638_vm8, %v14062_v24, %v14065_v13  ;;  %v1382_v29 = vsel %vm13638_vm8, %v14065_v13, %v14064_v31  ;;  %v5358_v11 = vld [vmem:[%s13404_s3 + $0x450] sm:$0xff]  ;;  %v14067_v39 = vld [vmem:[#allocation47_spill] sm:$0xff]  ;;  %v1268_v4 = vadd.f32 %v1256_v16, %v1195_v36  ;;  %v5359_v36 = vld [vmem:[%s13404_s3 + $0x458] sm:$0xff] }
 0x3c1   :  { %v8208_v63 = vpop.permute.xlu1 %1810  ;;  %2160 = vrot.lane.b32.xlu0 %v6768_v46, %s13606_s28  ;;  %v14068_v47 = vld [vmem:[#allocation75_spill] sm:$0xff]  ;;  %v14069_v17 = vld [vmem:[#allocation45_spill] sm:$0xff]  ;;  %v1194_v0 = vadd.f32 %v1182_v3, %v1121_v10  ;;  %v1329_v59 = vmul.f32 %v5334_v52, %v1302_v8  ;;  %v1330_v25 = vmul.f32 %v5335_v22, %v1299_v20  ;;  %v8229_v24 = vmul.f32 %v5345_v19, %v1379_v49 }
 0x3c2   :  { %14066 = vst [vmem:[#allocation56_spill] sm:$0xff] %v8208_v63  ;;  %v1449_v55 = vsel %vm179_vm3, %v14068_v47, %v14067_v39  ;;  %v1452_v1 = vsel %vm179_vm3, %v14069_v17, %v14068_v47  ;;  %v8231_v26 = vmul.f32 %v5346_v60, %v1376_v6  ;;  %v5356_v13 = vld [vmem:[%s13404_s3 + $0x440] sm:$0xff]  ;;  %v14071_v3 = vld [vmem:[#allocation77_spill] sm:$0xff]  ;;  %v1339_v52 = vadd.f32 %v1327_v61, %v1265_v35  ;;  %v5369_v35 = vld [vmem:[%s13404_s3 + $0x508] sm:$0xff] }
 0x3c3   :  { %2166 = vrot.lane.b32.xlu1 %v6776_v33, %s13606_s28  ;;  %v8235_v31 = vpop.permute.xlu0 %1934  ;;  %v1446_v10 = vsel %vm179_vm3, %v14067_v39, %v14071_v3  ;;  %v1455_v16 = vsel %vm179_vm3, %v14071_v3, %v14069_v17  ;;  %v1193_v8 = vadd.f32 %v8122_v48, %v1120_v62  ;;  %v1401_v20 = vmul.f32 %v5344_v32, %v1382_v29  ;;  %v5368_v49 = vld [vmem:[%s13404_s3 + $0x500] sm:$0xff]  ;;  %v14075_v32 = vld [vmem:[#allocation49_spill] sm:$0xff] }
 0x3c4   :  { %14070 = vst [vmem:[#allocation29_spill] sm:$0xff] %v8235_v31  ;;  %v1404_v22 = vmul.f32 %v5347_v41, %v1373_v56  ;;  %v8252_v19 = vmul.f32 %v5357_v58, %v1452_v1  ;;  %v8254_v60 = vmul.f32 %v5358_v11, %v1449_v55  ;;  %v14073_v48 = vld [vmem:[#allocation51_spill] sm:$0xff]  ;;  %v1267_v29 = vadd.f32 %v1255_v14, %v1194_v0  ;;  %v5370_v39 = vld [vmem:[%s13404_s3 + $0x510] sm:$0xff]  ;;  %v5371_v1 = vld [vmem:[%s13404_s3 + $0x518] sm:$0xff] }
 0x3c5   :  { %v8256_v6 = vpop.permute.xlu1 %1936  ;;  %2172 = vrot.lane.b32.xlu0 %v6784_v54, %s13606_s28  ;;  %v14074_v62 = vld [vmem:[#allocation79_spill] sm:$0xff]  ;;  %v1342_v41 = vadd.f32 %v1330_v25, %v1268_v4  ;;  %v1474_v58 = vmul.f32 %v5356_v13, %v1455_v16  ;;  %v1477_v11 = vmul.f32 %v5359_v36, %v1446_v10  ;;  %v14076_v47 = vld [vmem:[#allocation81_spill] sm:$0xff]  ;;  %v5381_v0 = vld [vmem:[%s13404_s3 + $0x568] sm:$0xff]  ;;  %v1413_v25 = vadd.f32 %v1401_v20, %v1339_v52 }
 0x3c6   :  { %14072 = vst [vmem:[#allocation31_spill] sm:$0xff] %v8256_v6  ;;  %v1522_v61 = vsel %vm213_vm4, %v14074_v62, %v14073_v48  ;;  %v1525_v56 = vsel %vm213_vm4, %v14075_v32, %v14074_v62  ;;  %v1519_v55 = vsel %vm213_vm4, %v14073_v48, %v14076_v47  ;;  %v1528_v17 = vsel %vm213_vm4, %v14076_v47, %v14075_v32  ;;  %v5380_v4 = vld [vmem:[%s13404_s3 + $0x560] sm:$0xff]  ;;  %v14080_v10 = vld [vmem:[#allocation53_spill] sm:$0xff] }
 0x3c7   :  { %2178 = vrot.lane.b32.xlu1 %v6791_v34, %s13606_s28  ;;  %v8287_v14 = vpop.permute.xlu0 %1940  ;;  %v14078_v13 = vld [vmem:[#allocation55_spill] sm:$0xff]  ;;  %v1266_v48 = vadd.f32 %v8143_v38, %v1193_v8  ;;  %v1547_v62 = vmul.f32 %v5368_v49, %v1525_v56  ;;  %v8307_v32 = vmul.f32 %v5369_v35, %v1522_v61  ;;  %v5382_v47 = vld [vmem:[%s13404_s3 + $0x570] sm:$0xff]  ;;  %v1341_v38 = vadd.f32 %v1329_v59, %v1267_v29  ;;  %v5383_v8 = vld [vmem:[%s13404_s3 + $0x578] sm:$0xff]  ;;  %s14275_s28 = smov 30  }
 0x3c8   :  { %14077 = vst [vmem:[#allocation58_spill] sm:$0xff] %v8287_v14  ;;  %v14079_v36 = vld [vmem:[#allocation83_spill] sm:$0xff]  ;;  %v14081_v52 = vld [vmem:[#allocation85_spill] sm:$0xff]  ;;  %v1416_v49 = vadd.f32 %v1404_v22, %v1342_v41  ;;  %v657_v35 = vld [vmem:[%s13404_s3 + $0x48] sm:$0xff]  ;;  %v8341_v29 = vmul.f32 %v5370_v39, %v1519_v55  ;;  %v1550_v22 = vmul.f32 %v5371_v1, %v1528_v17  ;;  %v1486_v31 = vadd.f32 %v1474_v58, %v1413_v25 }
 0x3c9   :  { %v1596_v3 = vsel %vm13637_vm7, %v14079_v36, %v14078_v13  ;;  %v1599_v16 = vsel %vm13637_vm7, %v14080_v10, %v14079_v36  ;;  %v1593_v20 = vsel %vm13637_vm7, %v14078_v13, %v14081_v52  ;;  %v1602_v6 = vsel %vm13637_vm7, %v14081_v52, %v14080_v10  ;;  %v8320_v36 = vpop.permute.xlu1 %1942  ;;  %2304 = vrot.lane.b32.xlu0 %v6391_v37, %s13648_s24  ;;  %v14083_v61 = vld [vmem:[#allocation87_spill] sm:$0xff]  ;;  %v14084_v56 = vld [vmem:[#allocation86_spill] sm:$0xff]  ;;  %v658_v10 = vld [vmem:[%s13404_s3 + $0x50] sm:$0xff] }
 0x3ca   :  { %14082 = vst [vmem:[#allocation6_spill] sm:$0xff] %v8320_v36  ;;  %v644_v13 = vsel %vm635_vm10, %v14084_v56, %v14083_v61  ;;  %v14085_v37 = vld [vmem:[#allocation88_spill] sm:$0xff]  ;;  %v1621_v41 = vmul.f32 %v5380_v4, %v1599_v16  ;;  %v8343_v52 = vmul.f32 %v5381_v0, %v1596_v3  ;;  %v1340_v14 = vadd.f32 %v8195_v12, %v1266_v48  ;;  %v656_v63 = vld [vmem:[%s13404_s3 + $0x40] sm:$0xff]  ;;  %v659_v39 = vld [vmem:[%s13404_s3 + $0x58] sm:$0xff] }
 0x3cb   :  { %v641_v59 = vsel %vm635_vm10, %v14083_v61, %v14085_v37  ;;  %2306 = vrot.lane.b32.xlu1 %v6457_v51, %s13648_s24  ;;  %v8347_v36 = vpop.permute.xlu0 %1946  ;;  %v14086_v55 = vld [vmem:[#allocation89_spill] sm:$0xff]  ;;  %v8364_v58 = vmul.f32 %v5382_v47, %v1593_v20  ;;  %v8366_v12 = vmul.f32 %v5383_v8, %v1602_v6  ;;  %v669_v1 = vmul.f32 %v657_v35, %v644_v13  ;;  %v5241_v16 = vld [vmem:[%s13404_s3 + $0xa8] sm:$0xff]  ;;  %v14088_v48 = vld [vmem:[#allocation91_spill] sm:$0xff] }
 0x3cc   :  { %v638_v17 = vsel %vm635_vm10, %v14085_v37, %v14086_v55  ;;  %v647_v51 = vsel %vm635_vm10, %v14086_v55, %v14084_v56  ;;  %v670_v4 = vmul.f32 %v658_v10, %v641_v59  ;;  %v1415_v25 = vadd.f32 %v8231_v26, %v1341_v38  ;;  %v14089_v61 = vld [vmem:[#allocation90_spill] sm:$0xff]  ;;  %v5242_v47 = vld [vmem:[%s13404_s3 + $0xb0] sm:$0xff]  ;;  %v14090_v20 = vld [vmem:[#allocation92_spill] sm:$0xff] }
 0x3cd   :  { %v8368_v0 = vpop.permute.xlu1 %1948  ;;  %2310 = vrot.lane.b32.xlu0 %v6395_v40, %s13648_s24  ;;  %v1489_v3 = vadd.f32 %v1477_v11, %v1416_v49  ;;  %v717_v6 = vsel %vm708_vm11, %v14089_v61, %v14088_v48  ;;  %v714_v40 = vsel %vm708_vm11, %v14088_v48, %v14090_v20  ;;  %v668_v26 = vmul.f32 %v656_v63, %v647_v51  ;;  %v5240_v38 = vld [vmem:[%s13404_s3 + $0xa0] sm:$0xff]  ;;  %v5243_v8 = vld [vmem:[%s13404_s3 + $0xb8] sm:$0xff]  ;;  %v14091_v49 = vld [vmem:[#allocation93_spill] sm:$0xff] }
 0x3ce   :  { %14087 = vst [vmem:[#allocation62_spill] sm:$0xff] %v8368_v0  ;;  %v671_v11 = vmul.f32 %v659_v39, %v638_v17  ;;  %v711_v35 = vsel %vm708_vm11, %v14090_v20, %v14091_v49  ;;  %v720_v56 = vsel %vm708_vm11, %v14091_v49, %v14089_v61  ;;  %v1559_v13 = vadd.f32 %v1547_v62, %v1486_v31  ;;  %v5253_v10 = vld [vmem:[%s13404_s3 + $0x108] sm:$0xff]  ;;  %v14093_v37 = vld [vmem:[#allocation95_spill] sm:$0xff]  ;;  %v14094_v59 = vld [vmem:[#allocation94_spill] sm:$0xff] }
 0x3cf   :  { %2312 = vrot.lane.b32.xlu1 %v6651_v45, %s13648_s24  ;;  %v8403_v63 = vpop.permute.xlu0 %1952  ;;  %v791_v39 = vsel %vm782_vm12, %v14094_v59, %v14093_v37  ;;  %v5254_v55 = vld [vmem:[%s13404_s3 + $0x110] sm:$0xff]  ;;  %v14095_v17 = vld [vmem:[#allocation96_spill] sm:$0xff]  ;;  %v1414_v31 = vadd.f32 %v8229_v24, %v1340_v14  ;;  %v743_v62 = vmul.f32 %v5241_v16, %v717_v6  ;;  %v744_v51 = vmul.f32 %v5242_v47, %v714_v40  ;;  %v5252_v48 = vld [vmem:[%s13404_s3 + $0x100] sm:$0xff] }
 0x3d0   :  { %14092 = vst [vmem:[#allocation57_spill] sm:$0xff] %v8403_v63  ;;  %v788_v45 = vsel %vm782_vm12, %v14093_v37, %v14095_v17  ;;  %v5255_v61 = vld [vmem:[%s13404_s3 + $0x118] sm:$0xff]  ;;  %v14096_v20 = vld [vmem:[#allocation97_spill] sm:$0xff]  ;;  %v681_v16 = vadd.f32 %v669_v1, %v7395_v28  ;;  %v682_v6 = vadd.f32 %v670_v4, %v7676_v30  ;;  %v742_v47 = vmul.f32 %v5240_v38, %v720_v56 }
 0x3d1   :  { %v785_v49 = vsel %vm782_vm12, %v14095_v17, %v14096_v20  ;;  %v794_v24 = vsel %vm782_vm12, %v14096_v20, %v14094_v59  ;;  %v8434_v14 = vpop.permute.xlu1 %1954  ;;  %2316 = vrot.lane.b32.xlu0 %v6399_v42, %s13648_s24  ;;  %v745_v40 = vmul.f32 %v5243_v8, %v711_v35  ;;  %v8441_v37 = vadd.f32 %v8254_v60, %v1415_v25  ;;  %v14099_v20 = vld [vmem:[#allocation44_spill] sm:$0xff] }
 0x3d2   :  { %14097 = vst [vmem:[#allocation30_spill] sm:$0xff] %v8434_v14  ;;  %v8443_v17 = vadd.f32 %v1550_v22, %v1489_v3  ;;  %v817_v63 = vmul.f32 %v5253_v10, %v791_v39  ;;  %v818_v0 = vmul.f32 %v5254_v55, %v788_v45  ;;  %v680_v42 = vadd.f32 %v668_v26, %v7427_v57  ;;  %v5265_v57 = vld [vmem:[%s13404_s3 + $0x168] sm:$0xff]  ;;  %v14101_v26 = vld [vmem:[#allocation99_spill] sm:$0xff]  ;;  %v5267_v10 = vld [vmem:[%s13404_s3 + $0x178] sm:$0xff] }
 0x3d3   :  { %2318 = vrot.lane.b32.xlu1 %v6465_v53, %s13648_s24  ;;  %v8447_v59 = vpop.permute.xlu0 %1865  ;;  %v683_v28 = vadd.f32 %v671_v11, %v14099_v20  ;;  %v816_v1 = vmul.f32 %v5252_v48, %v794_v24  ;;  %v819_v30 = vmul.f32 %v5255_v61, %v785_v49  ;;  %v8451_v4 = vadd.f32 %v1621_v41, %v1559_v13  ;;  %v14102_v11 = vld [vmem:[#allocation98_spill] sm:$0xff]  ;;  %v14103_v8 = vld [vmem:[#allocation100_spill] sm:$0xff]  ;;  %v5264_v13 = vld [vmem:[%s13404_s3 + $0x160] sm:$0xff] }
 0x3d4   :  { %14098 = vst [vmem:[#allocation28_spill] sm:$0xff] %v8447_v59  ;;  %v755_v38 = vadd.f32 %v743_v62, %v681_v16  ;;  %v756_v60 = vadd.f32 %v744_v51, %v682_v6  ;;  %v8454_v22 = vadd.f32 %v8252_v19, %v1414_v31  ;;  %v754_v53 = vadd.f32 %v742_v47, %v680_v42  ;;  %v5266_v19 = vld [vmem:[%s13404_s3 + $0x170] sm:$0xff]  ;;  %v5277_v62 = vld [vmem:[%s13404_s3 + $0x1c8] sm:$0xff]  ;;  %v14106_v51 = vld [vmem:[#allocation103_spill] sm:$0xff] }
 0x3d5   :  { %v8456_v25 = vpop.permute.xlu1 %1871  ;;  %2322 = vrot.lane.b32.xlu0 %v6403_v43, %s13648_s24  ;;  %v757_v3 = vadd.f32 %v745_v40, %v683_v28  ;;  %v865_v41 = vsel %vm13654_vm13, %v14102_v11, %v14101_v26  ;;  %v862_v43 = vsel %vm13654_vm13, %v14101_v26, %v14103_v8  ;;  %v14104_v39 = vld [vmem:[#allocation101_spill] sm:$0xff]  ;;  %v14107_v48 = vld [vmem:[#allocation102_spill] sm:$0xff]  ;;  %v14108_v24 = vld [vmem:[#allocation104_spill] sm:$0xff] }
 0x3d6   :  { %14100 = vst [vmem:[#allocation7_spill] sm:$0xff] %v8456_v25  ;;  %v829_v35 = vadd.f32 %v817_v63, %v755_v38  ;;  %v830_v56 = vadd.f32 %v818_v0, %v756_v60  ;;  %v859_v55 = vsel %vm13654_vm13, %v14103_v8, %v14104_v39  ;;  %v868_v45 = vsel %vm13654_vm13, %v14104_v39, %v14102_v11  ;;  %v5278_v49 = vld [vmem:[%s13404_s3 + $0x1d0] sm:$0xff]  ;;  %v5276_v47 = vld [vmem:[%s13404_s3 + $0x1c0] sm:$0xff]  ;;  %v5279_v40 = vld [vmem:[%s13404_s3 + $0x1d8] sm:$0xff] }
 0x3d7   :  { %2324 = vrot.lane.b32.xlu1 %v13972_v27, %s13648_s24  ;;  %v8490_v0 = vpop.permute.xlu0 %1877  ;;  %v828_v63 = vadd.f32 %v816_v1, %v754_v53  ;;  %v831_v31 = vadd.f32 %v819_v30, %v757_v3  ;;  %v939_v61 = vsel %vm13640_vm14, %v14107_v48, %v14106_v51  ;;  %v936_v27 = vsel %vm13640_vm14, %v14106_v51, %v14108_v24  ;;  %v14109_v42 = vld [vmem:[#allocation105_spill] sm:$0xff]  ;;  %v5289_v60 = vld [vmem:[%s13404_s3 + $0x228] sm:$0xff]  ;;  %v14111_v53 = vld [vmem:[#allocation107_spill] sm:$0xff] }
 0x3d8   :  { %14105 = vst [vmem:[#allocation8_spill] sm:$0xff] %v8490_v0  ;;  %v891_v16 = vmul.f32 %v5265_v57, %v865_v41  ;;  %v892_v6 = vmul.f32 %v5266_v19, %v862_v43  ;;  %v933_v20 = vsel %vm13640_vm14, %v14108_v24, %v14109_v42  ;;  %v942_v28 = vsel %vm13640_vm14, %v14109_v42, %v14107_v48  ;;  %v14112_v3 = vld [vmem:[#allocation106_spill] sm:$0xff]  ;;  %v5290_v26 = vld [vmem:[%s13404_s3 + $0x230] sm:$0xff]  ;;  %v14113_v11 = vld [vmem:[#allocation108_spill] sm:$0xff] }
 0x3d9   :  { %v8520_v1 = vpop.permute.xlu1 %1883  ;;  %2234 = vrot.lane.b32.xlu0 %v6768_v46, %s6119_s25  ;;  %v890_v30 = vmul.f32 %v5264_v13, %v868_v45  ;;  %v893_v38 = vmul.f32 %v5267_v10, %v859_v55  ;;  %v1013_v57 = vsel %vm13620_vm15, %v14112_v3, %v14111_v53  ;;  %v1010_v41 = vsel %vm13620_vm15, %v14111_v53, %v14113_v11  ;;  %v5288_v43 = vld [vmem:[%s13404_s3 + $0x220] sm:$0xff]  ;;  %v5291_v13 = vld [vmem:[%s13404_s3 + $0x238] sm:$0xff]  ;;  %v14114_v10 = vld [vmem:[#allocation109_spill] sm:$0xff] }
 0x3da   :  { %14110 = vst [vmem:[#allocation66_spill] sm:$0xff] %v8520_v1  ;;  %v965_v19 = vmul.f32 %v5277_v62, %v939_v61  ;;  %v966_v8 = vmul.f32 %v5278_v49, %v936_v27  ;;  %v1007_v39 = vsel %vm13620_vm15, %v14113_v11, %v14114_v10  ;;  %v1016_v55 = vsel %vm13620_vm15, %v14114_v10, %v14112_v3  ;;  %v5301_v48 = vld [vmem:[%s13404_s3 + $0x288] sm:$0xff]  ;;  %v14116_v61 = vld [vmem:[#allocation111_spill] sm:$0xff]  ;;  %v14117_v49 = vld [vmem:[#allocation110_spill] sm:$0xff] }
 0x3db   :  { %2240 = vrot.lane.b32.xlu1 %v6776_v33, %s6119_s25  ;;  %v8554_v45 = vpop.permute.xlu0 %2008  ;;  %v964_v62 = vmul.f32 %v5276_v47, %v942_v28  ;;  %v967_v51 = vmul.f32 %v5279_v40, %v933_v20  ;;  %v1086_v24 = vsel %vm90_vm0, %v14117_v49, %v14116_v61  ;;  %v5302_v27 = vld [vmem:[%s13404_s3 + $0x290] sm:$0xff]  ;;  %v14118_v42 = vld [vmem:[#allocation112_spill] sm:$0xff]  ;;  %v903_v47 = vadd.f32 %v891_v16, %v829_v35 }
 0x3dc   :  { %14115 = vst [vmem:[#allocation10_spill] sm:$0xff] %v8554_v45  ;;  %v1083_v53 = vsel %vm90_vm0, %v14116_v61, %v14118_v42  ;;  %v904_v40 = vadd.f32 %v892_v6, %v830_v56  ;;  %v1039_v20 = vmul.f32 %v5289_v60, %v1013_v57  ;;  %v1040_v28 = vmul.f32 %v5290_v26, %v1010_v41  ;;  %v5303_v60 = vld [vmem:[%s13404_s3 + $0x298] sm:$0xff]  ;;  %v14119_v57 = vld [vmem:[#allocation113_spill] sm:$0xff]  ;;  %v14120_v26 = vld [vmem:[#allocation115_spill] sm:$0xff] }
 0x3dd   :  { %v8570_v3 = vpop.permute.xlu1 %2010  ;;  %2246 = vrot.lane.b32.xlu0 %v6784_v54, %s6119_s25  ;;  %v902_v11 = vadd.f32 %v890_v30, %v828_v63  ;;  %v905_v10 = vadd.f32 %v893_v38, %v831_v31  ;;  %v1038_v45 = vmul.f32 %v5288_v43, %v1016_v55  ;;  %v1041_v1 = vmul.f32 %v5291_v13, %v1007_v39  ;;  %v5300_v38 = vld [vmem:[%s13404_s3 + $0x280] sm:$0xff]  ;;  %v14121_v41 = vld [vmem:[#allocation114_spill] sm:$0xff]  ;;  %v14122_v43 = vld [vmem:[#allocation116_spill] sm:$0xff] }
 0x3de   :  { %v977_v0 = vadd.f32 %v965_v19, %v903_v47  ;;  %v978_v59 = vadd.f32 %v966_v8, %v904_v40  ;;  %v1112_v25 = vmul.f32 %v5301_v48, %v1086_v24  ;;  %v1113_v14 = vmul.f32 %v5302_v27, %v1083_v53  ;;  %v5314_v8 = vld [vmem:[%s13404_s3 + $0x2f0] sm:$0xff]  ;;  %v5312_v39 = vld [vmem:[%s13404_s3 + $0x2e0] sm:$0xff]  ;;  %v5315_v55 = vld [vmem:[%s13404_s3 + $0x2f8] sm:$0xff] }
 0x3df   :  { %2252 = vrot.lane.b32.xlu1 %v6791_v34, %s6119_s25  ;;  %v8576_v35 = vpop.permute.xlu0 %2014  ;;  %v8580_v56 = vadd.f32 %v8341_v29, %v8441_v37  ;;  %v8584_v16 = vadd.f32 %v8366_v12, %v8443_v17  ;;  %v976_v63 = vadd.f32 %v964_v62, %v902_v11  ;;  %v979_v31 = vadd.f32 %v967_v51, %v905_v10  ;;  %v5325_v61 = vld [vmem:[%s13404_s3 + $0x348] sm:$0xff]  ;;  %v14125_v24 = vld [vmem:[#allocation118_spill] sm:$0xff]  ;;  %v14127_v11 = vld [vmem:[#allocation121_spill] sm:$0xff] }
 0x3e0   :  { %v1051_v6 = vadd.f32 %v1039_v20, %v977_v0  ;;  %v1052_v30 = vadd.f32 %v1040_v28, %v978_v59  ;;  %v1080_v29 = vsel %vm90_vm0, %v14118_v42, %v14119_v57  ;;  %v1089_v12 = vsel %vm90_vm0, %v14119_v57, %v14117_v49  ;;  %v5313_v0 = vld [vmem:[%s13404_s3 + $0x2e8] sm:$0xff]  ;;  %v14124_v49 = vld [vmem:[#allocation119_spill] sm:$0xff]  ;;  %v5326_v42 = vld [vmem:[%s13404_s3 + $0x350] sm:$0xff] }
 0x3e1   :  { %v8600_v37 = vpop.permute.xlu1 %2016  ;;  %2308 = vrot.lane.b32.xlu0 %v6768_v46, %s13648_s24  ;;  %v1050_v17 = vadd.f32 %v1038_v45, %v976_v63  ;;  %v1053_v59 = vadd.f32 %v1041_v1, %v979_v31  ;;  %v1159_v19 = vsel %vm119_vm1, %v14121_v41, %v14120_v26  ;;  %v1156_v46 = vsel %vm119_vm1, %v14120_v26, %v14122_v43  ;;  %v14123_v45 = vld [vmem:[#allocation117_spill] sm:$0xff]  ;;  %v14126_v53 = vld [vmem:[#allocation120_spill] sm:$0xff]  ;;  %v5324_v20 = vld [vmem:[%s13404_s3 + $0x340] sm:$0xff] }
 0x3e2   :  { %v1124_v13 = vadd.f32 %v1112_v25, %v1051_v6  ;;  %v1125_v1 = vadd.f32 %v1113_v14, %v1052_v30  ;;  %v1153_v62 = vsel %vm119_vm1, %v14122_v43, %v14123_v45  ;;  %v1162_v51 = vsel %vm119_vm1, %v14123_v45, %v14121_v41  ;;  %v5327_v28 = vld [vmem:[%s13404_s3 + $0x358] sm:$0xff]  ;;  %v14131_v43 = vld [vmem:[#allocation125_spill] sm:$0xff] }
 0x3e3   :  { %2314 = vrot.lane.b32.xlu1 %v6776_v33, %s13648_s24  ;;  %v8634_v14 = vpop.permute.xlu0 %2020  ;;  %v1111_v25 = vmul.f32 %v5300_v38, %v1089_v12  ;;  %v1114_v48 = vmul.f32 %v5303_v60, %v1080_v29  ;;  %v1232_v27 = vsel %vm149_vm2, %v14125_v24, %v14124_v49  ;;  %v1229_v33 = vsel %vm149_vm2, %v14124_v49, %v14126_v53  ;;  %v5337_v38 = vld [vmem:[%s13404_s3 + $0x3a8] sm:$0xff]  ;;  %v14128_v60 = vld [vmem:[#allocation123_spill] sm:$0xff]  ;;  %v14129_v57 = vld [vmem:[#allocation122_spill] sm:$0xff] }
 0x3e4   :  { %v1185_v47 = vmul.f32 %v5313_v0, %v1159_v19  ;;  %v1186_v40 = vmul.f32 %v5314_v8, %v1156_v46  ;;  %v1226_v10 = vsel %vm149_vm2, %v14126_v53, %v14127_v11  ;;  %v1235_v63 = vsel %vm149_vm2, %v14127_v11, %v14125_v24  ;;  %v5338_v12 = vld [vmem:[%s13404_s3 + $0x3b0] sm:$0xff]  ;;  %v14130_v0 = vld [vmem:[#allocation124_spill] sm:$0xff]  ;;  %v5336_v19 = vld [vmem:[%s13404_s3 + $0x3a0] sm:$0xff] }
 0x3e5   :  { %v8664_v31 = vpop.permute.xlu1 %2022  ;;  %2320 = vrot.lane.b32.xlu0 %v6784_v54, %s13648_s24  ;;  %v1184_v6 = vmul.f32 %v5312_v39, %v1162_v51  ;;  %v1187_v30 = vmul.f32 %v5315_v55, %v1153_v62  ;;  %v1306_v29 = vsel %vm13639_vm9, %v14129_v57, %v14128_v60  ;;  %v1303_v54 = vsel %vm13639_vm9, %v14128_v60, %v14130_v0  ;;  %v5339_v8 = vld [vmem:[%s13404_s3 + $0x3b8] sm:$0xff] }
 0x3e6   :  { %vm13636_vm15 = vcmp.lt.s32.totalorder %v6243_v7, 114  ;;  %v1258_v26 = vmul.f32 %v5325_v61, %v1232_v27  ;;  %v1259_v41 = vmul.f32 %v5326_v42, %v1229_v33  ;;  %v1300_v46 = vsel %vm13639_vm9, %v14130_v0, %v14131_v43 }
 0x3e7   :  { %v1309_v39 = vsel %vm13639_vm9, %v14131_v43, %v14129_v57  ;;  %2326 = vrot.lane.b32.xlu1 %v6791_v34, %s13648_s24  ;;  %v8699_v55 = vpop.permute.xlu0 %2026  ;;  %v1123_v45 = vadd.f32 %v1111_v25, %v1050_v17  ;;  %v1126_v62 = vadd.f32 %v1114_v48, %v1053_v59  ;;  %v1257_v51 = vmul.f32 %v5324_v20, %v1235_v63  ;;  %v5349_v34 = vld [vmem:[%s13404_s3 + $0x408] sm:$0xff]  ;;  %v14134_v17 = vld [vmem:[#allocation127_spill] sm:$0xff]  ;;  %v14135_v59 = vld [vmem:[#allocation126_spill] sm:$0xff] }
 0x3e8   :  { %14132 = vst [vmem:[#allocation12_spill] sm:$0xff] %v8699_v55  ;;  %v1260_v61 = vmul.f32 %v5327_v28, %v1226_v10  ;;  %v1197_v49 = vadd.f32 %v1185_v47, %v1124_v13  ;;  %v1198_v24 = vadd.f32 %v1186_v40, %v1125_v1  ;;  %v1332_v27 = vmul.f32 %v5337_v38, %v1306_v29  ;;  %v5350_v40 = vld [vmem:[%s13404_s3 + $0x410] sm:$0xff]  ;;  %v14137_v20 = vld [vmem:[#allocation128_spill] sm:$0xff]  ;;  %v5348_v10 = vld [vmem:[%s13404_s3 + $0x400] sm:$0xff] }
 0x3e9   :  { %v1333_v42 = vmul.f32 %v5338_v12, %v1303_v54  ;;  %v8701_v53 = vpop.permute.xlu1 %2028  ;;  %v1196_v33 = vadd.f32 %v1184_v6, %v1123_v45  ;;  %v1199_v11 = vadd.f32 %v1187_v30, %v1126_v62  ;;  %v1331_v60 = vmul.f32 %v5336_v19, %v1309_v39  ;;  %v5351_v30 = vld [vmem:[%s13404_s3 + $0x418] sm:$0xff]  ;;  %v5361_v29 = vld [vmem:[%s13404_s3 + $0x468] sm:$0xff]  ;;  %v14139_v12 = vld [vmem:[#allocation131_spill] sm:$0xff] }
 0x3ea   :  { %14133 = vst [vmem:[#allocation70_spill] sm:$0xff] %v8701_v53  ;;  %v1334_v0 = vmul.f32 %v5339_v8, %v1300_v46  ;;  %v1270_v57 = vadd.f32 %v1258_v26, %v1197_v49  ;;  %v1271_v43 = vadd.f32 %v1259_v41, %v1198_v24  ;;  %v1380_v13 = vsel %vm13638_vm8, %v14135_v59, %v14134_v17  ;;  %v14140_v54 = vld [vmem:[#allocation130_spill] sm:$0xff]  ;;  %v5360_v39 = vld [vmem:[%s13404_s3 + $0x460] sm:$0xff]  ;;  %v14142_v45 = vld [vmem:[#allocation133_spill] sm:$0xff] }
 0x3eb   :  { %v8712_v1 = vadd.f32 %v8307_v32, %v8454_v22  ;;  %v8714_v25 = vpop.permute.xlu0 %1938  ;;  %v1269_v48 = vadd.f32 %v1257_v51, %v1196_v33  ;;  %v1272_v47 = vadd.f32 %v1260_v61, %v1199_v11  ;;  %v1377_v28 = vsel %vm13638_vm8, %v14134_v17, %v14137_v20  ;;  %v14138_v32 = vld [vmem:[#allocation129_spill] sm:$0xff]  ;;  %v14143_v24 = vld [vmem:[#allocation132_spill] sm:$0xff] }
 0x3ec   :  { %14136 = vst [vmem:[#allocation33_spill] sm:$0xff] %v8714_v25  ;;  %v1383_v22 = vsel %vm13638_vm8, %v14138_v32, %v14135_v59  ;;  %v1344_v63 = vadd.f32 %v1332_v27, %v1270_v57  ;;  %v1345_v6 = vadd.f32 %v1333_v42, %v1271_v43  ;;  %v1374_v38 = vsel %vm13638_vm8, %v14137_v20, %v14138_v32  ;;  %v5362_v49 = vld [vmem:[%s13404_s3 + $0x470] sm:$0xff]  ;;  %v5363_v42 = vld [vmem:[%s13404_s3 + $0x478] sm:$0xff]  ;;  %v5372_v57 = vld [vmem:[%s13404_s3 + $0x520] sm:$0xff] }
 0x3ed   :  { %v1453_v26 = vsel %vm179_vm3, %v14140_v54, %v14139_v12  ;;  %v8744_v41 = vpop.permute.xlu1 %1944  ;;  %v1343_v19 = vadd.f32 %v1331_v60, %v1269_v48  ;;  %v1346_v8 = vadd.f32 %v1334_v0, %v1272_v47  ;;  %v1406_v46 = vmul.f32 %v5349_v34, %v1380_v13  ;;  %v14145_v43 = vld [vmem:[#allocation135_spill] sm:$0xff]  ;;  %v14146_v34 = vld [vmem:[#allocation134_spill] sm:$0xff]  ;;  %v5373_v59 = vld [vmem:[%s13404_s3 + $0x528] sm:$0xff] }
 0x3ee   :  { %14141 = vst [vmem:[#allocation59_spill] sm:$0xff] %v8744_v41  ;;  %v1456_v62 = vsel %vm179_vm3, %v14142_v45, %v14140_v54  ;;  %v1407_v51 = vmul.f32 %v5350_v40, %v1377_v28  ;;  %v1405_v61 = vmul.f32 %v5348_v10, %v1383_v22  ;;  %v1450_v27 = vsel %vm179_vm3, %v14139_v12, %v14143_v24  ;;  %v14147_v13 = vld [vmem:[#allocation136_spill] sm:$0xff]  ;;  %v5374_v40 = vld [vmem:[%s13404_s3 + $0x530] sm:$0xff]  ;;  %v5375_v20 = vld [vmem:[%s13404_s3 + $0x538] sm:$0xff] }
 0x3ef   :  { %v1447_v33 = vsel %vm179_vm3, %v14143_v24, %v14142_v45  ;;  %v8767_v11 = vpop.permute.xlu0 %1950  ;;  %v1408_v60 = vmul.f32 %v5351_v30, %v1374_v38  ;;  %v1479_v0 = vmul.f32 %v5361_v29, %v1453_v26  ;;  %v1526_v17 = vsel %vm213_vm4, %v14146_v34, %v14145_v43  ;;  %v14148_v28 = vld [vmem:[#allocation137_spill] sm:$0xff]  ;;  %v5388_v22 = vld [vmem:[%s13404_s3 + $0x5a0] sm:$0xff]  ;;  %v14149_v30 = vld [vmem:[#allocation140_spill] sm:$0xff] }
 0x3f0   :  { %14144 = vst [vmem:[#allocation32_spill] sm:$0xff] %v8767_v11  ;;  %v1523_v48 = vsel %vm213_vm4, %v14145_v43, %v14147_v13  ;;  %v1478_v47 = vmul.f32 %v5360_v39, %v1456_v62  ;;  %v1520_v10 = vsel %vm213_vm4, %v14147_v13, %v14148_v28  ;;  %v1529_v32 = vsel %vm213_vm4, %v14148_v28, %v14146_v34  ;;  %v14150_v38 = vld [vmem:[#allocation138_spill] sm:$0xff]  ;;  %v5392_v45 = vld [vmem:[%s13404_s3 + $0x5c0] sm:$0xff]  ;;  %v14152_v62 = vld [vmem:[#allocation141_spill] sm:$0xff] }
 0x3f1   :  { %v1672_v29 = vsel %vm13636_vm15, %v14150_v38, %v14149_v30  ;;  %v8804_v12 = vpop.permute.xlu1 %1956  ;;  %v1418_v54 = vadd.f32 %v1406_v46, %v1344_v63  ;;  %v1480_v26 = vmul.f32 %v5362_v49, %v1450_v27  ;;  %v1481_v39 = vmul.f32 %v5363_v42, %v1447_v33  ;;  %v14153_v24 = vld [vmem:[#allocation139_spill] sm:$0xff] }
 0x3f2   :  { %14151 = vst [vmem:[#allocation60_spill] sm:$0xff] %v8804_v12  ;;  %v1673_v43 = vsel %vm13636_vm15, %v14153_v24, %v14152_v62  ;;  %v1419_v34 = vadd.f32 %v1407_v51, %v1345_v6  ;;  %v1417_v13 = vadd.f32 %v1405_v61, %v1343_v19  ;;  %v1551_v28 = vmul.f32 %v5372_v57, %v1526_v17  ;;  %v5389_v19 = vld [vmem:[%s13404_s3 + $0x5a8] sm:$0xff]  ;;  %v14155_v51 = vld [vmem:[#allocation142_spill] sm:$0xff]  ;;  %v5390_v57 = vld [vmem:[%s13404_s3 + $0x5b0] sm:$0xff] }
 0x3f3   :  { %v1552_v11 = vmul.f32 %v5373_v59, %v1523_v48  ;;  %v8813_v25 = vpop.permute.xlu0 %2082  ;;  %v1420_v41 = vadd.f32 %v1408_v60, %v1346_v8  ;;  %v1553_v12 = vmul.f32 %v5374_v40, %v1520_v10  ;;  %v1554_v63 = vmul.f32 %v5375_v20, %v1529_v32  ;;  %v5393_v60 = vld [vmem:[%s13404_s3 + $0x5c8] sm:$0xff]  ;;  %v14158_v48 = vld [vmem:[#allocation19_spill] sm:$0xff]  ;;  %v5391_v40 = vld [vmem:[%s13404_s3 + $0x5b8] sm:$0xff] }
 0x3f4   :  { %v1691_v46 = vmul.f32 %v5388_v22, %v1672_v29  ;;  %v8817_v49 = vadd.f32 %v8364_v58, %v8580_v56  ;;  %v1491_v27 = vadd.f32 %v1479_v0, %v1418_v54  ;;  %v1490_v42 = vadd.f32 %v1478_v47, %v1417_v13  ;;  %v14156_v0 = vld [vmem:[#allocation143_spill] sm:$0xff]  ;;  %v14157_v17 = vld [vmem:[#allocation144_spill] sm:$0xff]  ;;  %v5394_v22 = vld [vmem:[%s13404_s3 + $0x5d0] sm:$0xff] }
 0x3f5   :  { %v1695_v33 = vmul.f32 %v5392_v45, %v1673_v43  ;;  %v8819_v53 = vpop.permute.xlu1 %2084  ;;  %v1492_v55 = vadd.f32 %v1480_v26, %v1419_v34  ;;  %v1493_v6 = vadd.f32 %v1481_v39, %v1420_v41  ;;  %v1669_v8 = vsel %vm13636_vm15, %v14149_v30, %v14155_v51  ;;  %v14159_v30 = vld [vmem:[#allocation145_spill] sm:$0xff]  ;;  %v5384_v26 = vld [vmem:[%s13404_s3 + $0x580] sm:$0xff]  ;;  %v14162_v45 = vld [vmem:[#allocation146_spill] sm:$0xff] }
 0x3f6   :  { %14154 = vst [vmem:[#allocation14_spill] sm:$0xff] %v8819_v53  ;;  %v1634_v58 = vadd.f32 %v8343_v52, %v8712_v1  ;;  %v1563_v56 = vadd.f32 %v1551_v28, %v1490_v42  ;;  %v1564_v61 = vadd.f32 %v1552_v11, %v1491_v27  ;;  %v1670_v41 = vsel %vm13636_vm15, %v14152_v62, %v14156_v0  ;;  %v14161_v39 = vld [vmem:[#allocation147_spill] sm:$0xff]  ;;  %v5385_v43 = vld [vmem:[%s13404_s3 + $0x588] sm:$0xff]  ;;  %v5386_v28 = vld [vmem:[%s13404_s3 + $0x590] sm:$0xff] }
 0x3f7   :  { %v1666_v52 = vsel %vm13636_vm15, %v14155_v51, %v14157_v17  ;;  %v8844_v1 = vpop.permute.xlu0 %2088  ;;  %v1565_v11 = vadd.f32 %v1553_v12, %v1492_v55  ;;  %v1566_v59 = vadd.f32 %v1554_v63, %v1493_v6  ;;  %v1703_v47 = vadd.f32 %v1691_v46, %v14158_v48  ;;  %v5395_v55 = vld [vmem:[%s13404_s3 + $0x5d8] sm:$0xff]  ;;  %v14163_v34 = vld [vmem:[#allocation148_spill] sm:$0xff]  ;;  %v14164_v46 = vld [vmem:[#allocation151_spill] sm:$0xff] }
 0x3f8   :  { %v1675_v20 = vsel %vm13636_vm15, %v14157_v17, %v14150_v38  ;;  %v1707_v10 = vadd.f32 %v1695_v33, %v8451_v4  ;;  %v1692_v32 = vmul.f32 %v5389_v19, %v1669_v8  ;;  %v1667_v29 = vsel %vm13636_vm15, %v14156_v0, %v14159_v30  ;;  %v5387_v63 = vld [vmem:[%s13404_s3 + $0x598] sm:$0xff]  ;;  %v5400_v33 = vld [vmem:[%s13404_s3 + $0x600] sm:$0xff]  ;;  %v14165_v6 = vld [vmem:[#allocation156_spill] sm:$0xff] }
 0x3f9   :  { %v1676_v38 = vsel %vm13636_vm15, %v14159_v30, %v14153_v24  ;;  %v8869_v4 = vpop.permute.xlu1 %2090  ;;  %v1696_v12 = vmul.f32 %v5393_v60, %v1670_v41  ;;  %v1693_v54 = vmul.f32 %v5390_v57, %v1666_v52  ;;  %v1600_v62 = vsel %vm13637_vm7, %v14162_v45, %v14161_v39  ;;  %v14166_v19 = vld [vmem:[#allocation154_spill] sm:$0xff]  ;;  %v5404_v41 = vld [vmem:[%s13404_s3 + $0x620] sm:$0xff]  ;;  %v14168_v57 = vld [vmem:[#allocation157_spill] sm:$0xff] }
 0x3fa   :  { %14160 = vst [vmem:[#allocation16_spill] sm:$0xff] %v8869_v4  ;;  %v1597_v24 = vsel %vm13637_vm7, %v14161_v39, %v14163_v34  ;;  %v1694_v13 = vmul.f32 %v5391_v40, %v1675_v20  ;;  %v1594_v27 = vsel %vm13637_vm7, %v14163_v34, %v14164_v46  ;;  %v1603_v42 = vsel %vm13637_vm7, %v14164_v46, %v14162_v45  ;;  %v14169_v17 = vld [vmem:[#allocation155_spill] sm:$0xff]  ;;  %v5401_v48 = vld [vmem:[%s13404_s3 + $0x608] sm:$0xff]  ;;  %v14170_v40 = vld [vmem:[#allocation158_spill] sm:$0xff] }
 0x3fb   :  { %v1745_v51 = vsel %vm243_vm5, %v14166_v19, %v14165_v6  ;;  %v8906_v8 = vpop.permute.xlu0 %2094  ;;  %v1697_v60 = vmul.f32 %v5394_v22, %v1667_v29  ;;  %v1698_v0 = vmul.f32 %v5395_v55, %v1676_v38  ;;  %v1746_v52 = vsel %vm243_vm5, %v14169_v17, %v14168_v57  ;;  %v14171_v22 = vld [vmem:[#allocation21_spill] sm:$0xff]  ;;  %v5405_v38 = vld [vmem:[%s13404_s3 + $0x628] sm:$0xff]  ;;  %v14172_v39 = vld [vmem:[#allocation159_spill] sm:$0xff] }
 0x3fc   :  { %14167 = vst [vmem:[#allocation74_spill] sm:$0xff] %v8906_v8  ;;  %v1742_v20 = vsel %vm243_vm5, %v14165_v6, %v14170_v40  ;;  %v1704_v55 = vadd.f32 %v1692_v32, %v14171_v22  ;;  %v1625_v30 = vmul.f32 %v5384_v26, %v1600_v62  ;;  %v1626_v29 = vmul.f32 %v5385_v43, %v1597_v24  ;;  %v5402_v32 = vld [vmem:[%s13404_s3 + $0x610] sm:$0xff]  ;;  %v14174_v26 = vld [vmem:[#allocation160_spill] sm:$0xff]  ;;  %v14175_v24 = vld [vmem:[#allocation23_spill] sm:$0xff] }
 0x3fd   :  { %v1743_v45 = vsel %vm243_vm5, %v14168_v57, %v14172_v39  ;;  %v8930_v34 = vpop.permute.xlu1 %2096  ;;  %v1627_v46 = vmul.f32 %v5386_v28, %v1594_v27  ;;  %v1628_v8 = vmul.f32 %v5387_v63, %v1603_v42  ;;  %v1764_v53 = vmul.f32 %v5400_v33, %v1745_v51 }
 0x3fe   :  { %14173 = vst [vmem:[#allocation150_spill] sm:$0xff] %v8930_v34  ;;  %v1739_v62 = vsel %vm243_vm5, %v14170_v40, %v14174_v26  ;;  %v1708_v43 = vadd.f32 %v1696_v12, %v1634_v58  ;;  %v1705_v6 = vadd.f32 %v1693_v54, %v14175_v24  ;;  %v1768_v22 = vmul.f32 %v5404_v41, %v1746_v52  ;;  %v14177_v34 = vld [vmem:[#allocation52_spill] sm:$0xff]  ;;  %v5403_v40 = vld [vmem:[%s13404_s3 + $0x618] sm:$0xff] }
 0x3ff   :  { %v1765_v4 = vmul.f32 %v5401_v48, %v1742_v20  ;;  %v8940_v57 = vpop.permute.xlu0 %2100  ;;  %v1706_v28 = vadd.f32 %v1694_v13, %v14177_v34  ;;  %v1709_v63 = vadd.f32 %v1697_v60, %v8817_v49  ;;  %v1710_v27 = vadd.f32 %v1698_v0, %v8584_v16  ;;  %v5406_v16 = vld [vmem:[%s13404_s3 + $0x630] sm:$0xff]  ;;  %v5397_v48 = vld [vmem:[%s13404_s3 + $0x5e8] sm:$0xff] }
 0x400   :  { %14176 = vst [vmem:[#allocation153_spill] sm:$0xff] %v8940_v57  ;;  %v1769_v42 = vmul.f32 %v5405_v38, %v1743_v45  ;;  %v1637_v33 = vadd.f32 %v1625_v30, %v1563_v56  ;;  %v1638_v51 = vadd.f32 %v1626_v29, %v1564_v61  ;;  %v1748_v58 = vsel %vm243_vm5, %v14174_v26, %v14166_v19  ;;  %v14179_v56 = vld [vmem:[#allocation161_spill] sm:$0xff]  ;;  %v5407_v19 = vld [vmem:[%s13404_s3 + $0x638] sm:$0xff]  ;;  %v14184_v30 = vld [vmem:[#allocation36_spill] sm:$0xff] }
 0x401   :  { %v1766_v12 = vmul.f32 %v5402_v32, %v1739_v62  ;;  %v8952_v54 = vpop.permute.xlu1 %2102  ;;  %v1639_v13 = vadd.f32 %v1627_v46, %v1565_v11  ;;  %v1640_v41 = vadd.f32 %v1628_v8, %v1566_v59  ;;  %v1776_v49 = vadd.f32 %v1764_v53, %v1703_v47  ;;  %v5396_v11 = vld [vmem:[%s13404_s3 + $0x5e0] sm:$0xff]  ;;  %v14181_v47 = vld [vmem:[#allocation162_spill] sm:$0xff]  ;;  %v14183_v20 = vld [vmem:[#allocation5_spill] sm:$0xff] }
 0x402   :  { %14178 = vst [vmem:[#allocation18_spill] sm:$0xff] %v8952_v54  ;;  %v1740_v61 = vsel %vm243_vm5, %v14172_v39, %v14179_v56  ;;  %v1780_v60 = vadd.f32 %v1768_v22, %v1707_v10  ;;  %v1777_v0 = vadd.f32 %v1765_v4, %v1704_v55  ;;  %v1749_v53 = vsel %vm243_vm5, %v14179_v56, %v14169_v17  ;;  %v14180_v59 = vld [vmem:[#allocation163_spill] sm:$0xff]  ;;  %v5398_v55 = vld [vmem:[%s13404_s3 + $0x5f0] sm:$0xff]  ;;  %v5399_v45 = vld [vmem:[%s13404_s3 + $0x5f8] sm:$0xff] }
 0x403   :  { %v1674_v8 = vsel %vm13636_vm15, %v14181_v47, %v14180_v59  ;;  %v8975_v10 = vpop.permute.xlu0 %2012  ;;  %v1781_v4 = vadd.f32 %v1769_v42, %v1708_v43  ;;  %v1767_v52 = vmul.f32 %v5403_v40, %v1748_v58  ;;  %v1671_v17 = vsel %vm13636_vm15, %v14180_v59, %v14183_v20  ;;  %v5412_v46 = vld [vmem:[%s13404_s3 + $0x660] sm:$0xff]  ;;  %v14185_v32 = vld [vmem:[#allocation38_spill] sm:$0xff]  ;;  %v14186_v26 = vld [vmem:[#allocation9_spill] sm:$0xff] }
 0x404   :  { %14182 = vst [vmem:[#allocation20_spill] sm:$0xff] %v8975_v10  ;;  %v1668_v29 = vsel %vm13636_vm15, %v14183_v20, %v14184_v30  ;;  %v1778_v38 = vadd.f32 %v1766_v12, %v1705_v6  ;;  %v1770_v39 = vmul.f32 %v5406_v16, %v1740_v61  ;;  %v1677_v34 = vsel %vm13636_vm15, %v14184_v30, %v14181_v47  ;;  %v5416_v22 = vld [vmem:[%s13404_s3 + $0x680] sm:$0xff]  ;;  %v14188_v42 = vld [vmem:[#allocation40_spill] sm:$0xff]  ;;  %v14190_v16 = vld [vmem:[#allocation13_spill] sm:$0xff] }
 0x405   :  { %v1818_v62 = vsel %vm273_vm6, %v14186_v26, %v14185_v32  ;;  %v9005_v43 = vpop.permute.xlu1 %2018  ;;  %v1771_v24 = vmul.f32 %v5407_v19, %v1749_v53  ;;  %v1699_v6 = vmul.f32 %v5396_v11, %v1674_v8  ;;  %v14189_v40 = vld [vmem:[#allocation11_spill] sm:$0xff]  ;;  %v5413_v12 = vld [vmem:[%s13404_s3 + $0x668] sm:$0xff]  ;;  %v1815_v56 = vsel %vm273_vm6, %v14185_v32, %v14190_v16  ;;  %v5414_v47 = vld [vmem:[%s13404_s3 + $0x670] sm:$0xff] }
 0x406   :  { %14187 = vst [vmem:[#allocation78_spill] sm:$0xff] %v9005_v43  ;;  %v1819_v58 = vsel %vm273_vm6, %v14189_v40, %v14188_v42  ;;  %v1700_v61 = vmul.f32 %v5397_v48, %v1671_v17  ;;  %v1701_v19 = vmul.f32 %v5398_v55, %v1668_v29  ;;  %v5417_v53 = vld [vmem:[%s13404_s3 + $0x688] sm:$0xff]  ;;  %v14191_v11 = vld [vmem:[#allocation15_spill] sm:$0xff]  ;;  %v14192_v8 = vld [vmem:[#allocation42_spill] sm:$0xff]  ;;  %v1702_v17 = vmul.f32 %v5399_v45, %v1677_v34 }
 0x407   :  { %v1816_v59 = vsel %vm273_vm6, %v14188_v42, %v14191_v11  ;;  %v1812_v20 = vsel %vm273_vm6, %v14190_v16, %v14192_v8  ;;  %v9035_v48 = vpop.permute.xlu0 %2024  ;;  %v1837_v55 = vmul.f32 %v5412_v46, %v1818_v62  ;;  %v5415_v30 = vld [vmem:[%s13404_s3 + $0x678] sm:$0xff]  ;;  %v1821_v29 = vsel %vm273_vm6, %v14192_v8, %v14186_v26  ;;  %v5418_v32 = vld [vmem:[%s13404_s3 + $0x690] sm:$0xff] }
 0x408   :  { %14193 = vst [vmem:[#allocation64_spill] sm:$0xff] %v9035_v48  ;;  %v14194_v42 = vld [vmem:[#allocation17_spill] sm:$0xff]  ;;  %v1779_v45 = vadd.f32 %v1767_v52, %v1706_v28  ;;  %v1841_v34 = vmul.f32 %v5416_v22, %v1819_v58  ;;  %v1838_v46 = vmul.f32 %v5413_v12, %v1815_v56  ;;  %v5419_v62 = vld [vmem:[%s13404_s3 + $0x698] sm:$0xff]  ;;  %v1782_v48 = vadd.f32 %v1770_v39, %v1709_v63 }
 0x409   :  { %v1813_v16 = vsel %vm273_vm6, %v14191_v11, %v14194_v42  ;;  %v1822_v26 = vsel %vm273_vm6, %v14194_v42, %v14189_v40  ;;  %v9058_v8 = vpop.permute.xlu1 %2030  ;;  %v1783_v10 = vadd.f32 %v1771_v24, %v1710_v27  ;;  %v1842_v43 = vmul.f32 %v5417_v53, %v1816_v59  ;;  %v5408_v27 = vld [vmem:[%s13404_s3 + $0x640] sm:$0xff] }
 0x40a   :  { %v1839_v54 = vmul.f32 %v5414_v47, %v1812_v20  ;;  %v9060_v57 = vadd.f32 %v1699_v6, %v1637_v33  ;;  %v9062_v28 = vadd.f32 %v1700_v61, %v1638_v51  ;;  %v1840_v52 = vmul.f32 %v5415_v30, %v1821_v29  ;;  %v14195_v33 = vld [vmem:[#allocation48_spill] sm:$0xff]  ;;  %v14196_v51 = vld [vmem:[#allocation46_spill] sm:$0xff]  ;;  %v5410_v61 = vld [vmem:[%s13404_s3 + $0x650] sm:$0xff] }
 0x40b   :  { %v1843_v22 = vmul.f32 %v5418_v32, %v1813_v16  ;;  %v9064_v58 = vpop.permute.xlu0 %2156  ;;  %v9066_v12 = vadd.f32 %v1701_v19, %v1639_v13  ;;  %v9068_v56 = vadd.f32 %v1702_v17, %v1640_v41  ;;  %v9070_v11 = vadd.f32 %v1837_v55, %v1776_v49  ;;  %v5409_v13 = vld [vmem:[%s13404_s3 + $0x648] sm:$0xff]  ;;  %v14197_v41 = vld [vmem:[#allocation50_spill] sm:$0xff]  ;;  %v14198_v53 = vld [vmem:[#allocation27_spill] sm:$0xff] }
 0x40c   :  { %v1844_v40 = vmul.f32 %v5419_v62, %v1822_v26  ;;  %v9072_v42 = vadd.f32 %v1841_v34, %v1780_v60  ;;  %v9074_v63 = vadd.f32 %v1838_v46, %v1777_v0  ;;  %v1747_v39 = vsel %vm243_vm5, %v14196_v51, %v14195_v33  ;;  %v2531_v0 = vld [vmem:[%s13405_s5] sm:$0xf]  ;;  %v5411_v19 = vld [vmem:[%s13404_s3 + $0x658] sm:$0xff]  ;;  %v14199_v47 = vld [vmem:[#allocation25_spill] sm:$0xff]  ;;  %s14274_s5 = smov 31  }
 0x40d   :  { %v1744_v49 = vsel %vm243_vm5, %v14195_v33, %v14197_v41  ;;  %v9090_v60 = vpop.permute.xlu1 %2158  ;;  %v9095_v24 = vadd.f32 %v1842_v43, %v1781_v4  ;;  %v9097_v6 = vadd.f32 %v1839_v54, %v1778_v38  ;;  %v1741_v59 = vsel %vm243_vm5, %v14197_v41, %v14198_v53  ;;  %2534 = vperm.xlu0 %5912, %v2531_v0   ;;  %v5424_v43 = vld [vmem:[%s13404_s3 + $0x6c0] sm:$0xff]  ;;  %v14201_v55 = vld [vmem:[#allocation54_spill] sm:$0xff]  ;;  %v5429_v26 = vld [vmem:[%s13404_s3 + $0x6e8] sm:$0xff] }
 0x40e   :  { %v1750_v4 = vsel %vm243_vm5, %v14198_v53, %v14196_v51  ;;  %vm13653_vm15 = vcmp.lt.s32.totalorder %v6243_v7, 110  ;;  %v1852_v54 = vadd.f32 %v1840_v52, %v1779_v45  ;;  %v1855_v38 = vadd.f32 %v1843_v22, %v1782_v48  ;;  %v5428_v17 = vld [vmem:[%s13404_s3 + $0x6e0] sm:$0xff]  ;;  %v5425_v45 = vld [vmem:[%s13404_s3 + $0x6c8] sm:$0xff]  ;;  %v5426_v52 = vld [vmem:[%s13404_s3 + $0x6d0] sm:$0xff] }
 0x40f   :  { %vm14200_vm7 = vcmp.lt.s32.totalorder %v6243_v7, 111  ;;  %v9128_v29 = vpop.permute.xlu0 %2162  ;;  %v1856_v48 = vadd.f32 %v1844_v40, %v1783_v10  ;;  %v1772_v32 = vmul.f32 %v5408_v27, %v1747_v39  ;;  %v1773_v16 = vmul.f32 %v5409_v13, %v1744_v49  ;;  %v5427_v33 = vld [vmem:[%s13404_s3 + $0x6d8] sm:$0xff]  ;;  %v5430_v51 = vld [vmem:[%s13404_s3 + $0x6f0] sm:$0xff] }
 0x410   :  { %v1891_v20 = vsel %vm14200_vm7, %v14199_v47, %v8002_v5  ;;  %vm14202_vm8 = vmmov %vm14200_vm7  ;;  %v1888_v34 = vsel %vm14200_vm7, %v8002_v5, %v8040_v18  ;;  %v1774_v46 = vmul.f32 %v5410_v61, %v1741_v59  ;;  %v1775_v62 = vmul.f32 %v5411_v19, %v1750_v4  ;;  %v5431_v13 = vld [vmem:[%s13404_s3 + $0x6f8] sm:$0xff]  ;;  %v5422_v53 = vld [vmem:[%s13404_s3 + $0x6b0] sm:$0xff] }
 0x411   :  { %v1892_v30 = vsel %vm14202_vm8, %v14201_v55, %v8015_v21  ;;  %vm14203_vm8 = vmmov %vm14200_vm7  ;;  %v9151_v22 = vpop.permute.xlu1 %2164  ;;  %v1910_v40 = vmul.f32 %v5424_v43, %v1891_v20  ;;  %v1911_v39 = vmul.f32 %v5425_v45, %v1888_v34  ;;  %v1820_v49 = vsel %vm273_vm6, %v8134_v9, %v8149_v44  ;;  %v5423_v59 = vld [vmem:[%s13404_s3 + $0x6b8] sm:$0xff]  ;;  %v14207_v4 = vld [vmem:[#allocation56_spill] sm:$0xff] }
 0x412   :  { %v1889_v10 = vsel %vm14203_vm8, %v8015_v21, %v8059_v23  ;;  %vm14204_vm9 = vmmov %vm14200_vm7  ;;  %v1914_v27 = vmul.f32 %v5428_v17, %v1892_v30  ;;  %v1894_v21 = vsel %vm14200_vm7, %v8083_v50, %v14199_v47  ;;  %v1817_v0 = vsel %vm273_vm6, %v8149_v44, %v8176_v15 }
 0x413   :  { %v1885_v5 = vsel %vm14204_vm9, %v8040_v18, %v8083_v50  ;;  %vm14205_vm9 = vmmov %vm14200_vm7  ;;  %v5420_v50 = vld [vmem:[%s13404_s3 + $0x6a0] sm:$0xff]  ;;  %v9188_v61 = vpop.permute.xlu0 %2168  ;;  %v1814_v43 = vsel %vm273_vm6, %v8176_v15, %v14207_v4  ;;  %v1823_v44 = vsel %vm273_vm6, %v14207_v4, %v8134_v9  ;;  %v1784_v47 = vadd.f32 %v1772_v32, %v9060_v57 }
 0x414   :  { %v1886_v18 = vsel %vm14205_vm9, %v8059_v23, %v8107_v2  ;;  %vm14206_vm8 = vmmov %vm14200_vm7  ;;  %v5421_v23 = vld [vmem:[%s13404_s3 + $0x6a8] sm:$0xff]  ;;  %v1912_v19 = vmul.f32 %v5426_v52, %v1885_v5  ;;  %vm13647_vm7 = vcmp.lt.s32.totalorder %v6243_v7, 98  ;;  %v1785_v20 = vadd.f32 %v1773_v16, %v9062_v28 }
 0x415   :  { %v1895_v41 = vsel %vm14206_vm8, %v8107_v2, %v14201_v55  ;;  %v1915_v2 = vmul.f32 %v5429_v26, %v1889_v10  ;;  %v1913_v17 = vmul.f32 %v5427_v33, %v1894_v21  ;;  %v1916_v55 = vmul.f32 %v5430_v51, %v1886_v18  ;;  %v9207_v30 = vpop.permute.xlu1 %2170  ;;  %v5437_v21 = vld [vmem:[%s13404_s3 + $0x728] sm:$0xff]  ;;  %vm14221_vm9 = vmmov %vm14206_vm8 }
 0x416   :  { %14208 = vst [vmem:[#allocation22_spill] sm:$0xff] %v9207_v30  ;;  %v1786_v45 = vadd.f32 %v1774_v46, %v9066_v12  ;;  %v1917_v34 = vmul.f32 %v5431_v13, %v1895_v41  ;;  %v1845_v26 = vmul.f32 %v5420_v50, %v1820_v49  ;;  %v1846_v15 = vmul.f32 %v5421_v23, %v1817_v0  ;;  %v5441_v13 = vld [vmem:[%s13404_s3 + $0x748] sm:$0xff]  ;;  %v14215_v41 = vld [vmem:[#allocation62_spill] sm:$0xff]  ;;  %v5438_v50 = vld [vmem:[%s13404_s3 + $0x730] sm:$0xff] }
 0x417   :  { %v1787_v10 = vadd.f32 %v1775_v62, %v9068_v56  ;;  %v1922_v52 = vadd.f32 %v1910_v40, %v9070_v11  ;;  %v1847_v9 = vmul.f32 %v5422_v53, %v1814_v43  ;;  %v1848_v5 = vmul.f32 %v5423_v59, %v1823_v44  ;;  %v9212_v4 = vpop.permute.xlu0 %2174  ;;  %v5436_v56 = vld [vmem:[%s13404_s3 + $0x720] sm:$0xff]  ;;  %v14210_v62 = vld [vmem:[#allocation58_spill] sm:$0xff]  ;;  %v14211_v11 = vld [vmem:[#allocation29_spill] sm:$0xff] }
 0x418   :  { %14209 = vst [vmem:[#allocation24_spill] sm:$0xff] %v9212_v4  ;;  %v1926_v57 = vadd.f32 %v1914_v27, %v9072_v42  ;;  %v1923_v28 = vadd.f32 %v1911_v39, %v9074_v63  ;;  %v1927_v32 = vadd.f32 %v1915_v2, %v9095_v24  ;;  %v1924_v16 = vadd.f32 %v1912_v19, %v9097_v6  ;;  %v5440_v42 = vld [vmem:[%s13404_s3 + $0x740] sm:$0xff]  ;;  %v14212_v63 = vld [vmem:[#allocation6_spill] sm:$0xff]  ;;  %v14216_v49 = vld [vmem:[#allocation57_spill] sm:$0xff] }
 0x419   :  { %v1925_v12 = vadd.f32 %v1913_v17, %v1852_v54  ;;  %v1928_v46 = vadd.f32 %v1916_v55, %v1855_v38  ;;  %v1965_v40 = vsel %vm13653_vm15, %v14211_v11, %v14210_v62  ;;  %v14213_v27 = vld [vmem:[#allocation31_spill] sm:$0xff]  ;;  %v9232_v6 = vpop.permute.xlu1 %2176  ;;  %v1929_v54 = vadd.f32 %v1917_v34, %v1856_v48  ;;  %v5439_v53 = vld [vmem:[%s13404_s3 + $0x738] sm:$0xff]  ;;  %v5442_v43 = vld [vmem:[%s13404_s3 + $0x750] sm:$0xff] }
 0x41a   :  { %v1966_v24 = vsel %vm13653_vm15, %v14213_v27, %v14212_v63  ;;  %14214 = vst [vmem:[#allocation82_spill] sm:$0xff] %v9232_v6  ;;  %v1857_v38 = vadd.f32 %v1845_v26, %v1784_v47  ;;  %v1858_v33 = vadd.f32 %v1846_v15, %v1785_v20  ;;  %v1962_v51 = vsel %vm13653_vm15, %v14210_v62, %v8347_v36  ;;  %v14218_v44 = vld [vmem:[#allocation30_spill] sm:$0xff]  ;;  %v5432_v55 = vld [vmem:[%s13404_s3 + $0x700] sm:$0xff]  ;;  %v14220_v34 = vld [vmem:[#allocation28_spill] sm:$0xff] }
 0x41b   :  { %v1859_v18 = vadd.f32 %v1847_v9, %v1786_v45  ;;  %v1860_v39 = vadd.f32 %v1848_v5, %v1787_v10  ;;  %v1963_v48 = vsel %vm13653_vm15, %v14212_v63, %v14215_v41  ;;  %v1959_v23 = vsel %vm13653_vm15, %v8347_v36, %v14216_v49  ;;  %v9255_v0 = vpop.permute.xlu0 %2086  ;;  %v5443_v20 = vld [vmem:[%s13404_s3 + $0x758] sm:$0xff]  ;;  %v14219_v45 = vld [vmem:[#allocation7_spill] sm:$0xff]  ;;  %v5433_v15 = vld [vmem:[%s13404_s3 + $0x708] sm:$0xff] }
 0x41c   :  { %14217 = vst [vmem:[#allocation68_spill] sm:$0xff] %v9255_v0  ;;  %v1984_v2 = vmul.f32 %v5436_v56, %v1965_v40  ;;  %v1988_v19 = vmul.f32 %v5440_v42, %v1966_v24  ;;  %v1968_v59 = vsel %vm13653_vm15, %v14216_v49, %v14211_v11  ;;  %v1960_v36 = vsel %vm13653_vm15, %v14215_v41, %v14218_v44  ;;  %v14222_v10 = vld [vmem:[#allocation8_spill] sm:$0xff]  ;;  %v5434_v11 = vld [vmem:[%s13404_s3 + $0x710] sm:$0xff]  ;;  %v5435_v40 = vld [vmem:[%s13404_s3 + $0x718] sm:$0xff] }
 0x41d   :  { %v1985_v47 = vmul.f32 %v5437_v21, %v1962_v51  ;;  %v1969_v17 = vsel %vm13653_vm15, %v14218_v44, %v14213_v27  ;;  %v1893_v26 = vsel %vm14221_vm9, %v14220_v34, %v14219_v45  ;;  %v1890_v9 = vsel %vm14206_vm8, %v14219_v45, %v14222_v10  ;;  %v9292_v5 = vpop.permute.xlu1 %2092  ;;  %v14224_v42 = vld [vmem:[#allocation66_spill] sm:$0xff]  ;;  %vm14225_vm9 = vmmov %vm14206_vm8  ;;  %v5448_v51 = vld [vmem:[%s13404_s3 + $0x780] sm:$0xff] }
 0x41e   :  { %14223 = vst [vmem:[#allocation26_spill] sm:$0xff] %v9292_v5  ;;  %v1989_v56 = vmul.f32 %v5441_v13, %v1963_v48  ;;  %v1986_v62 = vmul.f32 %v5438_v50, %v1959_v23  ;;  %v1887_v63 = vsel %vm14225_vm9, %v14222_v10, %v14224_v42  ;;  %v1896_v27 = vsel %vm14206_vm8, %v14224_v42, %v14220_v34  ;;  %v14226_v13 = vld [vmem:[#allocation10_spill] sm:$0xff]  ;;  %v5452_v48 = vld [vmem:[%s13404_s3 + $0x7a0] sm:$0xff] }
 0x41f   :  { %vm13651_vm14 = vcmp.lt.s32.totalorder %v6243_v7, 97  ;;  %v1987_v24 = vmul.f32 %v5439_v53, %v1968_v59  ;;  %v1990_v21 = vmul.f32 %v5442_v43, %v1960_v36  ;;  %v2039_v41 = vsel %vm13647_vm7, %v14226_v13, %v8576_v35  ;;  %v9323_v49 = vpop.permute.xlu0 %2098  ;;  %v5449_v43 = vld [vmem:[%s13404_s3 + $0x788] sm:$0xff] }
 0x420   :  { %v2040_v50 = vsel %vm13647_vm7, %v8570_v3, %v8600_v37  ;;  %14227 = vst [vmem:[#allocation149_spill] sm:$0xff] %v9323_v49  ;;  %v1991_v23 = vmul.f32 %v5443_v20, %v1969_v17  ;;  %v1918_v53 = vmul.f32 %v5432_v55, %v1893_v26  ;;  %v1919_v59 = vmul.f32 %v5433_v15, %v1890_v9 }
 0x421   :  { %v2036_v44 = vsel %vm13647_vm7, %v8576_v35, %v8634_v14  ;;  %v1996_v36 = vadd.f32 %v1984_v2, %v1922_v52  ;;  %v2000_v45 = vadd.f32 %v1988_v19, %v1926_v57  ;;  %v1920_v34 = vmul.f32 %v5434_v11, %v1887_v63  ;;  %v9332_v42 = vpop.permute.xlu1 %2104  ;;  %v5453_v35 = vld [vmem:[%s13404_s3 + $0x7a8] sm:$0xff]  ;;  %v14229_v2 = vld [vmem:[#allocation70_spill] sm:$0xff]  ;;  %v14230_v11 = vld [vmem:[#allocation59_spill] sm:$0xff] }
 0x422   :  { %v1921_v10 = vmul.f32 %v5435_v40, %v1896_v27  ;;  %v1997_v0 = vadd.f32 %v1985_v47, %v1923_v28  ;;  %v2001_v49 = vadd.f32 %v1989_v56, %v1927_v32  ;;  %v2058_v20 = vmul.f32 %v5448_v51, %v2039_v41  ;;  %v5450_v32 = vld [vmem:[%s13404_s3 + $0x790] sm:$0xff]  ;;  %v14232_v27 = vld [vmem:[#allocation32_spill] sm:$0xff] }
 0x423   :  { %v2062_v17 = vmul.f32 %v5452_v48, %v2040_v50  ;;  %v1998_v55 = vadd.f32 %v1986_v62, %v1924_v16  ;;  %v1999_v26 = vadd.f32 %v1987_v24, %v1925_v12  ;;  %v2002_v15 = vadd.f32 %v1990_v21, %v1928_v46  ;;  %v9334_v5 = vpop.permute.xlu0 %2230  ;;  %v5451_v16 = vld [vmem:[%s13404_s3 + $0x798] sm:$0xff]  ;;  %v14228_v12 = vld [vmem:[#allocation12_spill] sm:$0xff]  ;;  %v5444_v62 = vld [vmem:[%s13404_s3 + $0x760] sm:$0xff] }
 0x424   :  { %v2059_v9 = vmul.f32 %v5449_v43, %v2036_v44  ;;  %v2003_v6 = vadd.f32 %v1991_v23, %v1929_v54  ;;  %v1930_v4 = vadd.f32 %v1918_v53, %v1857_v38  ;;  %v1931_v30 = vadd.f32 %v1919_v59, %v1858_v33  ;;  %v14231_v40 = vld [vmem:[#allocation33_spill] sm:$0xff]  ;;  %v14233_v41 = vld [vmem:[#allocation60_spill] sm:$0xff]  ;;  %v5460_v59 = vld [vmem:[%s13404_s3 + $0x7e0] sm:$0xff] }
 0x425   :  { %v2037_v52 = vsel %vm13647_vm7, %v8600_v37, %v8664_v31  ;;  %v1932_v57 = vadd.f32 %v1920_v34, %v1859_v18  ;;  %v1933_v28 = vadd.f32 %v1921_v10, %v1860_v39  ;;  %v2033_v46 = vsel %vm13647_vm7, %v8634_v14, %v14228_v12  ;;  %v9357_v54 = vpop.permute.xlu1 %2232  ;;  %v5454_v18 = vld [vmem:[%s13404_s3 + $0x7b0] sm:$0xff]  ;;  %v5455_v39 = vld [vmem:[%s13404_s3 + $0x7b8] sm:$0xff]  ;;  %v5464_v44 = vld [vmem:[%s13404_s3 + $0x800] sm:$0xff] }
 0x426   :  { %v2042_v37 = vsel %vm13647_vm7, %v14228_v12, %v14226_v13  ;;  %v2070_v38 = vadd.f32 %v2058_v20, %v1996_v36  ;;  %v2074_v33 = vadd.f32 %v2062_v17, %v2000_v45  ;;  %v2034_v14 = vsel %vm13647_vm7, %v8664_v31, %v14229_v2  ;;  %v5445_v31 = vld [vmem:[%s13404_s3 + $0x768] sm:$0xff]  ;;  %v5446_v51 = vld [vmem:[%s13404_s3 + $0x770] sm:$0xff]  ;;  %v5447_v13 = vld [vmem:[%s13404_s3 + $0x778] sm:$0xff] }
 0x427   :  { %v2043_v19 = vsel %vm13647_vm7, %v14229_v2, %v8570_v3  ;;  %v2071_v47 = vadd.f32 %v2059_v9, %v1997_v0  ;;  %v2063_v56 = vmul.f32 %v5453_v35, %v2037_v52  ;;  %v1967_v63 = vsel %vm13653_vm15, %v14231_v40, %v14230_v11  ;;  %v9387_v0 = vpop.permute.xlu0 %2236  ;;  %v14234_v36 = vld [vmem:[#allocation16_spill] sm:$0xff]  ;;  %v14235_v45 = vld [vmem:[#allocation14_spill] sm:$0xff]  ;;  %v14238_v2 = vld [vmem:[#allocation153_spill] sm:$0xff] }
 0x428   :  { %v1964_v3 = vsel %vm13653_vm15, %v14230_v11, %v14232_v27  ;;  %v2060_v24 = vmul.f32 %v5450_v32, %v2033_v46  ;;  %v2061_v21 = vmul.f32 %v5451_v16, %v2042_v37  ;;  %v1961_v48 = vsel %vm13653_vm15, %v14232_v27, %v14233_v41  ;;  %v5461_v9 = vld [vmem:[%s13404_s3 + $0x7e8] sm:$0xff]  ;;  %v14236_v35 = vld [vmem:[#allocation74_spill] sm:$0xff] }
 0x429   :  { %v1970_v50 = vsel %vm13653_vm15, %v14233_v41, %v14231_v40  ;;  %vm13650_vm9 = vcmp.lt.s32.totalorder %v6243_v7, 96  ;;  %v2064_v23 = vmul.f32 %v5454_v18, %v2034_v14  ;;  %v2065_v53 = vmul.f32 %v5455_v39, %v2043_v19  ;;  %v9418_v10 = vpop.permute.xlu1 %2238  ;;  %v5465_v32 = vld [vmem:[%s13404_s3 + $0x808] sm:$0xff]  ;;  %v14237_v16 = vld [vmem:[#allocation150_spill] sm:$0xff]  ;;  %v5462_v39 = vld [vmem:[%s13404_s3 + $0x7f0] sm:$0xff] }
 0x42a   :  { %v2113_v43 = vsel %vm13651_vm14, %v8813_v25, %v8844_v1  ;;  %v2114_v34 = vsel %vm13651_vm14, %v14235_v45, %v14234_v36  ;;  %v1992_v20 = vmul.f32 %v5444_v62, %v1967_v63  ;;  %v1993_v17 = vmul.f32 %v5445_v31, %v1964_v3 }
 0x42b   :  { %v2110_v52 = vsel %vm13651_vm14, %v8844_v1, %v14236_v35  ;;  %v2111_v12 = vsel %vm13651_vm14, %v14234_v36, %v14237_v16  ;;  %v2075_v46 = vadd.f32 %v2063_v56, %v2001_v49  ;;  %v1994_v37 = vmul.f32 %v5446_v51, %v1961_v48  ;;  %v9441_v14 = vpop.permute.xlu0 %2242  ;;  %v5456_v48 = vld [vmem:[%s13404_s3 + $0x7c0] sm:$0xff] }
 0x42c   :  { %v1995_v18 = vmul.f32 %v5447_v13, %v1970_v50  ;;  %v2107_v1 = vsel %vm13651_vm14, %v14236_v35, %v14238_v2  ;;  %v2072_v19 = vadd.f32 %v2060_v24, %v1998_v55  ;;  %v2073_v62 = vadd.f32 %v2061_v21, %v1999_v26  ;;  %v5463_v13 = vld [vmem:[%s13404_s3 + $0x7f8] sm:$0xff] }
 0x42d   :  { %v2132_v11 = vmul.f32 %v5460_v59, %v2113_v43  ;;  %v2136_v40 = vmul.f32 %v5464_v44, %v2114_v34  ;;  %v2076_v63 = vadd.f32 %v2064_v23, %v2002_v15  ;;  %v9443_v31 = vadd.f32 %v2065_v53, %v2003_v6  ;;  %v9445_v27 = vpop.permute.xlu1 %2244  ;;  %v14239_v24 = vld [vmem:[#allocation18_spill] sm:$0xff]  ;;  %v14241_v23 = vld [vmem:[#allocation20_spill] sm:$0xff] }
 0x42e   :  { %v2133_v49 = vmul.f32 %v5461_v9, %v2110_v52  ;;  %v2137_v56 = vmul.f32 %v5465_v32, %v2111_v12  ;;  %v9447_v3 = vadd.f32 %v1992_v20, %v1930_v4  ;;  %v9449_v51 = vadd.f32 %v1993_v17, %v1931_v30  ;;  %v5466_v4 = vld [vmem:[%s13404_s3 + $0x810] sm:$0xff]  ;;  %v5467_v30 = vld [vmem:[%s13404_s3 + $0x818] sm:$0xff]  ;;  %v5457_v59 = vld [vmem:[%s13404_s3 + $0x7c8] sm:$0xff] }
 0x42f   :  { %v2116_v55 = vsel %vm13651_vm14, %v14238_v2, %v8813_v25  ;;  %v2134_v26 = vmul.f32 %v5462_v39, %v2107_v1  ;;  %v9458_v6 = vadd.f32 %v1994_v37, %v1932_v57  ;;  %v9460_v15 = vadd.f32 %v1995_v18, %v1933_v28  ;;  %v9477_v57 = vpop.permute.xlu0 %2248  ;;  %v14240_v50 = vld [vmem:[#allocation78_spill] sm:$0xff]  ;;  %v14242_v43 = vld [vmem:[#allocation64_spill] sm:$0xff]  ;;  %v5472_v12 = vld [vmem:[%s13404_s3 + $0x840] sm:$0xff] }
 0x430   :  { %v2108_v21 = vsel %vm13651_vm14, %v14237_v16, %v14239_v24  ;;  %v2117_v25 = vsel %vm13651_vm14, %v14239_v24, %v14235_v45  ;;  %vm13652_vm8 = vcmp.lt.s32.totalorder %v6243_v7, 95  ;;  %v2144_v28 = vadd.f32 %v2132_v11, %v2070_v38  ;;  %v5458_v45 = vld [vmem:[%s13404_s3 + $0x7d0] sm:$0xff]  ;;  %v5476_v37 = vld [vmem:[%s13404_s3 + $0x860] sm:$0xff]  ;;  %v5473_v2 = vld [vmem:[%s13404_s3 + $0x848] sm:$0xff] }
 0x431   :  { %v2148_v41 = vadd.f32 %v2136_v40, %v2074_v33  ;;  %v2041_v53 = vsel %vm13647_vm7, %v14241_v23, %v14240_v50  ;;  %v2038_v44 = vsel %vm13647_vm7, %v14240_v50, %v14242_v43  ;;  %v2145_v38 = vadd.f32 %v2133_v49, %v2071_v47  ;;  %v9500_v20 = vpop.permute.xlu1 %2250  ;;  %v5459_v47 = vld [vmem:[%s13404_s3 + $0x7d8] sm:$0xff]  ;;  %v5474_v49 = vld [vmem:[%s13404_s3 + $0x850] sm:$0xff] }
 0x432   :  { %v2149_v33 = vadd.f32 %v2137_v56, %v2075_v46  ;;  %v2135_v36 = vmul.f32 %v5463_v13, %v2116_v55  ;;  %v2035_v34 = vsel %vm13647_vm7, %v14242_v43, %v9058_v8  ;;  %v2146_v17 = vadd.f32 %v2134_v26, %v2072_v19  ;;  %v5477_v19 = vld [vmem:[%s13404_s3 + $0x868] sm:$0xff]  ;;  %v14243_v11 = vld [vmem:[#allocation22_spill] sm:$0xff]  ;;  %v5468_v43 = vld [vmem:[%s13404_s3 + $0x820] sm:$0xff] }
 0x433   :  { %v2138_v9 = vmul.f32 %v5466_v4, %v2108_v21  ;;  %v2139_v35 = vmul.f32 %v5467_v30, %v2117_v25  ;;  %v2044_v52 = vsel %vm13647_vm7, %v9058_v8, %v14241_v23  ;;  %v2066_v32 = vmul.f32 %v5456_v48, %v2041_v53  ;;  %v9523_v18 = vpop.permute.xlu0 %2160  ;;  %v14244_v56 = vld [vmem:[#allocation24_spill] sm:$0xff]  ;;  %v5479_v4 = vld [vmem:[%s13404_s3 + $0x878] sm:$0xff] }
 0x434   :  { %v2067_v16 = vmul.f32 %v5457_v59, %v2038_v44  ;;  %v2187_v46 = vsel %vm13650_vm9, %v9064_v58, %v9128_v29  ;;  %v2188_v8 = vsel %vm13650_vm9, %v9090_v60, %v9151_v22  ;;  %v2068_v39 = vmul.f32 %v5458_v45, %v2035_v34  ;;  %v14245_v30 = vld [vmem:[#allocation82_spill] sm:$0xff]  ;;  %v14247_v45 = vld [vmem:[#allocation68_spill] sm:$0xff] }
 0x435   :  { %v2184_v1 = vsel %vm13650_vm9, %v9128_v29, %v9188_v61  ;;  %v2185_v40 = vsel %vm13650_vm9, %v9151_v22, %v14243_v11  ;;  %v2181_v13 = vsel %vm13650_vm9, %v9188_v61, %v14244_v56  ;;  %v2069_v55 = vmul.f32 %v5459_v47, %v2044_v52  ;;  %v5475_v29 = vld [vmem:[%s13404_s3 + $0x858] sm:$0xff]  ;;  %v5478_v22 = vld [vmem:[%s13404_s3 + $0x870] sm:$0xff]  ;;  %v9567_v21 = vpop.permute.xlu1 %2166 }
 0x436   :  { %v2190_v26 = vsel %vm13650_vm9, %v14244_v56, %v9064_v58  ;;  %v2182_v61 = vsel %vm13650_vm9, %v14243_v11, %v14245_v30  ;;  %v2191_v24 = vsel %vm13650_vm9, %v14245_v30, %v9090_v60  ;;  %vm13655_vm7 = vcmp.lt.s32.totalorder %v6243_v7, 94  ;;  %v14246_v44 = vld [vmem:[#allocation26_spill] sm:$0xff]  ;;  %v5485_v11 = vld [vmem:[%s13404_s3 + $0x8a8] sm:$0xff]  ;;  %v5496_v30 = vld [vmem:[%s13404_s3 + $0x900] sm:$0xff] }
 0x437   :  { %v2147_v58 = vadd.f32 %v2135_v36, %v2073_v62  ;;  %v2150_v25 = vadd.f32 %v2138_v9, %v2076_v63  ;;  %v2206_v48 = vmul.f32 %v5472_v12, %v2187_v46  ;;  %v2210_v50 = vmul.f32 %v5476_v37, %v2188_v8  ;;  %v9577_v34 = vpop.permute.xlu0 %2172 }
 0x438   :  { %v2207_v23 = vmul.f32 %v5473_v2, %v2184_v1  ;;  %v2211_v53 = vmul.f32 %v5477_v19, %v2185_v40  ;;  %v2208_v59 = vmul.f32 %v5474_v49, %v2181_v13  ;;  %v2115_v60 = vsel %vm13651_vm14, %v14247_v45, %v14246_v44  ;;  %v5489_v49 = vld [vmem:[%s13404_s3 + $0x8c8] sm:$0xff]  ;;  %v5486_v13 = vld [vmem:[%s13404_s3 + $0x8b0] sm:$0xff] }
 0x439   :  { %v2151_v47 = vadd.f32 %v2139_v35, %v9443_v31  ;;  %v2209_v62 = vmul.f32 %v5475_v29, %v2190_v26  ;;  %v2212_v63 = vmul.f32 %v5478_v22, %v2182_v61  ;;  %v2213_v36 = vmul.f32 %v5479_v4, %v2191_v24  ;;  %v9590_v37 = vpop.permute.xlu1 %2178  ;;  %v5484_v31 = vld [vmem:[%s13404_s3 + $0x8a0] sm:$0xff]  ;;  %v5470_v22 = vld [vmem:[%s13404_s3 + $0x830] sm:$0xff]  ;;  %v5487_v4 = vld [vmem:[%s13404_s3 + $0x8b8] sm:$0xff] }
 0x43a   :  { %v2078_v9 = vadd.f32 %v2066_v32, %v9447_v3  ;;  %v9582_v52 = vadd.f32 %v2067_v16, %v9449_v51  ;;  %v9585_v12 = vadd.f32 %v2068_v39, %v9458_v6  ;;  %v9588_v46 = vadd.f32 %v2069_v55, %v9460_v15  ;;  %v5469_v15 = vld [vmem:[%s13404_s3 + $0x828] sm:$0xff]  ;;  %v14248_v32 = vld [vmem:[#allocation149_spill] sm:$0xff]  ;;  %v5471_v61 = vld [vmem:[%s13404_s3 + $0x838] sm:$0xff] }
 0x43b   :  { %v2218_v8 = vadd.f32 %v2206_v48, %v2144_v28  ;;  %v2222_v2 = vadd.f32 %v2210_v50, %v2148_v41  ;;  %v2140_v1 = vmul.f32 %v5468_v43, %v2115_v60  ;;  %v2261_v3 = vsel %vm13652_vm8, %v9334_v5, %v9387_v0  ;;  %v9606_v41 = vpop.permute.xlu0 %2304  ;;  %v5500_v43 = vld [vmem:[%s13404_s3 + $0x920] sm:$0xff] }
 0x43c   :  { %v2219_v51 = vadd.f32 %v2207_v23, %v2145_v38  ;;  %v2223_v6 = vadd.f32 %v2211_v53, %v2149_v33  ;;  %v2220_v35 = vadd.f32 %v2208_v59, %v2146_v17  ;;  %v2112_v28 = vsel %vm13651_vm14, %v14246_v44, %v14248_v32  ;;  %v5488_v38 = vld [vmem:[%s13404_s3 + $0x8c0] sm:$0xff] }
 0x43d   :  { %v2221_v16 = vadd.f32 %v2209_v62, %v2147_v58  ;;  %v2224_v39 = vadd.f32 %v2212_v63, %v2150_v25  ;;  %v2225_v19 = vadd.f32 %v2213_v36, %v2151_v47  ;;  %v2262_v33 = vsel %vm13652_vm8, %v9357_v54, %v9418_v10  ;;  %v9636_v29 = vpop.permute.xlu1 %2306  ;;  %v5490_v25 = vld [vmem:[%s13404_s3 + $0x8d0] sm:$0xff]  ;;  %v5497_v36 = vld [vmem:[%s13404_s3 + $0x908] sm:$0xff] }
 0x43e   :  { %v2280_v17 = vmul.f32 %v5484_v31, %v2261_v3  ;;  %v2258_v40 = vsel %vm13652_vm8, %v9387_v0, %v9441_v14  ;;  %v2259_v56 = vsel %vm13652_vm8, %v9418_v10, %v9445_v27  ;;  %v2255_v55 = vsel %vm13652_vm8, %v9441_v14, %v9477_v57 }
 0x43f   :  { %v9638_v0 = vadd.f32 %v2140_v1, %v2078_v9  ;;  %v9640_v26 = vmul.f32 %v5469_v15, %v2112_v28  ;;  %v2109_v10 = vsel %vm13651_vm14, %v14248_v32, %v9332_v42  ;;  %v2264_v14 = vsel %vm13652_vm8, %v9477_v57, %v9334_v5  ;;  %v5491_v5 = vld [vmem:[%s13404_s3 + $0x8d8] sm:$0xff] }
 0x440   :  { %v2118_v24 = vsel %vm13651_vm14, %v9332_v42, %v14247_v45  ;;  %v2284_v58 = vmul.f32 %v5488_v38, %v2262_v33  ;;  %v2256_v57 = vsel %vm13652_vm8, %v9445_v27, %v9500_v20  ;;  %v2265_v48 = vsel %vm13652_vm8, %v9500_v20, %v9357_v54  ;;  %v2311_v42 = vpop.permute.xlu0 %2310 }
 0x441   :  { %v2281_v50 = vmul.f32 %v5485_v11, %v2258_v40  ;;  %v2285_v23 = vmul.f32 %v5489_v49, %v2259_v56  ;;  %v2282_v53 = vmul.f32 %v5486_v13, %v2255_v55  ;;  %v2335_v59 = vsel %vm13655_vm7, %v9606_v41, %v2311_v42  ;;  %v2313_v47 = vpop.permute.xlu1 %2312  ;;  %v5501_v49 = vld [vmem:[%s13404_s3 + $0x928] sm:$0xff] }
 0x442   :  { %v9686_v44 = vmul.f32 %v5470_v22, %v2109_v10  ;;  %v2292_v27 = vadd.f32 %v2280_v17, %v2218_v8  ;;  %v2283_v45 = vmul.f32 %v5487_v4, %v2264_v14  ;;  %v2354_v60 = vmul.f32 %v5496_v30, %v2335_v59  ;;  %v5480_v8 = vld [vmem:[%s13404_s3 + $0x880] sm:$0xff] }
 0x443   :  { %v9688_v62 = vmul.f32 %v5471_v61, %v2118_v24  ;;  %v2286_v54 = vmul.f32 %v5490_v25, %v2256_v57  ;;  %v2287_v20 = vmul.f32 %v5491_v5, %v2265_v48  ;;  %v2336_v63 = vsel %vm13655_vm7, %v9636_v29, %v2313_v47  ;;  %v5502_v24 = vld [vmem:[%s13404_s3 + $0x930] sm:$0xff]  ;;  %v5481_v48 = vld [vmem:[%s13404_s3 + $0x888] sm:$0xff] }
 0x444   :  { %v2296_v9 = vadd.f32 %v2284_v58, %v2222_v2  ;;  %v2189_v1 = vsel %vm13650_vm9, %v9523_v18, %v9567_v21  ;;  %v9703_v31 = vadd.f32 %v2354_v60, %v2292_v27  ;;  %v2358_v3 = vmul.f32 %v5500_v43, %v2336_v63  ;;  %v2317_v15 = vpop.permute.xlu0 %2316  ;;  %v5483_v60 = vld [vmem:[%s13404_s3 + $0x898] sm:$0xff] }
 0x445   :  { %v2293_v32 = vadd.f32 %v2281_v50, %v2219_v51  ;;  %v2297_v28 = vadd.f32 %v2285_v23, %v2223_v6  ;;  %v2294_v38 = vadd.f32 %v2282_v53, %v2220_v35  ;;  %v2332_v33 = vsel %vm13655_vm7, %v2311_v42, %v2317_v15  ;;  %v2319_v56 = vpop.permute.xlu1 %2318  ;;  %v5498_v6 = vld [vmem:[%s13404_s3 + $0x910] sm:$0xff] }
 0x446   :  { %v2295_v2 = vadd.f32 %v2283_v45, %v2221_v16  ;;  %v2390_v17 = vmin.f32 %v9703_v31, 0.0  ;;  %v9708_v11 = vadd.f32 %v2358_v3, %v2296_v9  ;;  %v2355_v40 = vmul.f32 %v5497_v36, %v2332_v33  ;;  %v5482_v53 = vld [vmem:[%s13404_s3 + $0x890] sm:$0xff] }
 0x447   :  { %v2298_v13 = vadd.f32 %v2286_v54, %v2224_v39  ;;  %v2299_v55 = vadd.f32 %v2287_v20, %v2225_v19  ;;  %v2214_v22 = vmul.f32 %v5480_v8, %v2189_v1  ;;  %v2333_v51 = vsel %vm13655_vm7, %v2313_v47, %v2319_v56  ;;  %v5499_v39 = vld [vmem:[%s13404_s3 + $0x918] sm:$0xff] }
 0x448   :  { %v2186_v35 = vsel %vm13650_vm9, %v9567_v21, %v9577_v34  ;;  %v2402_v16 = vmul.f32 1.442695, %v2390_v17  ;;  %v2394_v10 = vmin.f32 %v9708_v11, 0.0  ;;  %v9723_v4 = vadd.f32 %v2355_v40, %v2293_v32  ;;  %v2323_v19 = vpop.permute.xlu0 %2322  ;;  %v5492_v40 = vld [vmem:[%s13404_s3 + $0x8e0] sm:$0xff] }
 0x449   :  { %v2183_v14 = vsel %vm13650_vm9, %v9577_v34, %v9590_v37  ;;  %v2359_v30 = vmul.f32 %v5501_v49, %v2333_v51  ;;  %v2329_v61 = vsel %vm13655_vm7, %v2317_v15, %v2323_v19  ;;  %v2338_v21 = vsel %vm13655_vm7, %v2323_v19, %v9606_v41  ;;  %v5503_v34 = vld [vmem:[%s13404_s3 + $0x938] sm:$0xff]  ;;  %v2325_v57 = vpop.permute.xlu1 %2324  ;;  %v5493_v49 = vld [vmem:[%s13404_s3 + $0x8e8] sm:$0xff] }
 0x44a   :  { %5975 = vpow2.f32 %v2402_v16  ;;  %v2410_v58 = vmul.f32 1.442695, %v2394_v10  ;;  %v2391_v25 = vmin.f32 %v9723_v4, 0.0  ;;  %v2356_v5 = vmul.f32 %v5498_v6, %v2329_v61  ;;  %v5495_v61 = vld [vmem:[%s13404_s3 + $0x8f8] sm:$0xff] }
 0x44b   :  { %v9747_v42 = vadd.f32 %v2359_v30, %v2297_v28  ;;  %v2357_v41 = vmul.f32 %v5499_v39, %v2338_v21  ;;  %v2330_v50 = vsel %vm13655_vm7, %v2319_v56, %v2325_v57  ;;  %v2339_v23 = vsel %vm13655_vm7, %v2325_v57, %v9636_v29  ;;  %v5494_v39 = vld [vmem:[%s13404_s3 + $0x8f0] sm:$0xff] }
 0x44c   :  { %5977 = vpow2.f32 %v2410_v58  ;;  %v2404_v59 = vmul.f32 1.442695, %v2391_v25  ;;  %v9757_v43 = vadd.f32 %v2356_v5, %v2294_v38  ;;  %v2360_v27 = vmul.f32 %v5502_v24, %v2330_v50  ;;  %v2235_v45 = vpop.permute.xlu0 %2234 }
 0x44d   :  { %v2192_v47 = vsel %vm13650_vm9, %v9590_v37, %v9523_v18  ;;  %v2395_v29 = vmin.f32 %v9747_v42, 0.0  ;;  %v9767_v54 = vadd.f32 %v2357_v41, %v2295_v2  ;;  %v2361_v20 = vmul.f32 %v5503_v34, %v2339_v23  ;;  %v2241_v8 = vpop.permute.xlu1 %2240  ;;  %v5505_v34 = vld [vmem:[%s13404_s3 + $0x948] sm:$0xff] }
 0x44e   :  { %v2215_v63 = vmul.f32 %v5481_v48, %v2186_v35  ;;  %5979 = vpow2.f32 %v2404_v59  ;;  %v2392_v36 = vmin.f32 %v9757_v43, 0.0  ;;  %v9770_v9 = vadd.f32 %v2360_v27, %v2298_v13 }
 0x44f   :  { %v2216_v1 = vmul.f32 %v5482_v53, %v2183_v14  ;;  %v2412_v3 = vmul.f32 1.442695, %v2395_v29  ;;  %v2393_v15 = vmin.f32 %v9767_v54, 0.0  ;;  %v9773_v32 = vadd.f32 %v2361_v20, %v2299_v55 }
 0x450   :  { %v2217_v28 = vmul.f32 %v5483_v60, %v2192_v47  ;;  %v2406_v18 = vmul.f32 1.442695, %v2392_v36  ;;  %v2396_v37 = vmin.f32 %v9770_v9, 0.0  ;;  %v2263_v38 = vsel %vm13652_vm8, %v2235_v45, %v2241_v8  ;;  %v2247_v33 = vpop.permute.xlu0 %2246 }
 0x451   :  { %5981 = vpow2.f32 %v2412_v3  ;;  %v2408_v2 = vmul.f32 1.442695, %v2393_v15  ;;  %v2397_v17 = vmin.f32 %v9773_v32, 0.0  ;;  %v2260_v56 = vsel %vm13652_vm8, %v2241_v8, %v2247_v33  ;;  %v2253_v35 = vpop.permute.xlu1 %2252 }
 0x452   :  { %v2153_v13 = vadd.f32 %v9640_v26, %v9582_v52  ;;  %v2154_v55 = vadd.f32 %v9686_v44, %v9585_v12  ;;  %v2155_v51 = vadd.f32 %v9688_v62, %v9588_v46  ;;  %v2414_v6 = vmul.f32 1.442695, %v2396_v37 }
 0x453   :  { %v2226_v16 = vadd.f32 %v2214_v22, %v9638_v0  ;;  %5983 = vpow2.f32 %v2406_v18  ;;  %v2416_v10 = vmul.f32 1.442695, %v2397_v17  ;;  %v2257_v19 = vsel %vm13652_vm8, %v2247_v33, %v2253_v35  ;;  %v5504_v0 = vld [vmem:[%s13404_s3 + $0x940] sm:$0xff] }
 0x454   :  { %v5976_v52 = vpop.eup %5975  ;;  %v2227_v26 = vadd.f32 %v2215_v63, %v2153_v13  ;;  %5985 = vpow2.f32 %v2414_v6  ;;  %v2288_v12 = vmul.f32 %v5492_v40, %v2263_v38  ;;  %v2289_v44 = vmul.f32 %v5493_v49, %v2260_v56  ;;  %v2309_v14 = vpop.permute.xlu0 %2308 }
 0x455   :  { %v2228_v46 = vadd.f32 %v2216_v1, %v2154_v55  ;;  %v2229_v62 = vadd.f32 %v2217_v28, %v2155_v51  ;;  %v5508_v30 = vadd.f32 -1.0, %v5976_v52  ;;  %5987 = vpow2.f32 %v2408_v2  ;;  %v2315_v58 = vpop.permute.xlu1 %2314 }
 0x456   :  { %v5978_v22 = vpop.eup %5977  ;;  %vm2378_vm9 = vcmp.gt.f32.partialorder %v9703_v31, 0.0  ;;  %5989 = vpow2.f32 %v2416_v10  ;;  %v2266_v21 = vsel %vm13652_vm8, %v2253_v35, %v2235_v45  ;;  %v2290_v24 = vmul.f32 %v5494_v39, %v2257_v19  ;;  %v5506_v45 = vld [vmem:[%s13404_s3 + $0x950] sm:$0xff] }
 0x457   :  { %vm2382_vm14 = vcmp.gt.f32.partialorder %v9708_v11, 0.0  ;;  %v5512_v25 = vadd.f32 -1.0, %v5978_v22  ;;  %v2337_v5 = vsel %vm13655_vm7, %v2309_v14, %v2315_v58  ;;  %v9815_v57 = vsel %vm2378_vm9, %v9703_v31, %v5508_v30  ;;  %v5507_v31 = vld [vmem:[%s13404_s3 + $0x958] sm:$0xff]  ;;  %s14276_s3 = smov 18  }
 0x458   :  { %v5980_v48 = vpop.eup %5979  ;;  %v2300_v41 = vadd.f32 %v2288_v12, %v2226_v16  ;;  %v2301_v50 = vadd.f32 %v2289_v44, %v2227_v26  ;;  %v2362_v23 = vmul.f32 %v5504_v0, %v2337_v5  ;;  %v2321_v53 = vpop.permute.xlu0 %2320  ;;  %vm2379_vm8 = vcmp.gt.f32.partialorder %v9723_v4, 0.0 }
 0x459   :  { %v2291_v59 = vmul.f32 %v5495_v61, %v2266_v21  ;;  %v2334_v27 = vsel %vm13655_vm7, %v2315_v58, %v2321_v53  ;;  %vm2383_vm9 = vcmp.gt.f32.partialorder %v9747_v42, 0.0  ;;  %v5509_v60 = vadd.f32 -1.0, %v5980_v48  ;;  %v2327_v63 = vpop.permute.xlu1 %2326 }
 0x45a   :  { %v2302_v47 = vadd.f32 %v2290_v24, %v2228_v46  ;;  %v9827_v29 = vadd.f32 %v2362_v23, %v2300_v41  ;;  %v2363_v20 = vmul.f32 %v5505_v34, %v2334_v27  ;;  %v2462_v36 = vmin.f32 %v9815_v57, 0.0 }
 0x45b   :  { %v5982_v8 = vpop.eup %5981  ;;  %vm2380_vm15 = vcmp.gt.f32.partialorder %v9757_v43, 0.0  ;;  %v2331_v1 = vsel %vm13655_vm7, %v2321_v53, %v2327_v63  ;;  %v2340_v3 = vsel %vm13655_vm7, %v2327_v63, %v2309_v14  ;;  %v9838_v15 = vsel %vm2379_vm8, %v9723_v4, %v5509_v60 }
 0x45c   :  { %v9843_v28 = vsel %vm2382_vm14, %v9708_v11, %v5512_v25  ;;  %vm2384_vm13 = vcmp.gt.f32.partialorder %v9770_v9, 0.0  ;;  %v2398_v18 = vmin.f32 %v9827_v29, 0.0  ;;  %v9847_v37 = vadd.f32 %v2363_v20, %v2301_v50 }
 0x45d   :  { %v2364_v38 = vmul.f32 %v5506_v45, %v2331_v1  ;;  %v2365_v33 = vmul.f32 %v5507_v31, %v2340_v3  ;;  %v5984_v2 = vpop.eup %5983  ;;  %v2303_v17 = vadd.f32 %v2291_v59, %v2229_v62  ;;  %v5513_v40 = vadd.f32 -1.0, %v5982_v8 }
 0x45e   :  { %v2463_v49 = vmin.f32 %v9838_v15, 0.0  ;;  %vm2381_vm8 = vcmp.gt.f32.partialorder %v9767_v54, 0.0  ;;  %v5986_v4 = vpop.eup %5985  ;;  %v2418_v56 = vmul.f32 1.442695, %v2398_v18  ;;  %v2399_v11 = vmin.f32 %v9847_v37, 0.0 }
 0x45f   :  { %v9852_v13 = vadd.f32 %v2364_v38, %v2302_v47  ;;  %v2466_v55 = vmin.f32 %v9843_v28, 0.0  ;;  %v5988_v51 = vpop.eup %5987  ;;  %v9855_v6 = vadd.f32 %v2365_v33, %v2303_v17  ;;  %v9860_v35 = vsel %vm2383_vm9, %v9747_v42, %v5513_v40 }
 0x460   :  { %v2476_v16 = vmul.f32 1.442695, %v2463_v49  ;;  %v2474_v10 = vmul.f32 1.442695, %v2462_v36  ;;  %v5990_v39 = vpop.eup %5989  ;;  %v5510_v19 = vadd.f32 -1.0, %v5984_v2  ;;  %5991 = vpow2.f32 %v2418_v56 }
 0x461   :  { %v2420_v52 = vmul.f32 1.442695, %v2399_v11  ;;  %v2400_v26 = vmin.f32 %v9852_v13, 0.0  ;;  %v5514_v12 = vadd.f32 -1.0, %v5986_v4  ;;  %v2401_v44 = vmin.f32 %v9855_v6, 0.0 }
 0x462   :  { %v2467_v14 = vmin.f32 %v9860_v35, 0.0  ;;  %5993 = vpow2.f32 %v2476_v16  ;;  %v2482_v62 = vmul.f32 1.442695, %v2466_v55  ;;  %v5511_v30 = vadd.f32 -1.0, %v5988_v51 }
 0x463   :  { %5995 = vpow2.f32 %v2420_v52  ;;  %v2422_v46 = vmul.f32 1.442695, %v2400_v26  ;;  %v2424_v42 = vmul.f32 1.442695, %v2401_v44  ;;  %v5515_v22 = vadd.f32 -1.0, %v5990_v39 }
 0x464   :  { %v2484_v0 = vmul.f32 1.442695, %v2467_v14  ;;  %5997 = vpow2.f32 %v2474_v10  ;;  %vm2385_vm14 = vcmp.gt.f32.partialorder %v9773_v32, 0.0  ;;  %v9869_v61 = vsel %vm2381_vm8, %v9767_v54, %v5511_v30 }
 0x465   :  { %5999 = vpow2.f32 %v2422_v46  ;;  %v9874_v21 = vsel %vm2380_vm15, %v9757_v43, %v5510_v19  ;;  %v9877_v24 = vsel %vm2385_vm14, %v9773_v32, %v5515_v22  ;;  %v2465_v58 = vmin.f32 %v9869_v61, 0.0 }
 0x466   :  { %6001 = vpow2.f32 %v2424_v42  ;;  %v9883_v25 = vsel %vm2384_vm13, %v9770_v9, %v5514_v12  ;;  %v2469_v54 = vmin.f32 %v9877_v24, 0.0  ;;  %v2464_v34 = vmin.f32 %v9874_v21, 0.0 }
 0x467   :  { %6003 = vpow2.f32 %v2484_v0  ;;  %v2480_v5 = vmul.f32 1.442695, %v2465_v58  ;;  %v2468_v48 = vmin.f32 %v9883_v25, 0.0  ;;  %vm2386_vm13 = vcmp.gt.f32.partialorder %v9827_v29, 0.0 }
 0x468   :  { %6005 = vpow2.f32 %v2482_v62  ;;  %v2488_v43 = vmul.f32 1.442695, %v2469_v54  ;;  %v2478_v32 = vmul.f32 1.442695, %v2464_v34  ;;  %vm2387_vm15 = vcmp.gt.f32.partialorder %v9847_v37, 0.0 }
 0x469   :  { %6007 = vpow2.f32 %v2480_v5  ;;  %v2486_v50 = vmul.f32 1.442695, %v2468_v48  ;;  %vm2450_vm9 = vcmp.gt.f32.partialorder %v9815_v57, 0.0  ;;  %vm2451_vm8 = vcmp.gt.f32.partialorder %v9838_v15, 0.0 }
 0x46a   :  { %v5992_v41 = vpop.eup %5991  ;;  %6009 = vpow2.f32 %v2488_v43  ;;  %vm2455_vm14 = vcmp.gt.f32.partialorder %v9860_v35, 0.0  ;;  %vm2388_vm7 = vcmp.gt.f32.partialorder %v9852_v13, 0.0 }
 0x46b   :  { %6011 = vpow2.f32 %v2478_v32  ;;  %v5516_v53 = vadd.f32 -1.0, %v5992_v41  ;;  %v2522_v41 = vld [vmem:[%s13406_s4] sm:$0x3]  ;;  %s14278_s4 = smov 114  }
 0x46c   :  { %v5994_v23 = vpop.eup %5993  ;;  %6013 = vpow2.f32 %v2486_v50 }
 0x46d   :  { %v5996_v9 = vpop.eup %5995  ;;  %v5521_v27 = vadd.f32 -1.0, %v5994_v23  ;;  %v9890_v31 = vsel %vm2386_vm13, %v9827_v29, %v5516_v53  ;;  %vm2389_vm13 = vcmp.gt.f32.partialorder %v9855_v6, 0.0 }
 0x46e   :  { %v5998_v59 = vpop.eup %5997  ;;  %v5517_v45 = vadd.f32 -1.0, %v5996_v9  ;;  %v2470_v20 = vmin.f32 %v9890_v31, 0.0 }
 0x46f   :  { %v6000_v60 = vpop.eup %5999  ;;  %v5520_v47 = vadd.f32 -1.0, %v5998_v59  ;;  %v2511_v33 = vsel %vm2451_vm8, %v9838_v15, %v5521_v27  ;;  %vm2452_vm8 = vcmp.gt.f32.partialorder %v9874_v21, 0.0  ;;  %v14252_v59 = vmov 0  }
 0x470   :  { %v6002_v63 = vpop.eup %6001  ;;  %v2447_v36 = vsel %vm2387_vm15, %v9847_v37, %v5517_v45  ;;  %v5518_v8 = vadd.f32 -1.0, %v6000_v60  ;;  %v2490_v3 = vmul.f32 1.442695, %v2470_v20  ;;  %vm2454_vm15 = vcmp.gt.f32.partialorder %v9843_v28, 0.0 }
 0x471   :  { %v6004_v1 = vpop.eup %6003  ;;  %v2471_v29 = vmin.f32 %v2447_v36, 0.0  ;;  %v5519_v2 = vadd.f32 -1.0, %v6002_v63  ;;  %v2510_v37 = vsel %vm2450_vm9, %v9815_v57, %v5520_v47  ;;  %vm2457_vm9 = vcmp.gt.f32.partialorder %v9877_v24, 0.0 }
 0x472   :  { %v6006_v18 = vpop.eup %6005  ;;  %v5525_v38 = vadd.f32 -1.0, %v6004_v1  ;;  %v2448_v17 = vsel %vm2388_vm7, %v9852_v13, %v5518_v8  ;;  %6015 = vpow2.f32 %v2490_v3  ;;  %vm2453_vm7 = vcmp.gt.f32.partialorder %v9869_v61, 0.0  ;;  %v14253_v1 = vld [vmem:[#allocation4_spill] sm:$0xff] }
 0x473   :  { %v5524_v40 = vadd.f32 -1.0, %v6006_v18  ;;  %v2492_v49 = vmul.f32 1.442695, %v2471_v29  ;;  %v6008_v4 = vpop.eup %6007  ;;  %v2449_v15 = vsel %vm2389_vm13, %v9855_v6, %v5519_v2  ;;  %v2472_v11 = vmin.f32 %v2448_v17, 0.0 }
 0x474   :  { %v2515_v56 = vsel %vm2455_vm14, %v9860_v35, %v5525_v38  ;;  %v6010_v13 = vpop.eup %6009  ;;  %v5523_v16 = vadd.f32 -1.0, %v6008_v4  ;;  %v2473_v19 = vmin.f32 %v2449_v15, 0.0  ;;  %vm2456_vm14 = vcmp.gt.f32.partialorder %v9883_v25, 0.0 }
 0x475   :  { %v2524_v55 = vpack.c.bf16 %v2515_v56, %v2511_v33  ;;  %v2514_v51 = vsel %vm2454_vm15, %v9843_v28, %v5524_v40  ;;  %6017 = vpow2.f32 %v2492_v49  ;;  %v6012_v57 = vpop.eup %6011  ;;  %v5527_v39 = vadd.f32 -1.0, %v6010_v13  ;;  %v2663_v56 = vld [vmem:[%s13403_s1] sm:$0xff]  ;;  %v2664_v13 = vld [vmem:[%s13403_s1 + $0x8] sm:$0xff] }
 0x476   :  { %v2523_v10 = vpack.c.bf16 %v2514_v51, %v2510_v37  ;;  %v6014_v35 = vpop.eup %6013  ;;  %v2513_v52 = vsel %vm2453_vm7, %v9869_v61, %v5523_v16  ;;  %v5522_v6 = vadd.f32 -1.0, %v6012_v57  ;;  %v2494_v26 = vmul.f32 1.442695, %v2472_v11  ;;  %v14255_v37 = vld [vmem:[#allocation3_spill] sm:$0xff] }
 0x477   :  { %2553 = vmatprep.subr.bf16.mxu0 %v2524_v55  ;;  %v2517_v12 = vsel %vm2457_vm9, %v9877_v24, %v5527_v39  ;;  %v5526_v28 = vadd.f32 -1.0, %v6014_v35  ;;  %v2496_v44 = vmul.f32 1.442695, %v2473_v19  ;;  %vm2458_vm13 = vcmp.gt.f32.partialorder %v9890_v31, 0.0  ;;  %v5536_v35 = vld [vmem:[%s13403_s1 + $0x10] sm:$0xff] }
 0x478   :  { %2554 = vmatpush1.bf16.msra.mxu0 %v2523_v10  ;;  %v2526_v14 = vpack.c.bf16 %v2517_v12, %v2513_v52  ;;  %v2512_v46 = vsel %vm2452_vm8, %v9874_v21, %v5522_v6  ;;  %6019 = vpow2.f32 %v2494_v26  ;;  %vm2459_vm15 = vcmp.gt.f32.partialorder %v2447_v36, 0.0 }
 0x479   :  { %v2516_v62 = vsel %vm2456_vm14, %v9883_v25, %v5526_v28  ;;  %6021 = vpow2.f32 %v2496_v44  ;;  %vm14249_vm7 = vcmask 1043456   ;;  %vm2460_vm8 = vcmp.gt.f32.partialorder %v2448_v17, 0.0 }
 0x47a   :  { %2594 = vmatprep.subr.bf16.mxu1 %v2526_v14  ;;  %v2525_v30 = vpack.c.bf16 %v2516_v62, %v2512_v46  ;;  %vm14250_vm9 = vmmov %vm14249_vm7  ;;  %vm2461_vm14 = vcmp.gt.f32.partialorder %v2449_v15, 0.0  ;;  %v2667_v11 = vcombine.high %v2663_v56, %v2663_v56  ;;  %v2668_v39 = vcombine.high %v2664_v13, %v2664_v13  ;;  %v5537_v46 = vld [vmem:[%s13403_s1 + $0x18] sm:$0xff] }
 0x47b   :  { %v2695_v14 = vcombine.high %v5536_v35, %v5536_v35 }
 0x47c   :  { %v6016_v42 = vpop.eup %6015  ;;  %2595 = vmatpush1.bf16.msra.mxu1 %v2525_v30 }
 0x47d   :  { %v5528_v0 = vadd.f32 -1.0, %v6016_v42 }
 0x47f   :  { %v6018_v22 = vpop.eup %6017  ;;  %v2518_v24 = vsel %vm2458_vm13, %v9890_v31, %v5528_v0  ;;  %vm13656_vm13 = vcmask 195584  }
 0x480   :  { %v5529_v61 = vadd.f32 -1.0, %v6018_v22  ;;  %v2527_v58 = vpack.c.bf16 %v2518_v24, %v2518_v24 }
 0x482   :  { %v2519_v54 = vsel %vm2459_vm15, %v2447_v36, %v5529_v61  ;;  %v6020_v5 = vpop.eup %6019  ;;  %v2542_v25 = vsel %vm14250_vm9, %v2527_v58, 0  ;;  %vm14251_vm15 = vmmov %vm14249_vm7  ;;  %v2696_v61 = vcombine.high %v5537_v46, %v5537_v46  ;;  %v5538_v58 = vld [vmem:[%s13403_s1 + $0x20] sm:$0xff]  ;;  %vm14257_vm9 = vcmp.lt.s32.totalorder %v6243_v7, 111 }
 0x483   :  { %v2528_v21 = vpack.c.bf16 %v2519_v54, %v2519_v54  ;;  %v6022_v34 = vpop.eup %6021  ;;  %v5530_v43 = vadd.f32 -1.0, %v6020_v5 }
 0x484   :  { %v5531_v48 = vadd.f32 -1.0, %v6022_v34 }
 0x485   :  { %5532 = vmatprep.subr.msk.bf16.mxu0 %vm14249_vm7, %v2528_v21  ;;  %v2520_v32 = vsel %vm2460_vm8, %v2448_v17, %v5530_v43  ;;  %vm14258_vm8 = vmmov %vm14257_vm9 }
 0x486   :  { %2556 = vmatpush1.bf16.msra.mxu0 %v2542_v25  ;;  %v2521_v50 = vsel %vm2461_vm14, %v2449_v15, %v5531_v48  ;;  %v2529_v23 = vpack.c.bf16 %v2520_v32, %v2520_v32  ;;  %v2723_v48 = vcombine.high %v5538_v58, %v5538_v58  ;;  %v5539_v32 = vld [vmem:[%s13403_s1 + $0x28] sm:$0xff]  ;;  %vm14259_vm14 = vmmov %vm14258_vm8 }
 0x487   :  { %v2530_v53 = vpack.c.bf16 %v2521_v50, %v2521_v50 }
 0x488   :  { %v2548_v9 = vsel %vm14251_vm15, %v2529_v23, 0  ;;  %vm14260_vm15 = vmmov %vm14258_vm8 }
 0x489   :  { %5533 = vmatmul.mubr.msk.bf16.vlgmr.msra.gmra.mrb[8].mxu0 %vm13656_vm13, %v2522_v41  ;;  %5534 = vmatprep.subr.msk.bf16.mxu1 %vm14249_vm7, %v2530_v53 }
 0x48a   :  { %2996 = vmatprep.mubr.bf16.mxu0 %v14252_v59  ;;  %2597 = vmatpush1.bf16.msra.mxu1 %v2548_v9 }
 0x48c   :  { %v2535_v27 = vpop.permute.xlu0 %2534 }
 0x48d   :  { %5535 = vmatmul.mubr.msk.bf16.vlgmr.msra.gmra.mrb[8].mxu1 %vm13656_vm13, %v2522_v41 }
 0x48e   :  { %3047 = vmatprep.mubr.bf16.mxu1 %v14252_v59 }
 0x55c   :  { %v2587_v45 = vpop.f32.mrb[8].mxu0 }
 0x55d   :  { %v2588_v31 = vadd.f32 %v2587_v45, %v2535_v27  ;;  %v2589_v60 = vpop.f32.mrb[9].mxu0 }
 0x55e   :  { %v2590_v47 = vadd.f32 %v2589_v60, %v2535_v27  ;;  %v2591_v20 = vpop.f32.mrb[10].mxu0 }
 0x55f   :  { %v2592_v63 = vpop.f32.mrb[11].mxu0 }
 0x560   :  { %v2639_v36 = vcombine.low %v2588_v31, %v2590_v47  ;;  %v2628_v8 = vpop.f32.mrb[8].mxu1  ;;  %v5540_v47 = vld [vmem:[%s13403_s1 + $0x30] sm:$0xff] }
 0x561   :  { %v2629_v3 = vadd.f32 %v2628_v8, %v2535_v27  ;;  %v2630_v18 = vpop.f32.mrb[9].mxu1 }
 0x562   :  { %v9935_v29 = vsub.f32 %v14253_v1, %v2639_v36  ;;  %v2631_v38 = vadd.f32 %v2630_v18, %v2535_v27  ;;  %v2632_v33 = vpop.f32.mrb[10].mxu1  ;;  %v2724_v27 = vcombine.high %v5539_v32, %v5539_v32 }
 0x563   :  { %v2633_v2 = vpop.f32.mrb[11].mxu1 }
 0x564   :  { %14254 = vst [vmem:[#allocation72_spill] sm:$0xff] %v9935_v29  ;;  %2763 = vst [vmem:[#allocation2 + $0x80] sm:$0xf] %v9935_v29  ;;  %2651 = vrot.lane.b32.xlu1 %v9935_v29, %s6096_s0  ;;  %v2647_v17 = vcombine.high %v9935_v29, %v9935_v29  ;;  %v2640_v40 = vcombine.low %v2629_v3, %v2631_v38  ;;  %v2751_v38 = vcombine.high %v5540_v47, %v5540_v47 }
 0x566   :  { %2764 = vst [vmem:[#allocation2 + $0x88] sm:$0xf] %v2647_v17  ;;  %v9943_v49 = vsub.f32 %v14255_v37, %v2640_v40 }
 0x568   :  { %14256 = vst [vmem:[#allocation152_spill] sm:$0xff] %v9943_v49  ;;  %2653 = vrot.lane.b32.xlu1 %v2647_v17, %s6096_s0  ;;  %2765 = vst [vmem:[#allocation2 + $0x90] sm:$0xf] %v9943_v49  ;;  %2655 = vrot.lane.b32.xlu0 %v9943_v49, %s6096_s0  ;;  %v2648_v4 = vcombine.high %v9943_v49, %v9943_v49 }
 0x56a   :  { %2766 = vst [vmem:[#allocation2 + $0x98] sm:$0xf] %v2648_v4 }
 0x56c   :  { %2657 = vrot.lane.b32.xlu1 %v2648_v4, %s6096_s0  ;;  %2679 = vrot.lane.b32.xlu0 %v9935_v29, %s6097_s17 }
 0x570   :  { %2681 = vrot.lane.b32.xlu1 %v2647_v17, %s6097_s17  ;;  %2683 = vrot.lane.b32.xlu0 %v9943_v49, %s6097_s17 }
 0x574   :  { %2685 = vrot.lane.b32.xlu1 %v2648_v4, %s6097_s17  ;;  %2707 = vrot.lane.b32.xlu0 %v9935_v29, %s6098_s18 }
 0x578   :  { %2709 = vrot.lane.b32.xlu1 %v2647_v17, %s6098_s18  ;;  %2711 = vrot.lane.b32.xlu0 %v9943_v49, %s6098_s18 }
 0x57c   :  { %2713 = vrot.lane.b32.xlu1 %v2648_v4, %s6098_s18  ;;  %2735 = vrot.lane.b32.xlu0 %v9935_v29, %s6099_s19 }
 0x580   :  { %2737 = vrot.lane.b32.xlu1 %v2647_v17, %s6099_s19  ;;  %2739 = vrot.lane.b32.xlu0 %v9943_v49, %s6099_s19 }
 0x584   :  { %2741 = vrot.lane.b32.xlu1 %v2648_v4, %s6099_s19  ;;  %2767 = vrot.lane.b32.xlu0 %v9935_v29, %s6100_s20 }
 0x588   :  { %2769 = vrot.lane.b32.xlu1 %v2647_v17, %s6100_s20  ;;  %2771 = vrot.lane.b32.xlu0 %v9943_v49, %s6100_s20 }
 0x58c   :  { %2773 = vrot.lane.b32.xlu1 %v2648_v4, %s6100_s20  ;;  %2795 = vrot.lane.b32.xlu0 %v9935_v29, %s6101_s21 }
 0x590   :  { %2797 = vrot.lane.b32.xlu1 %v2647_v17, %s6101_s21  ;;  %2799 = vrot.lane.b32.xlu0 %v9943_v49, %s6101_s21 }
 0x594   :  { %2801 = vrot.lane.b32.xlu1 %v2648_v4, %s6101_s21  ;;  %2823 = vrot.lane.b32.xlu0 %v9935_v29, %s6102_s22 }
 0x598   :  { %2825 = vrot.lane.b32.xlu1 %v2647_v17, %s6102_s22  ;;  %2827 = vrot.lane.b32.xlu0 %v9943_v49, %s6102_s22 }
 0x59c   :  { %2829 = vrot.lane.b32.xlu1 %v2648_v4, %s6102_s22  ;;  %2851 = vrot.lane.b32.xlu0 %v9935_v29, %s6103_s23 }
 0x5a0   :  { %2853 = vrot.lane.b32.xlu1 %v2647_v17, %s6103_s23  ;;  %2855 = vrot.lane.b32.xlu0 %v9943_v49, %s6103_s23 }
 0x5a4   :  { %2857 = vrot.lane.b32.xlu1 %v2648_v4, %s6103_s23  ;;  %v5541_v4 = vld [vmem:[%s13403_s1 + $0x38] sm:$0xff] }
 0x5d6   :  { %v2652_v15 = vpop.permute.xlu1 %2651 }
 0x5da   :  { %v2654_v55 = vpop.permute.xlu1 %2653  ;;  %v2656_v51 = vpop.permute.xlu0 %2655 }
 0x5db   :  { %v2661_v16 = vsel %vm90_vm0, %v2652_v15, %v2654_v55  ;;  %v2660_v57 = vsel %vm90_vm0, %v2654_v55, %v2656_v51 }
 0x5dc   :  { %v2672_v10 = vmul.f32 %v2667_v11, %v2661_v16  ;;  %v2673_v19 = vmul.f32 %v2664_v13, %v2660_v57 }
 0x5de   :  { %2676 = vst [vmem:[#allocation2 + $0x8] sm:$0xf] %v2672_v10  ;;  %v2658_v52 = vpop.permute.xlu1 %2657  ;;  %2677 = vst [vmem:[#allocation2 + $0x10] sm:$0xf] %v2673_v19  ;;  %v2680_v6 = vpop.permute.xlu0 %2679 }
 0x5df   :  { %v2659_v26 = vsel %vm90_vm0, %v2656_v51, %v2658_v52  ;;  %v2662_v12 = vsel %vm90_vm0, %v2658_v52, %v2652_v15  ;;  %v5542_v52 = vld [vmem:[%s13403_s1 + $0x50] sm:$0xff] }
 0x5e0   :  { %v2671_v28 = vmul.f32 %v2663_v56, %v2662_v12  ;;  %v2674_v44 = vmul.f32 %v2668_v39, %v2659_v26  ;;  %v2752_v39 = vcombine.high %v5541_v4, %v5541_v4 }
 0x5e2   :  { %2675 = vst [vmem:[#allocation2] sm:$0xf] %v2671_v28  ;;  %2678 = vst [vmem:[#allocation2 + $0x18] sm:$0xf] %v2674_v44  ;;  %v2682_v62 = vpop.permute.xlu1 %2681  ;;  %v2684_v30 = vpop.permute.xlu0 %2683 }
 0x5e3   :  { %v2689_v42 = vsel %vm119_vm1, %v2680_v6, %v2682_v62  ;;  %v2688_v0 = vsel %vm119_vm1, %v2682_v62, %v2684_v30 }
 0x5e4   :  { %v2700_v22 = vmul.f32 %v2695_v14, %v2689_v42  ;;  %v2701_v24 = vmul.f32 %v5537_v46, %v2688_v0  ;;  %v2783_v14 = vcombine.high %v5542_v52, %v5542_v52  ;;  %v5543_v46 = vld [vmem:[%s13403_s1 + $0x58] sm:$0xff] }
 0x5e5   :  { %v2883_v31 = vld [vmem:[#allocation2 + $0x8] sm:$0xff]  ;;  %v2884_v13 = vld [vmem:[#allocation2 + $0x10] sm:$0xff] }
 0x5e6   :  { %2704 = vst [vmem:[#allocation2 + $0x28] sm:$0xf] %v2700_v22  ;;  %v2686_v54 = vpop.permute.xlu1 %2685  ;;  %2705 = vst [vmem:[#allocation2 + $0x30] sm:$0xf] %v2701_v24  ;;  %v2708_v5 = vpop.permute.xlu0 %2707 }
 0x5e7   :  { %v2687_v21 = vsel %vm119_vm1, %v2684_v30, %v2686_v54  ;;  %v2690_v34 = vsel %vm119_vm1, %v2686_v54, %v2680_v6 }
 0x5e8   :  { %v2699_v43 = vmul.f32 %v5536_v35, %v2690_v34  ;;  %v2702_v25 = vmul.f32 %v2696_v61, %v2687_v21  ;;  %v2784_v61 = vcombine.high %v5543_v46, %v5543_v46  ;;  %v5544_v34 = vld [vmem:[%s13403_s1 + $0x60] sm:$0xff] }
 0x5e9   :  { %v2882_v33 = vld [vmem:[#allocation2] sm:$0xff]  ;;  %v2885_v40 = vld [vmem:[#allocation2 + $0x18] sm:$0xff] }
 0x5ea   :  { %2703 = vst [vmem:[#allocation2 + $0x20] sm:$0xf] %v2699_v43  ;;  %2706 = vst [vmem:[#allocation2 + $0x38] sm:$0xf] %v2702_v25  ;;  %v2710_v41 = vpop.permute.xlu1 %2709  ;;  %v2712_v50 = vpop.permute.xlu0 %2711 }
 0x5eb   :  { %v2717_v23 = vsel %vm149_vm2, %v2708_v5, %v2710_v41  ;;  %v2716_v53 = vsel %vm149_vm2, %v2710_v41, %v2712_v50 }
 0x5ec   :  { %v2728_v9 = vmul.f32 %v2723_v48, %v2717_v23  ;;  %v2729_v45 = vmul.f32 %v5539_v32, %v2716_v53  ;;  %v5545_v53 = vld [vmem:[%s13403_s1 + $0x68] sm:$0xff] }
 0x5ed   :  { %v2887_v60 = vld [vmem:[#allocation2 + $0x28] sm:$0xff]  ;;  %v2888_v2 = vld [vmem:[#allocation2 + $0x30] sm:$0xff] }
 0x5ee   :  { %2732 = vst [vmem:[#allocation2 + $0x48] sm:$0xf] %v2728_v9  ;;  %v2714_v20 = vpop.permute.xlu1 %2713  ;;  %v2919_v63 = vpack.c.bf16 %v2887_v60, %v2883_v31  ;;  %2733 = vst [vmem:[#allocation2 + $0x50] sm:$0xf] %v2729_v45  ;;  %v2736_v36 = vpop.permute.xlu0 %2735  ;;  %v2920_v16 = vpack.c.bf16 %v2888_v2, %v2884_v13  ;;  %v2811_v9 = vcombine.high %v5544_v34, %v5544_v34  ;;  %v2898_v2 = vld [vmem:[#allocation2 + $0x80] sm:$0xff] }
 0x5ef   :  { %v2715_v8 = vsel %vm149_vm2, %v2712_v50, %v2714_v20  ;;  %v2718_v1 = vsel %vm149_vm2, %v2714_v20, %v2708_v5 }
 0x5f0   :  { %v2727_v3 = vmul.f32 %v5538_v58, %v2718_v1  ;;  %v2730_v18 = vmul.f32 %v2724_v27, %v2715_v8  ;;  %2964 = vmatprep.subr.bf16.mxu0 %v2919_v63 }
 0x5f1   :  { %v2886_v17 = vld [vmem:[#allocation2 + $0x20] sm:$0xff]  ;;  %v2889_v37 = vld [vmem:[#allocation2 + $0x38] sm:$0xff] }
 0x5f2   :  { %2731 = vst [vmem:[#allocation2 + $0x40] sm:$0xf] %v2727_v3  ;;  %2734 = vst [vmem:[#allocation2 + $0x58] sm:$0xf] %v2730_v18  ;;  %v2738_v56 = vpop.permute.xlu1 %2737  ;;  %v2918_v15 = vpack.c.bf16 %v2886_v17, %v2882_v33  ;;  %v2921_v11 = vpack.c.bf16 %v2889_v37, %v2885_v40  ;;  %v2740_v55 = vpop.permute.xlu0 %2739  ;;  %v2899_v37 = vld [vmem:[#allocation2 + $0x88] sm:$0xff] }
 0x5f3   :  { %v2745_v51 = vsel %vm179_vm3, %v2736_v36, %v2738_v56  ;;  %v2744_v57 = vsel %vm179_vm3, %v2738_v56, %v2740_v55 }
 0x5f4   :  { %v2756_v10 = vmul.f32 %v2751_v38, %v2745_v51  ;;  %2965 = vmatpush1.bf16.msra.mxu0 %v2918_v15  ;;  %3015 = vmatprep.subr.bf16.mxu1 %v2921_v11  ;;  %v2757_v19 = vmul.f32 %v5541_v4, %v2744_v57  ;;  %v2812_v38 = vcombine.high %v5545_v53, %v5545_v53  ;;  %v5546_v15 = vld [vmem:[%s13403_s1 + $0x70] sm:$0xff] }
 0x5f5   :  { %3016 = vmatpush1.bf16.msra.mxu1 %v2920_v16  ;;  %v2891_v58 = vld [vmem:[#allocation2 + $0x48] sm:$0xff]  ;;  %v2892_v63 = vld [vmem:[#allocation2 + $0x50] sm:$0xff] }
 0x5f6   :  { %2760 = vst [vmem:[#allocation2 + $0x68] sm:$0xf] %v2756_v10  ;;  %v2742_v35 = vpop.permute.xlu1 %2741  ;;  %2761 = vst [vmem:[#allocation2 + $0x70] sm:$0xf] %v2757_v19  ;;  %v2768_v6 = vpop.permute.xlu0 %2767  ;;  %v2901_v10 = vld [vmem:[#allocation2 + $0x98] sm:$0xff]  ;;  %v2839_v19 = vcombine.high %v5546_v15, %v5546_v15 }
 0x5f7   :  { %v2743_v26 = vsel %vm179_vm3, %v2740_v55, %v2742_v35  ;;  %v2746_v12 = vsel %vm179_vm3, %v2742_v35, %v2736_v36 }
 0x5f8   :  { %v2755_v28 = vmul.f32 %v5540_v47, %v2746_v12  ;;  %v2758_v44 = vmul.f32 %v2752_v39, %v2743_v26  ;;  %v2900_v39 = vld [vmem:[#allocation2 + $0x90] sm:$0xff] }
 0x5f9   :  { %v2890_v50 = vld [vmem:[#allocation2 + $0x40] sm:$0xff]  ;;  %v2893_v45 = vld [vmem:[#allocation2 + $0x58] sm:$0xff] }
 0x5fa   :  { %2759 = vst [vmem:[#allocation2 + $0x60] sm:$0xf] %v2755_v28  ;;  %2762 = vst [vmem:[#allocation2 + $0x78] sm:$0xf] %v2758_v44  ;;  %v2770_v62 = vpop.permute.xlu1 %2769  ;;  %v2772_v30 = vpop.permute.xlu0 %2771 }
 0x5fb   :  { %v2777_v42 = vsel %vm213_vm4, %v2768_v6, %v2770_v62  ;;  %v2776_v0 = vsel %vm213_vm4, %v2770_v62, %v2772_v30 }
 0x5fc   :  { %v2787_v22 = vmul.f32 %v5542_v52, %v2777_v42  ;;  %v2788_v24 = vmul.f32 %v2783_v14, %v2776_v0 }
 0x5fd   :  { %v2895_v54 = vld [vmem:[#allocation2 + $0x68] sm:$0xff]  ;;  %v2896_v23 = vld [vmem:[#allocation2 + $0x70] sm:$0xff] }
 0x5fe   :  { %2791 = vst [vmem:[#allocation2 + $0xa0] sm:$0xf] %v2787_v22  ;;  %v2774_v5 = vpop.permute.xlu1 %2773  ;;  %v2923_v21 = vpack.c.bf16 %v2895_v54, %v2891_v58  ;;  %2792 = vst [vmem:[#allocation2 + $0xa8] sm:$0xf] %v2788_v24  ;;  %v2796_v43 = vpop.permute.xlu0 %2795  ;;  %v2924_v1 = vpack.c.bf16 %v2896_v23, %v2892_v63  ;;  %v5548_v22 = vld [vmem:[%s13403_s1 + $0x80] sm:$0xff] }
 0x5ff   :  { %v2775_v25 = vsel %vm213_vm4, %v2772_v30, %v2774_v5  ;;  %v2778_v48 = vsel %vm213_vm4, %v2774_v5, %v2768_v6  ;;  %v5547_v6 = vld [vmem:[%s13403_s1 + $0x78] sm:$0xff] }
 0x600   :  { %v2789_v32 = vmul.f32 %v5543_v46, %v2775_v25  ;;  %v2790_v41 = vmul.f32 %v2784_v61, %v2778_v48  ;;  %2966 = vmatprep.subr.bf16.mxu0 %v2923_v21  ;;  %v2840_v30 = vcombine.high %v5547_v6, %v5547_v6  ;;  %v2867_v21 = vcombine.high %v5548_v22, %v5548_v22 }
 0x601   :  { %v2894_v27 = vld [vmem:[#allocation2 + $0x60] sm:$0xff]  ;;  %v2897_v31 = vld [vmem:[#allocation2 + $0x78] sm:$0xff] }
 0x602   :  { %2793 = vst [vmem:[#allocation2 + $0xb0] sm:$0xf] %v2789_v32  ;;  %2794 = vst [vmem:[#allocation2 + $0xb8] sm:$0xf] %v2790_v41  ;;  %v2798_v60 = vpop.permute.xlu1 %2797  ;;  %v2922_v47 = vpack.c.bf16 %v2894_v27, %v2890_v50  ;;  %v2925_v20 = vpack.c.bf16 %v2897_v31, %v2893_v45  ;;  %v2800_v36 = vpop.permute.xlu0 %2799 }
 0x603   :  { %v2805_v8 = vsel %vm243_vm5, %v2796_v43, %v2798_v60  ;;  %v2804_v3 = vsel %vm243_vm5, %v2798_v60, %v2800_v36 }
 0x604   :  { %v2815_v18 = vmul.f32 %v5544_v34, %v2805_v8  ;;  %2967 = vmatpush1.bf16.msra.mxu0 %v2922_v47  ;;  %3017 = vmatprep.subr.bf16.mxu1 %v2925_v20  ;;  %v2816_v33 = vmul.f32 %v2811_v9, %v2804_v3  ;;  %v5549_v34 = vld [vmem:[%s13403_s1 + $0x88] sm:$0xff] }
 0x605   :  { %3018 = vmatpush1.bf16.msra.mxu1 %v2924_v1  ;;  %v2902_v17 = vld [vmem:[#allocation2 + $0xa0] sm:$0xff]  ;;  %v2903_v4 = vld [vmem:[#allocation2 + $0xa8] sm:$0xff]  ;;  %v2868_v50 = vcombine.high %v5549_v34, %v5549_v34 }
 0x606   :  { %2819 = vst [vmem:[#allocation2 + $0xc0] sm:$0xf] %v2815_v18  ;;  %v2802_v40 = vpop.permute.xlu1 %2801  ;;  %v2926_v56 = vpack.c.bf16 %v2902_v17, %v2898_v2  ;;  %2820 = vst [vmem:[#allocation2 + $0xc8] sm:$0xf] %v2816_v33  ;;  %v2824_v11 = vpop.permute.xlu0 %2823  ;;  %v2927_v51 = vpack.c.bf16 %v2903_v4, %v2899_v37 }
 0x607   :  { %v2803_v13 = vsel %vm243_vm5, %v2800_v36, %v2802_v40  ;;  %v2806_v55 = vsel %vm243_vm5, %v2802_v40, %v2796_v43 }
 0x608   :  { %v2817_v16 = vmul.f32 %v5545_v53, %v2803_v13  ;;  %v2818_v57 = vmul.f32 %v2812_v38, %v2806_v55  ;;  %2968 = vmatprep.subr.bf16.mxu0 %v2927_v51 }
 0x609   :  { %v2905_v35 = vld [vmem:[#allocation2 + $0xb8] sm:$0xff]  ;;  %v2904_v52 = vld [vmem:[#allocation2 + $0xb0] sm:$0xff]  ;;  %2969 = vmatpush1.bf16.msra.mxu0 %v2926_v56 }
 0x60a   :  { %2821 = vst [vmem:[#allocation2 + $0xd0] sm:$0xf] %v2817_v16  ;;  %2822 = vst [vmem:[#allocation2 + $0xd8] sm:$0xf] %v2818_v57  ;;  %v2826_v26 = vpop.permute.xlu1 %2825  ;;  %v2929_v12 = vpack.c.bf16 %v2905_v35, %v2901_v10  ;;  %v2928_v28 = vpack.c.bf16 %v2904_v52, %v2900_v39  ;;  %v2828_v44 = vpop.permute.xlu0 %2827  ;;  %v5950_v57 = vld [vmem:[%s13407_s6 + $0x8] ss:$0 sps:$4 sm:$0xff]  }
 0x60b   :  { %v2833_v14 = vsel %vm273_vm6, %v2824_v11, %v2826_v26  ;;  %v2832_v46 = vsel %vm273_vm6, %v2826_v26, %v2828_v44 }
 0x60c   :  { %v2843_v62 = vmul.f32 %v5546_v15, %v2833_v14  ;;  %3019 = vmatprep.subr.bf16.mxu1 %v2929_v12  ;;  %v2844_v42 = vmul.f32 %v2839_v19, %v2832_v46  ;;  %v5949_v15 = vld [vmem:[%s13407_s6] sm:$0xff]   ;;  %s14270_s6 = smov 33  }
 0x60d   :  { %3020 = vmatpush1.bf16.msra.mxu1 %v2928_v28  ;;  %v2906_v53 = vld [vmem:[#allocation2 + $0xc0] sm:$0xff]  ;;  %v2907_v45 = vld [vmem:[#allocation2 + $0xc8] sm:$0xff] }
 0x60e   :  { %2847 = vst [vmem:[#allocation2 + $0xe0] sm:$0xf] %v2843_v62  ;;  %v2830_v0 = vpop.permute.xlu1 %2829  ;;  %2848 = vst [vmem:[#allocation2 + $0xe8] sm:$0xf] %v2844_v42  ;;  %v2852_v61 = vpop.permute.xlu0 %2851 }
 0x60f   :  { %v2831_v24 = vsel %vm273_vm6, %v2828_v44, %v2830_v0  ;;  %v2834_v58 = vsel %vm273_vm6, %v2830_v0, %v2824_v11 }
 0x610   :  { %v2845_v54 = vmul.f32 %v5547_v6, %v2831_v24  ;;  %v2846_v5 = vmul.f32 %v2840_v30, %v2834_v58 }
 0x611   :  { %v2909_v1 = vld [vmem:[#allocation2 + $0xd8] sm:$0xff]  ;;  %v2908_v18 = vld [vmem:[#allocation2 + $0xd0] sm:$0xff] }
 0x612   :  { %2849 = vst [vmem:[#allocation2 + $0xf0] sm:$0xf] %v2845_v54  ;;  %2850 = vst [vmem:[#allocation2 + $0xf8] sm:$0xf] %v2846_v5  ;;  %v2854_v43 = vpop.permute.xlu1 %2853  ;;  %v2856_v25 = vpop.permute.xlu0 %2855 }
 0x613   :  { %v2861_v48 = vsel %vm14257_vm9, %v2852_v61, %v2854_v43  ;;  %v2860_v32 = vsel %vm14258_vm8, %v2854_v43, %v2856_v25  ;;  %vm14261_vm9 = vmmov %vm14249_vm7 }
 0x614   :  { %v2871_v41 = vmul.f32 %v5548_v22, %v2861_v48  ;;  %v2872_v23 = vmul.f32 %v2867_v21, %v2860_v32  ;;  %vm14262_vm8 = vmmov %vm14249_vm7 }
 0x615   :  { %v2910_v9 = vld [vmem:[#allocation2 + $0xe0] sm:$0xff]  ;;  %v2911_v31 = vld [vmem:[#allocation2 + $0xe8] sm:$0xff] }
 0x616   :  { %2875 = vst [vmem:[#allocation2 + $0x100] sm:$0xf] %v2871_v41  ;;  %v2858_v27 = vpop.permute.xlu1 %2857  ;;  %v2930_v60 = vpack.c.bf16 %v2910_v9, %v2906_v53  ;;  %2876 = vst [vmem:[#allocation2 + $0x108] sm:$0xf] %v2872_v23  ;;  %v2931_v63 = vpack.c.bf16 %v2911_v31, %v2907_v45 }
 0x617   :  { %v2859_v47 = vsel %vm14259_vm14, %v2856_v25, %v2858_v27  ;;  %v2862_v20 = vsel %vm14260_vm15, %v2858_v27, %v2852_v61  ;;  %vm14263_vm14 = vmmov %vm14249_vm7  ;;  %vm14264_vm15 = vcmask 588800  }
 0x618   :  { %v2873_v36 = vmul.f32 %v5549_v34, %v2859_v47  ;;  %v2874_v8 = vmul.f32 %v2868_v50, %v2862_v20  ;;  %2970 = vmatprep.subr.bf16.mxu0 %v2931_v63 }
 0x619   :  { %v2913_v3 = vld [vmem:[#allocation2 + $0xf8] sm:$0xff]  ;;  %v2912_v38 = vld [vmem:[#allocation2 + $0xf0] sm:$0xff]  ;;  %2971 = vmatpush1.bf16.msra.mxu0 %v2930_v60 }
 0x61a   :  { %2877 = vst [vmem:[#allocation2 + $0x110] sm:$0xf] %v2873_v36  ;;  %2878 = vst [vmem:[#allocation2 + $0x118] sm:$0xf] %v2874_v8  ;;  %v2933_v33 = vpack.c.bf16 %v2913_v3, %v2909_v1  ;;  %v2932_v2 = vpack.c.bf16 %v2912_v38, %v2908_v18 }
 0x61c   :  { %3021 = vmatprep.subr.bf16.mxu1 %v2933_v33 }
 0x61d   :  { %3022 = vmatpush1.bf16.msra.mxu1 %v2932_v2  ;;  %v2914_v17 = vld [vmem:[#allocation2 + $0x100] sm:$0xff]  ;;  %v2915_v40 = vld [vmem:[#allocation2 + $0x108] sm:$0xff] }
 0x61e   :  { %v2934_v37 = vpack.c.bf16 %v2914_v17, %v2914_v17  ;;  %v2935_v4 = vpack.c.bf16 %v2915_v40, %v2915_v40 }
 0x620   :  { %v2953_v56 = vsel %vm14249_vm7, %v2934_v37, 0  ;;  %5552 = vmatprep.subr.msk.bf16.mxu0 %vm14261_vm9, %v2935_v4  ;;  %vm14265_vm7 = vmmov %vm14264_vm15 }
 0x621   :  { %v2917_v11 = vld [vmem:[#allocation2 + $0x118] sm:$0xff]  ;;  %v2916_v13 = vld [vmem:[#allocation2 + $0x110] sm:$0xff]  ;;  %2973 = vmatpush1.bf16.msra.mxu0 %v2953_v56  ;;  %vm14266_vm9 = vmmov %vm14265_vm7 }
 0x622   :  { %v2937_v55 = vpack.c.bf16 %v2917_v11, %v2917_v11  ;;  %v2936_v51 = vpack.c.bf16 %v2916_v13, %v2916_v13  ;;  %vm14267_vm13 = vmmov %vm14265_vm7 }
 0x624   :  { %5555 = vmatprep.subr.msk.bf16.mxu1 %vm14262_vm8, %v2937_v55  ;;  %v2959_v16 = vsel %vm14263_vm14, %v2936_v51, 0  ;;  %5553 = vmatmul.mubr.msk.bf16.vlgmr.msra.gmra.mrb[12].mxu0 %vm14264_vm15, %v5949_v15 }
 0x625   :  { %3024 = vmatpush1.bf16.msra.mxu1 %v2959_v16  ;;  %3006 = vmatprep.mubr.bf16.mxu0 %v14252_v59 }
 0x628   :  { %5556 = vmatmul.mubr.msk.bf16.vlgmr.msra.gmra.mrb[12].mxu1 %vm14265_vm7, %v5949_v15 }
 0x629   :  { %3057 = vmatprep.mubr.bf16.mxu1 %v14252_v59 }
 0x62c   :  { %5554 = vmatmul.mubr.msk.bf16.gmra.mrb[16].mxu0 %vm14266_vm9, %v5950_v57 }
 0x62d   :  { %5120 = vmatprep.mubr.bf16.mxu0 %v14252_v59 }
 0x630   :  { %5557 = vmatmul.mubr.msk.bf16.gmra.mrb[16].mxu1 %vm14267_vm13, %v5950_v57 }
 0x631   :  { %5161 = vmatprep.mubr.bf16.mxu1 %v14252_v59 }
 0x6f7   :  { %v2998_v10 = vpop.f32.mrb[12].mxu0 }
 0x6f8   :  { %v3078_v39 = vmin.f32 %v2998_v10, 0.0  ;;  %v3000_v19 = vpop.f32.mrb[13].mxu0  ;;  %vm3066_vm13 = vcmp.gt.f32.partialorder %v2998_v10, 0.0 }
 0x6f9   :  { %v10124_v35 = vpop.f32.mrb[14].mxu0  ;;  %v3079_v62 = vmin.f32 %v3000_v19, 0.0  ;;  %vm3067_vm14 = vcmp.gt.f32.partialorder %v3000_v19, 0.0 }
 0x6fa   :  { %v3090_v52 = vmul.f32 1.442695, %v3078_v39  ;;  %v10126_v6 = vpop.f32.mrb[15].mxu0  ;;  %v3082_v32 = vmin.f32 %v10124_v35, 0.0  ;;  %vm3070_vm7 = vcmp.gt.f32.partialorder %v10124_v35, 0.0 }
 0x6fb   :  { %v3049_v26 = vpop.f32.mrb[12].mxu1  ;;  %v3092_v59 = vmul.f32 1.442695, %v3079_v62 }
 0x6fc   :  { %v3051_v12 = vpop.f32.mrb[13].mxu1  ;;  %6023 = vpow2.f32 %v3090_v52  ;;  %v3080_v28 = vmin.f32 %v3049_v26, 0.0  ;;  %vm3068_vm8 = vcmp.gt.f32.partialorder %v3049_v26, 0.0  ;;  %v3098_v41 = vmul.f32 1.442695, %v3082_v32 }
 0x6fd   :  { %v10128_v44 = vpop.f32.mrb[14].mxu1  ;;  %v3081_v30 = vmin.f32 %v3051_v12, 0.0  ;;  %vm3069_vm15 = vcmp.gt.f32.partialorder %v3051_v12, 0.0 }
 0x6fe   :  { %v10130_v14 = vpop.f32.mrb[15].mxu1  ;;  %v3094_v46 = vmul.f32 1.442695, %v3080_v28  ;;  %v3084_v50 = vmin.f32 %v10128_v44, 0.0  ;;  %vm3072_vm9 = vcmp.gt.f32.partialorder %v10128_v44, 0.0 }
 0x6ff   :  { %v3096_v22 = vmul.f32 1.442695, %v3081_v30  ;;  %v10402_v30 = vpop.f32.mrb[16].mxu0 }
 0x700   :  { %6025 = vpow2.f32 %v3094_v46  ;;  %v3102_v23 = vmul.f32 1.442695, %v3084_v50 }
 0x701   :  { %6027 = vpow2.f32 %v3092_v59 }
 0x702   :  { %6029 = vpow2.f32 %v3096_v22 }
 0x703   :  { %6031 = vpow2.f32 %v3098_v41 }
 0x704   :  { %6033 = vpow2.f32 %v3102_v23 }
 0x706   :  { %v6024_v42 = vpop.eup %6023 }
 0x707   :  { %v5558_v0 = vadd.f32 -1.0, %v6024_v42  ;;  %v10404_v42 = vpop.f32.mrb[16].mxu1 }
 0x709   :  { %v10132_v61 = vsel %vm3066_vm13, %v2998_v10, %v5558_v0  ;;  %v10410_v0 = vpop.f32.mrb[17].mxu0  ;;  %vm3071_vm13 = vcmp.gt.f32.partialorder %v10126_v6, 0.0 }
 0x70a   :  { %14268 = vst [vmem:[#allocation61_spill] sm:$0xff] %v10132_v61  ;;  %v6026_v24 = vpop.eup %6025  ;;  %3163 = vrot.lane.b32.xlu0 %v10132_v61, %s6105_s2  ;;  %v3012_v22 = vpop.f32.mrb[18].mxu0 }
 0x70b   :  { %v5560_v58 = vadd.f32 -1.0, %v6026_v24  ;;  %v6028_v5 = vpop.eup %6027 }
 0x70c   :  { %v5559_v21 = vadd.f32 -1.0, %v6028_v5  ;;  %v6030_v34 = vpop.eup %6029  ;;  %v10416_v5 = vpop.f32.mrb[17].mxu1 }
 0x70d   :  { %v10136_v54 = vsel %vm3068_vm8, %v3049_v26, %v5560_v58  ;;  %v5561_v25 = vadd.f32 -1.0, %v6030_v34  ;;  %v6032_v53 = vpop.eup %6031  ;;  %v3063_v34 = vpop.f32.mrb[18].mxu1  ;;  %vm3073_vm8 = vcmp.gt.f32.partialorder %v10130_v14, 0.0 }
 0x70e   :  { %14269 = vst [vmem:[#allocation76_spill] sm:$0xff] %v10136_v54  ;;  %3831 = vrot.lane.b32.xlu1 %v10136_v54, %s6111_s26  ;;  %3175 = vrot.lane.b32.xlu0 %v10136_v54, %s6105_s2  ;;  %v10150_v43 = vsel %vm3067_vm14, %v3000_v19, %v5559_v21  ;;  %v5562_v9 = vadd.f32 -1.0, %v6032_v53  ;;  %v6034_v27 = vpop.eup %6033  ;;  %v3013_v21 = vpop.f32.mrb[19].mxu0  ;;  %vm3074_vm14 = vcmp.gt.f32.partialorder %v10402_v30, 0.0 }
 0x70f   :  { %14271 = vst [vmem:[#allocation80_spill] sm:$0xff] %v10150_v43  ;;  %v10156_v48 = vsel %vm3069_vm15, %v3051_v12, %v5561_v25  ;;  %v5564_v31 = vadd.f32 -1.0, %v6034_v27  ;;  %v3064_v25 = vpop.f32.mrb[19].mxu1  ;;  %vm3075_vm15 = vcmp.gt.f32.partialorder %v10410_v0, 0.0 }
 0x710   :  { %14273 = vst [vmem:[#allocation84_spill] sm:$0xff] %v10156_v48  ;;  %v10246_v45 = vsel %vm3070_vm7, %v10124_v35, %v5562_v9  ;;  %vm3076_vm7 = vcmp.gt.f32.partialorder %v10404_v42, 0.0 }
 0x711   :  { %v10254_v60 = vsel %vm3072_vm9, %v10128_v44, %v5564_v31  ;;  %vm3077_vm9 = vcmp.gt.f32.partialorder %v10416_v5, 0.0 }
 0x712   :  { %3892 = vrot.lane.b32.xlu1 %v10132_v61, %s6112_s27  ;;  %3235 = vrot.lane.b32.xlu0 %v10132_v61, %s14270_s6  ;;  %14279 = vst [vmem:[#allocation63_spill] sm:$0xff] %v10254_v60 }
 0x716   :  { %3904 = vrot.lane.b32.xlu1 %v10136_v54, %s6112_s27  ;;  %3247 = vrot.lane.b32.xlu0 %v10136_v54, %s14270_s6 }
 0x71a   :  { %3308 = vrot.lane.b32.xlu0 %v10132_v61, %s14272_s29  ;;  %3169 = vrot.lane.b32.xlu1 %v10150_v43, %s6105_s2 }
 0x71e   :  { %3320 = vrot.lane.b32.xlu0 %v10136_v54, %s14272_s29  ;;  %3181 = vrot.lane.b32.xlu1 %v10156_v48, %s6105_s2 }
 0x722   :  { %3381 = vrot.lane.b32.xlu0 %v10132_v61, %s14274_s5  ;;  %3241 = vrot.lane.b32.xlu1 %v10150_v43, %s14270_s6 }
 0x726   :  { %3393 = vrot.lane.b32.xlu0 %v10136_v54, %s14274_s5  ;;  %3253 = vrot.lane.b32.xlu1 %v10156_v48, %s14270_s6 }
 0x72a   :  { %3454 = vrot.lane.b32.xlu0 %v10132_v61, %s14275_s28  ;;  %3314 = vrot.lane.b32.xlu1 %v10150_v43, %s14272_s29 }
 0x72e   :  { %3466 = vrot.lane.b32.xlu0 %v10136_v54, %s14275_s28  ;;  %3326 = vrot.lane.b32.xlu1 %v10156_v48, %s14272_s29 }
 0x732   :  { %3527 = vrot.lane.b32.xlu0 %v10132_v61, %s14276_s3  ;;  %3387 = vrot.lane.b32.xlu1 %v10150_v43, %s14274_s5 }
 0x736   :  { %3539 = vrot.lane.b32.xlu0 %v10136_v54, %s14276_s3  ;;  %3399 = vrot.lane.b32.xlu1 %v10156_v48, %s14274_s5 }
 0x73a   :  { %3600 = vrot.lane.b32.xlu0 %v10132_v61, %s6096_s0  ;;  %3460 = vrot.lane.b32.xlu1 %v10150_v43, %s14275_s28 }
 0x73e   :  { %3612 = vrot.lane.b32.xlu0 %v10136_v54, %s6096_s0  ;;  %3472 = vrot.lane.b32.xlu1 %v10156_v48, %s14275_s28 }
 0x742   :  { %3673 = vrot.lane.b32.xlu0 %v10132_v61, %s6097_s17  ;;  %3533 = vrot.lane.b32.xlu1 %v10150_v43, %s14276_s3 }
 0x746   :  { %3685 = vrot.lane.b32.xlu0 %v10136_v54, %s6097_s17  ;;  %3545 = vrot.lane.b32.xlu1 %v10156_v48, %s14276_s3 }
 0x74a   :  { %3746 = vrot.lane.b32.xlu0 %v10132_v61, %s6098_s18  ;;  %3606 = vrot.lane.b32.xlu1 %v10150_v43, %s6096_s0 }
 0x74e   :  { %3758 = vrot.lane.b32.xlu0 %v10136_v54, %s6098_s18  ;;  %3618 = vrot.lane.b32.xlu1 %v10156_v48, %s6096_s0 }
 0x752   :  { %3819 = vrot.lane.b32.xlu0 %v10132_v61, %s6111_s26  ;;  %3679 = vrot.lane.b32.xlu1 %v10150_v43, %s6097_s17 }
 0x756   :  { %3965 = vrot.lane.b32.xlu0 %v10132_v61, %s6099_s19  ;;  %3691 = vrot.lane.b32.xlu1 %v10156_v48, %s6097_s17 }
 0x75a   :  { %3977 = vrot.lane.b32.xlu0 %v10136_v54, %s6099_s19  ;;  %3752 = vrot.lane.b32.xlu1 %v10150_v43, %s6098_s18 }
 0x75e   :  { %4038 = vrot.lane.b32.xlu0 %v10132_v61, %s6100_s20  ;;  %3764 = vrot.lane.b32.xlu1 %v10156_v48, %s6098_s18 }
 0x762   :  { %4050 = vrot.lane.b32.xlu0 %v10136_v54, %s6100_s20  ;;  %3825 = vrot.lane.b32.xlu1 %v10150_v43, %s6111_s26 }
 0x766   :  { %4111 = vrot.lane.b32.xlu0 %v10132_v61, %s14277_s14  ;;  %3837 = vrot.lane.b32.xlu1 %v10156_v48, %s6111_s26 }
 0x76a   :  { %4123 = vrot.lane.b32.xlu0 %v10136_v54, %s14277_s14  ;;  %3898 = vrot.lane.b32.xlu1 %v10150_v43, %s6112_s27 }
 0x76e   :  { %4184 = vrot.lane.b32.xlu0 %v10132_v61, %s14278_s4  ;;  %3910 = vrot.lane.b32.xlu1 %v10156_v48, %s6112_s27 }
 0x772   :  { %4196 = vrot.lane.b32.xlu0 %v10136_v54, %s14278_s4  ;;  %3165 = vrot.lane.b32.xlu1 %v10246_v45, %s6105_s2 }
 0x776   :  { %4257 = vrot.lane.b32.xlu0 %v10132_v61, %s6101_s21  ;;  %3177 = vrot.lane.b32.xlu1 %v10254_v60, %s6105_s2 }
 0x77a   :  { %4269 = vrot.lane.b32.xlu0 %v10136_v54, %s6101_s21  ;;  %3237 = vrot.lane.b32.xlu1 %v10246_v45, %s14270_s6 }
 0x77c   :  { %v10264_v47 = vpop.permute.xlu0 %3163 }
 0x77e   :  { %4330 = vrot.lane.b32.xlu0 %v10132_v61, %s6102_s22  ;;  %3249 = vrot.lane.b32.xlu1 %v10254_v60, %s14270_s6 }
 0x780   :  { %v10270_v20 = vpop.permute.xlu1 %3831  ;;  %v10272_v63 = vpop.permute.xlu0 %3175 }
 0x781   :  { %14280 = vst [vmem:[#allocation34_spill] sm:$0xff] %v10270_v20  ;;  %v3202_v20 = vld [vmem:[%s13408_s7 + $0x18] sm:$0xff] }
 0x782   :  { %4342 = vrot.lane.b32.xlu0 %v10136_v54, %s6102_s22  ;;  %3310 = vrot.lane.b32.xlu1 %v10246_v45, %s14272_s29 }
 0x784   :  { %v10278_v36 = vpop.permute.xlu1 %3892  ;;  %v10280_v8 = vpop.permute.xlu0 %3235 }
 0x785   :  { %14281 = vst [vmem:[#allocation65_spill] sm:$0xff] %v10278_v36  ;;  %v3089_v36 = vmin.f32 %v10416_v5, 0.0 }
 0x786   :  { %4403 = vrot.lane.b32.xlu0 %v10132_v61, %s6103_s23  ;;  %3322 = vrot.lane.b32.xlu1 %v10254_v60, %s14272_s29 }
 0x788   :  { %v10286_v1 = vpop.permute.xlu1 %3904  ;;  %v10288_v3 = vpop.permute.xlu0 %3247 }
 0x789   :  { %14282 = vst [vmem:[#allocation35_spill] sm:$0xff] %v10286_v1  ;;  %v5571_v1 = vld [vmem:[%s13408_s7 + $0x488] sm:$0xff] }
 0x78a   :  { %4415 = vrot.lane.b32.xlu0 %v10136_v54, %s6103_s23  ;;  %3383 = vrot.lane.b32.xlu1 %v10246_v45, %s14274_s5 }
 0x78c   :  { %v10294_v18 = vpop.permute.xlu0 %3308  ;;  %v10296_v38 = vpop.permute.xlu1 %3169 }
 0x78e   :  { %4476 = vrot.lane.b32.xlu0 %v10132_v61, %s6115_s30  ;;  %3395 = vrot.lane.b32.xlu1 %v10254_v60, %s14274_s5 }
 0x790   :  { %v10302_v33 = vpop.permute.xlu0 %3320  ;;  %v10304_v2 = vpop.permute.xlu1 %3181 }
 0x792   :  { %4488 = vrot.lane.b32.xlu0 %v10136_v54, %s6115_s30  ;;  %3456 = vrot.lane.b32.xlu1 %v10246_v45, %s14275_s28 }
 0x794   :  { %v10310_v17 = vpop.permute.xlu0 %3381  ;;  %v10312_v40 = vpop.permute.xlu1 %3241 }
 0x796   :  { %4549 = vrot.lane.b32.xlu0 %v10132_v61, %s6116_s11  ;;  %3468 = vrot.lane.b32.xlu1 %v10254_v60, %s14275_s28 }
 0x798   :  { %v10318_v37 = vpop.permute.xlu0 %3393  ;;  %v10320_v4 = vpop.permute.xlu1 %3253 }
 0x79a   :  { %4561 = vrot.lane.b32.xlu0 %v10136_v54, %s6116_s11  ;;  %3529 = vrot.lane.b32.xlu1 %v10246_v45, %s14276_s3 }
 0x79c   :  { %v10326_v56 = vpop.permute.xlu0 %3454  ;;  %v10328_v15 = vpop.permute.xlu1 %3314 }
 0x79e   :  { %4622 = vrot.lane.b32.xlu0 %v10132_v61, %s6117_s13  ;;  %3541 = vrot.lane.b32.xlu1 %v10254_v60, %s14276_s3 }
 0x7a0   :  { %v10334_v11 = vpop.permute.xlu0 %3466  ;;  %v10336_v13 = vpop.permute.xlu1 %3326 }
 0x7a2   :  { %4634 = vrot.lane.b32.xlu0 %v10136_v54, %s6117_s13  ;;  %3602 = vrot.lane.b32.xlu1 %v10246_v45, %s6096_s0 }
 0x7a4   :  { %v10342_v55 = vpop.permute.xlu0 %3527  ;;  %v10344_v51 = vpop.permute.xlu1 %3387 }
 0x7a6   :  { %4695 = vrot.lane.b32.xlu0 %v10132_v61, %s14283_s15  ;;  %3614 = vrot.lane.b32.xlu1 %v10254_v60, %s6096_s0 }
 0x7a8   :  { %v10350_v16 = vpop.permute.xlu0 %3539  ;;  %v10352_v57 = vpop.permute.xlu1 %3399 }
 0x7aa   :  { %3971 = vrot.lane.b32.xlu0 %v10150_v43, %s6099_s19  ;;  %3675 = vrot.lane.b32.xlu1 %v10246_v45, %s6097_s17 }
 0x7ac   :  { %v10358_v10 = vpop.permute.xlu0 %3600  ;;  %v10360_v39 = vpop.permute.xlu1 %3460 }
 0x7ae   :  { %3983 = vrot.lane.b32.xlu0 %v10156_v48, %s6099_s19  ;;  %3687 = vrot.lane.b32.xlu1 %v10254_v60, %s6097_s17 }
 0x7b0   :  { %v10366_v19 = vpop.permute.xlu0 %3612  ;;  %v10368_v35 = vpop.permute.xlu1 %3472 }
 0x7b2   :  { %4044 = vrot.lane.b32.xlu0 %v10150_v43, %s6100_s20  ;;  %3748 = vrot.lane.b32.xlu1 %v10246_v45, %s6098_s18 }
 0x7b4   :  { %v10374_v52 = vpop.permute.xlu0 %3673  ;;  %v10376_v26 = vpop.permute.xlu1 %3533 }
 0x7b6   :  { %4056 = vrot.lane.b32.xlu0 %v10156_v48, %s6100_s20  ;;  %3760 = vrot.lane.b32.xlu1 %v10254_v60, %s6098_s18 }
 0x7b8   :  { %v10382_v12 = vpop.permute.xlu0 %3685  ;;  %v10384_v28 = vpop.permute.xlu1 %3545 }
 0x7ba   :  { %4117 = vrot.lane.b32.xlu0 %v10150_v43, %s14277_s14  ;;  %3821 = vrot.lane.b32.xlu1 %v10246_v45, %s6111_s26 }
 0x7bc   :  { %v10390_v44 = vpop.permute.xlu0 %3746  ;;  %v10392_v46 = vpop.permute.xlu1 %3606 }
 0x7bd   :  { %14284 = vst [vmem:[#allocation67_spill] sm:$0xff] %v10390_v44  ;;  %v5584_v44 = vld [vmem:[%s13408_s7 + $0x70] sm:$0xff] }
 0x7be   :  { %4129 = vrot.lane.b32.xlu0 %v10156_v48, %s14277_s14  ;;  %3967 = vrot.lane.b32.xlu1 %v10246_v45, %s6099_s19 }
 0x7c0   :  { %v10398_v62 = vpop.permute.xlu0 %3758  ;;  %v10400_v59 = vpop.permute.xlu1 %3618 }
 0x7c1   :  { %14285 = vst [vmem:[#allocation37_spill] sm:$0xff] %v10398_v62  ;;  %v3268_v62 = vsel %vm708_vm11, %v10320_v4, %v10280_v8 }
 0x7c2   :  { %4190 = vrot.lane.b32.xlu0 %v10150_v43, %s14278_s4  ;;  %3979 = vrot.lane.b32.xlu1 %v10254_v60, %s6099_s19 }
 0x7c4   :  { %v10412_v24 = vpop.permute.xlu0 %3819  ;;  %v10414_v58 = vpop.permute.xlu1 %3679 }
 0x7c5   :  { %14286 = vst [vmem:[#allocation69_spill] sm:$0xff] %v10412_v24  ;;  %v5573_v24 = vld [vmem:[%s13408_s7 + $0x498] sm:$0xff] }
 0x7c6   :  { %4202 = vrot.lane.b32.xlu0 %v10156_v48, %s14278_s4  ;;  %4040 = vrot.lane.b32.xlu1 %v10246_v45, %s6100_s20 }
 0x7c8   :  { %v10422_v32 = vpop.permute.xlu0 %3965  ;;  %v10424_v41 = vpop.permute.xlu1 %3691 }
 0x7c9   :  { %14287 = vst [vmem:[#allocation39_spill] sm:$0xff] %v10422_v32  ;;  %14288 = vst [vmem:[#allocation43_spill] sm:$0xff] %v10424_v41 }
 0x7ca   :  { %4263 = vrot.lane.b32.xlu0 %v10150_v43, %s6101_s21  ;;  %4052 = vrot.lane.b32.xlu1 %v10254_v60, %s6100_s20 }
 0x7cc   :  { %v10430_v50 = vpop.permute.xlu0 %3977  ;;  %v10432_v23 = vpop.permute.xlu1 %3752 }
 0x7cd   :  { %14289 = vst [vmem:[#allocation71_spill] sm:$0xff] %v10430_v50  ;;  %14290 = vst [vmem:[#allocation41_spill] sm:$0xff] %v10432_v23  ;;  %v5582_v23 = vld [vmem:[%s13408_s7 + $0x60] sm:$0xff] }
 0x7ce   :  { %4275 = vrot.lane.b32.xlu0 %v10156_v48, %s6101_s21  ;;  %4113 = vrot.lane.b32.xlu1 %v10246_v45, %s14277_s14 }
 0x7d0   :  { %v10438_v53 = vpop.permute.xlu0 %4038  ;;  %v10440_v9 = vpop.permute.xlu1 %3764 }
 0x7d1   :  { %14291 = vst [vmem:[#allocation73_spill] sm:$0xff] %v10438_v53  ;;  %14292 = vst [vmem:[#allocation47_spill] sm:$0xff] %v10440_v9  ;;  %v3196_v9 = vsel %vm635_vm10, %v10304_v2, %v10264_v47 }
 0x7d2   :  { %4336 = vrot.lane.b32.xlu0 %v10150_v43, %s6102_s22  ;;  %4125 = vrot.lane.b32.xlu1 %v10254_v60, %s14277_s14 }
 0x7d4   :  { %v10446_v27 = vpop.permute.xlu0 %4050  ;;  %v10448_v31 = vpop.permute.xlu1 %3825 }
 0x7d5   :  { %14293 = vst [vmem:[#allocation75_spill] sm:$0xff] %v10446_v27  ;;  %14294 = vst [vmem:[#allocation45_spill] sm:$0xff] %v10448_v31 }
 0x7d6   :  { %4348 = vrot.lane.b32.xlu0 %v10156_v48, %s6102_s22  ;;  %4186 = vrot.lane.b32.xlu1 %v10246_v45, %s14278_s4 }
 0x7d8   :  { %v10454_v22 = vpop.permute.xlu0 %4111  ;;  %v10456_v21 = vpop.permute.xlu1 %3837 }
 0x7d9   :  { %14295 = vst [vmem:[#allocation77_spill] sm:$0xff] %v10454_v22  ;;  %14296 = vst [vmem:[#allocation51_spill] sm:$0xff] %v10456_v21  ;;  %v5572_v21 = vld [vmem:[%s13408_s7 + $0x490] sm:$0xff] }
 0x7da   :  { %4409 = vrot.lane.b32.xlu0 %v10150_v43, %s6103_s23  ;;  %4198 = vrot.lane.b32.xlu1 %v10254_v60, %s14278_s4 }
 0x7dc   :  { %v10462_v34 = vpop.permute.xlu0 %4123  ;;  %v10464_v25 = vpop.permute.xlu1 %3898 }
 0x7dd   :  { %14297 = vst [vmem:[#allocation79_spill] sm:$0xff] %v10462_v34  ;;  %14298 = vst [vmem:[#allocation49_spill] sm:$0xff] %v10464_v25 }
 0x7de   :  { %4421 = vrot.lane.b32.xlu0 %v10156_v48, %s6103_s23  ;;  %4259 = vrot.lane.b32.xlu1 %v10246_v45, %s6101_s21 }
 0x7e0   :  { %v10470_v49 = vpop.permute.xlu0 %4184  ;;  %v10472_v29 = vpop.permute.xlu1 %3910 }
 0x7e1   :  { %14299 = vst [vmem:[#allocation81_spill] sm:$0xff] %v10470_v49  ;;  %14300 = vst [vmem:[#allocation55_spill] sm:$0xff] %v10472_v29 }
 0x7e2   :  { %4482 = vrot.lane.b32.xlu0 %v10150_v43, %s6115_s30  ;;  %4271 = vrot.lane.b32.xlu1 %v10254_v60, %s6101_s21 }
 0x7e4   :  { %v10478_v22 = vpop.permute.xlu0 %4196  ;;  %v10480_v34 = vpop.permute.xlu1 %3165 }
 0x7e5   :  { %14301 = vst [vmem:[#allocation83_spill] sm:$0xff] %v10478_v22  ;;  %14302 = vst [vmem:[#allocation53_spill] sm:$0xff] %v10480_v34  ;;  %v3083_v22 = vmin.f32 %v10126_v6, 0.0 }
 0x7e6   :  { %4494 = vrot.lane.b32.xlu0 %v10156_v48, %s6115_s30  ;;  %4332 = vrot.lane.b32.xlu1 %v10246_v45, %s6102_s22 }
 0x7e8   :  { %v10486_v53 = vpop.permute.xlu0 %4257  ;;  %v10488_v49 = vpop.permute.xlu1 %3177 }
 0x7e9   :  { %14303 = vst [vmem:[#allocation85_spill] sm:$0xff] %v10486_v53  ;;  %14304 = vst [vmem:[#allocation87_spill] sm:$0xff] %v10488_v49  ;;  %v3100_v53 = vmul.f32 1.442695, %v3083_v22  ;;  %v3085_v49 = vmin.f32 %v10130_v14, 0.0 }
 0x7ea   :  { %4555 = vrot.lane.b32.xlu0 %v10150_v43, %s6116_s11  ;;  %4344 = vrot.lane.b32.xlu1 %v10254_v60, %s6102_s22 }
 0x7eb   :  { %6035 = vpow2.f32 %v3100_v53 }
 0x7ec   :  { %v10495_v27 = vpop.permute.xlu0 %4269  ;;  %v10497_v34 = vpop.permute.xlu1 %3237 }
 0x7ed   :  { %14305 = vst [vmem:[#allocation86_spill] sm:$0xff] %v10495_v27  ;;  %14306 = vst [vmem:[#allocation88_spill] sm:$0xff] %v10497_v34  ;;  %v3104_v34 = vmul.f32 1.442695, %v3085_v49 }
 0x7ee   :  { %4567 = vrot.lane.b32.xlu0 %v10156_v48, %s6116_s11  ;;  %4405 = vrot.lane.b32.xlu1 %v10246_v45, %s6103_s23 }
 0x7ef   :  { %6037 = vpow2.f32 %v3104_v34 }
 0x7f0   :  { %v10504_v50 = vpop.permute.xlu0 %4330  ;;  %v10506_v32 = vpop.permute.xlu1 %3249 }
 0x7f1   :  { %14307 = vst [vmem:[#allocation89_spill] sm:$0xff] %v10504_v50  ;;  %14308 = vst [vmem:[#allocation91_spill] sm:$0xff] %v10506_v32 }
 0x7f2   :  { %4628 = vrot.lane.b32.xlu0 %v10150_v43, %s6117_s13  ;;  %4417 = vrot.lane.b32.xlu1 %v10254_v60, %s6103_s23 }
 0x7f4   :  { %v10512_v27 = vpop.permute.xlu0 %4342  ;;  %v10514_v29 = vpop.permute.xlu1 %3310 }
 0x7f5   :  { %14309 = vst [vmem:[#allocation90_spill] sm:$0xff] %v10512_v27  ;;  %14310 = vst [vmem:[#allocation92_spill] sm:$0xff] %v10514_v29  ;;  %v6036_v29 = vpop.eup %6035 }
 0x7f6   :  { %4640 = vrot.lane.b32.xlu0 %v10156_v48, %s6117_s13  ;;  %4478 = vrot.lane.b32.xlu1 %v10246_v45, %s6115_s30 }
 0x7f8   :  { %v10520_v22 = vpop.permute.xlu0 %4403  ;;  %v10522_v32 = vpop.permute.xlu1 %3322 }
 0x7f9   :  { %14311 = vst [vmem:[#allocation93_spill] sm:$0xff] %v10520_v22  ;;  %14312 = vst [vmem:[#allocation95_spill] sm:$0xff] %v10522_v32  ;;  %v5563_v22 = vadd.f32 -1.0, %v6036_v29  ;;  %v6038_v50 = vpop.eup %6037 }
 0x7fa   :  { %3833 = vrot.lane.b32.xlu0 %v10254_v60, %s6111_s26  ;;  %4490 = vrot.lane.b32.xlu1 %v10254_v60, %s6115_s30 }
 0x7fb   :  { %v10550_v27 = vsel %vm3071_vm13, %v10126_v6, %v5563_v22  ;;  %vm14422_vm13 = vcmp.lt.s32.totalorder %v6243_v7, 31 }
 0x7fc   :  { %v10528_v49 = vpop.permute.xlu0 %4415  ;;  %v10530_v53 = vpop.permute.xlu1 %3383 }
 0x7fd   :  { %14313 = vst [vmem:[#allocation94_spill] sm:$0xff] %v10528_v49  ;;  %14314 = vst [vmem:[#allocation96_spill] sm:$0xff] %v10530_v53 }
 0x7fe   :  { %3894 = vrot.lane.b32.xlu0 %v10246_v45, %s6112_s27  ;;  %4551 = vrot.lane.b32.xlu1 %v10246_v45, %s6116_s11 }
 0x800   :  { %v10536_v34 = vpop.permute.xlu0 %4476  ;;  %v10538_v32 = vpop.permute.xlu1 %3395 }
 0x801   :  { %14315 = vst [vmem:[#allocation97_spill] sm:$0xff] %v10536_v34  ;;  %14316 = vst [vmem:[#allocation44_spill] sm:$0xff] %v10538_v32  ;;  %v5565_v34 = vadd.f32 -1.0, %v6038_v50 }
 0x802   :  { %3906 = vrot.lane.b32.xlu0 %v10254_v60, %s6112_s27  ;;  %4563 = vrot.lane.b32.xlu1 %v10254_v60, %s6116_s11 }
 0x804   :  { %v10545_v53 = vpop.permute.xlu0 %4488  ;;  %v10547_v49 = vpop.permute.xlu1 %3456 }
 0x805   :  { %14317 = vst [vmem:[#allocation99_spill] sm:$0xff] %v10545_v53  ;;  %14318 = vst [vmem:[#allocation98_spill] sm:$0xff] %v10547_v49  ;;  %v10562_v53 = vsel %vm3073_vm8, %v10130_v14, %v5565_v34 }
 0x806   :  { %4624 = vrot.lane.b32.xlu1 %v10246_v45, %s6117_s13  ;;  %3171 = vrot.lane.b32.xlu0 %v10550_v27, %s6105_s2  ;;  %14321 = vst [vmem:[#allocation103_spill] sm:$0xff] %v10562_v53  ;;  %vm14423_vm8 = vmmov %vm14422_vm13 }
 0x808   :  { %v10557_v29 = vpop.permute.xlu0 %4549  ;;  %v10559_v32 = vpop.permute.xlu1 %3468 }
 0x809   :  { %14319 = vst [vmem:[#allocation100_spill] sm:$0xff] %v10557_v29  ;;  %14320 = vst [vmem:[#allocation101_spill] sm:$0xff] %v10559_v32 }
 0x80a   :  { %4636 = vrot.lane.b32.xlu1 %v10254_v60, %s6117_s13  ;;  %3183 = vrot.lane.b32.xlu0 %v10562_v53, %s6105_s2  ;;  %v5583_v60 = vld [vmem:[%s13408_s7 + $0x68] sm:$0xff] }
 0x80c   :  { %v10568_v6 = vpop.permute.xlu0 %4561  ;;  %v10570_v50 = vpop.permute.xlu1 %3529 }
 0x80d   :  { %14322 = vst [vmem:[#allocation102_spill] sm:$0xff] %v10568_v6  ;;  %14323 = vst [vmem:[#allocation104_spill] sm:$0xff] %v10570_v50 }
 0x80e   :  { %4697 = vrot.lane.b32.xlu1 %v10246_v45, %s14283_s15  ;;  %3243 = vrot.lane.b32.xlu0 %v10550_v27, %s14270_s6 }
 0x810   :  { %v10576_v22 = vpop.permute.xlu0 %4622  ;;  %v10578_v14 = vpop.permute.xlu1 %3541 }
 0x811   :  { %14324 = vst [vmem:[#allocation105_spill] sm:$0xff] %v10576_v22  ;;  %14325 = vst [vmem:[#allocation107_spill] sm:$0xff] %v10578_v14 }
 0x812   :  { %3973 = vrot.lane.b32.xlu1 %v10550_v27, %s6099_s19  ;;  %3255 = vrot.lane.b32.xlu0 %v10562_v53, %s14270_s6 }
 0x814   :  { %v10584_v34 = vpop.permute.xlu0 %4634  ;;  %v10586_v6 = vpop.permute.xlu1 %3602 }
 0x815   :  { %14326 = vst [vmem:[#allocation106_spill] sm:$0xff] %v10584_v34  ;;  %14327 = vst [vmem:[#allocation108_spill] sm:$0xff] %v10586_v6 }
 0x816   :  { %3985 = vrot.lane.b32.xlu1 %v10562_v53, %s6099_s19  ;;  %3316 = vrot.lane.b32.xlu0 %v10550_v27, %s14272_s29 }
 0x818   :  { %v10592_v29 = vpop.permute.xlu0 %4695  ;;  %v10594_v22 = vpop.permute.xlu1 %3614 }
 0x819   :  { %14328 = vst [vmem:[#allocation109_spill] sm:$0xff] %v10592_v29  ;;  %14329 = vst [vmem:[#allocation111_spill] sm:$0xff] %v10594_v22 }
 0x81a   :  { %4046 = vrot.lane.b32.xlu1 %v10550_v27, %s6100_s20  ;;  %3328 = vrot.lane.b32.xlu0 %v10562_v53, %s14272_s29 }
 0x81c   :  { %v10600_v14 = vpop.permute.xlu0 %3971  ;;  %v10602_v34 = vpop.permute.xlu1 %3675 }
 0x81d   :  { %14330 = vst [vmem:[#allocation110_spill] sm:$0xff] %v10600_v14  ;;  %14331 = vst [vmem:[#allocation112_spill] sm:$0xff] %v10602_v34 }
 0x81e   :  { %4058 = vrot.lane.b32.xlu1 %v10562_v53, %s6100_s20  ;;  %3389 = vrot.lane.b32.xlu0 %v10550_v27, %s14274_s5 }
 0x820   :  { %v10608_v6 = vpop.permute.xlu0 %3983  ;;  %v10610_v29 = vpop.permute.xlu1 %3687 }
 0x821   :  { %14332 = vst [vmem:[#allocation113_spill] sm:$0xff] %v10608_v6  ;;  %14333 = vst [vmem:[#allocation115_spill] sm:$0xff] %v10610_v29 }
 0x822   :  { %4119 = vrot.lane.b32.xlu1 %v10550_v27, %s14277_s14  ;;  %3401 = vrot.lane.b32.xlu0 %v10562_v53, %s14274_s5 }
 0x824   :  { %v10616_v22 = vpop.permute.xlu0 %4044  ;;  %v10618_v50 = vpop.permute.xlu1 %3748 }
 0x825   :  { %14334 = vst [vmem:[#allocation114_spill] sm:$0xff] %v10616_v22  ;;  %14335 = vst [vmem:[#allocation116_spill] sm:$0xff] %v10618_v50  ;;  %v3088_v22 = vmin.f32 %v10404_v42, 0.0 }
 0x826   :  { %4131 = vrot.lane.b32.xlu1 %v10562_v53, %s14277_s14  ;;  %3462 = vrot.lane.b32.xlu0 %v10550_v27, %s14275_s28 }
 0x828   :  { %v10624_v34 = vpop.permute.xlu0 %4056  ;;  %v10626_v32 = vpop.permute.xlu1 %3760 }
 0x829   :  { %14336 = vst [vmem:[#allocation117_spill] sm:$0xff] %v10624_v34  ;;  %14337 = vst [vmem:[#allocation119_spill] sm:$0xff] %v10626_v32 }
 0x82a   :  { %4192 = vrot.lane.b32.xlu1 %v10550_v27, %s14278_s4  ;;  %3474 = vrot.lane.b32.xlu0 %v10562_v53, %s14275_s28 }
 0x82c   :  { %v10632_v29 = vpop.permute.xlu0 %4117  ;;  %v10634_v49 = vpop.permute.xlu1 %3821 }
 0x82d   :  { %14338 = vst [vmem:[#allocation118_spill] sm:$0xff] %v10632_v29  ;;  %14339 = vst [vmem:[#allocation120_spill] sm:$0xff] %v10634_v49 }
 0x82e   :  { %4204 = vrot.lane.b32.xlu1 %v10562_v53, %s14278_s4  ;;  %3535 = vrot.lane.b32.xlu0 %v10550_v27, %s14276_s3 }
 0x830   :  { %v10640_v50 = vpop.permute.xlu0 %4129  ;;  %v10642_v34 = vpop.permute.xlu1 %3967 }
 0x831   :  { %14340 = vst [vmem:[#allocation121_spill] sm:$0xff] %v10640_v50  ;;  %14341 = vst [vmem:[#allocation123_spill] sm:$0xff] %v10642_v34 }
 0x832   :  { %4265 = vrot.lane.b32.xlu1 %v10550_v27, %s6101_s21  ;;  %3547 = vrot.lane.b32.xlu0 %v10562_v53, %s14276_s3 }
 0x834   :  { %v10648_v32 = vpop.permute.xlu0 %4190  ;;  %v10650_v29 = vpop.permute.xlu1 %3979 }
 0x835   :  { %14342 = vst [vmem:[#allocation122_spill] sm:$0xff] %v10648_v32  ;;  %14343 = vst [vmem:[#allocation124_spill] sm:$0xff] %v10650_v29 }
 0x836   :  { %4277 = vrot.lane.b32.xlu1 %v10562_v53, %s6101_s21  ;;  %3608 = vrot.lane.b32.xlu0 %v10550_v27, %s6096_s0 }
 0x838   :  { %v10656_v49 = vpop.permute.xlu0 %4202  ;;  %v10658_v50 = vpop.permute.xlu1 %4040 }
 0x839   :  { %14344 = vst [vmem:[#allocation125_spill] sm:$0xff] %v10656_v49  ;;  %14345 = vst [vmem:[#allocation127_spill] sm:$0xff] %v10658_v50  ;;  %v3086_v50 = vmin.f32 %v10402_v30, 0.0 }
 0x83a   :  { %4338 = vrot.lane.b32.xlu1 %v10550_v27, %s6102_s22  ;;  %3620 = vrot.lane.b32.xlu0 %v10562_v53, %s6096_s0 }
 0x83c   :  { %v10664_v34 = vpop.permute.xlu0 %4263  ;;  %v10666_v32 = vpop.permute.xlu1 %4052 }
 0x83d   :  { %14346 = vst [vmem:[#allocation126_spill] sm:$0xff] %v10664_v34  ;;  %14347 = vst [vmem:[#allocation128_spill] sm:$0xff] %v10666_v32 }
 0x83e   :  { %4350 = vrot.lane.b32.xlu1 %v10562_v53, %s6102_s22  ;;  %3681 = vrot.lane.b32.xlu0 %v10550_v27, %s6097_s17 }
 0x840   :  { %v10672_v29 = vpop.permute.xlu0 %4275  ;;  %v10674_v49 = vpop.permute.xlu1 %4113 }
 0x841   :  { %14348 = vst [vmem:[#allocation129_spill] sm:$0xff] %v10672_v29  ;;  %14349 = vst [vmem:[#allocation131_spill] sm:$0xff] %v10674_v49  ;;  %v3087_v49 = vmin.f32 %v10410_v0, 0.0  ;;  %v3106_v29 = vmul.f32 1.442695, %v3086_v50 }
 0x842   :  { %4411 = vrot.lane.b32.xlu1 %v10550_v27, %s6103_s23  ;;  %3693 = vrot.lane.b32.xlu0 %v10562_v53, %s6097_s17 }
 0x843   :  { %6039 = vpow2.f32 %v3106_v29 }
 0x844   :  { %v10681_v34 = vpop.permute.xlu0 %4336  ;;  %v10683_v32 = vpop.permute.xlu1 %4125 }
 0x845   :  { %14350 = vst [vmem:[#allocation130_spill] sm:$0xff] %v10681_v34  ;;  %14351 = vst [vmem:[#allocation133_spill] sm:$0xff] %v10683_v32  ;;  %v3108_v32 = vmul.f32 1.442695, %v3087_v49  ;;  %v3110_v34 = vmul.f32 1.442695, %v3088_v22 }
 0x846   :  { %4423 = vrot.lane.b32.xlu1 %v10562_v53, %s6103_s23  ;;  %3754 = vrot.lane.b32.xlu0 %v10550_v27, %s6098_s18 }
 0x847   :  { %6041 = vpow2.f32 %v3108_v32 }
 0x848   :  { %v10691_v6 = vpop.permute.xlu0 %4348  ;;  %v10693_v14 = vpop.permute.xlu1 %4186  ;;  %6043 = vpow2.f32 %v3110_v34 }
 0x849   :  { %14352 = vst [vmem:[#allocation132_spill] sm:$0xff] %v10691_v6  ;;  %14353 = vst [vmem:[#allocation135_spill] sm:$0xff] %v10693_v14  ;;  %v3112_v14 = vmul.f32 1.442695, %v3089_v36 }
 0x84a   :  { %4484 = vrot.lane.b32.xlu1 %v10550_v27, %s6115_s30  ;;  %3766 = vrot.lane.b32.xlu0 %v10562_v53, %s6098_s18 }
 0x84b   :  { %6045 = vpow2.f32 %v3112_v14 }
 0x84c   :  { %v10700_v25 = vpop.permute.xlu0 %4409  ;;  %v10702_v50 = vpop.permute.xlu1 %4198 }
 0x84d   :  { %14354 = vst [vmem:[#allocation134_spill] sm:$0xff] %v10700_v25  ;;  %14355 = vst [vmem:[#allocation136_spill] sm:$0xff] %v10702_v50  ;;  %v6040_v50 = vpop.eup %6039 }
 0x84e   :  { %4496 = vrot.lane.b32.xlu1 %v10562_v53, %s6115_s30  ;;  %3827 = vrot.lane.b32.xlu0 %v10550_v27, %s6111_s26 }
 0x850   :  { %v10708_v6 = vpop.permute.xlu0 %4421  ;;  %v10710_v49 = vpop.permute.xlu1 %4259 }
 0x851   :  { %14356 = vst [vmem:[#allocation137_spill] sm:$0xff] %v10708_v6  ;;  %14357 = vst [vmem:[#allocation140_spill] sm:$0xff] %v10710_v49  ;;  %v6042_v34 = vpop.eup %6041  ;;  %v5566_v49 = vadd.f32 -1.0, %v6040_v50 }
 0x852   :  { %4557 = vrot.lane.b32.xlu1 %v10550_v27, %s6116_s11  ;;  %3839 = vrot.lane.b32.xlu0 %v10562_v53, %s6111_s26  ;;  %v6044_v6 = vpop.eup %6043 }
 0x854   :  { %v10716_v29 = vpop.permute.xlu0 %4482  ;;  %v10718_v22 = vpop.permute.xlu1 %4271 }
 0x855   :  { %14358 = vst [vmem:[#allocation138_spill] sm:$0xff] %v10716_v29  ;;  %14359 = vst [vmem:[#allocation141_spill] sm:$0xff] %v10718_v22  ;;  %v10738_v29 = vsel %vm3074_vm14, %v10402_v30, %v5566_v49  ;;  %v6046_v25 = vpop.eup %6045 }
 0x856   :  { %4569 = vrot.lane.b32.xlu1 %v10562_v53, %s6116_s11  ;;  %3900 = vrot.lane.b32.xlu0 %v10550_v27, %s6112_s27  ;;  %v5569_v49 = vadd.f32 -1.0, %v6046_v25  ;;  %vm14424_vm14 = vmmov %vm14423_vm8 }
 0x858   :  { %v10724_v36 = vpop.permute.xlu0 %4494  ;;  %v10726_v32 = vpop.permute.xlu1 %4332 }
 0x859   :  { %14360 = vst [vmem:[#allocation139_spill] sm:$0xff] %v10724_v36  ;;  %14361 = vst [vmem:[#allocation142_spill] sm:$0xff] %v10726_v32  ;;  %v5567_v36 = vadd.f32 -1.0, %v6042_v34  ;;  %v5568_v32 = vadd.f32 -1.0, %v6044_v6 }
 0x85a   :  { %4630 = vrot.lane.b32.xlu1 %v10550_v27, %s6117_s13  ;;  %3912 = vrot.lane.b32.xlu0 %v10562_v53, %s6112_s27 }
 0x85b   :  { %v10751_v30 = vsel %vm3075_vm15, %v10410_v0, %v5567_v36  ;;  %v10754_v6 = vsel %vm3076_vm7, %v10404_v42, %v5568_v32  ;;  %vm14425_vm15 = vmmov %vm14423_vm8  ;;  %vm14426_vm7 = vcmp.lt.s32.totalorder %v6243_v7, 30 }
 0x85c   :  { %v10733_v14 = vpop.permute.xlu0 %4555  ;;  %v10735_v22 = vpop.permute.xlu1 %4344 }
 0x85d   :  { %14362 = vst [vmem:[#allocation143_spill] sm:$0xff] %v10733_v14  ;;  %14363 = vst [vmem:[#allocation144_spill] sm:$0xff] %v10735_v22 }
 0x85e   :  { %4642 = vrot.lane.b32.xlu1 %v10562_v53, %s6117_s13  ;;  %3167 = vrot.lane.b32.xlu0 %v10738_v29, %s6105_s2  ;;  %v3187_v53 = vsel %vm635_vm10, %v10272_v63, %v10304_v2 }
 0x85f   :  { %v3214_v41 = vmul.f32 %v3202_v20, %v3187_v53  ;;  %v3341_v53 = vsel %vm782_vm12, %v10336_v13, %v10294_v18 }
 0x860   :  { %v10746_v50 = vpop.permute.xlu0 %4567  ;;  %v10748_v14 = vpop.permute.xlu1 %4405 }
 0x861   :  { %14364 = vst [vmem:[#allocation19_spill] sm:$0xff] %v10746_v50  ;;  %14365 = vst [vmem:[#allocation145_spill] sm:$0xff] %v10748_v14  ;;  %v10766_v14 = vsel %vm3077_vm9, %v10416_v5, %v5569_v49 }
 0x862   :  { %3179 = vrot.lane.b32.xlu0 %v10754_v6, %s6105_s2  ;;  %3173 = vrot.lane.b32.xlu1 %v10751_v30, %s6105_s2  ;;  %vm14427_vm9 = vmmov %vm14426_vm7 }
 0x864   :  { %v10761_v34 = vpop.permute.xlu0 %4628  ;;  %v10763_v22 = vpop.permute.xlu1 %4417 }
 0x865   :  { %14366 = vst [vmem:[#allocation147_spill] sm:$0xff] %v10761_v34  ;;  %14367 = vst [vmem:[#allocation146_spill] sm:$0xff] %v10763_v22 }
 0x866   :  { %3239 = vrot.lane.b32.xlu0 %v10738_v29, %s14270_s6  ;;  %3185 = vrot.lane.b32.xlu1 %v10766_v14, %s6105_s2 }
 0x868   :  { %v10772_v42 = vpop.permute.xlu0 %4640  ;;  %v10774_v0 = vpop.permute.xlu1 %4478 }
 0x869   :  { %14368 = vst [vmem:[#allocation148_spill] sm:$0xff] %v10772_v42  ;;  %14369 = vst [vmem:[#allocation151_spill] sm:$0xff] %v10774_v0 }
 0x86a   :  { %3251 = vrot.lane.b32.xlu0 %v10754_v6, %s14270_s6  ;;  %3245 = vrot.lane.b32.xlu1 %v10751_v30, %s14270_s6 }
 0x86c   :  { %v10780_v25 = vpop.permute.xlu0 %3833  ;;  %v10782_v5 = vpop.permute.xlu1 %4490 }
 0x86d   :  { %14370 = vst [vmem:[#allocation156_spill] sm:$0xff] %v10780_v25  ;;  %14371 = vst [vmem:[#allocation154_spill] sm:$0xff] %v10782_v5 }
 0x86e   :  { %3312 = vrot.lane.b32.xlu0 %v10738_v29, %s14272_s29  ;;  %3257 = vrot.lane.b32.xlu1 %v10766_v14, %s14270_s6 }
 0x870   :  { %v10788_v36 = vpop.permute.xlu0 %3894  ;;  %v10790_v32 = vpop.permute.xlu1 %4551 }
 0x871   :  { %14372 = vst [vmem:[#allocation157_spill] sm:$0xff] %v10788_v36  ;;  %14373 = vst [vmem:[#allocation155_spill] sm:$0xff] %v10790_v32 }
 0x872   :  { %3324 = vrot.lane.b32.xlu0 %v10754_v6, %s14272_s29  ;;  %3318 = vrot.lane.b32.xlu1 %v10751_v30, %s14272_s29 }
 0x874   :  { %v10796_v49 = vpop.permute.xlu0 %3906  ;;  %v10798_v0 = vpop.permute.xlu1 %4563 }
 0x875   :  { %14374 = vst [vmem:[#allocation158_spill] sm:$0xff] %v10796_v49  ;;  %14375 = vst [vmem:[#allocation21_spill] sm:$0xff] %v10798_v0 }
 0x876   :  { %3385 = vrot.lane.b32.xlu0 %v10738_v29, %s14274_s5  ;;  %3330 = vrot.lane.b32.xlu1 %v10766_v14, %s14272_s29 }
 0x878   :  { %v10804_v5 = vpop.permute.xlu1 %4624  ;;  %v10806_v42 = vpop.permute.xlu0 %3171 }
 0x879   :  { %14376 = vst [vmem:[#allocation159_spill] sm:$0xff] %v10804_v5  ;;  %14377 = vst [vmem:[#allocation160_spill] sm:$0xff] %v10806_v42  ;;  %v3193_v42 = vsel %vm635_vm10, %v10264_v47, %v10296_v38  ;;  %v3265_v47 = vsel %vm708_vm11, %v10280_v8, %v10312_v40  ;;  %v3338_v8 = vsel %vm782_vm12, %v10294_v18, %v10328_v15 }
 0x87a   :  { %3397 = vrot.lane.b32.xlu0 %v10754_v6, %s14274_s5  ;;  %3391 = vrot.lane.b32.xlu1 %v10751_v30, %s14274_s5  ;;  %v3285_v20 = vmul.f32 %v5583_v60, %v3265_v47 }
 0x87c   :  { %v10812_v32 = vpop.permute.xlu1 %4636  ;;  %v10814_v22 = vpop.permute.xlu0 %3183 }
 0x87d   :  { %14378 = vst [vmem:[#allocation23_spill] sm:$0xff] %v10812_v32  ;;  %14379 = vst [vmem:[#allocation52_spill] sm:$0xff] %v10814_v22  ;;  %v3190_v22 = vsel %vm635_vm10, %v10296_v38, %v10272_v63  ;;  %v3199_v38 = vld [vmem:[%s13408_s7] sm:$0xff]  ;;  %v3262_v63 = vsel %vm708_vm11, %v10312_v40, %v10288_v3 }
 0x87e   :  { %3458 = vrot.lane.b32.xlu0 %v10738_v29, %s14275_s28  ;;  %3403 = vrot.lane.b32.xlu1 %v10766_v14, %s14274_s5  ;;  %v3211_v40 = vmul.f32 %v3199_v38, %v3196_v9  ;;  %v3286_v9 = vmul.f32 %v5584_v44, %v3262_v63  ;;  %v3284_v38 = vmul.f32 %v5582_v23, %v3268_v62  ;;  %v5597_v63 = vld [vmem:[%s13408_s7 + $0xd8] sm:$0xff]  ;;  %v5608_v62 = vld [vmem:[%s13408_s7 + $0x130] sm:$0xff] }
 0x87f   :  { %v3408_v23 = vsel %vm14422_vm13, %v10344_v51, %v10318_v37  ;;  %vm14428_vm13 = vmmov %vm14426_vm7 }
 0x880   :  { %v10820_v0 = vpop.permute.xlu1 %4697  ;;  %v10822_v5 = vpop.permute.xlu0 %3243 }
 0x881   :  { %14380 = vst [vmem:[#allocation161_spill] sm:$0xff] %v10820_v0  ;;  %14381 = vst [vmem:[#allocation163_spill] sm:$0xff] %v10822_v5  ;;  %v3201_v5 = vld [vmem:[%s13408_s7 + $0x10] sm:$0xff] }
 0x882   :  { %3470 = vrot.lane.b32.xlu0 %v10754_v6, %s14275_s28  ;;  %3464 = vrot.lane.b32.xlu1 %v10751_v30, %s14275_s28 }
 0x884   :  { %v10828_v34 = vpop.permute.xlu1 %3973  ;;  %v10830_v32 = vpop.permute.xlu0 %3255 }
 0x885   :  { %14382 = vst [vmem:[#allocation162_spill] sm:$0xff] %v10828_v34  ;;  %14383 = vst [vmem:[#allocation5_spill] sm:$0xff] %v10830_v32  ;;  %v3200_v34 = vld [vmem:[%s13408_s7 + $0x8] sm:$0xff] }
 0x886   :  { %3531 = vrot.lane.b32.xlu0 %v10738_v29, %s14276_s3  ;;  %3476 = vrot.lane.b32.xlu1 %v10766_v14, %s14275_s28 }
 0x888   :  { %v10836_v50 = vpop.permute.xlu1 %3985  ;;  %v10838_v0 = vpop.permute.xlu0 %3316 }
 0x889   :  { %14384 = vst [vmem:[#allocation36_spill] sm:$0xff] %v10836_v50  ;;  %14385 = vst [vmem:[#allocation38_spill] sm:$0xff] %v10838_v0 }
 0x88a   :  { %3543 = vrot.lane.b32.xlu0 %v10754_v6, %s14276_s3  ;;  %3537 = vrot.lane.b32.xlu1 %v10751_v30, %s14276_s3 }
 0x88c   :  { %v10844_v49 = vpop.permute.xlu1 %4046  ;;  %v10846_v36 = vpop.permute.xlu0 %3328 }
 0x88d   :  { %14386 = vst [vmem:[#allocation9_spill] sm:$0xff] %v10844_v49  ;;  %14387 = vst [vmem:[#allocation40_spill] sm:$0xff] %v10846_v36 }
 0x88e   :  { %3604 = vrot.lane.b32.xlu0 %v10738_v29, %s6096_s0  ;;  %3549 = vrot.lane.b32.xlu1 %v10766_v14, %s14276_s3 }
 0x890   :  { %v10852_v25 = vpop.permute.xlu1 %4058  ;;  %v10854_v50 = vpop.permute.xlu0 %3389 }
 0x891   :  { %14388 = vst [vmem:[#allocation11_spill] sm:$0xff] %v10852_v25  ;;  %14389 = vst [vmem:[#allocation13_spill] sm:$0xff] %v10854_v50 }
 0x892   :  { %3616 = vrot.lane.b32.xlu0 %v10754_v6, %s6096_s0  ;;  %3610 = vrot.lane.b32.xlu1 %v10751_v30, %s6096_s0 }
 0x894   :  { %v10860_v0 = vpop.permute.xlu1 %4119  ;;  %v10862_v49 = vpop.permute.xlu0 %3401 }
 0x895   :  { %14390 = vst [vmem:[#allocation15_spill] sm:$0xff] %v10860_v0  ;;  %14391 = vst [vmem:[#allocation42_spill] sm:$0xff] %v10862_v49 }
 0x896   :  { %3677 = vrot.lane.b32.xlu0 %v10738_v29, %s6097_s17  ;;  %3622 = vrot.lane.b32.xlu1 %v10766_v14, %s6096_s0 }
 0x898   :  { %v10868_v36 = vpop.permute.xlu1 %4131  ;;  %v10870_v25 = vpop.permute.xlu0 %3462 }
 0x899   :  { %14392 = vst [vmem:[#allocation17_spill] sm:$0xff] %v10868_v36  ;;  %14393 = vst [vmem:[#allocation48_spill] sm:$0xff] %v10870_v25 }
 0x89a   :  { %3689 = vrot.lane.b32.xlu0 %v10754_v6, %s6097_s17  ;;  %3683 = vrot.lane.b32.xlu1 %v10751_v30, %s6097_s17 }
 0x89c   :  { %v10876_v50 = vpop.permute.xlu1 %4192  ;;  %v10878_v0 = vpop.permute.xlu0 %3474 }
 0x89d   :  { %14394 = vst [vmem:[#allocation46_spill] sm:$0xff] %v10876_v50  ;;  %14395 = vst [vmem:[#allocation50_spill] sm:$0xff] %v10878_v0 }
 0x89e   :  { %3750 = vrot.lane.b32.xlu0 %v10738_v29, %s6098_s18  ;;  %3695 = vrot.lane.b32.xlu1 %v10766_v14, %s6097_s17 }
 0x8a0   :  { %v10884_v49 = vpop.permute.xlu1 %4204  ;;  %v10886_v36 = vpop.permute.xlu0 %3535 }
 0x8a1   :  { %14396 = vst [vmem:[#allocation27_spill] sm:$0xff] %v10884_v49  ;;  %14397 = vst [vmem:[#allocation25_spill] sm:$0xff] %v10886_v36 }
 0x8a2   :  { %3762 = vrot.lane.b32.xlu0 %v10754_v6, %s6098_s18  ;;  %3756 = vrot.lane.b32.xlu1 %v10751_v30, %s6098_s18 }
 0x8a4   :  { %v10892_v25 = vpop.permute.xlu1 %4265  ;;  %v10894_v50 = vpop.permute.xlu0 %3547 }
 0x8a5   :  { %14398 = vst [vmem:[#allocation54_spill] sm:$0xff] %v10892_v25  ;;  %14399 = vst [vmem:[#allocation56_spill] sm:$0xff] %v10894_v50 }
 0x8a6   :  { %3823 = vrot.lane.b32.xlu0 %v10738_v29, %s6111_s26  ;;  %3768 = vrot.lane.b32.xlu1 %v10766_v14, %s6098_s18 }
 0x8a8   :  { %v10900_v0 = vpop.permute.xlu1 %4277  ;;  %v10902_v49 = vpop.permute.xlu0 %3608 }
 0x8a9   :  { %14400 = vst [vmem:[#allocation58_spill] sm:$0xff] %v10900_v0  ;;  %14401 = vst [vmem:[#allocation29_spill] sm:$0xff] %v10902_v49 }
 0x8aa   :  { %3835 = vrot.lane.b32.xlu0 %v10754_v6, %s6111_s26  ;;  %3829 = vrot.lane.b32.xlu1 %v10751_v30, %s6111_s26 }
 0x8ac   :  { %v10908_v36 = vpop.permute.xlu1 %4338  ;;  %v10910_v25 = vpop.permute.xlu0 %3620 }
 0x8ad   :  { %14402 = vst [vmem:[#allocation6_spill] sm:$0xff] %v10908_v36  ;;  %14403 = vst [vmem:[#allocation31_spill] sm:$0xff] %v10910_v25 }
 0x8ae   :  { %3896 = vrot.lane.b32.xlu0 %v10738_v29, %s6112_s27  ;;  %3841 = vrot.lane.b32.xlu1 %v10766_v14, %s6111_s26 }
 0x8b0   :  { %v10916_v50 = vpop.permute.xlu1 %4350  ;;  %v10918_v0 = vpop.permute.xlu0 %3681 }
 0x8b1   :  { %14404 = vst [vmem:[#allocation62_spill] sm:$0xff] %v10916_v50  ;;  %14405 = vst [vmem:[#allocation57_spill] sm:$0xff] %v10918_v0 }
 0x8b2   :  { %3908 = vrot.lane.b32.xlu0 %v10754_v6, %s6112_s27  ;;  %3902 = vrot.lane.b32.xlu1 %v10751_v30, %s6112_s27 }
 0x8b4   :  { %v10924_v49 = vpop.permute.xlu1 %4411  ;;  %v10926_v36 = vpop.permute.xlu0 %3693 }
 0x8b5   :  { %14406 = vst [vmem:[#allocation30_spill] sm:$0xff] %v10924_v49  ;;  %14407 = vst [vmem:[#allocation7_spill] sm:$0xff] %v10926_v36 }
 0x8b6   :  { %3969 = vrot.lane.b32.xlu0 %v10738_v29, %s6099_s19  ;;  %3914 = vrot.lane.b32.xlu1 %v10766_v14, %s6112_s27 }
 0x8b8   :  { %v10932_v25 = vpop.permute.xlu1 %4423  ;;  %v10934_v50 = vpop.permute.xlu0 %3754 }
 0x8b9   :  { %14408 = vst [vmem:[#allocation28_spill] sm:$0xff] %v10932_v25  ;;  %14409 = vst [vmem:[#allocation8_spill] sm:$0xff] %v10934_v50 }
 0x8ba   :  { %3981 = vrot.lane.b32.xlu0 %v10754_v6, %s6099_s19  ;;  %3975 = vrot.lane.b32.xlu1 %v10751_v30, %s6099_s19 }
 0x8bc   :  { %v10940_v0 = vpop.permute.xlu1 %4484  ;;  %v10942_v49 = vpop.permute.xlu0 %3766 }
 0x8bd   :  { %14410 = vst [vmem:[#allocation66_spill] sm:$0xff] %v10940_v0  ;;  %14411 = vst [vmem:[#allocation10_spill] sm:$0xff] %v10942_v49 }
 0x8be   :  { %4042 = vrot.lane.b32.xlu0 %v10738_v29, %s6100_s20  ;;  %3987 = vrot.lane.b32.xlu1 %v10766_v14, %s6099_s19 }
 0x8c0   :  { %v10948_v36 = vpop.permute.xlu1 %4496  ;;  %v10950_v25 = vpop.permute.xlu0 %3827 }
 0x8c1   :  { %14412 = vst [vmem:[#allocation12_spill] sm:$0xff] %v10948_v36  ;;  %14413 = vst [vmem:[#allocation70_spill] sm:$0xff] %v10950_v25 }
 0x8c2   :  { %4054 = vrot.lane.b32.xlu0 %v10754_v6, %s6100_s20  ;;  %4048 = vrot.lane.b32.xlu1 %v10751_v30, %s6100_s20 }
 0x8c4   :  { %v10956_v50 = vpop.permute.xlu1 %4557  ;;  %v10958_v0 = vpop.permute.xlu0 %3839 }
 0x8c5   :  { %14414 = vst [vmem:[#allocation59_spill] sm:$0xff] %v10956_v50  ;;  %14415 = vst [vmem:[#allocation33_spill] sm:$0xff] %v10958_v0 }
 0x8c6   :  { %4115 = vrot.lane.b32.xlu0 %v10738_v29, %s14277_s14  ;;  %4060 = vrot.lane.b32.xlu1 %v10766_v14, %s6100_s20  ;;  %s14506_s20 = smov 94  }
 0x8c8   :  { %v10964_v49 = vpop.permute.xlu1 %4569  ;;  %v10966_v36 = vpop.permute.xlu0 %3900 }
 0x8c9   :  { %14416 = vst [vmem:[#allocation32_spill] sm:$0xff] %v10964_v49  ;;  %14417 = vst [vmem:[#allocation60_spill] sm:$0xff] %v10966_v36 }
 0x8ca   :  { %4127 = vrot.lane.b32.xlu0 %v10754_v6, %s14277_s14  ;;  %4121 = vrot.lane.b32.xlu1 %v10751_v30, %s14277_s14 }
 0x8cc   :  { %v10972_v25 = vpop.permute.xlu1 %4630  ;;  %v10974_v50 = vpop.permute.xlu0 %3912 }
 0x8cd   :  { %14418 = vst [vmem:[#allocation16_spill] sm:$0xff] %v10972_v25  ;;  %14419 = vst [vmem:[#allocation14_spill] sm:$0xff] %v10974_v50 }
 0x8ce   :  { %4188 = vrot.lane.b32.xlu0 %v10738_v29, %s14278_s4  ;;  %4133 = vrot.lane.b32.xlu1 %v10766_v14, %s14277_s14 }
 0x8d0   :  { %v10980_v0 = vpop.permute.xlu1 %4642  ;;  %v10982_v49 = vpop.permute.xlu0 %3167 }
 0x8d1   :  { %14420 = vst [vmem:[#allocation74_spill] sm:$0xff] %v10980_v0  ;;  %v5570_v0 = vld [vmem:[%s13408_s7 + $0x480] sm:$0xff] }
 0x8d2   :  { %4200 = vrot.lane.b32.xlu0 %v10754_v6, %s14278_s4  ;;  %4194 = vrot.lane.b32.xlu1 %v10751_v30, %s14278_s4  ;;  %v3151_v31 = vmul.f32 %v5570_v0, %v10132_v61  ;;  %v3212_v0 = vmul.f32 %v3200_v34, %v3193_v42  ;;  %v3213_v61 = vmul.f32 %v3201_v5, %v3190_v22 }
 0x8d3   :  { %v3153_v34 = vmul.f32 %v5572_v21, %v10136_v54  ;;  %v3152_v42 = vmul.f32 %v5571_v1, %v10150_v43  ;;  %v3154_v5 = vmul.f32 %v5573_v24, %v10156_v48  ;;  %v3259_v1 = vsel %vm708_vm11, %v10288_v3, %v10320_v4  ;;  %v5595_v24 = vld [vmem:[%s13408_s7 + $0xc8] sm:$0xff]  ;;  %v5596_v21 = vld [vmem:[%s13408_s7 + $0xd0] sm:$0xff]  ;;  %v5594_v4 = vld [vmem:[%s13408_s7 + $0xc0] sm:$0xff] }
 0x8d4   :  { %v10988_v36 = vpop.permute.xlu0 %3179  ;;  %v10990_v25 = vpop.permute.xlu1 %3173  ;;  %v3335_v3 = vsel %vm782_vm12, %v10328_v15, %v10302_v33  ;;  %v3332_v15 = vsel %vm782_vm12, %v10302_v33, %v10336_v13  ;;  %v3358_v54 = vmul.f32 %v5595_v24, %v3338_v8  ;;  %v3411_v33 = vsel %vm14423_vm8, %v10310_v17, %v10344_v51  ;;  %vm14429_vm8 = vmmov %vm14426_vm7 }
 0x8d5   :  { %v3224_v60 = vadd.f32 %v3212_v0, %v3152_v42  ;;  %v3225_v44 = vadd.f32 %v3213_v61, %v3153_v34  ;;  %v5607_v61 = vld [vmem:[%s13408_s7 + $0x128] sm:$0xff]  ;;  %v3223_v13 = vadd.f32 %v3211_v40, %v3151_v31  ;;  %v3357_v0 = vmul.f32 %v5594_v4, %v3341_v53  ;;  %v5606_v34 = vld [vmem:[%s13408_s7 + $0x120] sm:$0xff] }
 0x8d6   :  { %4261 = vrot.lane.b32.xlu0 %v10738_v29, %s6101_s21  ;;  %4206 = vrot.lane.b32.xlu1 %v10766_v14, %s14278_s4  ;;  %v3414_v42 = vsel %vm14424_vm14, %v10352_v57, %v10310_v17  ;;  %v3360_v43 = vmul.f32 %v5597_v63, %v3332_v15  ;;  %v3431_v31 = vmul.f32 %v5607_v61, %v3411_v33  ;;  %v5618_v63 = vld [vmem:[%s13408_s7 + $0x180] sm:$0xff]  ;;  %v5621_v15 = vld [vmem:[%s13408_s7 + $0x198] sm:$0xff]  ;;  %vm14430_vm14 = vcmp.lt.s32.totalorder %v6243_v7, 18 }
 0x8d7   :  { %v3297_v24 = vadd.f32 %v3285_v20, %v3224_v60  ;;  %v3298_v8 = vadd.f32 %v3286_v9, %v3225_v44  ;;  %v3296_v51 = vadd.f32 %v3284_v38, %v3223_v13  ;;  %v3432_v40 = vmul.f32 %v5608_v62, %v3408_v23  ;;  %v5619_v60 = vld [vmem:[%s13408_s7 + $0x188] sm:$0xff]  ;;  %v5620_v44 = vld [vmem:[%s13408_s7 + $0x190] sm:$0xff] }
 0x8d8   :  { %v10999_v50 = vpop.permute.xlu0 %3239  ;;  %v11001_v32 = vpop.permute.xlu1 %3185  ;;  %v3405_v17 = vsel %vm14425_vm15, %v10318_v37, %v10352_v57  ;;  %v3430_v9 = vmul.f32 %v5606_v34, %v3414_v42  ;;  %v3481_v37 = vsel %vm14426_vm7, %v10360_v39, %v10334_v11  ;;  %v5631_v62 = vld [vmem:[%s13408_s7 + $0x1e8] sm:$0xff]  ;;  %v5632_v23 = vld [vmem:[%s13408_s7 + $0x1f0] sm:$0xff]  ;;  %vm14431_vm15 = vmmov %vm14430_vm14 }
 0x8d9   :  { %14421 = vst [vmem:[#allocation150_spill] sm:$0xff] %v10999_v50  ;;  %v5585_v50 = vld [vmem:[%s13408_s7 + $0x78] sm:$0xff]  ;;  %v3370_v20 = vadd.f32 %v3358_v54, %v3297_v24  ;;  %v3369_v53 = vadd.f32 %v3357_v0, %v3296_v51  ;;  %v3484_v54 = vsel %vm14427_vm9, %v10326_v56, %v10360_v39  ;;  %v3487_v39 = vsel %vm14429_vm8, %v10368_v35, %v10326_v56  ;;  %v5630_v34 = vld [vmem:[%s13408_s7 + $0x1e0] sm:$0xff]  ;;  %vm14432_vm7 = vmmov %vm14430_vm14 }
 0x8da   :  { %4273 = vrot.lane.b32.xlu0 %v10754_v6, %s6101_s21  ;;  %4267 = vrot.lane.b32.xlu1 %v10751_v30, %s6101_s21  ;;  %v3287_v18 = vmul.f32 %v5585_v50, %v3259_v1  ;;  %v3359_v50 = vmul.f32 %v5596_v21, %v3335_v3  ;;  %v3226_v1 = vadd.f32 %v3214_v41, %v3154_v5  ;;  %v5609_v21 = vld [vmem:[%s13408_s7 + $0x138] sm:$0xff]  ;;  %vm14433_vm9 = vmmov %vm14432_vm7  ;;  %v5643_v51 = vld [vmem:[%s13408_s7 + $0x248] sm:$0xff] }
 0x8db   :  { %v3433_v38 = vmul.f32 %v5609_v21, %v3405_v17  ;;  %v3557_v56 = vsel %vm14431_vm15, %v10342_v55, %v10376_v26  ;;  %v3442_v13 = vadd.f32 %v3430_v9, %v3369_v53  ;;  %v3505_v0 = vmul.f32 %v5620_v44, %v3481_v37  ;;  %v5644_v17 = vld [vmem:[%s13408_s7 + $0x250] sm:$0xff] }
 0x8dc   :  { %v11059_v2 = vpop.permute.xlu0 %3251  ;;  %v11061_v22 = vpop.permute.xlu1 %3245  ;;  %v3299_v5 = vadd.f32 %v3287_v18, %v3226_v1  ;;  %v3371_v4 = vadd.f32 %v3359_v50, %v3298_v8  ;;  %v3478_v18 = vsel %vm14428_vm13, %v10334_v11, %v10368_v35  ;;  %v3554_v11 = vsel %vm14430_vm14, %v10376_v26, %v10350_v16  ;;  %v5633_v26 = vld [vmem:[%s13408_s7 + $0x1f8] sm:$0xff] }
 0x8dd   :  { %v3504_v50 = vmul.f32 %v5619_v60, %v3484_v54  ;;  %v3560_v42 = vsel %vm14432_vm7, %v10384_v28, %v10342_v55  ;;  %v3503_v1 = vmul.f32 %v5618_v63, %v3487_v39  ;;  %v3506_v24 = vmul.f32 %v5621_v15, %v3478_v18 }
 0x8de   :  { %4334 = vrot.lane.b32.xlu0 %v10738_v29, %s6102_s22  ;;  %4279 = vrot.lane.b32.xlu1 %v10766_v14, %s6101_s21  ;;  %v3372_v57 = vadd.f32 %v3360_v43, %v3299_v5  ;;  %v3443_v43 = vadd.f32 %v3431_v31, %v3370_v20  ;;  %v3444_v61 = vadd.f32 %v3432_v40, %v3371_v4  ;;  %v5642_v5 = vld [vmem:[%s13408_s7 + $0x240] sm:$0xff]  ;;  %v5645_v20 = vld [vmem:[%s13408_s7 + $0x258] sm:$0xff]  ;;  %vm14436_vm13 = vcmp.lt.s32.totalorder %v6243_v7, 31 }
 0x8df   :  { %v3551_v8 = vsel %vm14433_vm9, %v10350_v16, %v10384_v28  ;;  %v3630_v55 = vsel %vm90_vm0, %v10358_v10, %v10392_v46  ;;  %v3577_v40 = vmul.f32 %v5631_v62, %v3557_v56  ;;  %v3578_v21 = vmul.f32 %v5632_v23, %v3554_v11  ;;  %v5655_v4 = vld [vmem:[%s13408_s7 + $0x2a8] sm:$0xff]  ;;  %v5574_v23 = vld [vmem:[%s13408_s7 + $0x4a0] sm:$0xff]  ;;  %vm14437_vm8 = vmmov %vm14436_vm13 }
 0x8e0   :  { %v11112_v47 = vpop.permute.xlu0 %3312  ;;  %v11114_v48 = vpop.permute.xlu1 %3257  ;;  %v3445_v31 = vadd.f32 %v3433_v38, %v3372_v57  ;;  %v3627_v16 = vsel %vm90_vm0, %v10392_v46, %v10366_v19  ;;  %v3576_v28 = vmul.f32 %v5630_v34, %v3560_v42  ;;  %v3624_v9 = vsel %vm90_vm0, %v10366_v19, %v10400_v59  ;;  %v5575_v62 = vld [vmem:[%s13408_s7 + $0x4a8] sm:$0xff]  ;;  %vm14440_vm7 = vmmov %vm14437_vm8 }
 0x8e1   :  { %v3633_v46 = vsel %vm90_vm0, %v10400_v59, %v10358_v10  ;;  %v3703_v53 = vsel %vm119_vm1, %v10374_v52, %v10414_v58  ;;  %v3516_v37 = vadd.f32 %v3504_v50, %v3443_v43  ;;  %v3517_v19 = vadd.f32 %v3505_v0, %v3444_v61  ;;  %v5656_v59 = vld [vmem:[%s13408_s7 + $0x2b0] sm:$0xff]  ;;  %v3208_v42 = vld [vmem:[%s13408_s7 + $0x48] sm:$0xff]  ;;  %vm14441_vm9 = vmmov %vm14440_vm7 }
 0x8e2   :  { %4346 = vrot.lane.b32.xlu0 %v10754_v6, %s6102_s22  ;;  %4340 = vrot.lane.b32.xlu1 %v10751_v30, %s6102_s22  ;;  %v3579_v54 = vmul.f32 %v5633_v26, %v3551_v8  ;;  %v3650_v57 = vmul.f32 %v5643_v51, %v3630_v55  ;;  %v3515_v38 = vadd.f32 %v3503_v1, %v3442_v13  ;;  %v3209_v51 = vld [vmem:[%s13408_s7 + $0x50] sm:$0xff]  ;;  %vm14438_vm14 = vcmp.lt.s32.totalorder %v6243_v7, 30 }
 0x8e3   :  { %v3518_v63 = vadd.f32 %v3506_v24, %v3445_v31  ;;  %v3651_v10 = vmul.f32 %v5644_v17, %v3627_v16  ;;  %v3700_v15 = vsel %vm119_vm1, %v10414_v58, %v10382_v12  ;;  %v3589_v18 = vadd.f32 %v3577_v40, %v3516_v37  ;;  %v5579_v17 = vld [vmem:[%s13408_s7 + $0x4c8] sm:$0xff]  ;;  %v5580_v16 = vld [vmem:[%s13408_s7 + $0x4d0] sm:$0xff]  ;;  %vm14439_vm15 = vmmov %vm14438_vm14 }
 0x8e4   :  { %v11148_v3 = vpop.permute.xlu0 %3324  ;;  %v11150_v41 = vpop.permute.xlu1 %3318  ;;  %v3649_v39 = vmul.f32 %v5642_v5, %v3633_v46  ;;  %v3652_v43 = vmul.f32 %v5645_v20, %v3624_v9  ;;  %v3723_v61 = vmul.f32 %v5655_v4, %v3703_v53  ;;  %v3590_v11 = vadd.f32 %v3578_v21, %v3517_v19  ;;  %v3210_v20 = vld [vmem:[%s13408_s7 + $0x58] sm:$0xff]  ;;  %v5591_v46 = vld [vmem:[%s13408_s7 + $0xa8] sm:$0xff] }
 0x8e5   :  { %v3588_v58 = vadd.f32 %v3576_v28, %v3515_v38  ;;  %v3591_v50 = vadd.f32 %v3579_v54, %v3518_v63  ;;  %v3662_v0 = vadd.f32 %v3650_v57, %v3589_v18  ;;  %v3724_v34 = vmul.f32 %v5656_v59, %v3700_v15  ;;  %v14434_v53 = vld [vmem:[#allocation150_spill] sm:$0xff]  ;;  %v14435_v54 = vld [vmem:[#allocation43_spill] sm:$0xff] }
 0x8e6   :  { %4407 = vrot.lane.b32.xlu0 %v10738_v29, %s6103_s23  ;;  %4352 = vrot.lane.b32.xlu1 %v10766_v14, %s6102_s22  ;;  %v3195_v1 = vsel %vm635_vm10, %v10982_v49, %v10990_v25  ;;  %v3663_v24 = vadd.f32 %v3651_v10, %v3590_v11  ;;  %v11288_v26 = vmul.f32 %v5575_v62, %v10550_v27  ;;  %v5581_v10 = vld [vmem:[%s13408_s7 + $0x4d8] sm:$0xff]  ;;  %v5590_v18 = vld [vmem:[%s13408_s7 + $0xa0] sm:$0xff] }
 0x8e7   :  { %v11291_v8 = vmul.f32 %v5574_v23, %v10246_v45  ;;  %v3192_v55 = vsel %vm635_vm10, %v10990_v25, %v10988_v36  ;;  %v11302_v31 = vadd.f32 %v3649_v39, %v3588_v58  ;;  %v11304_v40 = vadd.f32 %v3652_v43, %v3591_v50  ;;  %v3207_v25 = vld [vmem:[%s13408_s7 + $0x40] sm:$0xff]  ;;  %v5603_v23 = vld [vmem:[%s13408_s7 + $0x108] sm:$0xff] }
 0x8e8   :  { %v11198_v35 = vpop.permute.xlu0 %3385  ;;  %v11200_v33 = vpop.permute.xlu1 %3330  ;;  %v11306_v21 = vadd.f32 %v3723_v61, %v3662_v0  ;;  %v3198_v28 = vsel %vm635_vm10, %v11001_v32, %v10982_v49  ;;  %v3220_v5 = vmul.f32 %v3208_v42, %v3195_v1  ;;  %v3189_v9 = vsel %vm635_vm10, %v10988_v36, %v11001_v32  ;;  %v5592_v49 = vld [vmem:[%s13408_s7 + $0xb0] sm:$0xff]  ;;  %v5654_v39 = vld [vmem:[%s13408_s7 + $0x2a0] sm:$0xff] }
 0x8e9   :  { %v3264_v4 = vsel %vm708_vm11, %v11061_v22, %v11059_v2  ;;  %v3267_v37 = vsel %vm708_vm11, %v14434_v53, %v11061_v22  ;;  %v11346_v32 = vadd.f32 %v3724_v34, %v3663_v24  ;;  %v11352_v57 = vsel %vm119_vm1, %v10382_v12, %v14435_v54  ;;  %v5578_v22 = vld [vmem:[%s13408_s7 + $0x4c0] sm:$0xff]  ;;  %v5604_v34 = vld [vmem:[%s13408_s7 + $0x110] sm:$0xff] }
 0x8ea   :  { %4419 = vrot.lane.b32.xlu0 %v10754_v6, %s6103_s23  ;;  %4413 = vrot.lane.b32.xlu1 %v10751_v30, %s6103_s23  ;;  %v3706_v38 = vsel %vm119_vm1, %v14435_v54, %v10374_v52  ;;  %v3221_v63 = vmul.f32 %v3209_v51, %v3192_v55  ;;  %v3161_v59 = vmul.f32 %v5580_v16, %v10754_v6  ;;  %v5593_v51 = vld [vmem:[%s13408_s7 + $0xb8] sm:$0xff]  ;;  %v5615_v16 = vld [vmem:[%s13408_s7 + $0x168] sm:$0xff] }
 0x8eb   :  { %v3160_v15 = vmul.f32 %v5579_v17, %v10751_v30  ;;  %v3219_v12 = vmul.f32 %v3207_v25, %v3198_v28  ;;  %v3270_v52 = vsel %vm708_vm11, %v11114_v48, %v14434_v53  ;;  %v3222_v43 = vmul.f32 %v3210_v20, %v3189_v9  ;;  %v5616_v9 = vld [vmem:[%s13408_s7 + $0x170] sm:$0xff]  ;;  %v5605_v54 = vld [vmem:[%s13408_s7 + $0x118] sm:$0xff] }
 0x8ec   :  { %v11255_v60 = vpop.permute.xlu0 %3397  ;;  %v11257_v44 = vpop.permute.xlu1 %3391  ;;  %v3293_v61 = vmul.f32 %v5591_v46, %v3267_v37  ;;  %v3294_v62 = vmul.f32 %v5592_v49, %v3264_v4  ;;  %v3340_v11 = vsel %vm782_vm12, %v11112_v47, %v11150_v41  ;;  %v3159_v50 = vmul.f32 %v5578_v22, %v10738_v29  ;;  %v5602_v37 = vld [vmem:[%s13408_s7 + $0x100] sm:$0xff] }
 0x8ed   :  { %v3232_v58 = vadd.f32 %v3220_v5, %v3160_v15  ;;  %v3162_v0 = vmul.f32 %v5581_v10, %v10766_v14  ;;  %v3337_v42 = vsel %vm782_vm12, %v11150_v41, %v11148_v3  ;;  %v3233_v24 = vadd.f32 %v3221_v63, %v3161_v59  ;;  %v5627_v15 = vld [vmem:[%s13408_s7 + $0x1c8] sm:$0xff] }
 0x8ee   :  { %4480 = vrot.lane.b32.xlu0 %v10738_v29, %s6115_s30  ;;  %4425 = vrot.lane.b32.xlu1 %v10766_v14, %s6103_s23  ;;  %v3261_v55 = vsel %vm708_vm11, %v11059_v2, %v11114_v48  ;;  %v3292_v17 = vmul.f32 %v5590_v18, %v3270_v52  ;;  %v3413_v41 = vsel %vm14436_vm13, %v11198_v35, %v11257_v44  ;;  %v5614_v52 = vld [vmem:[%s13408_s7 + $0x160] sm:$0xff]  ;;  %vm14442_vm13 = vcmp.lt.s32.totalorder %v6243_v7, 18 }
 0x8ef   :  { %v11412_v28 = vmul.f32 %v5654_v39, %v3706_v38  ;;  %v3231_v5 = vadd.f32 %v3219_v12, %v3159_v50  ;;  %v3366_v20 = vmul.f32 %v5603_v23, %v3340_v11  ;;  %v3410_v48 = vsel %vm14437_vm8, %v11257_v44, %v11255_v60  ;;  %v5628_v12 = vld [vmem:[%s13408_s7 + $0x1d0] sm:$0xff]  ;;  %v5617_v39 = vld [vmem:[%s13408_s7 + $0x178] sm:$0xff]  ;;  %v5639_v50 = vld [vmem:[%s13408_s7 + $0x228] sm:$0xff] }
 0x8f0   :  { %v11276_v56 = vpop.permute.xlu0 %3458  ;;  %v11278_v13 = vpop.permute.xlu1 %3403  ;;  %v3234_v2 = vadd.f32 %v3222_v43, %v3162_v0  ;;  %v3305_v46 = vadd.f32 %v3293_v61, %v3232_v58  ;;  %v3306_v49 = vadd.f32 %v3294_v62, %v3233_v24  ;;  %v3367_v4 = vmul.f32 %v5604_v34, %v3337_v42  ;;  %v14443_v62 = vld [vmem:[#allocation80_spill] sm:$0xff]  ;;  %vm14444_vm8 = vmmov %vm14442_vm13 }
 0x8f1   :  { %v3295_v53 = vmul.f32 %v5593_v51, %v3261_v55  ;;  %v3334_v44 = vsel %vm782_vm12, %v11148_v3, %v11200_v33  ;;  %v3343_v38 = vsel %vm782_vm12, %v11200_v33, %v11112_v47  ;;  %v3439_v63 = vmul.f32 %v5615_v16, %v3413_v41 }
 0x8f2   :  { %4492 = vrot.lane.b32.xlu0 %v10754_v6, %s6115_s30  ;;  %4486 = vrot.lane.b32.xlu1 %v10751_v30, %s6115_s30  ;;  %v3304_v10 = vadd.f32 %v3292_v17, %v3231_v5  ;;  %v3440_v59 = vmul.f32 %v5616_v9, %v3410_v48  ;;  %v3378_v18 = vadd.f32 %v3366_v20, %v3305_v46  ;;  %v5626_v20 = vld [vmem:[%s13408_s7 + $0x1c0] sm:$0xff]  ;;  %v5629_v9 = vld [vmem:[%s13408_s7 + $0x1d8] sm:$0xff] }
 0x8f3   :  { %v3407_v43 = vsel %vm14440_vm7, %v11255_v60, %v11278_v13  ;;  %v3379_v23 = vadd.f32 %v3367_v4, %v3306_v49  ;;  %v3365_v11 = vmul.f32 %v5602_v37, %v3343_v38  ;;  %v3368_v58 = vmul.f32 %v5605_v54, %v3334_v44  ;;  %v5640_v60 = vld [vmem:[%s13408_s7 + $0x230] sm:$0xff]  ;;  %vm14446_vm7 = vmmov %vm14444_vm8 }
 0x8f4   :  { %v11344_v19 = vpop.permute.xlu0 %3470  ;;  %v3465_v36 = vpop.permute.xlu1 %3464  ;;  %v3307_v0 = vadd.f32 %v3295_v53, %v3234_v2  ;;  %v3451_v34 = vadd.f32 %v3439_v63, %v3378_v18  ;;  %v3441_v16 = vmul.f32 %v5617_v39, %v3407_v43  ;;  %v14448_v53 = vld [vmem:[#allocation37_spill] sm:$0xff] }
 0x8f5   :  { %v3483_v3 = vsel %vm14438_vm14, %v3465_v36, %v11344_v19  ;;  %v3486_v47 = vsel %vm14439_vm15, %v11276_v56, %v3465_v36  ;;  %v3416_v36 = vsel %vm14441_vm9, %v11278_v13, %v11198_v35  ;;  %v5657_v13 = vld [vmem:[%s13408_s7 + $0x2b8] sm:$0xff]  ;;  %v3452_v55 = vadd.f32 %v3440_v59, %v3379_v23  ;;  %vm14445_vm15 = vmmov %vm14438_vm14  ;;  %v14449_v37 = vld [vmem:[#allocation41_spill] sm:$0xff] }
 0x8f6   :  { %4553 = vrot.lane.b32.xlu0 %v10738_v29, %s6116_s11  ;;  %4498 = vrot.lane.b32.xlu1 %v10766_v14, %s6115_s30  ;;  %v3512_v42 = vmul.f32 %v5627_v15, %v3486_v47  ;;  %v3513_v24 = vmul.f32 %v5628_v12, %v3483_v3  ;;  %v3438_v17 = vmul.f32 %v5614_v52, %v3416_v36  ;;  %v5641_v59 = vld [vmem:[%s13408_s7 + $0x238] sm:$0xff]  ;;  %vm14451_vm9 = vmmov %vm14446_vm7  ;;  %v5651_v12 = vld [vmem:[%s13408_s7 + $0x288] sm:$0xff] }
 0x8f7   :  { %v3725_v4 = vmul.f32 %v5657_v13, %v11352_v57  ;;  %v3773_v54 = vsel %vm149_vm2, %v14449_v37, %v14448_v53  ;;  %v3377_v44 = vadd.f32 %v3365_v11, %v3304_v10  ;;  %v3380_v38 = vadd.f32 %v3368_v58, %v3307_v0  ;;  %v5652_v3 = vld [vmem:[%s13408_s7 + $0x290] sm:$0xff]  ;;  %v14452_v23 = vld [vmem:[#allocation84_spill] sm:$0xff]  ;;  %v14453_v0 = vld [vmem:[#allocation63_spill] sm:$0xff] }
 0x8f8   :  { %v11396_v1 = vpop.permute.xlu0 %3531  ;;  %v3477_v25 = vpop.permute.xlu1 %3476  ;;  %v3524_v57 = vadd.f32 %v3512_v42, %v3451_v34  ;;  %v5667_v11 = vld [vmem:[%s13408_s7 + $0x308] sm:$0xff]  ;;  %v5668_v58 = vld [vmem:[%s13408_s7 + $0x310] sm:$0xff]  ;;  %v3734_v34 = vadd.f32 %v11412_v28, %v11302_v31  ;;  %v5653_v31 = vld [vmem:[%s13408_s7 + $0x298] sm:$0xff] }
 0x8f9   :  { %v3480_v41 = vsel %vm14438_vm14, %v11344_v19, %v3477_v25  ;;  %v3489_v48 = vsel %vm14445_vm15, %v3477_v25, %v11276_v56  ;;  %v14447_v19 = vld [vmem:[#allocation76_spill] sm:$0xff]  ;;  %v5638_v56 = vld [vmem:[%s13408_s7 + $0x220] sm:$0xff]  ;;  %v3450_v47 = vadd.f32 %v3438_v17, %v3377_v44  ;;  %v3737_v42 = vadd.f32 %v3725_v4, %v11304_v40  ;;  %v5669_v28 = vld [vmem:[%s13408_s7 + $0x318] sm:$0xff] }
 0x8fa   :  { %4565 = vrot.lane.b32.xlu0 %v10754_v6, %s6116_s11  ;;  %4559 = vrot.lane.b32.xlu1 %v10751_v30, %s6116_s11  ;;  %v14450_v25 = vld [vmem:[#allocation67_spill] sm:$0xff]  ;;  %v3511_v18 = vmul.f32 %v5626_v20, %v3489_v48  ;;  %v3514_v52 = vmul.f32 %v5629_v9, %v3480_v41 }
 0x8fb   :  { %v3776_v63 = vsel %vm149_vm2, %v14450_v25, %v14449_v37  ;;  %v5650_v41 = vld [vmem:[%s13408_s7 + $0x280] sm:$0xff] }
 0x8fc   :  { %v3544_v22 = vpop.permute.xlu0 %3543  ;;  %v3538_v33 = vpop.permute.xlu1 %3537  ;;  %v5666_v40 = vld [vmem:[%s13408_s7 + $0x300] sm:$0xff] }
 0x8fd   :  { %v3556_v61 = vsel %vm14442_vm13, %v3538_v33, %v3544_v22  ;;  %v3559_v35 = vsel %vm14444_vm8, %v11396_v1, %v3538_v33  ;;  %v3453_v33 = vadd.f32 %v3441_v16, %v3380_v38  ;;  %vm14458_vm13 = vcmp.lt.s32.totalorder %v6243_v7, 14 }
 0x8fe   :  { %4701 = vrot.lane.b32.xlu0 %v14443_v62, %s14283_s15  ;;  %4571 = vrot.lane.b32.xlu1 %v10766_v14, %s6116_s11  ;;  %v3585_v2 = vmul.f32 %v5639_v50, %v3559_v35  ;;  %v3586_v46 = vmul.f32 %v5640_v60, %v3556_v61  ;;  %vm14460_vm8 = vmmov %vm14458_vm13 }
 0x8ff   :  { %v3526_v20 = vadd.f32 %v3514_v52, %v3453_v33  ;;  %v5680_v33 = vld [vmem:[%s13408_s7 + $0x370] sm:$0xff]  ;;  %v5681_v52 = vld [vmem:[%s13408_s7 + $0x378] sm:$0xff]  ;;  %vm14462_vm14 = vmmov %vm14460_vm8 }
 0x900   :  { %v3605_v51 = vpop.permute.xlu0 %3604  ;;  %v3550_v5 = vpop.permute.xlu1 %3549  ;;  %v3597_v43 = vadd.f32 %v3585_v2, %v3524_v57  ;;  %vm14463_vm15 = vmmov %vm14460_vm8 }
 0x901   :  { %v3553_v49 = vsel %vm14446_vm7, %v3544_v22, %v3550_v5  ;;  %v3525_v22 = vadd.f32 %v3513_v24, %v3452_v55  ;;  %v3562_v10 = vsel %vm14451_vm9, %v3550_v5, %v11396_v1  ;;  %v14454_v24 = vld [vmem:[#allocation47_spill] sm:$0xff]  ;;  %v3523_v5 = vadd.f32 %v3511_v18, %v3450_v47  ;;  %v5664_v47 = vld [vmem:[%s13408_s7 + $0x2f0] sm:$0xff] }
 0x902   :  { %4707 = vrot.lane.b32.xlu0 %v14447_v19, %s14283_s15  ;;  %4703 = vrot.lane.b32.xlu1 %v10550_v27, %s14283_s15  ;;  %v3584_v50 = vmul.f32 %v5638_v56, %v3562_v10  ;;  %v3587_v60 = vmul.f32 %v5641_v59, %v3553_v49  ;;  %v3770_v55 = vsel %vm149_vm2, %v14448_v53, %v14454_v24  ;;  %v14457_v59 = vld [vmem:[#allocation45_spill] sm:$0xff]  ;;  %v5678_v18 = vld [vmem:[%s13408_s7 + $0x360] sm:$0xff]  ;;  %vm14466_vm7 = vcmp.lt.s32.totalorder %v6243_v7, 2 }
 0x903   :  { %v3598_v36 = vadd.f32 %v3586_v46, %v3525_v22  ;;  %v3779_v17 = vsel %vm149_vm2, %v14454_v24, %v14450_v25  ;;  %v3796_v46 = vmul.f32 %v5667_v11, %v3776_v63  ;;  %v3797_v49 = vmul.f32 %v5668_v58, %v3773_v54  ;;  %v14455_v25 = vld [vmem:[#allocation103_spill] sm:$0xff]  ;;  %v5679_v54 = vld [vmem:[%s13408_s7 + $0x368] sm:$0xff]  ;;  %v14456_v63 = vld [vmem:[#allocation34_spill] sm:$0xff] }
 0x904   :  { %v3617_v15 = vpop.permute.xlu0 %3616  ;;  %v3611_v39 = vpop.permute.xlu1 %3610  ;;  %v3596_v37 = vadd.f32 %v3584_v50, %v3523_v5  ;;  %v3599_v44 = vadd.f32 %v3587_v60, %v3526_v20  ;;  %v3795_v57 = vmul.f32 %v5666_v40, %v3779_v17  ;;  %v3798_v22 = vmul.f32 %v5669_v28, %v3770_v55  ;;  %v14459_v10 = vld [vmem:[#allocation69_spill] sm:$0xff]  ;;  %v14464_v24 = vld [vmem:[#allocation35_spill] sm:$0xff]  ;;  %vm14468_vm9 = vmmov %vm14466_vm7 }
 0x905   :  { %v3629_v61 = vsel %vm90_vm0, %v3611_v39, %v3617_v15  ;;  %v3632_v1 = vsel %vm90_vm0, %v3605_v51, %v3611_v39  ;;  %v14461_v39 = vld [vmem:[#allocation51_spill] sm:$0xff]  ;;  %v3808_v58 = vadd.f32 %v3796_v46, %v11306_v21  ;;  %v3809_v50 = vadd.f32 %v3797_v49, %v11346_v32  ;;  %v5692_v21 = vld [vmem:[%s13408_s7 + $0x3d0] sm:$0xff] }
 0x906   :  { %4713 = vrot.lane.b32.xlu0 %v14452_v23, %s14283_s15  ;;  %v3658_v35 = vmul.f32 %v5651_v12, %v3632_v1  ;;  %v3659_v13 = vmul.f32 %v5652_v3, %v3629_v61  ;;  %4709 = vrot.lane.b32.xlu1 %v14453_v0, %s14283_s15  ;;  %v5663_v3 = vld [vmem:[%s13408_s7 + $0x2e8] sm:$0xff]  ;;  %v14465_v32 = vld [vmem:[#allocation49_spill] sm:$0xff]  ;;  %v5662_v49 = vld [vmem:[%s13408_s7 + $0x2e0] sm:$0xff] }
 0x907   :  { %v3919_v55 = vsel %vm14466_vm7, %v14465_v32, %v14464_v24  ;;  %v14467_v17 = vld [vmem:[#allocation65_spill] sm:$0xff] }
 0x908   :  { %v11550_v16 = vpop.permute.xlu0 %3677  ;;  %v3670_v9 = vadd.f32 %v3658_v35, %v3597_v43  ;;  %v3671_v48 = vadd.f32 %v3659_v13, %v3598_v36  ;;  %v3623_v2 = vpop.permute.xlu1 %3622  ;;  %v3843_v43 = vsel %vm14462_vm14, %v14456_v63, %v14461_v39  ;;  %v3852_v36 = vsel %vm14463_vm15, %v14461_v39, %v14459_v10  ;;  %v5691_v13 = vld [vmem:[%s13408_s7 + $0x3c8] sm:$0xff]  ;;  %vm14481_vm15 = vmmov %vm14462_vm14 }
 0x909   :  { %v3626_v4 = vsel %vm90_vm0, %v3617_v15, %v3623_v2  ;;  %v3635_v53 = vsel %vm90_vm0, %v3623_v2, %v3605_v51  ;;  %v3846_v51 = vsel %vm14458_vm13, %v14457_v59, %v14456_v63  ;;  %v3849_v15 = vsel %vm14460_vm8, %v14459_v10, %v14457_v59  ;;  %v14469_v10 = vld [vmem:[#allocation61_spill] sm:$0xff]  ;;  %vm14471_vm13 = vmmov %vm14466_vm7  ;;  %v5703_v39 = vld [vmem:[%s13408_s7 + $0x428] sm:$0xff] }
 0x90a   :  { %4626 = vrot.lane.b32.xlu0 %v10738_v29, %s6117_s13  ;;  %v3657_v38 = vmul.f32 %v5650_v41, %v3635_v53  ;;  %v3660_v56 = vmul.f32 %v5653_v31, %v3626_v4  ;;  %4715 = vrot.lane.b32.xlu1 %v14455_v25, %s14283_s15  ;;  %v3922_v41 = vsel %vm14468_vm9, %v14467_v17, %v14465_v32  ;;  %v5665_v4 = vld [vmem:[%s13408_s7 + $0x2f8] sm:$0xff]  ;;  %vm14472_vm8 = vmmov %vm14466_vm7  ;;  %vm14484_vm7 = vcmp.lt.s32.totalorder %v6243_v7, 126 }
 0x90b   :  { %v3869_v28 = vmul.f32 %v5679_v54, %v3849_v15  ;;  %v3870_v5 = vmul.f32 %v5680_v33, %v3846_v51  ;;  %v3868_v20 = vmul.f32 %v5678_v18, %v3852_v36  ;;  %v3871_v2 = vmul.f32 %v5681_v52, %v3843_v43  ;;  %v5675_v18 = vld [vmem:[%s13408_s7 + $0x348] sm:$0xff]  ;;  %v5676_v52 = vld [vmem:[%s13408_s7 + $0x350] sm:$0xff]  ;;  %v14473_v43 = vld [vmem:[#allocation110_spill] sm:$0xff] }
 0x90c   :  { %v3690_v12 = vpop.permute.xlu0 %3689  ;;  %v3669_v61 = vadd.f32 %v3657_v38, %v3596_v37  ;;  %v3672_v1 = vadd.f32 %v3660_v56, %v3599_v44  ;;  %v3684_v11 = vpop.permute.xlu1 %3683  ;;  %v3807_v53 = vadd.f32 %v3795_v57, %v3734_v34  ;;  %v3810_v37 = vadd.f32 %v3798_v22, %v3737_v42  ;;  %v5690_v34 = vld [vmem:[%s13408_s7 + $0x3c0] sm:$0xff]  ;;  %v5693_v42 = vld [vmem:[%s13408_s7 + $0x3d8] sm:$0xff]  ;;  %vm14486_vm9 = vmmov %vm14484_vm7 }
 0x90d   :  { %v3702_v60 = vsel %vm119_vm1, %v3684_v11, %v3690_v12  ;;  %v3705_v35 = vsel %vm119_vm1, %v11550_v16, %v3684_v11  ;;  %v3942_v63 = vmul.f32 %v5691_v13, %v3922_v41  ;;  %v3943_v54 = vmul.f32 %v5692_v21, %v3919_v55  ;;  %v14474_v36 = vld [vmem:[#allocation39_spill] sm:$0xff] }
 0x90e   :  { %4638 = vrot.lane.b32.xlu0 %v10754_v6, %s6117_s13  ;;  %v3731_v31 = vmul.f32 %v5663_v3, %v3705_v35  ;;  %v3732_v40 = vmul.f32 %v5664_v47, %v3702_v60  ;;  %4632 = vrot.lane.b32.xlu1 %v10751_v30, %s6117_s13  ;;  %v3881_v15 = vadd.f32 %v3869_v28, %v3808_v58  ;;  %v5702_v58 = vld [vmem:[%s13408_s7 + $0x420] sm:$0xff] }
 0x90f   :  { %v3880_v3 = vadd.f32 %v3868_v20, %v3807_v53  ;;  %v3883_v47 = vadd.f32 %v3871_v2, %v3810_v37  ;;  %v3995_v11 = vsel %vm179_vm3, %v14474_v36, %v14473_v43  ;;  %v5674_v53 = vld [vmem:[%s13408_s7 + $0x340] sm:$0xff]  ;;  %v5677_v37 = vld [vmem:[%s13408_s7 + $0x358] sm:$0xff] }
 0x910   :  { %v11631_v46 = vpop.permute.xlu0 %3750  ;;  %v3743_v44 = vadd.f32 %v3731_v31, %v3670_v9  ;;  %v3744_v38 = vadd.f32 %v3732_v40, %v3671_v48  ;;  %v3696_v56 = vpop.permute.xlu1 %3695  ;;  %v14470_v9 = vld [vmem:[#allocation55_spill] sm:$0xff]  ;;  %v3954_v41 = vadd.f32 %v3942_v63, %v3881_v15  ;;  %v4015_v20 = vmul.f32 %v5703_v39, %v3995_v11 }
 0x911   :  { %v3699_v59 = vsel %vm119_vm1, %v3690_v12, %v3696_v56  ;;  %v3708_v51 = vsel %vm119_vm1, %v3696_v56, %v11550_v16  ;;  %v3916_v48 = vsel %vm14471_vm13, %v14464_v24, %v14470_v9  ;;  %v3925_v16 = vsel %vm14472_vm8, %v14470_v9, %v14467_v17  ;;  %v5705_v56 = vld [vmem:[%s13408_s7 + $0x438] sm:$0xff]  ;;  %v5714_v63 = vld [vmem:[%s13408_s7 + $0x4e0] sm:$0xff]  ;;  %vm14488_vm13 = vmmov %vm14484_vm7 }
 0x912   :  { %4768 = vrot.lane.b32.xlu0 %v14469_v10, %s6119_s25  ;;  %v3730_v57 = vmul.f32 %v5662_v49, %v3708_v51  ;;  %v3733_v22 = vmul.f32 %v5665_v4, %v3699_v59  ;;  %4644 = vrot.lane.b32.xlu1 %v10766_v14, %s6117_s13  ;;  %v3882_v12 = vadd.f32 %v3870_v5, %v3809_v50  ;;  %v14475_v50 = vld [vmem:[#allocation113_spill] sm:$0xff]  ;;  %v14477_v59 = vld [vmem:[#allocation75_spill] sm:$0xff]  ;;  %v14478_v51 = vld [vmem:[#allocation114_spill] sm:$0xff] }
 0x913   :  { %v3998_v60 = vsel %vm179_vm3, %v14475_v50, %v14474_v36  ;;  %v3941_v24 = vmul.f32 %v5690_v34, %v3925_v16  ;;  %v3944_v32 = vmul.f32 %v5693_v42, %v3916_v48  ;;  %v4065_v34 = vsel %vm213_vm4, %v14478_v51, %v14477_v59  ;;  %v14479_v42 = vld [vmem:[#allocation73_spill] sm:$0xff]  ;;  %vm14489_vm8 = vmmov %vm14484_vm7 }
 0x914   :  { %v3763_v33 = vpop.permute.xlu0 %3762  ;;  %v3742_v35 = vadd.f32 %v3730_v57, %v3669_v61  ;;  %v3745_v13 = vadd.f32 %v3733_v22, %v3672_v1  ;;  %v3757_v21 = vpop.permute.xlu1 %3756  ;;  %v3955_v31 = vadd.f32 %v3943_v54, %v3882_v12  ;;  %v5704_v61 = vld [vmem:[%s13408_s7 + $0x430] sm:$0xff]  ;;  %v14476_v1 = vld [vmem:[#allocation71_spill] sm:$0xff]  ;;  %v4014_v49 = vmul.f32 %v5702_v58, %v3998_v60  ;;  %v5715_v54 = vld [vmem:[%s13408_s7 + $0x4e8] sm:$0xff] }
 0x915   :  { %v3775_v55 = vsel %vm149_vm2, %v3757_v21, %v3763_v33  ;;  %v3778_v17 = vsel %vm149_vm2, %v11631_v46, %v3757_v21  ;;  %v3992_v5 = vsel %vm179_vm3, %v14473_v43, %v14476_v1  ;;  %v3989_v2 = vsel %vm179_vm3, %v14476_v1, %v14475_v50  ;;  %v5687_v50 = vld [vmem:[%s13408_s7 + $0x3a8] sm:$0xff]  ;;  %v5688_v60 = vld [vmem:[%s13408_s7 + $0x3b0] sm:$0xff] }
 0x916   :  { %4774 = vrot.lane.b32.xlu0 %v14443_v62, %s6119_s25  ;;  %v3804_v40 = vmul.f32 %v5675_v18, %v3778_v17  ;;  %v3805_v28 = vmul.f32 %v5676_v52, %v3775_v55  ;;  %4770 = vrot.lane.b32.xlu1 %v10246_v45, %s6119_s25  ;;  %v4068_v9 = vsel %vm213_vm4, %v14479_v42, %v14478_v51  ;;  %v5716_v52 = vld [vmem:[%s13408_s7 + $0x4f0] sm:$0xff] }
 0x917   :  { %v3953_v22 = vadd.f32 %v3941_v24, %v3880_v3  ;;  %v3956_v15 = vadd.f32 %v3944_v32, %v3883_v47  ;;  %v4016_v39 = vmul.f32 %v5704_v61, %v3992_v5  ;;  %v4017_v43 = vmul.f32 %v5705_v56, %v3989_v2  ;;  %v14483_v5 = vld [vmem:[#allocation118_spill] sm:$0xff]  ;;  %v14485_v2 = vld [vmem:[#allocation77_spill] sm:$0xff] }
 0x918   :  { %v11702_v4 = vpop.permute.xlu0 %3823  ;;  %v3816_v48 = vadd.f32 %v3804_v40, %v3743_v44  ;;  %v3817_v16 = vadd.f32 %v3805_v28, %v3744_v38  ;;  %v3769_v57 = vpop.permute.xlu1 %3768  ;;  %v5717_v44 = vld [vmem:[%s13408_s7 + $0x4f8] sm:$0xff]  ;;  %v14480_v38 = vld [vmem:[#allocation117_spill] sm:$0xff]  ;;  %v4087_v36 = vmul.f32 %v5714_v63, %v4068_v9  ;;  %v4088_v11 = vmul.f32 %v5715_v54, %v4065_v34  ;;  %v5686_v34 = vld [vmem:[%s13408_s7 + $0x3a0] sm:$0xff] }
 0x919   :  { %v3772_v12 = vsel %vm149_vm2, %v3763_v33, %v3769_v57  ;;  %v3781_v18 = vsel %vm149_vm2, %v3769_v57, %v11631_v46  ;;  %v4062_v3 = vsel %vm213_vm4, %v14477_v59, %v14480_v38  ;;  %v4071_v46 = vsel %vm213_vm4, %v14480_v38, %v14479_v42  ;;  %v5689_v42 = vld [vmem:[%s13408_s7 + $0x3b8] sm:$0xff]  ;;  %v5728_v9 = vld [vmem:[%s13408_s7 + $0x550] sm:$0xff] }
 0x91a   :  { %4780 = vrot.lane.b32.xlu0 %v14447_v19, %s6119_s25  ;;  %v3803_v47 = vmul.f32 %v5674_v53, %v3781_v18  ;;  %v3806_v33 = vmul.f32 %v5677_v37, %v3772_v12  ;;  %4776 = vrot.lane.b32.xlu1 %v10550_v27, %s6119_s25  ;;  %v4027_v21 = vadd.f32 %v4015_v20, %v3954_v41  ;;  %v5726_v41 = vld [vmem:[%s13408_s7 + $0x540] sm:$0xff]  ;;  %v14487_v57 = vld [vmem:[#allocation121_spill] sm:$0xff] }
 0x91b   :  { %v4026_v24 = vadd.f32 %v4014_v49, %v3953_v22  ;;  %v4089_v40 = vmul.f32 %v5716_v52, %v4062_v3  ;;  %v4090_v28 = vmul.f32 %v5717_v44, %v4071_v46  ;;  %v4141_v49 = vsel %vm14486_vm9, %v14485_v2, %v14483_v5 }
 0x91c   :  { %v3836_v58 = vpop.permute.xlu0 %3835  ;;  %v3815_v32 = vadd.f32 %v3803_v47, %v3742_v35  ;;  %v3818_v55 = vadd.f32 %v3806_v33, %v3745_v13  ;;  %v3830_v17 = vpop.permute.xlu1 %3829  ;;  %v5727_v35 = vld [vmem:[%s13408_s7 + $0x548] sm:$0xff]  ;;  %v14482_v13 = vld [vmem:[#allocation79_spill] sm:$0xff]  ;;  %v4028_v56 = vadd.f32 %v4016_v39, %v3955_v31  ;;  %v4029_v63 = vadd.f32 %v4017_v43, %v3956_v15  ;;  %v5729_v31 = vld [vmem:[%s13408_s7 + $0x558] sm:$0xff] }
 0x91d   :  { %v3848_v61 = vsel %vm14462_vm14, %v3830_v17, %v3836_v58  ;;  %v3851_v1 = vsel %vm14481_vm15, %v11702_v4, %v3830_v17  ;;  %v4138_v20 = vsel %vm14484_vm7, %v14483_v5, %v14482_v13  ;;  %v4099_v54 = vadd.f32 %v4087_v36, %v4026_v24  ;;  %vm14490_vm15 = vmmov %vm14462_vm14  ;;  %v5738_v36 = vld [vmem:[%s13408_s7 + $0x5a0] sm:$0xff]  ;;  %v5699_v24 = vld [vmem:[%s13408_s7 + $0x408] sm:$0xff] }
 0x91e   :  { %4786 = vrot.lane.b32.xlu0 %v14452_v23, %s6119_s25  ;;  %v3877_v53 = vmul.f32 %v5687_v50, %v3851_v1  ;;  %v3878_v37 = vmul.f32 %v5688_v60, %v3848_v61  ;;  %4782 = vrot.lane.b32.xlu1 %v14453_v0, %s6119_s25  ;;  %v4100_v59 = vadd.f32 %v4088_v11, %v4027_v21  ;;  %v14491_v11 = vld [vmem:[#allocation83_spill] sm:$0xff]  ;;  %vm14493_vm7 = vcmp.lt.s32.totalorder %v6243_v7, 114  ;;  %v14494_v50 = vld [vmem:[#allocation81_spill] sm:$0xff]  ;;  %v5741_v61 = vld [vmem:[%s13408_s7 + $0x5b8] sm:$0xff] }
 0x91f   :  { %v4135_v22 = vsel %vm14488_vm13, %v14482_v13, %v14487_v57  ;;  %v4144_v15 = vsel %vm14489_vm8, %v14487_v57, %v14485_v2  ;;  %v4160_v44 = vmul.f32 %v5726_v41, %v4141_v49  ;;  %v4161_v38 = vmul.f32 %v5727_v35, %v4138_v20  ;;  %vm14495_vm9 = vmmov %vm14493_vm7  ;;  %v5700_v17 = vld [vmem:[%s13408_s7 + $0x410] sm:$0xff] }
 0x920   :  { %v11779_v51 = vpop.permute.xlu0 %3896  ;;  %v3889_v12 = vadd.f32 %v3877_v53, %v3816_v48  ;;  %v3890_v18 = vadd.f32 %v3878_v37, %v3817_v16  ;;  %v3842_v52 = vpop.permute.xlu1 %3841  ;;  %v4101_v47 = vadd.f32 %v4089_v40, %v4028_v56  ;;  %v4102_v33 = vadd.f32 %v4090_v28, %v4029_v63  ;;  %v5739_v40 = vld [vmem:[%s13408_s7 + $0x5a8] sm:$0xff]  ;;  %v5740_v28 = vld [vmem:[%s13408_s7 + $0x5b0] sm:$0xff]  ;;  %vm14497_vm13 = vmmov %vm14493_vm7 }
 0x921   :  { %v3845_v3 = vsel %vm14462_vm14, %v3836_v58, %v3842_v52  ;;  %v3854_v46 = vsel %vm14490_vm15, %v3842_v52, %v11702_v4  ;;  %v4162_v48 = vmul.f32 %v5728_v9, %v4135_v22  ;;  %v4163_v16 = vmul.f32 %v5729_v31, %v4144_v15  ;;  %v14492_v58 = vld [vmem:[#allocation122_spill] sm:$0xff]  ;;  %v14496_v1 = vld [vmem:[#allocation125_spill] sm:$0xff]  ;;  %vm14498_vm8 = vmmov %vm14493_vm7 }
 0x922   :  { %4699 = vrot.lane.b32.xlu0 %v10738_v29, %s14283_s15  ;;  %v3876_v39 = vmul.f32 %v5686_v34, %v3854_v46  ;;  %v3879_v43 = vmul.f32 %v5689_v42, %v3845_v3  ;;  %4788 = vrot.lane.b32.xlu1 %v14455_v25, %s6119_s25  ;;  %v4211_v4 = vsel %vm14493_vm7, %v14492_v58, %v14491_v11  ;;  %vm14499_vm14 = vcmp.lt.s32.totalorder %v6243_v7, 2  ;;  %v5750_v56 = vld [vmem:[%s13408_s7 + $0x600] sm:$0xff]  ;;  %v14502_v63 = vld [vmem:[#allocation126_spill] sm:$0xff] }
 0x923   :  { %v4214_v60 = vsel %vm14495_vm9, %v14494_v50, %v14492_v58  ;;  %v4208_v41 = vsel %vm14497_vm13, %v14491_v11, %v14496_v1  ;;  %v4217_v35 = vsel %vm14498_vm8, %v14496_v1, %v14494_v50  ;;  %v4172_v2 = vadd.f32 %v4160_v44, %v4099_v54  ;;  %vm14500_vm15 = vmmov %vm14499_vm14  ;;  %v5698_v44 = vld [vmem:[%s13408_s7 + $0x400] sm:$0xff]  ;;  %v5763_v1 = vld [vmem:[%s13408_s7 + $0x668] sm:$0xff] }
 0x924   :  { %v3909_v21 = vpop.permute.xlu0 %3908  ;;  %v3888_v13 = vadd.f32 %v3876_v39, %v3815_v32  ;;  %v3891_v5 = vadd.f32 %v3879_v43, %v3818_v55  ;;  %v3903_v20 = vpop.permute.xlu1 %3902  ;;  %v4173_v49 = vadd.f32 %v4161_v38, %v4100_v59  ;;  %v5751_v32 = vld [vmem:[%s13408_s7 + $0x608] sm:$0xff]  ;;  %v14501_v55 = vld [vmem:[#allocation86_spill] sm:$0xff]  ;;  %v14503_v59 = vld [vmem:[#allocation85_spill] sm:$0xff]  ;;  %v4233_v31 = vmul.f32 %v5738_v36, %v4214_v60 }
 0x925   :  { %v3921_v53 = vsel %vm14499_vm14, %v3903_v20, %v3909_v21  ;;  %v3924_v37 = vsel %vm14500_vm15, %v11779_v51, %v3903_v20  ;;  %v4284_v54 = vsel %vm243_vm5, %v14502_v63, %v14501_v55  ;;  %v4287_v34 = vsel %vm243_vm5, %v14503_v59, %v14502_v63  ;;  %v5701_v38 = vld [vmem:[%s13408_s7 + $0x418] sm:$0xff]  ;;  %vm14504_vm7 = vmmov %vm14499_vm14 }
 0x926   :  { %4711 = vrot.lane.b32.xlu0 %v10754_v6, %s14283_s15  ;;  %v3950_v42 = vmul.f32 %v5699_v24, %v3924_v37  ;;  %v3951_v9 = vmul.f32 %v5700_v17, %v3921_v53  ;;  %4705 = vrot.lane.b32.xlu1 %v10751_v30, %s14283_s15  ;;  %v4234_v57 = vmul.f32 %v5739_v40, %v4211_v4  ;;  %vm14505_vm9 = vmmov %vm14504_vm7  ;;  %v5711_v40 = vld [vmem:[%s13408_s7 + $0x468] sm:$0xff]  ;;  %vm14514_vm13 = vcmp.lt.s32.totalorder %v6243_v7, 111 }
 0x927   :  { %v4235_v22 = vmul.f32 %v5740_v28, %v4208_v41  ;;  %v4236_v15 = vmul.f32 %v5741_v61, %v4217_v35  ;;  %v4174_v3 = vadd.f32 %v4162_v48, %v4101_v47  ;;  %v4175_v46 = vadd.f32 %v4163_v16, %v4102_v33  ;;  %v5752_v47 = vld [vmem:[%s13408_s7 + $0x610] sm:$0xff]  ;;  %v5762_v61 = vld [vmem:[%s13408_s7 + $0x660] sm:$0xff]  ;;  %v14508_v41 = vld [vmem:[#allocation90_spill] sm:$0xff] }
 0x928   :  { %v11867_v52 = vpop.permute.xlu0 %3969  ;;  %v3962_v39 = vadd.f32 %v3950_v42, %v3889_v12  ;;  %v3963_v43 = vadd.f32 %v3951_v9, %v3890_v18  ;;  %v3915_v11 = vpop.permute.xlu1 %3914  ;;  %v4306_v58 = vmul.f32 %v5750_v56, %v4287_v34  ;;  %v4307_v36 = vmul.f32 %v5751_v32, %v4284_v54  ;;  %v5753_v12 = vld [vmem:[%s13408_s7 + $0x618] sm:$0xff]  ;;  %v14507_v18 = vld [vmem:[#allocation129_spill] sm:$0xff]  ;;  %vm14516_vm8 = vmmov %vm14514_vm13 }
 0x929   :  { %v3918_v4 = vsel %vm14504_vm7, %v3909_v21, %v3915_v11  ;;  %v3927_v50 = vsel %vm14505_vm9, %v3915_v11, %v11779_v51  ;;  %v4281_v33 = vsel %vm243_vm5, %v14501_v55, %v14507_v18  ;;  %v4290_v51 = vsel %vm243_vm5, %v14507_v18, %v14503_v59  ;;  %v5712_v28 = vld [vmem:[%s13408_s7 + $0x470] sm:$0xff]  ;;  %v14509_v35 = vld [vmem:[#allocation130_spill] sm:$0xff]  ;;  %vm14518_vm14 = vmmov %vm14516_vm8 }
 0x92a   :  { %4841 = vrot.lane.b32.xlu0 %v14469_v10, %s14506_s20  ;;  %v3949_v48 = vmul.f32 %v5698_v44, %v3927_v50  ;;  %v3952_v10 = vmul.f32 %v5701_v38, %v3918_v4  ;;  %4717 = vrot.lane.b32.xlu1 %v10766_v14, %s14283_s15  ;;  %v4245_v16 = vadd.f32 %v4233_v31, %v4172_v2  ;;  %v14510_v2 = vld [vmem:[#allocation89_spill] sm:$0xff]  ;;  %v5713_v44 = vld [vmem:[%s13408_s7 + $0x478] sm:$0xff]  ;;  %vm14519_vm15 = vmmov %vm14516_vm8  ;;  %vm14526_vm7 = vcmp.lt.s32.totalorder %v6243_v7, 110 }
 0x92b   :  { %v4246_v60 = vadd.f32 %v4234_v57, %v4173_v49  ;;  %v4247_v21 = vadd.f32 %v4235_v22, %v4174_v3  ;;  %v4248_v24 = vadd.f32 %v4236_v15, %v4175_v46  ;;  %v4357_v20 = vsel %vm273_vm6, %v14509_v35, %v14508_v41  ;;  %v5764_v31 = vld [vmem:[%s13408_s7 + $0x670] sm:$0xff]  ;;  %v14511_v57 = vld [vmem:[#allocation132_spill] sm:$0xff]  ;;  %v5765_v38 = vld [vmem:[%s13408_s7 + $0x678] sm:$0xff] }
 0x92c   :  { %v3982_v17 = vpop.permute.xlu0 %3981  ;;  %v4360_v49 = vsel %vm273_vm6, %v14510_v2, %v14509_v35  ;;  %v3961_v53 = vadd.f32 %v3949_v48, %v3888_v13  ;;  %v3964_v37 = vadd.f32 %v3952_v10, %v3891_v5  ;;  %v3976_v56 = vpop.permute.xlu1 %3975  ;;  %v4308_v32 = vmul.f32 %v5752_v47, %v4281_v33  ;;  %v5774_v3 = vld [vmem:[%s13408_s7 + $0x6c0] sm:$0xff]  ;;  %v5775_v46 = vld [vmem:[%s13408_s7 + $0x6c8] sm:$0xff]  ;;  %v14512_v11 = vld [vmem:[#allocation94_spill] sm:$0xff] }
 0x92d   :  { %v4309_v55 = vmul.f32 %v5753_v12, %v4290_v51  ;;  %v3994_v63 = vsel %vm179_vm3, %v3976_v56, %v3982_v17  ;;  %v3997_v54 = vsel %vm179_vm3, %v11867_v52, %v3976_v56  ;;  %v4318_v59 = vadd.f32 %v4306_v58, %v4245_v16  ;;  %v14513_v58 = vld [vmem:[#allocation134_spill] sm:$0xff]  ;;  %v14515_v4 = vld [vmem:[#allocation93_spill] sm:$0xff]  ;;  %v5722_v35 = vld [vmem:[%s13408_s7 + $0x520] sm:$0xff] }
 0x92e   :  { %4847 = vrot.lane.b32.xlu0 %v14443_v62, %s14506_s20  ;;  %v4319_v34 = vadd.f32 %v4307_v36, %v4246_v60  ;;  %v4023_v42 = vmul.f32 %v5711_v40, %v3997_v54  ;;  %v4024_v9 = vmul.f32 %v5712_v28, %v3994_v63  ;;  %4843 = vrot.lane.b32.xlu1 %v10246_v45, %s14506_s20  ;;  %v5710_v45 = vld [vmem:[%s13408_s7 + $0x460] sm:$0xff]  ;;  %v5776_v16 = vld [vmem:[%s13408_s7 + $0x6d0] sm:$0xff]  ;;  %vm14528_vm9 = vmmov %vm14526_vm7 }
 0x92f   :  { %v4379_v13 = vmul.f32 %v5762_v61, %v4360_v49  ;;  %v4380_v5 = vmul.f32 %v5763_v1, %v4357_v20  ;;  %v4354_v22 = vsel %vm273_vm6, %v14508_v41, %v14511_v57  ;;  %v4363_v62 = vsel %vm273_vm6, %v14511_v57, %v14510_v2  ;;  %v5577_v1 = vld [vmem:[%s13408_s7 + $0x4b8] sm:$0xff]  ;;  %v5723_v20 = vld [vmem:[%s13408_s7 + $0x528] sm:$0xff] }
 0x930   :  { %v11938_v15 = vpop.permute.xlu0 %4042  ;;  %v4430_v36 = vsel %vm14514_vm13, %v14513_v58, %v14512_v11  ;;  %v4433_v50 = vsel %vm14516_vm8, %v14515_v4, %v14513_v58  ;;  %v4035_v47 = vadd.f32 %v4023_v42, %v3962_v39  ;;  %v11963_v12 = vadd.f32 %v4024_v9, %v3963_v43  ;;  %v3988_v18 = vpop.permute.xlu1 %3987  ;;  %v5777_v39 = vld [vmem:[%s13408_s7 + $0x6d8] sm:$0xff]  ;;  %v14517_v43 = vld [vmem:[#allocation137_spill] sm:$0xff]  ;;  %vm14535_vm8 = vmmov %vm14526_vm7 }
 0x931   :  { %v4320_v33 = vadd.f32 %v4308_v32, %v4247_v21  ;;  %v4321_v51 = vadd.f32 %v4309_v55, %v4248_v24  ;;  %v3991_v48 = vsel %vm179_vm3, %v3982_v17, %v3988_v18  ;;  %v4000_v10 = vsel %vm179_vm3, %v3988_v18, %v11867_v52 }
 0x932   :  { %4853 = vrot.lane.b32.xlu0 %v14447_v19, %s14506_s20  ;;  %v4427_v60 = vsel %vm14518_vm14, %v14512_v11, %v14517_v43  ;;  %v4436_v52 = vsel %vm14519_vm15, %v14517_v43, %v14515_v4  ;;  %v5576_v19 = vld [vmem:[%s13408_s7 + $0x4b0] sm:$0xff]  ;;  %v4022_v21 = vmul.f32 %v5710_v45, %v4000_v10  ;;  %v4025_v24 = vmul.f32 %v5713_v44, %v3991_v48  ;;  %v14520_v45 = vld [vmem:[#allocation87_spill] sm:$0xff]  ;;  %v14521_v44 = vld [vmem:[#allocation160_spill] sm:$0xff] }
 0x933   :  { %4849 = vrot.lane.b32.xlu1 %v10550_v27, %s14506_s20  ;;  %v4381_v17 = vmul.f32 %v5764_v31, %v4354_v22  ;;  %v4382_v40 = vmul.f32 %v5765_v38, %v4363_v62  ;;  %v4452_v28 = vmul.f32 %v5774_v3, %v4433_v50  ;;  %v4453_v61 = vmul.f32 %v5775_v46, %v4430_v36  ;;  %v5725_v22 = vld [vmem:[%s13408_s7 + $0x538] sm:$0xff]  ;;  %v3205_v62 = vld [vmem:[%s13408_s7 + $0x30] sm:$0xff]  ;;  %v14523_v10 = vld [vmem:[#allocation52_spill] sm:$0xff] }
 0x934   :  { %v4055_v41 = vpop.permute.xlu0 %4054  ;;  %v4391_v2 = vadd.f32 %v4379_v13, %v4318_v59  ;;  %v4392_v49 = vadd.f32 %v4380_v5, %v4319_v34  ;;  %v4034_v27 = vadd.f32 %v4022_v21, %v3961_v53  ;;  %v4037_v56 = vadd.f32 %v4025_v24, %v3964_v37  ;;  %v4049_v32 = vpop.permute.xlu1 %4048  ;;  %v14522_v3 = vld [vmem:[#allocation53_spill] sm:$0xff]  ;;  %v3206_v48 = vld [vmem:[%s13408_s7 + $0x38] sm:$0xff]  ;;  %vm14536_vm14 = vmmov %vm14526_vm7 }
 0x935   :  { %v4454_v55 = vmul.f32 %v5776_v16, %v4427_v60  ;;  %v4455_v63 = vmul.f32 %v5777_v39, %v4436_v52  ;;  %v4067_v54 = vsel %vm213_vm4, %v4049_v32, %v4055_v41  ;;  %v4070_v42 = vsel %vm213_vm4, %v11938_v15, %v4049_v32  ;;  %v5787_v60 = vld [vmem:[%s13408_s7 + $0x728] sm:$0xff]  ;;  %v14524_v52 = vld [vmem:[#allocation99_spill] sm:$0xff]  ;;  %v14527_v24 = vld [vmem:[#allocation97_spill] sm:$0xff] }
 0x936   :  { %4859 = vrot.lane.b32.xlu0 %v14452_v23, %s14506_s20  ;;  %v12008_v9 = vmul.f32 %v5576_v19, %v14453_v0  ;;  %v12011_v59 = vmul.f32 %v5577_v1, %v14455_v25  ;;  %v4095_v53 = vmul.f32 %v5722_v35, %v4070_v42  ;;  %v4096_v37 = vmul.f32 %v5723_v20, %v4067_v54  ;;  %v5724_v23 = vld [vmem:[%s13408_s7 + $0x530] sm:$0xff]  ;;  %v14525_v19 = vld [vmem:[#allocation138_spill] sm:$0xff]  ;;  %v5735_v1 = vld [vmem:[%s13408_s7 + $0x588] sm:$0xff] }
 0x937   :  { %4855 = vrot.lane.b32.xlu1 %v14453_v0, %s14506_s20  ;;  %v4393_v34 = vadd.f32 %v4381_v17, %v4320_v33  ;;  %v4394_v13 = vadd.f32 %v4382_v40, %v4321_v51  ;;  %v12015_v5 = vadd.f32 %v4452_v28, %v4391_v2  ;;  %v12017_v31 = vadd.f32 %v4453_v61, %v4392_v49  ;;  %v3204_v0 = vld [vmem:[%s13408_s7 + $0x28] sm:$0xff]  ;;  %v5786_v51 = vld [vmem:[%s13408_s7 + $0x720] sm:$0xff]  ;;  %v5588_v35 = vld [vmem:[%s13408_s7 + $0x90] sm:$0xff] }
 0x938   :  { %v12019_v57 = vpop.permute.xlu0 %4115  ;;  %v3191_v38 = vsel %vm635_vm10, %v14521_v44, %v14520_v45  ;;  %v3194_v46 = vsel %vm635_vm10, %v14522_v3, %v14521_v44  ;;  %v4107_v11 = vadd.f32 %v4095_v53, %v4034_v27  ;;  %v4108_v58 = vadd.f32 %v4096_v37, %v4035_v47  ;;  %v4061_v36 = vpop.permute.xlu1 %4060  ;;  %v3203_v47 = vld [vmem:[%s13408_s7 + $0x20] sm:$0xff]  ;;  %v14531_v27 = vld [vmem:[#allocation88_spill] sm:$0xff] }
 0x939   :  { %v12041_v4 = vadd.f32 %v4454_v55, %v4393_v34  ;;  %v12043_v50 = vadd.f32 %v4455_v63, %v4394_v13  ;;  %v4064_v18 = vsel %vm213_vm4, %v4055_v41, %v4061_v36  ;;  %v4073_v33 = vsel %vm213_vm4, %v4061_v36, %v11938_v15  ;;  %v5587_v41 = vld [vmem:[%s13408_s7 + $0x88] sm:$0xff]  ;;  %v14529_v20 = vld [vmem:[#allocation91_spill] sm:$0xff] }
 0x93a   :  { %4772 = vrot.lane.b32.xlu0 %v10738_v29, %s6119_s25  ;;  %v3188_v15 = vsel %vm635_vm10, %v14520_v45, %v14523_v10  ;;  %v3197_v16 = vsel %vm635_vm10, %v14523_v10, %v14522_v3  ;;  %v4097_v39 = vmul.f32 %v5724_v23, %v4064_v18  ;;  %v4098_v43 = vmul.f32 %v5725_v22, %v4073_v33  ;;  %v14530_v2 = vld [vmem:[#allocation163_spill] sm:$0xff]  ;;  %v5736_v3 = vld [vmem:[%s13408_s7 + $0x590] sm:$0xff] }
 0x93b   :  { %4861 = vrot.lane.b32.xlu1 %v14455_v25, %s14506_s20  ;;  %v4503_v21 = vsel %vm14526_vm7, %v14525_v19, %v14524_v52  ;;  %v4506_v17 = vsel %vm14528_vm9, %v14527_v24, %v14525_v19  ;;  %v3216_v40 = vmul.f32 %v3204_v0, %v3194_v46  ;;  %v3217_v28 = vmul.f32 %v3205_v62, %v3191_v38  ;;  %v5734_v25 = vld [vmem:[%s13408_s7 + $0x580] sm:$0xff]  ;;  %v5737_v46 = vld [vmem:[%s13408_s7 + $0x598] sm:$0xff] }
 0x93c   :  { %v4128_v61 = vpop.permute.xlu0 %4127  ;;  %v3263_v49 = vsel %vm708_vm11, %v14530_v2, %v14529_v20  ;;  %v3266_v32 = vsel %vm708_vm11, %v14531_v27, %v14530_v2  ;;  %v4109_v55 = vadd.f32 %v4097_v39, %v11963_v12  ;;  %v4110_v63 = vadd.f32 %v4098_v43, %v4037_v56  ;;  %v4122_v54 = vpop.permute.xlu1 %4121  ;;  %v14534_v56 = vld [vmem:[#allocation139_spill] sm:$0xff]  ;;  %v14545_v2 = vld [vmem:[#allocation92_spill] sm:$0xff] }
 0x93d   :  { %v3215_v42 = vmul.f32 %v3203_v47, %v3197_v16  ;;  %v3218_v53 = vmul.f32 %v3206_v48, %v3188_v15  ;;  %vm14532_vm10 = vcmp.lt.s32.totalorder %v6243_v7, 126  ;;  %v12110_v13 = vmul.f32 %v5786_v51, %v4506_v17 }
 0x93e   :  { %v4140_v37 = vsel %vm14532_vm10, %v4122_v54, %v4128_v61  ;;  %vm14533_vm13 = vmmov %vm14532_vm10  ;;  %4784 = vrot.lane.b32.xlu0 %v10754_v6, %s6119_s25  ;;  %v12112_v23 = vmul.f32 %v5787_v60, %v4503_v21  ;;  %v12120_v0 = vsel %vm14535_vm8, %v14524_v52, %v14534_v56  ;;  %v12126_v62 = vsel %vm14536_vm14, %v14534_v56, %v14527_v24  ;;  %v14542_v52 = vld [vmem:[#allocation124_spill] sm:$0xff]  ;;  %v5589_v21 = vld [vmem:[%s13408_s7 + $0x98] sm:$0xff] }
 0x93f   :  { %v4143_v34 = vsel %vm14533_vm13, %v12019_v57, %v4122_v54  ;;  %v4169_v12 = vmul.f32 %v5735_v1, %v4140_v37  ;;  %4778 = vrot.lane.b32.xlu1 %v10751_v30, %s6119_s25  ;;  %v3289_v45 = vmul.f32 %v5587_v41, %v3266_v32  ;;  %v3290_v44 = vmul.f32 %v5588_v35, %v3263_v49  ;;  %vm14537_vm15 = vmmov %vm14532_vm10  ;;  %v5600_v1 = vld [vmem:[%s13408_s7 + $0xf0] sm:$0xff]  ;;  %v14543_v41 = vld [vmem:[#allocation95_spill] sm:$0xff] }
 0x940   :  { %v4168_v22 = vmul.f32 %v5734_v25, %v4143_v34  ;;  %v12128_v38 = vpop.permute.xlu0 %4188  ;;  %v3228_v36 = vadd.f32 %v3216_v40, %v11288_v26  ;;  %v3229_v18 = vadd.f32 %v3217_v28, %v12008_v9  ;;  %v4134_v47 = vpop.permute.xlu1 %4133  ;;  %v3227_v48 = vadd.f32 %v3215_v42, %v11291_v8  ;;  %vm14538_vm7 = vmmov %vm14532_vm10  ;;  %v5707_v26 = vld [vmem:[%s13408_s7 + $0x448] sm:$0xff]  ;;  %v14539_v9 = vld [vmem:[#allocation162_spill] sm:$0xff] }
 0x941   :  { %v4181_v51 = vadd.f32 %v4169_v12, %v4108_v58  ;;  %v3230_v10 = vadd.f32 %v3218_v53, %v12011_v59  ;;  %v4137_v15 = vsel %vm14537_vm15, %v4128_v61, %v4134_v47  ;;  %v4146_v16 = vsel %vm14538_vm7, %v4134_v47, %v12019_v57  ;;  %v5586_v59 = vld [vmem:[%s13408_s7 + $0x80] sm:$0xff]  ;;  %v14541_v58 = vld [vmem:[#allocation5_spill] sm:$0xff]  ;;  %v5747_v28 = vld [vmem:[%s13408_s7 + $0x5e8] sm:$0xff] }
 0x942   :  { %v4180_v33 = vadd.f32 %v4168_v22, %v4107_v11  ;;  %4845 = vrot.lane.b32.xlu0 %v10738_v29, %s14506_s20  ;;  %v14540_v11 = vld [vmem:[#allocation123_spill] sm:$0xff]  ;;  %v3269_v57 = vsel %vm708_vm11, %v14541_v58, %v14531_v27  ;;  %v4170_v39 = vmul.f32 %v5736_v3, %v4137_v15  ;;  %v4171_v29 = vmul.f32 %v5737_v46, %v4146_v16  ;;  %v5708_v61 = vld [vmem:[%s13408_s7 + $0x450] sm:$0xff]  ;;  %v5599_v25 = vld [vmem:[%s13408_s7 + $0xe8] sm:$0xff] }
 0x943   :  { %v3996_v8 = vsel %vm179_vm3, %v14540_v11, %v14539_v9  ;;  %4790 = vrot.lane.b32.xlu1 %v10766_v14, %s6119_s25  ;;  %v12163_v43 = vadd.f32 %v3289_v45, %v3228_v36  ;;  %v12165_v60 = vadd.f32 %v3290_v44, %v3229_v18  ;;  %v3993_v19 = vsel %vm179_vm3, %v14539_v9, %v14542_v52  ;;  %v5746_v40 = vld [vmem:[%s13408_s7 + $0x5e0] sm:$0xff]  ;;  %v14544_v35 = vld [vmem:[#allocation38_spill] sm:$0xff]  ;;  %v5748_v47 = vld [vmem:[%s13408_s7 + $0x5f0] sm:$0xff] }
 0x944   :  { %v3260_v24 = vsel %vm708_vm11, %v14529_v20, %v14541_v58  ;;  %v4201_v17 = vpop.permute.xlu0 %4200  ;;  %v3336_v20 = vsel %vm782_vm12, %v14544_v35, %v14543_v41  ;;  %v3339_v49 = vsel %vm782_vm12, %v14545_v2, %v14544_v35  ;;  %v4182_v27 = vadd.f32 %v4170_v39, %v4109_v55  ;;  %v4195_v54 = vpop.permute.xlu1 %4194  ;;  %v5598_v55 = vld [vmem:[%s13408_s7 + $0xe0] sm:$0xff]  ;;  %v5601_v15 = vld [vmem:[%s13408_s7 + $0xf8] sm:$0xff]  ;;  %v5611_v16 = vld [vmem:[%s13408_s7 + $0x148] sm:$0xff] }
 0x945   :  { %v4183_v32 = vadd.f32 %v4171_v29, %v4110_v63  ;;  %v12201_v42 = vmul.f32 %v5707_v26, %v3996_v8  ;;  %v3288_v53 = vmul.f32 %v5586_v59, %v3269_v57  ;;  %vm14546_vm11 = vcmp.lt.s32.totalorder %v6243_v7, 114  ;;  %v14548_v63 = vld [vmem:[#allocation40_spill] sm:$0xff]  ;;  %v5067_v44 = vld [vmem:[%s13409_s9] sm:$0xf]  ;;  %v5612_v26 = vld [vmem:[%s13408_s7 + $0x150] sm:$0xff] }
 0x946   :  { %v4213_v37 = vsel %vm14546_vm11, %v4195_v54, %v4201_v17  ;;  %vm14547_vm9 = vmmov %vm14546_vm11  ;;  %4857 = vrot.lane.b32.xlu0 %v10754_v6, %s14506_s20  ;;  %v3291_v22 = vmul.f32 %v5589_v21, %v3260_v24  ;;  %v3342_v12 = vsel %vm782_vm12, %v14548_v63, %v14545_v2  ;;  %v12222_v6 = vmul.f32 %v5708_v61, %v3993_v19  ;;  %v14549_v9 = vld [vmem:[#allocation44_spill] sm:$0xff]  ;;  %v14550_v8 = vld [vmem:[#allocation13_spill] sm:$0xff] }
 0x947   :  { %v4216_v34 = vsel %vm14547_vm9, %v12128_v38, %v4195_v54  ;;  %v4242_v45 = vmul.f32 %v5747_v28, %v4213_v37  ;;  %4851 = vrot.lane.b32.xlu1 %v10751_v30, %s14506_s20  ;;  %v3362_v3 = vmul.f32 %v5599_v25, %v3339_v49  ;;  %v3363_v46 = vmul.f32 %v5600_v1, %v3336_v20  ;;  %v5749_v30 = vld [vmem:[%s13408_s7 + $0x5f8] sm:$0xff]  ;;  %v14552_v58 = vld [vmem:[#allocation96_spill] sm:$0xff]  ;;  %vm14554_vm13 = vmmov %vm14547_vm9 }
 0x948   :  { %v4241_v56 = vmul.f32 %v5746_v40, %v4216_v34  ;;  %v3333_v36 = vsel %vm782_vm12, %v14543_v41, %v14548_v63  ;;  %v12228_v18 = vpop.permute.xlu0 %4261  ;;  %vm14551_vm12 = vcmp.lt.s32.totalorder %v6243_v7, 31  ;;  %v4207_v19 = vpop.permute.xlu1 %4206  ;;  %v3300_v21 = vadd.f32 %v3288_v53, %v3227_v48  ;;  %vm14555_vm8 = vmmov %vm14547_vm9  ;;  %v5610_v25 = vld [vmem:[%s13408_s7 + $0x140] sm:$0xff]  ;;  %v14556_v1 = vld [vmem:[#allocation42_spill] sm:$0xff] }
 0x949   :  { %v3409_v59 = vsel %vm14551_vm12, %v14550_v8, %v14549_v9  ;;  %vm14553_vm10 = vmmov %vm14551_vm12  ;;  %v4254_v29 = vadd.f32 %v4242_v45, %v4181_v51  ;;  %v3361_v24 = vmul.f32 %v5598_v55, %v3342_v12  ;;  %v4210_v40 = vsel %vm14554_vm13, %v4201_v17, %v4207_v19  ;;  %v5758_v2 = vld [vmem:[%s13408_s7 + $0x640] sm:$0xff]  ;;  %v5623_v45 = vld [vmem:[%s13408_s7 + $0x1a8] sm:$0xff] }
 0x94a   :  { %v3412_v57 = vsel %vm14553_vm10, %v14552_v58, %v14550_v8  ;;  %v4253_v39 = vadd.f32 %v4241_v56, %v4180_v33  ;;  %v4219_v28 = vsel %vm14555_vm8, %v4207_v19, %v12128_v38  ;;  %5070 = vperm.xlu0 %5912, %v5067_v44   ;;  %v3303_v61 = vadd.f32 %v3291_v22, %v3230_v10  ;;  %vm14557_vm14 = vmmov %vm14553_vm10  ;;  %v5613_v38 = vld [vmem:[%s13408_s7 + $0x158] sm:$0xff]  ;;  %v5622_v8 = vld [vmem:[%s13408_s7 + $0x1a0] sm:$0xff] }
 0x94b   :  { %v3415_v33 = vsel %vm14557_vm14, %v14556_v1, %v14552_v58  ;;  %v4243_v51 = vmul.f32 %v5748_v47, %v4210_v40  ;;  %v4244_v48 = vmul.f32 %v5749_v30, %v4219_v28  ;;  %4863 = vrot.lane.b32.xlu1 %v10766_v14, %s14506_s20  ;;  %v3364_v17 = vmul.f32 %v5601_v15, %v3333_v36  ;;  %vm14558_vm15 = vmmov %vm14553_vm10  ;;  %v5759_v14 = vld [vmem:[%s13408_s7 + $0x648] sm:$0xff]  ;;  %v14560_v44 = vld [vmem:[#allocation98_spill] sm:$0xff] }
 0x94c   :  { %v3435_v41 = vmul.f32 %v5611_v16, %v3412_v57  ;;  %v3436_v35 = vmul.f32 %v5612_v26, %v3409_v59  ;;  %v3406_v10 = vsel %vm14558_vm15, %v14549_v9, %v14556_v1  ;;  %v4274_v20 = vpop.permute.xlu0 %4273  ;;  %v3374_v49 = vadd.f32 %v3362_v3, %v12163_v43  ;;  %v4268_v34 = vpop.permute.xlu1 %4267  ;;  %v14559_v43 = vld [vmem:[#allocation48_spill] sm:$0xff]  ;;  %v14562_v47 = vld [vmem:[#allocation101_spill] sm:$0xff]  ;;  %v5761_v26 = vld [vmem:[%s13408_s7 + $0x658] sm:$0xff] }
 0x94d   :  { %v3375_v54 = vadd.f32 %v3363_v46, %v12165_v60  ;;  %v4255_v53 = vadd.f32 %v4243_v51, %v4182_v27  ;;  %v4256_v37 = vadd.f32 %v4244_v48, %v4183_v32  ;;  %v3373_v22 = vadd.f32 %v3361_v24, %v3300_v21  ;;  %v5760_v16 = vld [vmem:[%s13408_s7 + $0x650] sm:$0xff]  ;;  %v5625_v59 = vld [vmem:[%s13408_s7 + $0x1b8] sm:$0xff]  ;;  %v5635_v51 = vld [vmem:[%s13408_s7 + $0x208] sm:$0xff] }
 0x94e   :  { %v3434_v55 = vmul.f32 %v5610_v25, %v3415_v33  ;;  %v4286_v63 = vsel %vm243_vm5, %v4268_v34, %v4274_v20  ;;  %v4289_v12 = vsel %vm243_vm5, %v12228_v18, %v4268_v34  ;;  %v3437_v56 = vmul.f32 %v5613_v38, %v3406_v10  ;;  %v5624_v9 = vld [vmem:[%s13408_s7 + $0x1b0] sm:$0xff]  ;;  %v14564_v58 = vld [vmem:[#allocation50_spill] sm:$0xff]  ;;  %v5634_v34 = vld [vmem:[%s13408_s7 + $0x200] sm:$0xff] }
 0x94f   :  { %vm14561_vm7 = vcmp.lt.s32.totalorder %v6243_v7, 30  ;;  %v4314_v27 = vmul.f32 %v5758_v2, %v4289_v12  ;;  %v4315_v32 = vmul.f32 %v5759_v14, %v4286_v63  ;;  %v3376_v3 = vadd.f32 %v3364_v17, %v3303_v61  ;;  %v14567_v48 = vld [vmem:[#allocation25_spill] sm:$0xff]  ;;  %v14568_v17 = vld [vmem:[#allocation104_spill] sm:$0xff] }
 0x950   :  { %v3485_v60 = vsel %vm14561_vm7, %v14560_v44, %v14559_v43  ;;  %v3447_v46 = vadd.f32 %v3435_v41, %v3374_v49  ;;  %v3448_v36 = vadd.f32 %v3436_v35, %v3375_v54  ;;  %vm14563_vm11 = vmmov %vm14561_vm7  ;;  %v4335_v15 = vpop.permute.xlu0 %4334  ;;  %v4280_v40 = vpop.permute.xlu1 %4279  ;;  %v3446_v28 = vadd.f32 %v3434_v55, %v3373_v22  ;;  %v5770_v49 = vld [vmem:[%s13408_s7 + $0x6a0] sm:$0xff]  ;;  %v5771_v54 = vld [vmem:[%s13408_s7 + $0x6a8] sm:$0xff] }
 0x951   :  { %v3482_v30 = vsel %vm14563_vm11, %v14559_v43, %v14562_v47  ;;  %vm14565_vm9 = vmmov %vm14561_vm7  ;;  %v4326_v21 = vadd.f32 %v4314_v27, %v4253_v39  ;;  %v4327_v24 = vadd.f32 %v4315_v32, %v4254_v29  ;;  %v3508_v61 = vmul.f32 %v5623_v45, %v3485_v60  ;;  %v5637_v22 = vld [vmem:[%s13408_s7 + $0x218] sm:$0xff]  ;;  %v14572_v55 = vld [vmem:[#allocation56_spill] sm:$0xff] }
 0x952   :  { %v3479_v57 = vsel %vm14565_vm9, %v14562_v47, %v14564_v58  ;;  %vm14566_vm12 = vmmov %vm14561_vm7  ;;  %v4283_v25 = vsel %vm243_vm5, %v4274_v20, %v4280_v40  ;;  %v4292_v1 = vsel %vm243_vm5, %v4280_v40, %v12228_v18  ;;  %v3449_v33 = vadd.f32 %v3437_v56, %v3376_v3  ;;  %v5636_v20 = vld [vmem:[%s13408_s7 + $0x210] sm:$0xff]  ;;  %v14570_v18 = vld [vmem:[#allocation107_spill] sm:$0xff] }
 0x953   :  { %v3488_v19 = vsel %vm14566_vm12, %v14564_v58, %v14560_v44  ;;  %vm14569_vm10 = vcmp.lt.s32.totalorder %v6243_v7, 18  ;;  %v4316_v29 = vmul.f32 %v5760_v16, %v4283_v25  ;;  %v4317_v41 = vmul.f32 %v5761_v26, %v4292_v1  ;;  %v5647_v47 = vld [vmem:[%s13408_s7 + $0x268] sm:$0xff]  ;;  %v14577_v25 = vld [vmem:[#allocation111_spill] sm:$0xff] }
 0x954   :  { %v3558_v39 = vsel %vm14569_vm10, %v14568_v17, %v14567_v48  ;;  %v3509_v35 = vmul.f32 %v5624_v9, %v3482_v30  ;;  %v3507_v38 = vmul.f32 %v5622_v8, %v3488_v19  ;;  %v3510_v10 = vmul.f32 %v5625_v59, %v3479_v57  ;;  %vm14571_vm13 = vmmov %vm14569_vm10  ;;  %v4347_v14 = vpop.permute.xlu0 %4346  ;;  %v4341_v43 = vpop.permute.xlu1 %4340  ;;  %v14575_v30 = vld [vmem:[#allocation29_spill] sm:$0xff]  ;;  %v14576_v16 = vld [vmem:[#allocation108_spill] sm:$0xff] }
 0x955   :  { %v3555_v2 = vsel %vm14571_vm13, %v14567_v48, %v14570_v18  ;;  %vm14573_vm8 = vmmov %vm14569_vm10  ;;  %v4328_v56 = vadd.f32 %v4316_v29, %v4255_v53  ;;  %v4329_v45 = vadd.f32 %v4317_v41, %v4256_v37  ;;  %v3520_v44 = vadd.f32 %v3508_v61, %v3447_v46  ;;  %v5772_v57 = vld [vmem:[%s13408_s7 + $0x6b0] sm:$0xff]  ;;  %v5773_v19 = vld [vmem:[%s13408_s7 + $0x6b8] sm:$0xff] }
 0x956   :  { %v3552_v63 = vsel %vm14573_vm8, %v14570_v18, %v14572_v55  ;;  %vm14574_vm14 = vmmov %vm14573_vm8  ;;  %v3581_v60 = vmul.f32 %v5635_v51, %v3558_v39  ;;  %v4359_v27 = vsel %vm273_vm6, %v4341_v43, %v4347_v14  ;;  %v4362_v32 = vsel %vm273_vm6, %v4335_v15, %v4341_v43  ;;  %v5648_v61 = vld [vmem:[%s13408_s7 + $0x270] sm:$0xff]  ;;  %v5646_v41 = vld [vmem:[%s13408_s7 + $0x260] sm:$0xff] }
 0x957   :  { %v3561_v12 = vsel %vm14574_vm14, %v14572_v55, %v14568_v17  ;;  %v3582_v3 = vmul.f32 %v5636_v20, %v3555_v2  ;;  %v3631_v53 = vsel %vm90_vm0, %v14576_v16, %v14575_v30  ;;  %v4387_v37 = vmul.f32 %v5770_v49, %v4362_v32  ;;  %v5783_v49 = vld [vmem:[%s13408_s7 + $0x708] sm:$0xff]  ;;  %v14579_v55 = vld [vmem:[#allocation115_spill] sm:$0xff] }
 0x958   :  { %v4388_v26 = vmul.f32 %v5771_v54, %v4359_v27  ;;  %v3521_v46 = vadd.f32 %v3509_v35, %v3448_v36  ;;  %v3519_v9 = vadd.f32 %v3507_v38, %v3446_v28  ;;  %v3580_v8 = vmul.f32 %v5634_v34, %v3561_v12  ;;  %v4408_v58 = vpop.permute.xlu0 %4407  ;;  %v4353_v51 = vpop.permute.xlu1 %4352  ;;  %v14578_v35 = vld [vmem:[#allocation31_spill] sm:$0xff]  ;;  %v5649_v54 = vld [vmem:[%s13408_s7 + $0x278] sm:$0xff]  ;;  %v5659_v34 = vld [vmem:[%s13408_s7 + $0x2c8] sm:$0xff] }
 0x959   :  { %v3583_v59 = vmul.f32 %v5637_v22, %v3552_v63  ;;  %v3522_v40 = vadd.f32 %v3510_v10, %v3449_v33  ;;  %v3628_v36 = vsel %vm90_vm0, %v14575_v30, %v14577_v25  ;;  %v4399_v28 = vadd.f32 %v4387_v37, %v4326_v21  ;;  %v5660_v22 = vld [vmem:[%s13408_s7 + $0x2d0] sm:$0xff]  ;;  %v14581_v43 = vld [vmem:[#allocation112_spill] sm:$0xff]  ;;  %v5661_v37 = vld [vmem:[%s13408_s7 + $0x2d8] sm:$0xff] }
 0x95a   :  { %v4400_v1 = vadd.f32 %v4388_v26, %v4327_v24  ;;  %v3593_v48 = vadd.f32 %v3581_v60, %v3520_v44  ;;  %v3654_v17 = vmul.f32 %v5647_v47, %v3631_v53  ;;  %v4356_v39 = vsel %vm273_vm6, %v4347_v14, %v4353_v51  ;;  %v5782_v14 = vld [vmem:[%s13408_s7 + $0x700] sm:$0xff]  ;;  %v14580_v63 = vld [vmem:[#allocation57_spill] sm:$0xff] }
 0x95b   :  { %v4365_v33 = vsel %vm273_vm6, %v4353_v51, %v4335_v15  ;;  %v3594_v29 = vadd.f32 %v3582_v3, %v3521_v46  ;;  %v3634_v21 = vsel %vm90_vm0, %v14578_v35, %v14576_v16  ;;  %v4389_v24 = vmul.f32 %v5772_v57, %v4356_v39  ;;  %v5658_v53 = vld [vmem:[%s13408_s7 + $0x2c0] sm:$0xff]  ;;  %v5784_v51 = vld [vmem:[%s13408_s7 + $0x710] sm:$0xff] }
 0x95c   :  { %v4390_v38 = vmul.f32 %v5773_v19, %v4365_v33  ;;  %v3592_v10 = vadd.f32 %v3580_v8, %v3519_v9  ;;  %v3595_v20 = vadd.f32 %v3583_v59, %v3522_v40  ;;  %v3655_v18 = vmul.f32 %v5648_v61, %v3628_v36  ;;  %v4420_v2 = vpop.permute.xlu0 %4419  ;;  %v4414_v32 = vpop.permute.xlu1 %4413  ;;  %v14584_v26 = vld [vmem:[#allocation7_spill] sm:$0xff]  ;;  %v5671_v19 = vld [vmem:[%s13408_s7 + $0x328] sm:$0xff]  ;;  %v5672_v39 = vld [vmem:[%s13408_s7 + $0x330] sm:$0xff] }
 0x95d   :  { %v3625_v15 = vsel %vm90_vm0, %v14577_v25, %v14578_v35  ;;  %v3701_v12 = vsel %vm119_vm1, %v14580_v63, %v14579_v55  ;;  %v3704_v44 = vsel %vm119_vm1, %v14581_v43, %v14580_v63  ;;  %v4401_v60 = vadd.f32 %v4389_v24, %v4328_v56  ;;  %v14585_v40 = vld [vmem:[#allocation8_spill] sm:$0xff]  ;;  %v14587_v33 = vld [vmem:[#allocation119_spill] sm:$0xff] }
 0x95e   :  { %v4402_v27 = vadd.f32 %v4390_v38, %v4329_v45  ;;  %v3666_v3 = vadd.f32 %v3654_v17, %v3593_v48  ;;  %v3653_v47 = vmul.f32 %v5646_v41, %v3634_v21  ;;  %vm14582_vm0 = vcmp.lt.s32.totalorder %v6243_v7, 111  ;;  %v14586_v61 = vld [vmem:[#allocation116_spill] sm:$0xff]  ;;  %v5785_v48 = vld [vmem:[%s13408_s7 + $0x718] sm:$0xff] }
 0x95f   :  { %v4432_v30 = vsel %vm14582_vm0, %v4414_v32, %v4420_v2  ;;  %vm14583_vm15 = vmmov %vm14582_vm0  ;;  %v3698_v56 = vsel %vm119_vm1, %v14579_v55, %v14584_v26  ;;  %v3707_v45 = vsel %vm119_vm1, %v14584_v26, %v14581_v43  ;;  %v3656_v8 = vmul.f32 %v5649_v54, %v3625_v15 }
 0x960   :  { %v4435_v16 = vsel %vm14583_vm15, %v4408_v58, %v4414_v32  ;;  %v4461_v9 = vmul.f32 %v5783_v49, %v4432_v30  ;;  %v3727_v59 = vmul.f32 %v5659_v34, %v3704_v44  ;;  %v3728_v57 = vmul.f32 %v5660_v22, %v3701_v12  ;;  %v4481_v36 = vpop.permute.xlu0 %4480  ;;  %v4426_v24 = vpop.permute.xlu1 %4425  ;;  %vm14588_vm1 = vmmov %vm14582_vm0  ;;  %v14591_v44 = vld [vmem:[#allocation70_spill] sm:$0xff]  ;;  %v14592_v32 = vld [vmem:[#allocation120_spill] sm:$0xff] }
 0x961   :  { %v4460_v46 = vmul.f32 %v5782_v14, %v4435_v16  ;;  %v3777_v25 = vsel %vm149_vm2, %v14586_v61, %v14585_v40  ;;  %v3667_v17 = vadd.f32 %v3655_v18, %v3594_v29  ;;  %v3774_v41 = vsel %vm149_vm2, %v14585_v40, %v14587_v33  ;;  %vm14589_vm7 = vmmov %vm14582_vm0 }
 0x962   :  { %v4473_v21 = vadd.f32 %v4461_v9, %v4400_v1  ;;  %v3726_v38 = vmul.f32 %v5658_v53, %v3707_v45  ;;  %v3729_v15 = vmul.f32 %v5661_v37, %v3698_v56  ;;  %v4429_v14 = vsel %vm14588_vm1, %v4420_v2, %v4426_v24  ;;  %v5795_v1 = vld [vmem:[%s13408_s7 + $0x768] sm:$0xff] }
 0x963   :  { %v4472_v35 = vadd.f32 %v4460_v46, %v4399_v28  ;;  %v4438_v29 = vsel %vm14589_vm7, %v4426_v24, %v4408_v58  ;;  %v3665_v18 = vadd.f32 %v3653_v47, %v3592_v10  ;;  %v3800_v49 = vmul.f32 %v5671_v19, %v3777_v25  ;;  %v5794_v28 = vld [vmem:[%s13408_s7 + $0x760] sm:$0xff]  ;;  %v14590_v10 = vld [vmem:[#allocation10_spill] sm:$0xff]  ;;  %v5683_v2 = vld [vmem:[%s13408_s7 + $0x388] sm:$0xff] }
 0x964   :  { %v4462_v54 = vmul.f32 %v5784_v51, %v4429_v14  ;;  %v4463_v34 = vmul.f32 %v5785_v48, %v4438_v29  ;;  %v3668_v22 = vadd.f32 %v3656_v8, %v3595_v20  ;;  %v3739_v55 = vadd.f32 %v3727_v59, %v3666_v3  ;;  %v4493_v43 = vpop.permute.xlu0 %4492  ;;  %v5670_v58 = vld [vmem:[%s13408_s7 + $0x320] sm:$0xff]  ;;  %v4487_v16 = vpop.permute.xlu1 %4486  ;;  %v5684_v46 = vld [vmem:[%s13408_s7 + $0x390] sm:$0xff]  ;;  %v14596_v9 = vld [vmem:[#allocation156_spill] sm:$0xff] }
 0x965   :  { %v3740_v63 = vadd.f32 %v3728_v57, %v3667_v17  ;;  %v3801_v12 = vmul.f32 %v5672_v39, %v3774_v41  ;;  %v3780_v20 = vsel %vm149_vm2, %v14590_v10, %v14586_v61  ;;  %vm14593_vm11 = vcmp.lt.s32.totalorder %v6243_v7, 14  ;;  %v5796_v25 = vld [vmem:[%s13408_s7 + $0x770] sm:$0xff]  ;;  %v5797_v51 = vld [vmem:[%s13408_s7 + $0x778] sm:$0xff]  ;;  %v5682_v17 = vld [vmem:[%s13408_s7 + $0x380] sm:$0xff] }
 0x966   :  { %v3850_v3 = vsel %vm14593_vm11, %v14592_v32, %v14591_v44  ;;  %v4474_v47 = vadd.f32 %v4462_v54, %v4401_v60  ;;  %v4475_v30 = vadd.f32 %v4463_v34, %v4402_v27  ;;  %v3738_v53 = vadd.f32 %v3726_v38, %v3665_v18  ;;  %vm14597_vm10 = vmmov %vm14593_vm11  ;;  %v5673_v48 = vld [vmem:[%s13408_s7 + $0x338] sm:$0xff]  ;;  %v14598_v39 = vld [vmem:[#allocation33_spill] sm:$0xff] }
 0x967   :  { %v3741_v37 = vadd.f32 %v3729_v15, %v3668_v22  ;;  %vm14594_vm9 = vcmp.lt.s32.totalorder %v6243_v7, 110  ;;  %v3812_v45 = vadd.f32 %v3800_v49, %v3739_v55  ;;  %v3847_v60 = vsel %vm14597_vm10, %v14591_v44, %v14596_v9  ;;  %v5695_v41 = vld [vmem:[%s13408_s7 + $0x3e8] sm:$0xff]  ;;  %v14601_v38 = vld [vmem:[#allocation157_spill] sm:$0xff]  ;;  %v14603_v34 = vld [vmem:[#allocation158_spill] sm:$0xff] }
 0x968   :  { %v4505_v26 = vsel %vm14594_vm9, %v4487_v16, %v4493_v43  ;;  %vm14595_vm12 = vmmov %vm14594_vm9  ;;  %v3813_v59 = vadd.f32 %v3801_v12, %v3740_v63  ;;  %v3771_v57 = vsel %vm149_vm2, %v14587_v33, %v14590_v10  ;;  %v3799_v19 = vmul.f32 %v5670_v58, %v3780_v20  ;;  %v4554_v61 = vpop.permute.xlu0 %4553  ;;  %v14600_v24 = vld [vmem:[#allocation60_spill] sm:$0xff]  ;;  %v4499_v18 = vpop.permute.xlu1 %4498  ;;  %v5696_v54 = vld [vmem:[%s13408_s7 + $0x3f0] sm:$0xff] }
 0x969   :  { %v4508_v56 = vsel %vm14595_vm12, %v4481_v36, %v4487_v16  ;;  %v4534_v8 = vmul.f32 %v5795_v1, %v4505_v26  ;;  %v3873_v40 = vmul.f32 %v5683_v2, %v3850_v3  ;;  %vm14599_vm2 = vmmov %vm14597_vm10  ;;  %vm14602_vm13 = vcmp.lt.s32.totalorder %v6243_v7, 2  ;;  %v5694_v12 = vld [vmem:[%s13408_s7 + $0x3e0] sm:$0xff]  ;;  %v5807_v3 = vld [vmem:[%s13408_s7 + $0x7c8] sm:$0xff] }
 0x96a   :  { %v4533_v27 = vmul.f32 %v5794_v28, %v4508_v56  ;;  %v3853_v33 = vsel %vm14599_vm2, %v14598_v39, %v14592_v32  ;;  %v3923_v15 = vsel %vm14602_vm13, %v14601_v38, %v14600_v24  ;;  %v3874_v49 = vmul.f32 %v5684_v46, %v3847_v60  ;;  %vm14604_vm8 = vmmov %vm14602_vm13  ;;  %v14608_v28 = vld [vmem:[#allocation14_spill] sm:$0xff]  ;;  %v5806_v32 = vld [vmem:[%s13408_s7 + $0x7c0] sm:$0xff] }
 0x96b   :  { %v4546_v29 = vadd.f32 %v4534_v8, %v4473_v21  ;;  %v3920_v22 = vsel %vm14604_vm8, %v14600_v24, %v14603_v34  ;;  %vm14605_vm14 = vmmov %vm14594_vm9  ;;  %v3802_v58 = vmul.f32 %v5673_v48, %v3771_v57  ;;  %v3811_v10 = vadd.f32 %v3799_v19, %v3738_v53  ;;  %v5697_v26 = vld [vmem:[%s13408_s7 + $0x3f8] sm:$0xff] }
 0x96c   :  { %v4545_v14 = vadd.f32 %v4533_v27, %v4472_v35  ;;  %v4502_v55 = vsel %vm14605_vm14, %v4493_v43, %v4499_v18  ;;  %vm14606_vm0 = vmmov %vm14594_vm9  ;;  %v5685_v35 = vld [vmem:[%s13408_s7 + $0x398] sm:$0xff]  ;;  %v3872_v20 = vmul.f32 %v5682_v17, %v3853_v33  ;;  %v3946_v2 = vmul.f32 %v5695_v41, %v3923_v15  ;;  %v4566_v44 = vpop.permute.xlu0 %4565  ;;  %v5706_v17 = vld [vmem:[%s13408_s7 + $0x440] sm:$0xff] }
 0x96d   :  { %v4511_v63 = vsel %vm14606_vm0, %v4499_v18, %v4481_v36  ;;  %vm14607_vm15 = vmmov %vm14599_vm2  ;;  %v4535_v1 = vmul.f32 %v5796_v25, %v4502_v55  ;;  %v3947_v16 = vmul.f32 %v5696_v54, %v3920_v22  ;;  %vm14611_vm11 = vcmp.lt.s32.totalorder %v6243_v7, 98  ;;  %v5788_v22 = vld [vmem:[%s13408_s7 + $0x730] sm:$0xff] }
 0x96e   :  { %v3844_v21 = vsel %vm14607_vm15, %v14596_v9, %v14598_v39  ;;  %vm14609_vm1 = vmmov %vm14604_vm8  ;;  %v4536_v36 = vmul.f32 %v5797_v51, %v4511_v63  ;;  %v4560_v9 = vpop.permute.xlu1 %4559  ;;  %v3885_v19 = vadd.f32 %v3873_v40, %v3812_v45  ;;  %v3886_v25 = vadd.f32 %v3874_v49, %v3813_v59  ;;  %v5808_v45 = vld [vmem:[%s13408_s7 + $0x7d0] sm:$0xff]  ;;  %v5809_v59 = vld [vmem:[%s13408_s7 + $0x7d8] sm:$0xff] }
 0x96f   :  { %v3926_v43 = vsel %vm14609_vm1, %v14608_v28, %v14601_v38  ;;  %vm14610_vm7 = vmmov %vm14609_vm1  ;;  %v4547_v56 = vadd.f32 %v4535_v1, %v4474_v47  ;;  %v3875_v60 = vmul.f32 %v5685_v35, %v3844_v21  ;;  %v4578_v8 = vsel %vm14611_vm11, %v4560_v9, %v4566_v44  ;;  %v14613_v47 = vld [vmem:[#allocation36_spill] sm:$0xff]  ;;  %v14618_v1 = vld [vmem:[#allocation127_spill] sm:$0xff] }
 0x970   :  { %v3917_v53 = vsel %vm14610_vm7, %v14603_v34, %v14608_v28  ;;  %v4548_v46 = vadd.f32 %v4536_v36, %v4475_v30  ;;  %v3945_v27 = vmul.f32 %v5694_v12, %v3926_v43  ;;  %vm14612_vm9 = vmmov %vm14611_vm11  ;;  %v4607_v48 = vmul.f32 %v5807_v3, %v4578_v8  ;;  %v12571_v24 = vpop.permute.xlu0 %4701  ;;  %v5719_v21 = vld [vmem:[%s13408_s7 + $0x508] sm:$0xff]  ;;  %v14617_v28 = vld [vmem:[#allocation9_spill] sm:$0xff] }
 0x971   :  { %v4581_v57 = vsel %vm14612_vm9, %v4554_v61, %v4560_v9  ;;  %v3999_v30 = vsel %vm179_vm3, %v14613_v47, %v14540_v11  ;;  %v3814_v39 = vadd.f32 %v3802_v58, %v3741_v37  ;;  %v3884_v33 = vadd.f32 %v3872_v20, %v3811_v10  ;;  %vm14614_vm12 = vmmov %vm14612_vm9  ;;  %v14616_v12 = vld [vmem:[#allocation128_spill] sm:$0xff]  ;;  %v14619_v58 = vld [vmem:[#allocation11_spill] sm:$0xff] }
 0x972   :  { %v4606_v51 = vmul.f32 %v5806_v32, %v4581_v57  ;;  %v3948_v41 = vmul.f32 %v5697_v26, %v3917_v53  ;;  %v3958_v40 = vadd.f32 %v3946_v2, %v3885_v19  ;;  %v3959_v38 = vadd.f32 %v3947_v16, %v3886_v25  ;;  %v4572_v11 = vpop.permute.xlu1 %4571  ;;  %vm14615_vm10 = vmmov %vm14612_vm9  ;;  %v14621_v25 = vld [vmem:[#allocation15_spill] sm:$0xff] }
 0x973   :  { %v12581_v18 = vadd.f32 %v4607_v48, %v4546_v29  ;;  %v3887_v37 = vadd.f32 %v3875_v60, %v3814_v39  ;;  %v3957_v49 = vadd.f32 %v3945_v27, %v3884_v33  ;;  %v4575_v54 = vsel %vm14614_vm12, %v4566_v44, %v4572_v11  ;;  %v5709_v29 = vld [vmem:[%s13408_s7 + $0x458] sm:$0xff]  ;;  %v5718_v44 = vld [vmem:[%s13408_s7 + $0x500] sm:$0xff]  ;;  %vm14629_vm13 = vmmov %vm14612_vm9 }
 0x974   :  { %v12579_v15 = vadd.f32 %v4606_v51, %v4545_v14  ;;  %v4584_v34 = vsel %vm14615_vm10, %v4572_v11, %v4554_v61  ;;  %v5789_v14 = vld [vmem:[%s13408_s7 + $0x738] sm:$0xff]  ;;  %v3990_v55 = vsel %vm179_vm3, %v14542_v52, %v14613_v47  ;;  %v4018_v63 = vmul.f32 %v5706_v17, %v3999_v30  ;;  %v5720_v52 = vld [vmem:[%s13408_s7 + $0x510] sm:$0xff]  ;;  %v12618_v2 = vpop.permute.xlu0 %4707  ;;  %v5730_v39 = vld [vmem:[%s13408_s7 + $0x560] sm:$0xff] }
 0x975   :  { %v4608_v35 = vmul.f32 %v5808_v45, %v4575_v54  ;;  %v4609_v61 = vmul.f32 %v5809_v59, %v4584_v34  ;;  %v4066_v43 = vsel %vm213_vm4, %v14617_v28, %v14616_v12  ;;  %v4069_v36 = vsel %vm213_vm4, %v14618_v1, %v14617_v28  ;;  %v14623_v51 = vld [vmem:[#allocation17_spill] sm:$0xff]  ;;  %v14625_v33 = vld [vmem:[#allocation131_spill] sm:$0xff]  ;;  %v14628_v54 = vld [vmem:[#allocation100_spill] sm:$0xff] }
 0x976   :  { %v4063_v10 = vsel %vm213_vm4, %v14616_v12, %v14619_v58  ;;  %v3960_v20 = vadd.f32 %v3948_v41, %v3887_v37  ;;  %v4031_v32 = vadd.f32 %v12201_v42, %v3958_v40  ;;  %v4032_v3 = vadd.f32 %v12222_v6, %v3959_v38  ;;  %v12629_v53 = vpop.permute.xlu1 %4703  ;;  %v5721_v42 = vld [vmem:[%s13408_s7 + $0x518] sm:$0xff]  ;;  %v5798_v37 = vld [vmem:[%s13408_s7 + $0x780] sm:$0xff]  ;;  %vm14637_vm15 = vmmov %vm14612_vm9 }
 0x977   :  { %v12625_v16 = vadd.f32 %v4608_v35, %v4547_v56  ;;  %v12627_v26 = vadd.f32 %v4609_v61, %v4548_v46  ;;  %v4527_v9 = vmul.f32 %v5788_v22, %v12120_v0  ;;  %v4528_v60 = vmul.f32 %v5789_v14, %v12126_v62  ;;  %v5731_v62 = vld [vmem:[%s13408_s7 + $0x568] sm:$0xff]  ;;  %v14620_v46 = vld [vmem:[#allocation133_spill] sm:$0xff]  ;;  %v14632_v35 = vld [vmem:[#allocation46_spill] sm:$0xff] }
 0x978   :  { %v4021_v27 = vmul.f32 %v5709_v29, %v3990_v55  ;;  %v4030_v8 = vadd.f32 %v4018_v63, %v3957_v49  ;;  %v12635_v57 = vadd.f32 %v12110_v13, %v12015_v5  ;;  %v4092_v19 = vmul.f32 %v5719_v21, %v4066_v43  ;;  %v5732_v13 = vld [vmem:[%s13408_s7 + $0x570] sm:$0xff]  ;;  %v12658_v47 = vpop.permute.xlu0 %4713  ;;  %v14627_v49 = vld [vmem:[#allocation143_spill] sm:$0xff]  ;;  %v5743_v55 = vld [vmem:[%s13408_s7 + $0x5c8] sm:$0xff] }
 0x979   :  { %v4072_v6 = vsel %vm213_vm4, %v14619_v58, %v14618_v1  ;;  %v4093_v56 = vmul.f32 %v5720_v52, %v4063_v10  ;;  %v4091_v0 = vmul.f32 %v5718_v44, %v4069_v36  ;;  %vm14622_vm3 = vcmp.lt.s32.totalorder %v6243_v7, 126  ;;  %v14631_v63 = vld [vmem:[#allocation136_spill] sm:$0xff]  ;;  %v5744_v21 = vld [vmem:[%s13408_s7 + $0x5d0] sm:$0xff]  ;;  %v14634_v12 = vld [vmem:[#allocation27_spill] sm:$0xff] }
 0x97a   :  { %v4139_v5 = vsel %vm14622_vm3, %v14621_v25, %v14620_v46  ;;  %vm14624_vm2 = vmmov %vm14622_vm3  ;;  %v4033_v17 = vadd.f32 %v4021_v27, %v3960_v20  ;;  %v12662_v30 = vadd.f32 %v12112_v23, %v12017_v31  ;;  %v4104_v45 = vadd.f32 %v4092_v19, %v4031_v32  ;;  %v12671_v40 = vpop.permute.xlu1 %4709  ;;  %v14636_v36 = vld [vmem:[#allocation102_spill] sm:$0xff]  ;;  %v5742_v58 = vld [vmem:[%s13408_s7 + $0x5c0] sm:$0xff] }
 0x97b   :  { %v4136_v48 = vsel %vm14624_vm2, %v14620_v46, %v14623_v51  ;;  %vm14626_vm4 = vmmov %vm14624_vm2  ;;  %v4105_v59 = vadd.f32 %v4093_v56, %v4032_v3  ;;  %v12674_v38 = vadd.f32 %v4527_v9, %v12041_v4  ;;  %v12677_v11 = vadd.f32 %v4528_v60, %v12043_v50  ;;  %v5733_v4 = vld [vmem:[%s13408_s7 + $0x578] sm:$0xff]  ;;  %v14638_v10 = vld [vmem:[#allocation135_spill] sm:$0xff] }
 0x97c   :  { %v4142_v41 = vsel %vm14626_vm4, %v14625_v33, %v14621_v25  ;;  %v4094_v31 = vmul.f32 %v5721_v42, %v4072_v6  ;;  %v4103_v23 = vadd.f32 %v4091_v0, %v4030_v8  ;;  %v4579_v34 = vsel %vm14629_vm13, %v14628_v54, %v14627_v49  ;;  %vm14630_vm8 = vmmov %vm14624_vm2  ;;  %v12707_v1 = vpop.permute.xlu0 %4626  ;;  %v5799_v9 = vld [vmem:[%s13408_s7 + $0x788] sm:$0xff]  ;;  %v14640_v27 = vld [vmem:[#allocation19_spill] sm:$0xff] }
 0x97d   :  { %v4165_v22 = vmul.f32 %v5731_v62, %v4139_v5  ;;  %v4145_v50 = vsel %vm14630_vm8, %v14623_v51, %v14625_v33  ;;  %v4166_v14 = vmul.f32 %v5732_v13, %v4136_v48  ;;  %v4164_v29 = vmul.f32 %v5730_v39, %v4142_v41  ;;  %vm14641_vm7 = vmmov %vm14612_vm9  ;;  %v5800_v6 = vld [vmem:[%s13408_s7 + $0x790] sm:$0xff]  ;;  %v5801_v56 = vld [vmem:[%s13408_s7 + $0x798] sm:$0xff] }
 0x97e   :  { %vm14633_vm14 = vcmp.lt.s32.totalorder %v6243_v7, 114  ;;  %v4106_v43 = vadd.f32 %v4094_v31, %v4033_v17  ;;  %v4576_v52 = vsel %vm14637_vm15, %v14627_v49, %v14636_v36  ;;  %v12720_v3 = vpop.permute.xlu1 %4715  ;;  %v4598_v60 = vmul.f32 %v5798_v37, %v4579_v34  ;;  %vm14642_vm11 = vmmov %vm14641_vm7  ;;  %v5745_v46 = vld [vmem:[%s13408_s7 + $0x5d8] sm:$0xff]  ;;  %v5755_v51 = vld [vmem:[%s13408_s7 + $0x628] sm:$0xff] }
 0x97f   :  { %v4212_v61 = vsel %vm14633_vm14, %v14632_v35, %v14631_v63  ;;  %vm14635_vm0 = vmmov %vm14633_vm14  ;;  %v4177_v44 = vadd.f32 %v4165_v22, %v4104_v45  ;;  %v4178_v32 = vadd.f32 %v4166_v14, %v4105_v59  ;;  %v4573_v8 = vsel %vm14641_vm7, %v14636_v36, %v14640_v27  ;;  %v14644_v48 = vld [vmem:[#allocation141_spill] sm:$0xff]  ;;  %v14645_v17 = vld [vmem:[#allocation54_spill] sm:$0xff] }
 0x980   :  { %v4209_v28 = vsel %vm14635_vm0, %v14631_v63, %v14634_v12  ;;  %vm14639_vm1 = vmmov %vm14635_vm0  ;;  %v4167_v19 = vmul.f32 %v5733_v4, %v4145_v50  ;;  %v4176_v42 = vadd.f32 %v4164_v29, %v4103_v23  ;;  %v4582_v0 = vsel %vm14642_vm11, %v14640_v27, %v14628_v54  ;;  %v5756_v33 = vld [vmem:[%s13408_s7 + $0x630] sm:$0xff]  ;;  %v14646_v41 = vld [vmem:[#allocation58_spill] sm:$0xff]  ;;  %v12760_v31 = vpop.permute.xlu0 %4638 }
 0x981   :  { %v4215_v20 = vsel %vm14639_vm1, %v14638_v10, %v14632_v35  ;;  %v4238_v62 = vmul.f32 %v5743_v55, %v4212_v61  ;;  %vm14643_vm9 = vmmov %vm14635_vm0  ;;  %v4239_v5 = vmul.f32 %v5744_v21, %v4209_v28  ;;  %v4285_v39 = vsel %vm243_vm5, %v14645_v17, %v14644_v48  ;;  %v5754_v37 = vld [vmem:[%s13408_s7 + $0x620] sm:$0xff]  ;;  %v14647_v49 = vld [vmem:[#allocation140_spill] sm:$0xff] }
 0x982   :  { %v4218_v25 = vsel %vm14643_vm9, %v14634_v12, %v14638_v10  ;;  %v4237_v13 = vmul.f32 %v5742_v58, %v4215_v20  ;;  %v4282_v45 = vsel %vm243_vm5, %v14644_v48, %v14646_v41  ;;  %v4179_v59 = vadd.f32 %v4167_v19, %v4106_v43  ;;  %v12769_v4 = vpop.permute.xlu1 %4632  ;;  %v5757_v61 = vld [vmem:[%s13408_s7 + $0x638] sm:$0xff]  ;;  %v5767_v43 = vld [vmem:[%s13408_s7 + $0x688] sm:$0xff]  ;;  %v5768_v58 = vld [vmem:[%s13408_s7 + $0x690] sm:$0xff] }
 0x983   :  { %v4599_v23 = vmul.f32 %v5799_v9, %v4576_v52  ;;  %v4288_v54 = vsel %vm243_vm5, %v14647_v49, %v14645_v17  ;;  %v4250_v34 = vadd.f32 %v4238_v62, %v4177_v44  ;;  %v4251_v22 = vadd.f32 %v4239_v5, %v4178_v32  ;;  %v14648_v36 = vld [vmem:[#allocation144_spill] sm:$0xff]  ;;  %v14649_v52 = vld [vmem:[#allocation6_spill] sm:$0xff]  ;;  %v14653_v5 = vld [vmem:[#allocation105_spill] sm:$0xff] }
 0x984   :  { %v4600_v50 = vmul.f32 %v5800_v6, %v4573_v8  ;;  %v4601_v14 = vmul.f32 %v5801_v56, %v4582_v0  ;;  %v4240_v29 = vmul.f32 %v5745_v46, %v4218_v25  ;;  %v4249_v55 = vadd.f32 %v4237_v13, %v4176_v42  ;;  %v14650_v10 = vld [vmem:[#allocation62_spill] sm:$0xff]  ;;  %v12795_v32 = vpop.permute.xlu0 %4768  ;;  %v5810_v46 = vld [vmem:[%s13408_s7 + $0x7e0] sm:$0xff]  ;;  %vm14678_vm1 = vmmov %vm14641_vm7 }
 0x985   :  { %v12772_v63 = vadd.f32 %v4598_v60, %v12635_v57  ;;  %v4311_v35 = vmul.f32 %v5755_v51, %v4285_v39  ;;  %v4291_v21 = vsel %vm243_vm5, %v14646_v41, %v14647_v49  ;;  %v4312_v12 = vmul.f32 %v5756_v33, %v4282_v45  ;;  %v5766_v60 = vld [vmem:[%s13408_s7 + $0x680] sm:$0xff]  ;;  %v14651_v27 = vld [vmem:[#allocation142_spill] sm:$0xff]  ;;  %v5779_v39 = vld [vmem:[%s13408_s7 + $0x6e8] sm:$0xff] }
 0x986   :  { %v4310_v28 = vmul.f32 %v5754_v37, %v4288_v54  ;;  %v4358_v57 = vsel %vm273_vm6, %v14649_v52, %v14648_v36  ;;  %v4355_v20 = vsel %vm273_vm6, %v14648_v36, %v14650_v10  ;;  %v4252_v44 = vadd.f32 %v4240_v29, %v4179_v59  ;;  %v12807_v6 = vpop.permute.xlu1 %4644  ;;  %v14652_v25 = vld [vmem:[#allocation147_spill] sm:$0xff]  ;;  %v14655_v33 = vld [vmem:[#allocation146_spill] sm:$0xff]  ;;  %v5780_v59 = vld [vmem:[%s13408_s7 + $0x6f0] sm:$0xff] }
 0x987   :  { %v12798_v9 = vadd.f32 %v4599_v23, %v12662_v30  ;;  %v4361_v8 = vsel %vm273_vm6, %v14651_v27, %v14649_v52  ;;  %v4323_v19 = vadd.f32 %v4311_v35, %v4250_v34  ;;  %v4324_v42 = vadd.f32 %v4312_v12, %v4251_v22  ;;  %v14656_v41 = vld [vmem:[#allocation30_spill] sm:$0xff]  ;;  %v14658_v23 = vld [vmem:[#allocation28_spill] sm:$0xff]  ;;  %vm14680_vm7 = vmmov %vm14678_vm1 }
 0x988   :  { %v12810_v56 = vadd.f32 %v4600_v50, %v12674_v38  ;;  %v12813_v0 = vadd.f32 %v4601_v14, %v12677_v11  ;;  %v4313_v30 = vmul.f32 %v5757_v61, %v4291_v21  ;;  %v4322_v62 = vadd.f32 %v4310_v28, %v4249_v55  ;;  %v5769_v38 = vld [vmem:[%s13408_s7 + $0x698] sm:$0xff]  ;;  %v12843_v54 = vpop.permute.xlu0 %4774  ;;  %v5778_v50 = vld [vmem:[%s13408_s7 + $0x6e0] sm:$0xff]  ;;  %v14662_v14 = vld [vmem:[#allocation145_spill] sm:$0xff] }
 0x989   :  { %vm14654_vm5 = vcmp.lt.s32.totalorder %v6243_v7, 97  ;;  %v4384_v51 = vmul.f32 %v5767_v43, %v4358_v57  ;;  %v4364_v11 = vsel %vm273_vm6, %v14650_v10, %v14651_v27  ;;  %v4385_v48 = vmul.f32 %v5768_v58, %v4355_v20  ;;  %v14660_v34 = vld [vmem:[#allocation106_spill] sm:$0xff]  ;;  %v5811_v21 = vld [vmem:[%s13408_s7 + $0x7e8] sm:$0xff]  ;;  %v5812_v57 = vld [vmem:[%s13408_s7 + $0x7f0] sm:$0xff] }
 0x98a   :  { %v4652_v13 = vsel %vm14654_vm5, %v14653_v5, %v14652_v25  ;;  %v4383_v17 = vmul.f32 %v5766_v60, %v4361_v8  ;;  %vm14657_vm12 = vcmp.lt.s32.totalorder %v6243_v7, 111  ;;  %v4325_v49 = vadd.f32 %v4313_v30, %v4252_v44  ;;  %vm14661_vm6 = vmmov %vm14654_vm5  ;;  %v12856_v61 = vpop.permute.xlu1 %4770  ;;  %v14664_v28 = vld [vmem:[#allocation148_spill] sm:$0xff]  ;;  %v5781_v10 = vld [vmem:[%s13408_s7 + $0x6f8] sm:$0xff] }
 0x98b   :  { %v4431_v45 = vsel %vm14657_vm12, %v14656_v41, %v14655_v33  ;;  %vm14659_vm10 = vmmov %vm14657_vm12  ;;  %v4649_v22 = vsel %vm14661_vm6, %v14652_v25, %v14660_v34  ;;  %v4396_v55 = vadd.f32 %v4384_v51, %v4323_v19  ;;  %v4397_v35 = vadd.f32 %v4385_v48, %v4324_v42  ;;  %v5790_v60 = vld [vmem:[%s13408_s7 + $0x740] sm:$0xff]  ;;  %v14667_v27 = vld [vmem:[#allocation66_spill] sm:$0xff] }
 0x98c   :  { %v4428_v37 = vsel %vm14659_vm10, %v14655_v33, %v14658_v23  ;;  %vm14663_vm3 = vmmov %vm14659_vm10  ;;  %v4671_v12 = vmul.f32 %v5810_v46, %v4652_v13  ;;  %v4386_v36 = vmul.f32 %v5769_v38, %v4364_v11  ;;  %v4395_v52 = vadd.f32 %v4383_v17, %v4322_v62  ;;  %v14668_v8 = vld [vmem:[#allocation151_spill] sm:$0xff]  ;;  %v5791_v30 = vld [vmem:[%s13408_s7 + $0x748] sm:$0xff]  ;;  %v12896_v11 = vpop.permute.xlu0 %4780 }
 0x98d   :  { %v4434_v29 = vsel %vm14663_vm3, %v14662_v14, %v14656_v41  ;;  %vm14665_vm2 = vmmov %vm14654_vm5  ;;  %v4457_v58 = vmul.f32 %v5779_v39, %v4431_v45  ;;  %v4458_v44 = vmul.f32 %v5780_v59, %v4428_v37  ;;  %vm14669_vm13 = vcmp.lt.s32.totalorder %v6243_v7, 110  ;;  %v14670_v62 = vld [vmem:[#allocation154_spill] sm:$0xff]  ;;  %v5792_v25 = vld [vmem:[%s13408_s7 + $0x750] sm:$0xff] }
 0x98e   :  { %v4646_v43 = vsel %vm14665_vm2, %v14660_v34, %v14664_v28  ;;  %vm14666_vm4 = vmmov %vm14663_vm3  ;;  %v4507_v19 = vsel %vm14669_vm13, %v14668_v8, %v14667_v27  ;;  %v4456_v42 = vmul.f32 %v5778_v50, %v4434_v29  ;;  %v14672_v13 = vld [vmem:[#allocation12_spill] sm:$0xff]  ;;  %v4398_v38 = vadd.f32 %v4386_v36, %v4325_v49  ;;  %v12902_v41 = vpop.permute.xlu1 %4776  ;;  %v5813_v49 = vld [vmem:[%s13408_s7 + $0x7f8] sm:$0xff] }
 0x98f   :  { %v4437_v20 = vsel %vm14666_vm4, %v14658_v23, %v14662_v14  ;;  %vm14671_vm8 = vmmov %vm14669_vm13  ;;  %v4672_v48 = vmul.f32 %v5811_v21, %v4649_v22  ;;  %v4469_v39 = vadd.f32 %v4457_v58, %v4396_v55  ;;  %v4470_v33 = vadd.f32 %v4458_v44, %v4397_v35  ;;  %v5793_v22 = vld [vmem:[%s13408_s7 + $0x758] sm:$0xff]  ;;  %v5802_v14 = vld [vmem:[%s13408_s7 + $0x7a0] sm:$0xff] }
 0x990   :  { %v4504_v46 = vsel %vm14671_vm8, %v14667_v27, %v14670_v62  ;;  %vm14673_vm14 = vmmov %vm14671_vm8  ;;  %v4673_v45 = vmul.f32 %v5812_v57, %v4646_v43  ;;  %v4459_v59 = vmul.f32 %v5781_v10, %v4437_v20  ;;  %v4529_v23 = vmul.f32 %v5790_v60, %v4507_v19  ;;  %v14676_v29 = vld [vmem:[#allocation21_spill] sm:$0xff]  ;;  %v14677_v55 = vld [vmem:[#allocation59_spill] sm:$0xff]  ;;  %v12942_v44 = vpop.permute.xlu0 %4786 }
 0x991   :  { %v4501_v51 = vsel %vm14673_vm14, %v14670_v62, %v14672_v13  ;;  %vm14674_vm0 = vmmov %vm14665_vm2  ;;  %v4468_v37 = vadd.f32 %v4456_v42, %v4395_v52  ;;  %v4530_v34 = vmul.f32 %v5791_v30, %v4504_v46  ;;  %v4577_v35 = vsel %vm14678_vm1, %v14677_v55, %v14676_v29  ;;  %v5803_v21 = vld [vmem:[%s13408_s7 + $0x7a8] sm:$0xff]  ;;  %v5804_v36 = vld [vmem:[%s13408_s7 + $0x7b0] sm:$0xff] }
 0x992   :  { %v4655_v17 = vsel %vm14674_vm0, %v14664_v28, %v14653_v5  ;;  %vm14675_vm15 = vmmov %vm14671_vm8  ;;  %v4531_v50 = vmul.f32 %v5792_v25, %v4501_v51  ;;  %v14679_v28 = vld [vmem:[#allocation155_spill] sm:$0xff]  ;;  %v5805_v52 = vld [vmem:[%s13408_s7 + $0x7b8] sm:$0xff]  ;;  %v4471_v20 = vadd.f32 %v4459_v59, %v4398_v38  ;;  %v12945_v60 = vadd.f32 %v4671_v12, %v12772_v63  ;;  %v12950_v42 = vpop.permute.xlu1 %4782 }
 0x993   :  { %v4510_v5 = vsel %vm14675_vm15, %v14672_v13, %v14668_v8  ;;  %v4580_v43 = vsel %vm14680_vm7, %v14679_v28, %v14677_v55  ;;  %v14681_v57 = vld [vmem:[#allocation32_spill] sm:$0xff]  ;;  %vm14682_vm11 = vmmov %vm14678_vm1  ;;  %v12948_v27 = vadd.f32 %v4672_v48, %v12798_v9  ;;  %v4542_v8 = vadd.f32 %v4530_v34, %v4469_v39  ;;  %v5814_v63 = vld [vmem:[%s13408_s7 + $0x800] sm:$0xff] }
 0x994   :  { %v4574_v58 = vsel %vm14682_vm11, %v14676_v29, %v14681_v57  ;;  %vm14683_vm9 = vmmov %vm14678_vm1  ;;  %v4543_v19 = vadd.f32 %v4531_v50, %v4470_v33  ;;  %v4674_v30 = vmul.f32 %v5813_v49, %v4655_v17  ;;  %v12953_v62 = vadd.f32 %v4673_v45, %v12810_v56  ;;  %v5815_v9 = vld [vmem:[%s13408_s7 + $0x808] sm:$0xff]  ;;  %v14684_v12 = vld [vmem:[#allocation23_spill] sm:$0xff]  ;;  %v12976_v49 = vpop.permute.xlu0 %4699 }
 0x995   :  { %v4583_v10 = vsel %vm14683_vm9, %v14681_v57, %v14679_v28  ;;  %v4532_v46 = vmul.f32 %v5793_v22, %v4510_v5  ;;  %v4541_v25 = vadd.f32 %v4529_v23, %v4468_v37  ;;  %v4602_v13 = vmul.f32 %v5802_v14, %v4580_v43  ;;  %v14685_v48 = vld [vmem:[#allocation16_spill] sm:$0xff]  ;;  %vm14686_vm5 = vmmov %vm14674_vm0  ;;  %v14687_v17 = vld [vmem:[#allocation159_spill] sm:$0xff] }
 0x996   :  { %v4603_v51 = vmul.f32 %v5803_v21, %v4577_v35  ;;  %v4604_v38 = vmul.f32 %v5804_v36, %v4574_v58  ;;  %v4605_v59 = vmul.f32 %v5805_v52, %v4583_v10  ;;  %v4650_v56 = vsel %vm14686_vm5, %v14685_v48, %v14684_v12  ;;  %vm14688_vm12 = vmmov %vm14674_vm0  ;;  %v5816_v33 = vld [vmem:[%s13408_s7 + $0x810] sm:$0xff]  ;;  %v14689_v23 = vld [vmem:[#allocation74_spill] sm:$0xff]  ;;  %v12992_v35 = vpop.permute.xlu1 %4788 }
 0x997   :  { %v4653_v39 = vsel %vm14688_vm12, %v14687_v17, %v14685_v48  ;;  %v4544_v45 = vadd.f32 %v4532_v46, %v4471_v20  ;;  %vm14690_vm10 = vmmov %vm14674_vm0  ;;  %v5817_v22 = vld [vmem:[%s13408_s7 + $0x818] sm:$0xff]  ;;  %v5822_v14 = vld [vmem:[%s13408_s7 + $0x840] sm:$0xff]  ;;  %vm14693_vm3 = vcmp.lt.s32.totalorder %v6243_v7, 96  ;;  %v4614_v43 = vadd.f32 %v4602_v13, %v4541_v25 }
 0x998   :  { %v4647_v37 = vsel %vm14690_vm10, %v14684_v12, %v14689_v23  ;;  %v4615_v34 = vadd.f32 %v4603_v51, %v4542_v8  ;;  %v4616_v5 = vadd.f32 %v4604_v38, %v4543_v19  ;;  %vm14691_vm6 = vmmov %vm14674_vm0  ;;  %v14692_v29 = vld [vmem:[#allocation109_spill] sm:$0xff]  ;;  %v5823_v21 = vld [vmem:[%s13408_s7 + $0x848] sm:$0xff]  ;;  %v4675_v20 = vmul.f32 %v5814_v63, %v4653_v39 }
 0x999   :  { %v4656_v50 = vsel %vm14691_vm6, %v14689_v23, %v14687_v17  ;;  %v4725_v55 = vsel %vm14693_vm3, %v14692_v29, %v12571_v24  ;;  %vm14694_vm2 = vmmov %vm14693_vm3  ;;  %v5826_v36 = vld [vmem:[%s13408_s7 + $0x860] sm:$0xff]  ;;  %v14695_v52 = vld [vmem:[#allocation161_spill] sm:$0xff]  ;;  %v4676_v8 = vmul.f32 %v5815_v9, %v4650_v56  ;;  %v4677_v19 = vmul.f32 %v5816_v33, %v4647_v37 }
 0x99a   :  { %v4722_v28 = vsel %vm14694_vm2, %v12571_v24, %v12618_v2  ;;  %vm14696_vm4 = vmmov %vm14694_vm2  ;;  %v5824_v58 = vld [vmem:[%s13408_s7 + $0x850] sm:$0xff]  ;;  %v4686_v24 = vadd.f32 %v4674_v30, %v12813_v0  ;;  %v4617_v46 = vadd.f32 %v4605_v59, %v4544_v45  ;;  %v4744_v25 = vmul.f32 %v5822_v14, %v4725_v55  ;;  %v5825_v13 = vld [vmem:[%s13408_s7 + $0x858] sm:$0xff]  ;;  %v13030_v30 = vpop.permute.xlu0 %4711  ;;  %v13032_v12 = vpop.permute.xlu1 %4705 }
 0x99b   :  { %v4726_v57 = vsel %vm14696_vm4, %v14695_v52, %v12629_v53  ;;  %vm14697_vm13 = vmmov %vm14694_vm2  ;;  %v4678_v38 = vmul.f32 %v5817_v22, %v4656_v50  ;;  %v4745_v59 = vmul.f32 %v5823_v21, %v4722_v28  ;;  %v4688_v48 = vadd.f32 %v4676_v8, %v4615_v34  ;;  %v5828_v17 = vld [vmem:[%s13408_s7 + $0x870] sm:$0xff]  ;;  %v5829_v45 = vld [vmem:[%s13408_s7 + $0x878] sm:$0xff] }
 0x99c   :  { %v4719_v10 = vsel %vm14697_vm13, %v12618_v2, %v12658_v47  ;;  %vm14698_vm8 = vmmov %vm14694_vm2  ;;  %v5827_v2 = vld [vmem:[%s13408_s7 + $0x868] sm:$0xff]  ;;  %v4748_v63 = vmul.f32 %v5826_v36, %v4726_v57  ;;  %v4689_v56 = vadd.f32 %v4677_v19, %v4616_v5  ;;  %v5834_v37 = vld [vmem:[%s13408_s7 + $0x8a0] sm:$0xff]  ;;  %vm14702_vm1 = vcmp.lt.s32.totalorder %v6243_v7, 95 }
 0x99d   :  { %v4728_v51 = vsel %vm14698_vm8, %v12658_v47, %v14692_v29  ;;  %vm14699_vm14 = vmmov %vm14694_vm2  ;;  %v4746_v9 = vmul.f32 %v5824_v58, %v4719_v10  ;;  %v4687_v47 = vadd.f32 %v4675_v20, %v4614_v43  ;;  %v4690_v34 = vadd.f32 %v4678_v38, %v4617_v46  ;;  %v5818_v5 = vld [vmem:[%s13408_s7 + $0x820] sm:$0xff]  ;;  %v5839_v38 = vld [vmem:[%s13408_s7 + $0x8c8] sm:$0xff] }
 0x99e   :  { %v4723_v0 = vsel %vm14699_vm14, %v12629_v53, %v12671_v40  ;;  %vm14700_vm0 = vmmov %vm14694_vm2  ;;  %v4747_v39 = vmul.f32 %v5825_v13, %v4728_v51  ;;  %v4756_v22 = vadd.f32 %v4744_v25, %v12945_v60  ;;  %v13070_v29 = vpop.permute.xlu0 %4841  ;;  %v4757_v60 = vadd.f32 %v4745_v59, %v12948_v27  ;;  %v13074_v43 = vpop.permute.xlu1 %4717  ;;  %v5835_v27 = vld [vmem:[%s13408_s7 + $0x8a8] sm:$0xff]  ;;  %v5846_v19 = vld [vmem:[%s13408_s7 + $0x900] sm:$0xff] }
 0x99f   :  { %v4720_v53 = vsel %vm14700_vm0, %v12671_v40, %v12720_v3  ;;  %v4749_v33 = vmul.f32 %v5827_v2, %v4723_v0  ;;  %vm14701_vm15 = vmmov %vm14700_vm0  ;;  %v4798_v40 = vsel %vm14702_vm1, %v12795_v32, %v12843_v54  ;;  %v4760_v55 = vadd.f32 %v4748_v63, %v4687_v47  ;;  %v5838_v46 = vld [vmem:[%s13408_s7 + $0x8c0] sm:$0xff]  ;;  %v5837_v25 = vld [vmem:[%s13408_s7 + $0x8b8] sm:$0xff] }
 0x9a0   :  { %v4729_v23 = vsel %vm14701_vm15, %v12720_v3, %v14695_v52  ;;  %v5819_v3 = vld [vmem:[%s13408_s7 + $0x828] sm:$0xff]  ;;  %vm14703_vm7 = vmmov %vm14686_vm5  ;;  %v4758_v21 = vadd.f32 %v4746_v9, %v12953_v62  ;;  %v4750_v28 = vmul.f32 %v5828_v17, %v4720_v53  ;;  %v5820_v52 = vld [vmem:[%s13408_s7 + $0x830] sm:$0xff]  ;;  %v4817_v57 = vmul.f32 %v5834_v37, %v4798_v40 }
 0x9a1   :  { %v4651_v50 = vsel %vm14703_vm7, %v12769_v4, %v12760_v31  ;;  %vm14704_vm11 = vmmov %vm14686_vm5  ;;  %v4751_v36 = vmul.f32 %v5829_v45, %v4729_v23  ;;  %v4759_v58 = vadd.f32 %v4747_v39, %v4686_v24  ;;  %v4761_v10 = vadd.f32 %v4749_v33, %v4688_v48  ;;  %v5836_v24 = vld [vmem:[%s13408_s7 + $0x8b0] sm:$0xff]  ;;  %v5821_v51 = vld [vmem:[%s13408_s7 + $0x838] sm:$0xff] }
 0x9a2   :  { %v4654_v14 = vsel %vm14704_vm11, %v12707_v1, %v12769_v4  ;;  %vm14705_vm9 = vmmov %vm14686_vm5  ;;  %v4680_v8 = vmul.f32 %v5819_v3, %v4651_v50  ;;  %v4848_v13 = vpop.permute.xlu0 %4847  ;;  %vm14712_vm4 = vcmp.lt.s32.totalorder %v6243_v7, 94  ;;  %v4762_v59 = vadd.f32 %v4750_v28, %v4689_v56  ;;  %v5841_v50 = vld [vmem:[%s13408_s7 + $0x8d8] sm:$0xff] }
 0x9a3   :  { %v4648_v4 = vsel %vm14705_vm9, %v12760_v31, %v12807_v6  ;;  %vm14706_vm5 = vmmov %vm14702_vm1  ;;  %v4679_v20 = vmul.f32 %v5818_v5, %v4654_v14  ;;  %v13133_v63 = vadd.f32 %v4751_v36, %v4690_v34  ;;  %v4829_v9 = vadd.f32 %v4817_v57, %v4756_v22  ;;  %v5840_v22 = vld [vmem:[%s13408_s7 + $0x8d0] sm:$0xff] }
 0x9a4   :  { %v4795_v62 = vsel %vm14706_vm5, %v12843_v54, %v12896_v11  ;;  %vm14707_vm12 = vmmov %vm14691_vm6  ;;  %v4681_v2 = vmul.f32 %v5820_v52, %v4648_v4  ;;  %v13142_v33 = vadd.f32 %v4680_v8, %v12581_v18  ;;  %v5848_v57 = vld [vmem:[%s13408_s7 + $0x910] sm:$0xff]  ;;  %vm14719_vm7 = vcmp.lt.s32.totalorder %v6243_v7, 96 }
 0x9a5   :  { %v4657_v31 = vsel %vm14707_vm12, %v12807_v6, %v12707_v1  ;;  %vm14708_vm10 = vmmov %vm14702_vm1  ;;  %v4818_v0 = vmul.f32 %v5835_v27, %v4795_v62  ;;  %v13136_v47 = vadd.f32 %v4679_v20, %v12579_v15  ;;  %v5850_v15 = vld [vmem:[%s13408_s7 + $0x920] sm:$0xff] }
 0x9a6   :  { %v4799_v54 = vsel %vm14708_vm10, %v12856_v61, %v12902_v41  ;;  %vm14709_vm6 = vmmov %vm14702_vm1  ;;  %v13144_v45 = vmul.f32 %v5821_v51, %v4657_v31  ;;  %v4854_v37 = vpop.permute.xlu0 %4853  ;;  %v13152_v40 = vadd.f32 %v4681_v2, %v12625_v16  ;;  %v5831_v51 = vld [vmem:[%s13408_s7 + $0x888] sm:$0xff]  ;;  %v5832_v2 = vld [vmem:[%s13408_s7 + $0x890] sm:$0xff] }
 0x9a7   :  { %v4792_v1 = vsel %vm14709_vm6, %v12896_v11, %v12942_v44  ;;  %vm14710_vm3 = vmmov %vm14702_vm1  ;;  %v4821_v17 = vmul.f32 %v5838_v46, %v4799_v54  ;;  %v4830_v34 = vadd.f32 %v4818_v0, %v4757_v60  ;;  %v4724_v46 = vsel %vm14719_vm7, %v13032_v12, %v13030_v30 }
 0x9a8   :  { %v4801_v6 = vsel %vm14710_vm3, %v12942_v44, %v12795_v32  ;;  %vm14711_vm2 = vmmov %vm14702_vm1  ;;  %v4871_v32 = vsel %vm14712_vm4, %v13070_v29, %v4848_v13  ;;  %v13131_v44 = vpop.permute.xlu1 %4843  ;;  %v4819_v53 = vmul.f32 %v5836_v24, %v4792_v1 }
 0x9a9   :  { %v4796_v11 = vsel %vm14711_vm2, %v12902_v41, %v12950_v42  ;;  %v4890_v48 = vmul.f32 %v5846_v19, %v4871_v32  ;;  %v4820_v39 = vmul.f32 %v5837_v25, %v4801_v6  ;;  %v5847_v41 = vld [vmem:[%s13408_s7 + $0x908] sm:$0xff]  ;;  %vm14713_vm13 = vmmov %vm14702_vm1  ;;  %v4833_v28 = vadd.f32 %v4821_v17, %v4760_v55  ;;  %v5830_v25 = vld [vmem:[%s13408_s7 + $0x880] sm:$0xff] }
 0x9aa   :  { %v4822_v56 = vmul.f32 %v5839_v38, %v4796_v11  ;;  %v4793_v18 = vsel %vm14713_vm13, %v12950_v42, %v12992_v35  ;;  %vm14714_vm8 = vmmov %vm14712_vm4  ;;  %v4831_v36 = vadd.f32 %v4819_v53, %v4758_v21 }
 0x9ab   :  { %v13146_v23 = vadd.f32 %v4890_v48, %v4829_v9  ;;  %v4868_v5 = vsel %vm14714_vm8, %v4848_v13, %v4854_v37  ;;  %vm14715_vm14 = vmmov %vm14702_vm1  ;;  %v4832_v52 = vadd.f32 %v4820_v39, %v4759_v58  ;;  %v4823_v62 = vmul.f32 %v5840_v22, %v4793_v18  ;;  %v5851_v58 = vld [vmem:[%s13408_s7 + $0x928] sm:$0xff]  ;;  %v5833_v48 = vld [vmem:[%s13408_s7 + $0x898] sm:$0xff] }
 0x9ac   :  { %v4850_v3 = vpop.permute.xlu1 %4849  ;;  %v4802_v16 = vsel %vm14715_vm14, %v12992_v35, %v12856_v61  ;;  %v4891_v60 = vmul.f32 %v5847_v41, %v4868_v5  ;;  %vm14716_vm0 = vmmov %vm14712_vm4  ;;  %v4834_v27 = vadd.f32 %v4822_v56, %v4761_v10  ;;  %v5849_v61 = vld [vmem:[%s13408_s7 + $0x918] sm:$0xff]  ;;  %v4860_v35 = vpop.permute.xlu0 %4859 }
 0x9ad   :  { %v4926_v14 = vmin.f32 %v13146_v23, 0.0  ;;  %v4872_v42 = vsel %vm14716_vm0, %v13131_v44, %v4850_v3  ;;  %v4824_v19 = vmul.f32 %v5841_v50, %v4802_v16  ;;  %vm14717_vm15 = vmmov %vm14716_vm0  ;;  %v4835_v9 = vadd.f32 %v4823_v62, %v4762_v59  ;;  %v5852_v59 = vld [vmem:[%s13408_s7 + $0x930] sm:$0xff] }
 0x9ae   :  { %v4894_v4 = vmul.f32 %v5850_v15, %v4872_v42  ;;  %v13177_v8 = vadd.f32 %v4891_v60, %v4830_v34  ;;  %v4865_v55 = vsel %vm14717_vm15, %v4854_v37, %v4860_v35  ;;  %vm14718_vm1 = vmmov %vm14716_vm0  ;;  %v5853_v15 = vld [vmem:[%s13408_s7 + $0x938] sm:$0xff]  ;;  %v4753_v34 = vmul.f32 %v5831_v51, %v4724_v46 }
 0x9af   :  { %v4938_v20 = vmul.f32 1.442695, %v4926_v14  ;;  %v4874_v21 = vsel %vm14718_vm1, %v4860_v35, %v13070_v29  ;;  %v4892_v24 = vmul.f32 %v5848_v57, %v4865_v55  ;;  %vm14720_vm11 = vmmov %vm14719_vm7  ;;  %v4836_v16 = vadd.f32 %v4824_v19, %v13133_v63  ;;  %v5843_v63 = vld [vmem:[%s13408_s7 + $0x8e8] sm:$0xff]  ;;  %v5844_v19 = vld [vmem:[%s13408_s7 + $0x8f0] sm:$0xff] }
 0x9b0   :  { %v13182_v31 = vadd.f32 %v4894_v4, %v4833_v28  ;;  %v4856_v10 = vpop.permute.xlu1 %4855  ;;  %v4927_v54 = vmin.f32 %v13177_v8, 0.0  ;;  %v4727_v29 = vsel %vm14720_vm11, %v12976_v49, %v13032_v12  ;;  %v4893_v6 = vmul.f32 %v5849_v61, %v4874_v21  ;;  %vm14721_vm9 = vmmov %vm14716_vm0  ;;  %v4773_v32 = vpop.permute.xlu0 %4772 }
 0x9b1   :  { %6047 = vpow2.f32 %v4938_v20  ;;  %v4869_v13 = vsel %vm14721_vm9, %v4850_v3, %v4856_v10  ;;  %vm14722_vm5 = vmmov %vm14719_vm7  ;;  %v13217_v38 = vadd.f32 %v4892_v24, %v4831_v36  ;;  %v4694_v36 = vadd.f32 %v13144_v45, %v12627_v26 }
 0x9b2   :  { %v4930_v1 = vmin.f32 %v13182_v31, 0.0  ;;  %v4721_v0 = vsel %vm14722_vm5, %v13030_v30, %v13074_v43  ;;  %v4940_v12 = vmul.f32 1.442695, %v4927_v54  ;;  %v4895_v11 = vmul.f32 %v5851_v58, %v4869_v13  ;;  %vm14723_vm12 = vmmov %vm14722_vm5 }
 0x9b3   :  { %v4730_v17 = vsel %vm14723_vm12, %v13074_v43, %v12976_v49  ;;  %v13226_v39 = vadd.f32 %v4893_v6, %v4832_v52  ;;  %v4752_v30 = vmul.f32 %v5830_v25, %v4727_v29  ;;  %v4928_v56 = vmin.f32 %v13217_v38, 0.0  ;;  %vm14724_vm10 = vmmov %vm14716_vm0 }
 0x9b4   :  { %v4946_v53 = vmul.f32 1.442695, %v4930_v1  ;;  %v4862_v41 = vpop.permute.xlu1 %4861  ;;  %6049 = vpow2.f32 %v4940_v12  ;;  %v13229_v37 = vadd.f32 %v4895_v11, %v4834_v27  ;;  %v4754_v49 = vmul.f32 %v5832_v2, %v4721_v0  ;;  %vm14725_vm6 = vmmov %vm14716_vm0  ;;  %v4785_v50 = vpop.permute.xlu0 %4784  ;;  %v5854_v11 = vld [vmem:[%s13408_s7 + $0x940] sm:$0xff] }
 0x9b5   :  { %v4866_v43 = vsel %vm14724_vm10, %v4856_v10, %v4862_v41  ;;  %v4755_v22 = vmul.f32 %v5833_v48, %v4730_v17  ;;  %v4942_v18 = vmul.f32 1.442695, %v4928_v56  ;;  %v4875_v3 = vsel %vm14725_vm6, %v4862_v41, %v13131_v44  ;;  %v5842_v44 = vld [vmem:[%s13408_s7 + $0x8e0] sm:$0xff]  ;;  %vm14726_vm3 = vmmov %vm14711_vm2 }
 0x9b6   :  { %6051 = vpow2.f32 %v4946_v53  ;;  %v4931_v5 = vmin.f32 %v13229_v37, 0.0  ;;  %v4929_v14 = vmin.f32 %v13226_v39, 0.0  ;;  %v4896_v60 = vmul.f32 %v5852_v59, %v4866_v43  ;;  %vm14727_vm13 = vmmov %vm14711_vm2 }
 0x9b7   :  { %v4897_v42 = vmul.f32 %v5853_v15, %v4875_v3  ;;  %v4764_v52 = vadd.f32 %v4752_v30, %v13136_v47  ;;  %6053 = vpow2.f32 %v4942_v18  ;;  %v4765_v45 = vadd.f32 %v4753_v34, %v13142_v33  ;;  %vm14728_vm8 = vmmov %vm14711_vm2  ;;  %v5856_v18 = vld [vmem:[%s13408_s7 + $0x950] sm:$0xff] }
 0x9b8   :  { %v4779_v28 = vpop.permute.xlu1 %4778  ;;  %v4948_v4 = vmul.f32 1.442695, %v4931_v5  ;;  %v13248_v57 = vadd.f32 %v4896_v60, %v4835_v9  ;;  %v4766_v20 = vadd.f32 %v4754_v49, %v13152_v40  ;;  %v4767_v61 = vadd.f32 %v4755_v22, %v4694_v36  ;;  %v4846_v35 = vpop.permute.xlu0 %4845  ;;  %v5845_v40 = vld [vmem:[%s13408_s7 + $0x8f8] sm:$0xff]  ;;  %vm14729_vm7 = vmmov %vm14718_vm1 }
 0x9b9   :  { %v13250_v27 = vadd.f32 %v4897_v42, %v4836_v16  ;;  %v4797_v62 = vsel %vm14726_vm3, %v4779_v28, %v4785_v50  ;;  %v4800_v26 = vsel %vm14711_vm2, %v4773_v32, %v4779_v28  ;;  %vm4914_vm4 = vcmp.gt.f32.partialorder %v13146_v23, 0.0  ;;  %v5857_v5 = vld [vmem:[%s13408_s7 + $0x958] sm:$0xff]  ;;  %vm14730_vm11 = vmmov %vm14718_vm1 }
 0x9ba   :  { %v4944_v21 = vmul.f32 1.442695, %v4929_v14  ;;  %6055 = vpow2.f32 %v4948_v4  ;;  %v4932_v58 = vmin.f32 %v13248_v57, 0.0  ;;  %v4825_v54 = vmul.f32 %v5842_v44, %v4800_v26  ;;  %vm14731_vm9 = vmmov %vm14718_vm1 }
 0x9bb   :  { %v6048_v47 = vpop.eup %6047  ;;  %v4933_v46 = vmin.f32 %v13250_v27, 0.0  ;;  %v4826_v33 = vmul.f32 %v5843_v63, %v4797_v62  ;;  %vm4915_vm14 = vcmp.gt.f32.partialorder %v13177_v8, 0.0  ;;  %vm4918_vm0 = vcmp.gt.f32.partialorder %v13182_v31, 0.0 }
 0x9bc   :  { %v5858_v55 = vadd.f32 -1.0, %v6048_v47  ;;  %v4791_v10 = vpop.permute.xlu1 %4790  ;;  %v4950_v29 = vmul.f32 1.442695, %v4932_v58  ;;  %v4858_v0 = vpop.permute.xlu0 %4857  ;;  %vm4916_vm15 = vcmp.gt.f32.partialorder %v13217_v38, 0.0  ;;  %v4837_v53 = vadd.f32 %v4825_v54, %v4764_v52 }
 0x9bd   :  { %v4794_v24 = vsel %vm14727_vm13, %v4785_v50, %v4791_v10  ;;  %v4803_v1 = vsel %vm14728_vm8, %v4791_v10, %v4773_v32  ;;  %v4952_v2 = vmul.f32 1.442695, %v4933_v46  ;;  %v5855_v32 = vld [vmem:[%s13408_s7 + $0x948] sm:$0xff]  ;;  %v4838_v41 = vadd.f32 %v4826_v33, %v4765_v45 }
 0x9be   :  { %v13276_v25 = vsel %vm4914_vm4, %v13146_v23, %v5858_v55  ;;  %v4827_v6 = vmul.f32 %v5844_v19, %v4794_v24  ;;  %v6050_v13 = vpop.eup %6049  ;;  %6057 = vpow2.f32 %v4950_v29  ;;  %v4828_v23 = vmul.f32 %v5845_v40, %v4803_v1 }
 0x9bf   :  { %v4998_v51 = vmin.f32 %v13276_v25, 0.0  ;;  %v5859_v48 = vadd.f32 -1.0, %v6050_v13  ;;  %6059 = vpow2.f32 %v4944_v21  ;;  %vm4919_vm5 = vcmp.gt.f32.partialorder %v13229_v37, 0.0 }
 0x9c0   :  { %v6052_v12 = vpop.eup %6051  ;;  %v4852_v9 = vpop.permute.xlu1 %4851  ;;  %6061 = vpow2.f32 %v4952_v2  ;;  %v4839_v30 = vadd.f32 %v4827_v6, %v4766_v20  ;;  %v4840_v16 = vadd.f32 %v4828_v23, %v4767_v61  ;;  %vm4920_vm12 = vcmp.gt.f32.partialorder %v13248_v57, 0.0 }
 0x9c1   :  { %v5862_v17 = vadd.f32 -1.0, %v6052_v12  ;;  %v4870_v56 = vsel %vm14718_vm1, %v4852_v9, %v4858_v0  ;;  %v4873_v59 = vsel %vm14729_vm7, %v4846_v35, %v4852_v9  ;;  %v6054_v15 = vpop.eup %6053  ;;  %v5010_v34 = vmul.f32 1.442695, %v4998_v51 }
 0x9c2   :  { %v4898_v43 = vmul.f32 %v5854_v11, %v4873_v59  ;;  %v4899_v22 = vmul.f32 %v5855_v32, %v4870_v56  ;;  %v5860_v50 = vadd.f32 -1.0, %v6054_v15  ;;  %vm4917_vm10 = vcmp.gt.f32.partialorder %v13226_v39, 0.0 }
 0x9c3   :  { %v13297_v49 = vsel %vm4918_vm0, %v13182_v31, %v5862_v17  ;;  %v13309_v31 = vsel %vm4915_vm14, %v13177_v8, %v5859_v48  ;;  %6063 = vpow2.f32 %v5010_v34  ;;  %vm4921_vm6 = vcmp.gt.f32.partialorder %v13250_v27, 0.0 }
 0x9c4   :  { %v5002_v3 = vmin.f32 %v13297_v49, 0.0  ;;  %v4864_v14 = vpop.permute.xlu1 %4863  ;;  %v13311_v60 = vadd.f32 %v4898_v43, %v4837_v53  ;;  %v13313_v42 = vadd.f32 %v4899_v22, %v4838_v41  ;;  %v6056_v52 = vpop.eup %6055  ;;  %v13322_v44 = vsel %vm4916_vm15, %v13217_v38, %v5860_v50 }
 0x9c5   :  { %v4867_v28 = vsel %vm14730_vm11, %v4858_v0, %v4864_v14  ;;  %v4876_v36 = vsel %vm14731_vm9, %v4864_v14, %v4846_v35  ;;  %v5000_v62 = vmin.f32 %v13322_v44, 0.0  ;;  %v5863_v35 = vadd.f32 -1.0, %v6056_v52 }
 0x9c6   :  { %v5018_v4 = vmul.f32 1.442695, %v5002_v3  ;;  %v4900_v63 = vmul.f32 %v5856_v18, %v4867_v28  ;;  %v4901_v8 = vmul.f32 %v5857_v5, %v4876_v36  ;;  %v4934_v26 = vmin.f32 %v13311_v60, 0.0 }
 0x9c7   :  { %v4935_v47 = vmin.f32 %v13313_v42, 0.0  ;;  %v5014_v20 = vmul.f32 1.442695, %v5000_v62  ;;  %v4999_v19 = vmin.f32 %v13309_v31, 0.0  ;;  %v13336_v54 = vsel %vm4919_vm5, %v13229_v37, %v5863_v35 }
 0x9c8   :  { %v13327_v45 = vadd.f32 %v4900_v63, %v4839_v30  ;;  %v13329_v7 = vadd.f32 %v4901_v8, %v4840_v16  ;;  %v4954_v61 = vmul.f32 1.442695, %v4934_v26  ;;  %v6058_v38 = vpop.eup %6057  ;;  %6065 = vpow2.f32 %v5018_v4 }
 0x9c9   :  { %v4956_v55 = vmul.f32 1.442695, %v4935_v47  ;;  %v6060_v58 = vpop.eup %6059  ;;  %6067 = vpow2.f32 %v5014_v20  ;;  %v5864_v10 = vadd.f32 -1.0, %v6058_v38  ;;  %v5003_v24 = vmin.f32 %v13336_v54, 0.0 }
 0x9ca   :  { %v4936_v21 = vmin.f32 %v13327_v45, 0.0  ;;  %v4937_v46 = vmin.f32 %v13329_v7, 0.0  ;;  %v6062_v33 = vpop.eup %6061  ;;  %6069 = vpow2.f32 %v4954_v61  ;;  %v5012_v6 = vmul.f32 1.442695, %v4999_v19 }
 0x9cb   :  { %v13341_v29 = vsel %vm4920_vm12, %v13248_v57, %v5864_v10  ;;  %6071 = vpow2.f32 %v4956_v55  ;;  %v5020_v51 = vmul.f32 1.442695, %v5003_v24  ;;  %v5861_v37 = vadd.f32 -1.0, %v6060_v58 }
 0x9cc   :  { %v4958_v40 = vmul.f32 1.442695, %v4936_v21  ;;  %v4960_v1 = vmul.f32 1.442695, %v4937_v46  ;;  %v5004_v13 = vmin.f32 %v13341_v29, 0.0  ;;  %v5865_v2 = vadd.f32 -1.0, %v6062_v33 }
 0x9cd   :  { %v13347_v57 = vsel %vm4917_vm10, %v13226_v39, %v5861_v37  ;;  %v6064_v23 = vpop.eup %6063  ;;  %vm4986_vm3 = vcmp.gt.f32.partialorder %v13276_v25, 0.0  ;;  %vm4922_vm2 = vcmp.gt.f32.partialorder %v13311_v60, 0.0  ;;  %vm4987_vm4 = vcmp.gt.f32.partialorder %v13309_v31, 0.0 }
 0x9ce   :  { %6073 = vpow2.f32 %v4958_v40  ;;  %v5022_v0 = vmul.f32 1.442695, %v5004_v13  ;;  %v13350_v12 = vsel %vm4921_vm6, %v13250_v27, %v5865_v2  ;;  %v5001_v11 = vmin.f32 %v13347_v57, 0.0 }
 0x9cf   :  { %6075 = vpow2.f32 %v4960_v1  ;;  %v5005_v32 = vmin.f32 %v13350_v12, 0.0  ;;  %vm4923_vm13 = vcmp.gt.f32.partialorder %v13313_v42, 0.0  ;;  %vm4990_vm8 = vcmp.gt.f32.partialorder %v13297_v49, 0.0 }
 0x9d0   :  { %6077 = vpow2.f32 %v5012_v6  ;;  %v5016_v48 = vmul.f32 1.442695, %v5001_v11  ;;  %v5870_v59 = vadd.f32 -1.0, %v6064_v23  ;;  %vm4924_vm14 = vcmp.gt.f32.partialorder %v13327_v45, 0.0 }
 0x9d1   :  { %6079 = vpow2.f32 %v5020_v51  ;;  %v5024_v53 = vmul.f32 1.442695, %v5005_v32  ;;  %vm4925_vm0 = vcmp.gt.f32.partialorder %v13329_v7, 0.0  ;;  %vm4991_vm15 = vcmp.gt.f32.partialorder %v13336_v54, 0.0 }
 0x9d2   :  { %6081 = vpow2.f32 %v5022_v0  ;;  %v6066_v9 = vpop.eup %6065  ;;  %vm4992_vm1 = vcmp.gt.f32.partialorder %v13341_v29, 0.0  ;;  %vm4988_vm7 = vcmp.gt.f32.partialorder %v13322_v44, 0.0  ;;  %vm4989_vm11 = vcmp.gt.f32.partialorder %v13347_v57, 0.0 }
 0x9d3   :  { %v6068_v17 = vpop.eup %6067  ;;  %6083 = vpow2.f32 %v5016_v48  ;;  %v5874_v34 = vadd.f32 -1.0, %v6066_v9  ;;  %vm4993_vm9 = vcmp.gt.f32.partialorder %v13350_v12, 0.0  ;;  %vm14732_vm6 = vcmask 1043456   ;;  %v5058_v48 = vld [vmem:[%s13410_s8] sm:$0x3] }
 0x9d4   :  { %v6070_v41 = vpop.eup %6069  ;;  %6085 = vpow2.f32 %v5024_v53 }
 0x9d5   :  { %v6072_v30 = vpop.eup %6071  ;;  %v5866_v39 = vadd.f32 -1.0, %v6070_v41  ;;  %v5050_v26 = vsel %vm4990_vm8, %v13297_v49, %v5874_v34  ;;  %vm14736_vm8 = vcmask 195584   ;;  %v5071_v41 = vpop.permute.xlu0 %5070 }
 0x9d6   :  { %v5867_v56 = vadd.f32 -1.0, %v6072_v30 }
 0x9d7   :  { %v4982_v43 = vsel %vm4922_vm2, %v13311_v60, %v5866_v39  ;;  %v5046_v60 = vsel %vm4986_vm3, %v13276_v25, %v5870_v59  ;;  %v5872_v25 = vadd.f32 -1.0, %v6068_v17  ;;  %vm14733_vm2 = vmmov %vm14732_vm6 }
 0x9d8   :  { %v6074_v27 = vpop.eup %6073  ;;  %v4983_v5 = vsel %vm4923_vm13, %v13313_v42, %v5867_v56  ;;  %v5006_v50 = vmin.f32 %v4982_v43, 0.0  ;;  %v5059_v38 = vpack.c.bf16 %v5050_v26, %v5046_v60  ;;  %vm4994_vm5 = vcmp.gt.f32.partialorder %v4982_v43, 0.0  ;;  %vm14735_vm13 = vmmov %vm14733_vm2 }
 0x9d9   :  { %v6076_v15 = vpop.eup %6075  ;;  %v5868_v22 = vadd.f32 -1.0, %v6074_v27  ;;  %v5007_v14 = vmin.f32 %v4983_v5, 0.0  ;;  %v5048_v10 = vsel %vm4988_vm7, %v13322_v44, %v5872_v25  ;;  %vm4995_vm12 = vcmp.gt.f32.partialorder %v4983_v5, 0.0 }
 0x9da   :  { %v6078_v18 = vpop.eup %6077  ;;  %v5869_v3 = vadd.f32 -1.0, %v6076_v15  ;;  %v5026_v42 = vmul.f32 1.442695, %v5006_v50  ;;  %v14738_v50 = vld [vmem:[#allocation72_spill] sm:$0xff] }
 0x9db   :  { %v6080_v16 = vpop.eup %6079  ;;  %v5871_v28 = vadd.f32 -1.0, %v6078_v18  ;;  %v4984_v36 = vsel %vm4924_vm14, %v13327_v45, %v5868_v22  ;;  %v5028_v8 = vmul.f32 1.442695, %v5007_v14  ;;  %vm14737_vm14 = vmmov %vm14736_vm8 }
 0x9dc   :  { %v6082_v52 = vpop.eup %6081  ;;  %v4985_v4 = vsel %vm4925_vm0, %v13329_v7, %v5869_v3  ;;  %v5875_v63 = vadd.f32 -1.0, %v6080_v16  ;;  %6087 = vpow2.f32 %v5026_v42  ;;  %v5008_v7 = vmin.f32 %v4984_v36, 0.0 }
 0x9dd   :  { %v5009_v62 = vmin.f32 %v4985_v4, 0.0  ;;  %v5876_v47 = vadd.f32 -1.0, %v6082_v52  ;;  %v5047_v45 = vsel %vm4987_vm4, %v13309_v31, %v5871_v28  ;;  %6089 = vpow2.f32 %v5028_v8  ;;  %v6084_v19 = vpop.eup %6083  ;;  %vm14734_vm4 = vmmov %vm14733_vm2 }
 0x9de   :  { %v5051_v20 = vsel %vm4991_vm15, %v13336_v54, %v5875_v63  ;;  %v5030_v55 = vmul.f32 1.442695, %v5008_v7  ;;  %v6086_v21 = vpop.eup %6085  ;;  %v5873_v49 = vadd.f32 -1.0, %v6084_v19  ;;  %vm4997_vm10 = vcmp.gt.f32.partialorder %v4985_v4, 0.0 }
 0x9df   :  { %v5032_v61 = vmul.f32 1.442695, %v5009_v62  ;;  %v5060_v35 = vpack.c.bf16 %v5051_v20, %v5047_v45  ;;  %v5052_v58 = vsel %vm4992_vm1, %v13341_v29, %v5876_v47  ;;  %v5877_v31 = vadd.f32 -1.0, %v6086_v21 }
 0x9e0   :  { %v5049_v46 = vsel %vm4989_vm11, %v13347_v57, %v5873_v49  ;;  %v5061_v33 = vpack.c.bf16 %v5052_v58, %v5048_v10  ;;  %vm4996_vm3 = vcmp.gt.f32.partialorder %v4984_v36, 0.0 }
 0x9e1   :  { %6091 = vpow2.f32 %v5032_v61  ;;  %5088 = vmatprep.subr.bf16.mxu0 %v5060_v35  ;;  %v5053_v54 = vsel %vm4993_vm9, %v13350_v12, %v5877_v31 }
 0x9e2   :  { %5089 = vmatpush1.bf16.msra.mxu0 %v5059_v38  ;;  %6093 = vpow2.f32 %v5030_v55  ;;  %v5062_v40 = vpack.c.bf16 %v5053_v54, %v5049_v46 }
 0x9e4   :  { %5129 = vmatprep.subr.bf16.mxu1 %v5062_v40 }
 0x9e5   :  { %5130 = vmatpush1.bf16.msra.mxu1 %v5061_v33 }
 0x9e6   :  { %v6088_v24 = vpop.eup %6087 }
 0x9e7   :  { %v6090_v29 = vpop.eup %6089  ;;  %v5878_v1 = vadd.f32 -1.0, %v6088_v24 }
 0x9e8   :  { %v5879_v6 = vadd.f32 -1.0, %v6090_v29 }
 0x9e9   :  { %v5054_v51 = vsel %vm4994_vm5, %v4982_v43, %v5878_v1 }
 0x9ea   :  { %v5055_v2 = vsel %vm4995_vm12, %v4983_v5, %v5879_v6  ;;  %v5063_v0 = vpack.c.bf16 %v5054_v51, %v5054_v51 }
 0x9eb   :  { %v6092_v13 = vpop.eup %6091  ;;  %v5064_v23 = vpack.c.bf16 %v5055_v2, %v5055_v2 }
 0x9ec   :  { %v6094_v37 = vpop.eup %6093  ;;  %v5881_v44 = vadd.f32 -1.0, %v6092_v13  ;;  %v5077_v12 = vsel %vm14732_vm6, %v5063_v0, 0 }
 0x9ed   :  { %v5880_v57 = vadd.f32 -1.0, %v6094_v37  ;;  %5882 = vmatprep.subr.msk.bf16.mxu0 %vm14733_vm2, %v5064_v23 }
 0x9ee   :  { %v5057_v11 = vsel %vm4997_vm10, %v4985_v4, %v5881_v44  ;;  %5091 = vmatpush1.bf16.msra.mxu0 %v5077_v12 }
 0x9ef   :  { %v5066_v32 = vpack.c.bf16 %v5057_v11, %v5057_v11  ;;  %v5056_v9 = vsel %vm4996_vm3, %v4984_v36, %v5880_v57  ;;  %v14739_v36 = vld [vmem:[#allocation152_spill] sm:$0xff] }
 0x9f0   :  { %v5065_v17 = vpack.c.bf16 %v5056_v9, %v5056_v9 }
 0x9f1   :  { %5884 = vmatprep.subr.msk.bf16.mxu1 %vm14734_vm4, %v5066_v32  ;;  %5883 = vmatmul.mubr.msk.bf16.vlgmr.msra.gmra.mrb[20].mxu0 %vm14736_vm8, %v5058_v48 }
 0x9f2   :  { %v5083_v53 = vsel %vm14735_vm13, %v5065_v17, 0 }
 0x9f3   :  { %5132 = vmatpush1.bf16.msra.mxu1 %v5083_v53 }
 0x9f6   :  { %5885 = vmatmul.mubr.msk.bf16.vlgmr.msra.gmra.mrb[20].mxu1 %vm14737_vm14, %v5058_v48 }
 0xac4   :  { %v5122_v30 = vpop.f32.mrb[20].mxu0 }
 0xac5   :  { %v5123_v39 = vadd.f32 %v5122_v30, %v5071_v41  ;;  %v5124_v27 = vpop.f32.mrb[21].mxu0 }
 0xac6   :  { %v5125_v56 = vadd.f32 %v5124_v27, %v5071_v41  ;;  %v5126_v59 = vpop.f32.mrb[22].mxu0 }
 0xac7   :  { %v5127_v34 = vpop.f32.mrb[23].mxu0 }
 0xac8   :  { %v5174_v43 = vcombine.low %v5123_v39, %v5125_v56 }
 0xac9   :  { %v5163_v15 = vpop.f32.mrb[20].mxu1 }
 0xaca   :  { %v5164_v22 = vadd.f32 %v5163_v15, %v5071_v41  ;;  %v5165_v18 = vpop.f32.mrb[21].mxu1  ;;  %v5178_v16 = vsub.f32 %v14738_v50, %v5174_v43 }
 0xacb   :  { %v5166_v5 = vadd.f32 %v5165_v18, %v5071_v41  ;;  %v5167_v3 = vpop.f32.mrb[22].mxu1 }
 0xacc   :  { %v5168_v14 = vpop.f32.mrb[23].mxu1  ;;  %5180 = vst [vmem:[%s13411_s10] sm:$0xff] %v5178_v16 }
 0xacd   :  { %v5175_v28 = vcombine.low %v5164_v22, %v5166_v5 }
 0xacf   :  { %v5179_v52 = vsub.f32 %v14739_v36, %v5175_v28 }
 0xad1   :  { %5181 = vst [vmem:[%s13411_s10 + $0x8] sm:$0xff] %v5179_v52 }

</bundles_post_ra>
